<compile_context>
chip_gen: v6e
topology: v6e:2x2x1
jax: 0.10.0
libtpu: 0.0.40
codegen_flags: <defaults>
</compile_context>

<pallas_src>
import functools
import math

import jax
import jax.numpy as jnp
from jax.experimental import pallas as pl
from jax.experimental.pallas import tpu as pltpu

# ----- model hyperparameters (DTNet1D(num_blocks=2, width=64, recall=True)) -----
NUM_BLOCKS = 2
WIDTH = 64
BOTTLENECK = WIDTH // 2          # 32
VOCAB_SIZE = 9
TGT_VOCAB_SIZE = 3
PADDING_IDX = 8
SEQLEN = 32
PACKW = 2 * WIDTH                # 128: two batch elements packed per lane row
LN_EPS = 1e-5
_GELU_C = math.sqrt(2.0 / math.pi)


# ------------------------------ in-kernel helpers ------------------------------
def _new_gelu(x):
    # NewGELU: 0.5 * x * (1 + tanh(sqrt(2/pi) * (x + 0.044715 * x^3)))
    return 0.5 * x * (1.0 + jnp.tanh(_GELU_C * (x + 0.044715 * x * x * x)))


def _bf16_dot(x, w_bf16, bias_f32):
    # MXU matmul: bf16 inputs, f32 accumulation; bias added in f32.
    return jnp.dot(x.astype(jnp.bfloat16), w_bf16,
                   preferred_element_type=jnp.float32) + bias_f32


# --------------------------------- fused kernel ---------------------------------
def _dtnet_fused_kernel(x_ref,
                        rh_w_ref, rh_b_ref,
                        ln1_g_ref, ln1_b_ref, attn_w_ref, attn_b_ref,
                        ln2_g_ref, ln2_b_ref,
                        mlp_w1_ref, mlp_b1_ref, mlp_w2_ref, mlp_b2_ref,
                        resh_w_ref, resh_b_ref,
                        head_w_ref, head_b_ref,
                        out_ref, h_state,
                        *, tile_pairs, iter_group):
    """One grid step = `iter_group` deep-thinking iterations for one pair tile.

    Packed lane layout (128 lanes = two batch elements A and B):
        [ interim_A(32) | x_A(32) | interim_B(32) | x_B(32) ]
    h_state: persistent VMEM scratch (tile_pairs*SEQLEN, 128).
    """
    t = pl.program_id(1)

    lane = jax.lax.broadcasted_iota(jnp.int32, (1, PACKW), 1)
    seg_a = (lane < WIDTH).astype(jnp.float32)                     # half-A lanes
    seg_b = 1.0 - seg_a                                            # half-B lanes
    x_mask = ((lane % WIDTH) >= BOTTLENECK).astype(jnp.float32)    # x_embed lanes

    # ---- first iteration of this batch tile: fused reshape_head + staging ----
    @pl.when(t == 0)
    def _init():
        xe = x_ref[...]                               # (R,128): 0 | x_A | 0 | x_B
        it0 = _new_gelu(_bf16_dot(xe, rh_w_ref[...], rh_b_ref[...]))
        h_state[...] = it0 + xe                       # [it_A | x_A | it_B | x_B]

    def seg_layernorm(v, g, b):
        # LayerNorm over each 64-lane half; var = E[x^2] - mu^2.
        inv_w = 1.0 / WIDTH
        sa = jnp.sum(v * seg_a, axis=-1, keepdims=True)
        sb = jnp.sum(v * seg_b, axis=-1, keepdims=True)
        mu = (seg_a * sa + seg_b * sb) * inv_w
        v2 = v * v
        qa = jnp.sum(v2 * seg_a, axis=-1, keepdims=True)
        qb = jnp.sum(v2 * seg_b, axis=-1, keepdims=True)
        ex2 = (seg_a * qa + seg_b * qb) * inv_w
        var = ex2 - mu * mu
        return (v - mu) * jax.lax.rsqrt(var + LN_EPS) * g + b

    def one_iteration(h):
        for blk in range(NUM_BLOCKS):                 # static unroll
            # --- AttentionBlock ---
            h = seg_layernorm(h, ln1_g_ref[blk], ln1_b_ref[blk])      # ln1
            # LiteAttention: softmax over the SEQUENCE axis (torch dim=1),
            # computed per sequence on a (pairs, S, 128) view.
            logits = _bf16_dot(h, attn_w_ref[blk], attn_b_ref[blk])   # (R,128)
            l3 = logits.reshape(tile_pairs, SEQLEN, PACKW)
            l3 = l3 - jnp.max(l3, axis=1, keepdims=True)
            e = jnp.exp(l3)
            inv = pl.reciprocal(jnp.sum(e, axis=1, keepdims=True), approx=True)
            aw = (e * inv).reshape(tile_pairs * SEQLEN, PACKW)
            h = h + h * aw                                            # x + gate(x)
            h = seg_layernorm(h, ln2_g_ref[blk], ln2_b_ref[blk])      # ln2
            m = _new_gelu(_bf16_dot(h, mlp_w1_ref[blk], mlp_b1_ref[blk]))
            m = _bf16_dot(m, mlp_w2_ref[blk], mlp_b2_ref[blk])
            # nn.Dropout(0.2) is the identity in eval mode.
            h = _new_gelu(h + m)                                      # activation
        # recall head: NewGELU(Linear(W, bn)); zero at x lanes by construction.
        return _new_gelu(_bf16_dot(h, resh_w_ref[...], resh_b_ref[...]))

    h = h_state[...]                                  # (R,128) resident state
    x_part = h * x_mask                               # x lanes, never change
    for g in range(iter_group):                       # static iteration group
        nt = one_iteration(h)                         # interim lanes only
        # OutputModule: Linear(bn, tgt_vocab), lane-padded per half; bf16 out.
        logit = _bf16_dot(nt, head_w_ref[...], head_b_ref[...])
        out_ref[:, pl.ds(g, 1), :, :] = logit.astype(out_ref.dtype).reshape(
            tile_pairs, 1, SEQLEN, PACKW)
        h = nt + x_part                               # recall concat, in-register
    h_state[...] = h                                  # carry to next grid step


# ----------------------------- wrapper / glue -----------------------------------
def _prepare_weights(p):
    """Block-diagonal 128-lane padded weights; matmul matrices cast to bf16."""
    bn, W, V, PW = BOTTLENECK, WIDTH, TGT_VOCAB_SIZE, PACKW

    def blockdiag(w):                     # (..., k, n) -> (..., 2k, 2n)
        k, n = w.shape[-2:]
        out = jnp.zeros(w.shape[:-2] + (2 * k, 2 * n), jnp.float32)
        out = out.at[..., :k, :n].set(w)
        out = out.at[..., k:, n:].set(w)
        return out

    def tile2(b):                         # (..., n) -> (..., 2n)
        return jnp.concatenate([b, b], axis=-1)

    bf16 = lambda w: w.astype(jnp.bfloat16)

    # reshape_head: reads x lanes [bn:W)/[W+bn:PW), writes interim lanes.
    rh_w = jnp.zeros((PW, PW), jnp.float32)
    rh_w = rh_w.at[bn:W, 0:bn].set(p["rh_w"]).at[W + bn:PW, W:W + bn].set(p["rh_w"])
    rh_b = jnp.zeros((1, PW), jnp.float32)
    rh_b = rh_b.at[:, 0:bn].set(p["rh_b"]).at[:, W:W + bn].set(p["rh_b"])

    # recur_block.reshape_layer: full 64-lane half -> interim lanes of that half.
    rs_w = jnp.zeros((PW, PW), jnp.float32)
    rs_w = rs_w.at[0:W, 0:bn].set(p["resh_w"]).at[W:PW, W:W + bn].set(p["resh_w"])
    rs_b = jnp.zeros((1, PW), jnp.float32)
    rs_b = rs_b.at[:, 0:bn].set(p["resh_b"]).at[:, W:W + bn].set(p["resh_b"])

    # out_head: interim lanes -> logits at lanes [0:V) (half A) / [W:W+V) (half B).
    hd_w = jnp.zeros((PW, PW), jnp.float32)
    hd_w = hd_w.at[0:bn, 0:V].set(p["head_w"]).at[W:W + bn, W:W + V].set(p["head_w"])
    hd_b = jnp.zeros((1, PW), jnp.float32)
    hd_b = hd_b.at[:, 0:V].set(p["head_b"]).at[:, W:W + V].set(p["head_b"])

    return [
        bf16(rh_w), rh_b,
        tile2(p["ln1_g"]), tile2(p["ln1_b"]),
        bf16(blockdiag(p["attn_w"])), tile2(p["attn_b"]),
        tile2(p["ln2_g"]), tile2(p["ln2_b"]),
        bf16(blockdiag(p["mlp_w1"])), tile2(p["mlp_b1"]),
        bf16(blockdiag(p["mlp_w2"])), tile2(p["mlp_b2"]),
        bf16(rs_w), rs_b,
        bf16(hd_w), hd_b,
    ]


def _pick_tile_pairs(num_pairs, max_pairs=64):
    """Largest divisor of num_pairs <= max_pairs (rows <= 2048); prefer >= 2
    tiles so the 'parallel' batch axis can shard across v7x's two TensorCores.
    NOTE: prime num_pairs > max_pairs degenerates to 1-pair tiles (correct but
    slow); pad the batch to a friendly size if that matters."""
    tp = min(num_pairs, max_pairs)
    while num_pairs % tp != 0:
        tp -= 1
    if num_pairs // tp == 1 and tp % 2 == 0:
        tp //= 2
    return tp


def _pick_iter_group(iters, max_group=4):
    for g in range(min(max_group, iters), 0, -1):
        if iters % g == 0:
            return g
    return 1


def dtnet1d_forward(tokens, params, iters_to_do):
    """Eval-mode forward. tokens: int32 (B, SEQLEN).
    Returns all_outputs: (B, iters_to_do, SEQLEN, TGT_VOCAB_SIZE) float32."""
    B = tokens.shape[0]
    # Embedding gather + positional encoding (glue, plain JAX).
    x = params["embed"][tokens] + params["pos_enc"][None]       # (B, S, bn) f32
    x = x.astype(jnp.float32)

    # Pad batch to even so two batch elements pack into one 128-lane row.
    b_pad = B + (B % 2)
    if b_pad != B:
        x = jnp.concatenate(
            [x, jnp.zeros((b_pad - B, SEQLEN, BOTTLENECK), jnp.float32)], axis=0)
    num_pairs = b_pad // 2

    # Packed, lane-dense input: [ 0(32) | x_even(32) | 0(32) | x_odd(32) ].
    x64 = jnp.concatenate([jnp.zeros_like(x), x], axis=-1)       # (b_pad, S, 64)
    xp = (x64.reshape(num_pairs, 2, SEQLEN, WIDTH)
              .transpose(0, 2, 1, 3)
              .reshape(num_pairs * SEQLEN, PACKW))               # (NP*S, 128)

    weights = _prepare_weights(params)

    tile_pairs = _pick_tile_pairs(num_pairs)
    nb = num_pairs // tile_pairs
    rows = tile_pairs * SEQLEN
    group = _pick_iter_group(iters_to_do)
    n_tsteps = iters_to_do // group

    def const_spec(w):
        n = w.ndim
        return pl.BlockSpec(tuple(w.shape), lambda b, t, _n=n: (0,) * _n)

    in_specs = ([pl.BlockSpec((rows, PACKW), lambda b, t: (b, 0))]
                + [const_spec(w) for w in weights])
    out_spec = pl.BlockSpec((tile_pairs, group, SEQLEN, PACKW),
                            lambda b, t: (b, t, 0, 0))

    kernel = functools.partial(_dtnet_fused_kernel,
                               tile_pairs=tile_pairs, iter_group=group)
    out_pad = pl.pallas_call(
        kernel,
        grid=(nb, n_tsteps),
        in_specs=in_specs,
        out_specs=out_spec,
        out_shape=jax.ShapeDtypeStruct(
            (num_pairs, iters_to_do, SEQLEN, PACKW), jnp.bfloat16),
        scratch_shapes=[pltpu.VMEM((rows, PACKW), jnp.float32)],
        compiler_params=pltpu.CompilerParams(
            dimension_semantics=("parallel", "arbitrary"),
            vmem_limit_bytes=48 * 1024 * 1024),
    )(xp, *weights)

    # Unpack the batch pairs and slice the lane-padded logits (zero-padded lanes).
    oa = out_pad[..., 0:TGT_VOCAB_SIZE]                          # even batches
    ob = out_pad[..., WIDTH:WIDTH + TGT_VOCAB_SIZE]              # odd batches
    out = jnp.stack([oa, ob], axis=1).reshape(
        b_pad, iters_to_do, SEQLEN, TGT_VOCAB_SIZE)
    return out[:B].astype(jnp.float32)


# ------------------------------ parameters --------------------------------------
def positional_encoding(d_model, seqlen=SEQLEN):
    position = jnp.arange(seqlen, dtype=jnp.float32)[:, None]
    div_term = jnp.exp(jnp.arange(0, d_model, 2, dtype=jnp.float32)
                       * (-math.log(10000.0) / d_model))
    ang = position * div_term
    pe = jnp.zeros((seqlen, d_model), jnp.float32)
    pe = pe.at[:, 0::2].set(jnp.sin(ang))
    pe = pe.at[:, 1::2].set(jnp.cos(ang))
    return pe


def init_params(key):
    def dense(k, fan_in, shape):
        bound = 1.0 / math.sqrt(fan_in)
        return jax.random.uniform(k, shape, jnp.float32, -bound, bound)

    ks = iter(jax.random.split(key, 16))
    p = {}
    emb = 0.02 * jax.random.normal(next(ks), (VOCAB_SIZE, BOTTLENECK), jnp.float32)
    p["embed"] = emb.at[PADDING_IDX].set(0.0)                 # padding_idx=8
    p["pos_enc"] = positional_encoding(BOTTLENECK)
    # reshape_head: Linear(bn, bn) + NewGELU
    p["rh_w"] = dense(next(ks), BOTTLENECK, (BOTTLENECK, BOTTLENECK))
    p["rh_b"] = dense(next(ks), BOTTLENECK, (1, BOTTLENECK))
    # AttentionBlocks (parameters stacked over NUM_BLOCKS)
    p["ln1_g"] = jnp.ones((NUM_BLOCKS, 1, WIDTH), jnp.float32)
    p["ln1_b"] = jnp.zeros((NUM_BLOCKS, 1, WIDTH), jnp.float32)
    p["ln2_g"] = jnp.ones((NUM_BLOCKS, 1, WIDTH), jnp.float32)
    p["ln2_b"] = jnp.zeros((NUM_BLOCKS, 1, WIDTH), jnp.float32)
    p["attn_w"] = dense(next(ks), WIDTH, (NUM_BLOCKS, WIDTH, WIDTH))
    p["attn_b"] = dense(next(ks), WIDTH, (NUM_BLOCKS, 1, WIDTH))
    p["mlp_w1"] = dense(next(ks), WIDTH, (NUM_BLOCKS, WIDTH, WIDTH))
    p["mlp_b1"] = dense(next(ks), WIDTH, (NUM_BLOCKS, 1, WIDTH))
    p["mlp_w2"] = dense(next(ks), WIDTH, (NUM_BLOCKS, WIDTH, WIDTH))
    p["mlp_b2"] = dense(next(ks), WIDTH, (NUM_BLOCKS, 1, WIDTH))
    # recur_block.reshape_layer: Linear(W, bn)
    p["resh_w"] = dense(next(ks), WIDTH, (WIDTH, BOTTLENECK))
    p["resh_b"] = dense(next(ks), WIDTH, (1, BOTTLENECK))
    # out_head: Linear(bn, tgt_vocab)
    p["head_w"] = dense(next(ks), BOTTLENECK, (BOTTLENECK, TGT_VOCAB_SIZE))
    p["head_b"] = dense(next(ks), BOTTLENECK, (1, TGT_VOCAB_SIZE))
    return p


if __name__ == "__main__":
    root = jax.random.PRNGKey(0)
    k_params, k_tokens = jax.random.split(root)
    params = init_params(k_params)

    B, iters_to_do = 2, 3
    tokens = jax.random.randint(k_tokens, (B, SEQLEN), 0, VOCAB_SIZE, dtype=jnp.int32)

    # TODO(synk): Adversarial_Perturbation / perturb_iters is undefined in the
    # reference module, so perturbation steps are not implemented.
    all_outputs = dtnet1d_forward(tokens, params, iters_to_do)
    jax.block_until_ready(all_outputs)
    assert all_outputs.shape == (B, iters_to_do, SEQLEN, TGT_VOCAB_SIZE)
    assert all_outputs.dtype == jnp.float32
    print("KERNEL_OK")
</pallas_src>

<mosaic_0001>
module attributes {stable_mosaic.version = 11 : i64} {
  func.func @_dtnet_fused_kernel(%arg0: i32, %arg1: i32, %arg2: memref<32x128xf32, #tpu.memory_space<vmem>>, %arg3: memref<128x128xbf16, #tpu.memory_space<vmem>>, %arg4: memref<1x128xf32, #tpu.memory_space<vmem>>, %arg5: memref<2x1x128xf32, #tpu.memory_space<vmem>>, %arg6: memref<2x1x128xf32, #tpu.memory_space<vmem>>, %arg7: memref<2x128x128xbf16, #tpu.memory_space<vmem>>, %arg8: memref<2x1x128xf32, #tpu.memory_space<vmem>>, %arg9: memref<2x1x128xf32, #tpu.memory_space<vmem>>, %arg10: memref<2x1x128xf32, #tpu.memory_space<vmem>>, %arg11: memref<2x128x128xbf16, #tpu.memory_space<vmem>>, %arg12: memref<2x1x128xf32, #tpu.memory_space<vmem>>, %arg13: memref<2x128x128xbf16, #tpu.memory_space<vmem>>, %arg14: memref<2x1x128xf32, #tpu.memory_space<vmem>>, %arg15: memref<128x128xbf16, #tpu.memory_space<vmem>>, %arg16: memref<1x128xf32, #tpu.memory_space<vmem>>, %arg17: memref<128x128xbf16, #tpu.memory_space<vmem>>, %arg18: memref<1x128xf32, #tpu.memory_space<vmem>>, %arg19: memref<1x3x32x128xbf16, #tpu.memory_space<vmem>>, %arg20: memref<32x128xf32, #tpu.memory_space<vmem>>) attributes {dimension_semantics = [#tpu.dimension_semantics<parallel>, #tpu.dimension_semantics<arbitrary>], iteration_bounds = array<i64: 1, 1>, scalar_prefetch = 0 : i64, scratch_operands = 1 : i64, tpu.core_type = #tpu.core_type<tc>, window_params = [{transform_indices = @transform_0, window_bounds = array<i64: 32, 128>}, {pipeline_mode = #tpu.pipeline_mode<synchronous>, transform_indices = @transform_1, window_bounds = array<i64: 128, 128>}, {pipeline_mode = #tpu.pipeline_mode<synchronous>, transform_indices = @transform_2, window_bounds = array<i64: 1, 128>}, {pipeline_mode = #tpu.pipeline_mode<synchronous>, transform_indices = @transform_3, window_bounds = array<i64: 2, 1, 128>}, {pipeline_mode = #tpu.pipeline_mode<synchronous>, transform_indices = @transform_4, window_bounds = array<i64: 2, 1, 128>}, {pipeline_mode = #tpu.pipeline_mode<synchronous>, transform_indices = @transform_5, window_bounds = array<i64: 2, 128, 128>}, {pipeline_mode = #tpu.pipeline_mode<synchronous>, transform_indices = @transform_6, window_bounds = array<i64: 2, 1, 128>}, {pipeline_mode = #tpu.pipeline_mode<synchronous>, transform_indices = @transform_7, window_bounds = array<i64: 2, 1, 128>}, {pipeline_mode = #tpu.pipeline_mode<synchronous>, transform_indices = @transform_8, window_bounds = array<i64: 2, 1, 128>}, {pipeline_mode = #tpu.pipeline_mode<synchronous>, transform_indices = @transform_9, window_bounds = array<i64: 2, 128, 128>}, {pipeline_mode = #tpu.pipeline_mode<synchronous>, transform_indices = @transform_10, window_bounds = array<i64: 2, 1, 128>}, {pipeline_mode = #tpu.pipeline_mode<synchronous>, transform_indices = @transform_11, window_bounds = array<i64: 2, 128, 128>}, {pipeline_mode = #tpu.pipeline_mode<synchronous>, transform_indices = @transform_12, window_bounds = array<i64: 2, 1, 128>}, {pipeline_mode = #tpu.pipeline_mode<synchronous>, transform_indices = @transform_13, window_bounds = array<i64: 128, 128>}, {pipeline_mode = #tpu.pipeline_mode<synchronous>, transform_indices = @transform_14, window_bounds = array<i64: 1, 128>}, {pipeline_mode = #tpu.pipeline_mode<synchronous>, transform_indices = @transform_15, window_bounds = array<i64: 128, 128>}, {pipeline_mode = #tpu.pipeline_mode<synchronous>, transform_indices = @transform_16, window_bounds = array<i64: 1, 128>}, {transform_indices = @transform_17, window_bounds = array<i64: 1, 3, 32, 128>}]} {
    %0 = tpu.iota {dimensions = array<i32: 1>} : vector<1x128xi32>
    %c64_i32 = arith.constant 64 : i32
    %1 = vector.broadcast %c64_i32 : i32 to vector<1x128xi32>
    %2 = arith.cmpi slt, %0, %1 : vector<1x128xi32>
    %3 = arith.extui %2 : vector<1x128xi1> to vector<1x128xi32>
    %4 = arith.sitofp %3 : vector<1x128xi32> to vector<1x128xf32>
    %cst = arith.constant 1.000000e+00 : f32
    %5 = vector.broadcast %cst : f32 to vector<1x128xf32>
    %6 = arith.subf %5, %4 : vector<1x128xf32>
    %c64_i32_0 = arith.constant 64 : i32
    %c0_i32 = arith.constant 0 : i32
    %7 = arith.cmpi eq, %c64_i32_0, %c0_i32 : i32
    %c1_i32 = arith.constant 1 : i32
    %8 = arith.select %7, %c1_i32, %c64_i32_0 : i32
    %9 = vector.broadcast %8 : i32 to vector<1x128xi32>
    %10 = arith.remsi %0, %9 : vector<1x128xi32>
    %c0_i32_1 = arith.constant 0 : i32
    %11 = vector.broadcast %c0_i32_1 : i32 to vector<1x128xi32>
    %12 = arith.cmpi ne, %10, %11 : vector<1x128xi32>
    %c0_i32_2 = arith.constant 0 : i32
    %13 = vector.broadcast %c0_i32_2 : i32 to vector<1x128xi32>
    %14 = arith.cmpi slt, %10, %13 : vector<1x128xi32>
    %c0_i32_3 = arith.constant 0 : i32
    %15 = arith.cmpi slt, %8, %c0_i32_3 : i32
    %16 = vector.broadcast %15 : i1 to vector<1x128xi1>
    %17 = vector.broadcast %16 : vector<1x128xi1> to vector<1x128xi1>
    %18 = arith.xori %14, %17 : vector<1x128xi1>
    %19 = arith.andi %18, %12 : vector<1x128xi1>
    %20 = vector.broadcast %8 : i32 to vector<1x128xi32>
    %21 = arith.addi %10, %20 : vector<1x128xi32>
    %22 = arith.select %19, %21, %10 : vector<1x128xi1>, vector<1x128xi32>
    %c32_i32 = arith.constant 32 : i32
    %23 = vector.broadcast %c32_i32 : i32 to vector<1x128xi32>
    %24 = arith.cmpi sge, %22, %23 : vector<1x128xi32>
    %25 = arith.extui %24 : vector<1x128xi1> to vector<1x128xi32>
    %26 = arith.sitofp %25 : vector<1x128xi32> to vector<1x128xf32>
    %c0_i32_4 = arith.constant 0 : i32
    %27 = arith.cmpi eq, %arg1, %c0_i32_4 : i32
    %28 = arith.extui %27 : i1 to i32
    %c0_i32_5 = arith.constant 0 : i32
    %29 = arith.cmpi ne, %28, %c0_i32_5 : i32
    scf.if %29 {
      %c0_403 = arith.constant 0 : index
      %c0_404 = arith.constant 0 : index
      %1111 = vector.load %arg2[%c0_403, %c0_404] : memref<32x128xf32, #tpu.memory_space<vmem>>, vector<32x128xf32>
      %c0_405 = arith.constant 0 : index
      %c0_406 = arith.constant 0 : index
      %1112 = vector.load %arg3[%c0_405, %c0_406] : memref<128x128xbf16, #tpu.memory_space<vmem>>, vector<128x128xbf16>
      %c0_407 = arith.constant 0 : index
      %c0_408 = arith.constant 0 : index
      %1113 = vector.load %arg4[%c0_407, %c0_408] : memref<1x128xf32, #tpu.memory_space<vmem>>, vector<1x128xf32>
      %1114 = arith.truncf %1111 : vector<32x128xf32> to vector<32x128xbf16>
      %cst_409 = arith.constant dense<0.000000e+00> : vector<32x128xf32>
      %1115 = tpu.matmul %1114, %1112, %cst_409 {dimension_numbers = #tpu.dot_dimension_numbers<[1], [0], [0], [1], [0, 0, 1, 1], [], []>} : vector<32x128xbf16>, vector<128x128xbf16>, vector<32x128xf32> -> vector<32x128xf32>
      %1116 = vector.broadcast %1113 : vector<1x128xf32> to vector<32x128xf32>
      %1117 = arith.addf %1115, %1116 : vector<32x128xf32>
      %cst_410 = arith.constant 5.000000e-01 : f32
      %1118 = vector.broadcast %cst_410 : f32 to vector<32x128xf32>
      %1119 = arith.mulf %1118, %1117 : vector<32x128xf32>
      %cst_411 = arith.constant 4.471500e-02 : f32
      %1120 = vector.broadcast %cst_411 : f32 to vector<32x128xf32>
      %1121 = arith.mulf %1120, %1117 : vector<32x128xf32>
      %1122 = arith.mulf %1121, %1117 : vector<32x128xf32>
      %1123 = arith.mulf %1122, %1117 : vector<32x128xf32>
      %1124 = arith.addf %1117, %1123 : vector<32x128xf32>
      %cst_412 = arith.constant 0.797884583 : f32
      %1125 = vector.broadcast %cst_412 : f32 to vector<32x128xf32>
      %1126 = arith.mulf %1125, %1124 : vector<32x128xf32>
      %1127 = math.tanh %1126 : vector<32x128xf32>
      %cst_413 = arith.constant 1.000000e+00 : f32
      %1128 = vector.broadcast %cst_413 : f32 to vector<32x128xf32>
      %1129 = arith.addf %1128, %1127 : vector<32x128xf32>
      %1130 = arith.mulf %1119, %1129 : vector<32x128xf32>
      %1131 = arith.addf %1130, %1111 : vector<32x128xf32>
      %c0_414 = arith.constant 0 : index
      %c0_415 = arith.constant 0 : index
      %1132 = vector.load %arg20[%c0_414, %c0_415] : memref<32x128xf32, #tpu.memory_space<vmem>>, vector<32x128xf32>
      tpu.vector_store %arg20[%c0_414, %c0_415], %1131 {strides = array<i32>} : memref<32x128xf32, #tpu.memory_space<vmem>>, vector<32x128xf32>,
    } else {
    }
    %c0 = arith.constant 0 : index
    %c0_6 = arith.constant 0 : index
    %30 = vector.load %arg20[%c0, %c0_6] : memref<32x128xf32, #tpu.memory_space<vmem>>, vector<32x128xf32>
    %31 = vector.broadcast %26 : vector<1x128xf32> to vector<32x128xf32>
    %32 = arith.mulf %30, %31 : vector<32x128xf32>
    %c0_7 = arith.constant 0 : index
    %c0_8 = arith.constant 0 : index
    %c0_9 = arith.constant 0 : index
    %33 = vector.load %arg5[%c0_7, %c0_8, %c0_9] : memref<2x1x128xf32, #tpu.memory_space<vmem>>, vector<1x1x128xf32>
    %34 = vector.shape_cast %33 : vector<1x1x128xf32> to vector<1x128xf32>
    %c0_10 = arith.constant 0 : index
    %c0_11 = arith.constant 0 : index
    %c0_12 = arith.constant 0 : index
    %35 = vector.load %arg6[%c0_10, %c0_11, %c0_12] : memref<2x1x128xf32, #tpu.memory_space<vmem>>, vector<1x1x128xf32>
    %36 = vector.shape_cast %35 : vector<1x1x128xf32> to vector<1x128xf32>
    %37 = vector.broadcast %4 : vector<1x128xf32> to vector<32x128xf32>
    %38 = arith.mulf %30, %37 : vector<32x128xf32>
    %cst_13 = arith.constant dense<0.000000e+00> : vector<32xf32>
    %39 = vector.multi_reduction <add>, %38, %cst_13 [1] : vector<32x128xf32> to vector<32xf32>
    %40 = vector.shape_cast %39 : vector<32xf32> to vector<32x1xf32>
    %41 = vector.broadcast %6 : vector<1x128xf32> to vector<32x128xf32>
    %42 = arith.mulf %30, %41 : vector<32x128xf32>
    %cst_14 = arith.constant dense<0.000000e+00> : vector<32xf32>
    %43 = vector.multi_reduction <add>, %42, %cst_14 [1] : vector<32x128xf32> to vector<32xf32>
    %44 = vector.shape_cast %43 : vector<32xf32> to vector<32x1xf32>
    %45 = vector.broadcast %4 : vector<1x128xf32> to vector<32x128xf32>
    %46 = vector.broadcast %40 : vector<32x1xf32> to vector<32x128xf32>
    %47 = arith.mulf %45, %46 : vector<32x128xf32>
    %48 = vector.broadcast %6 : vector<1x128xf32> to vector<32x128xf32>
    %49 = vector.broadcast %44 : vector<32x1xf32> to vector<32x128xf32>
    %50 = arith.mulf %48, %49 : vector<32x128xf32>
    %51 = arith.addf %47, %50 : vector<32x128xf32>
    %cst_15 = arith.constant 1.562500e-02 : f32
    %52 = vector.broadcast %cst_15 : f32 to vector<32x128xf32>
    %53 = arith.mulf %51, %52 : vector<32x128xf32>
    %54 = arith.mulf %30, %30 : vector<32x128xf32>
    %55 = vector.broadcast %4 : vector<1x128xf32> to vector<32x128xf32>
    %56 = arith.mulf %54, %55 : vector<32x128xf32>
    %cst_16 = arith.constant dense<0.000000e+00> : vector<32xf32>
    %57 = vector.multi_reduction <add>, %56, %cst_16 [1] : vector<32x128xf32> to vector<32xf32>
    %58 = vector.shape_cast %57 : vector<32xf32> to vector<32x1xf32>
    %59 = vector.broadcast %6 : vector<1x128xf32> to vector<32x128xf32>
    %60 = arith.mulf %54, %59 : vector<32x128xf32>
    %cst_17 = arith.constant dense<0.000000e+00> : vector<32xf32>
    %61 = vector.multi_reduction <add>, %60, %cst_17 [1] : vector<32x128xf32> to vector<32xf32>
    %62 = vector.shape_cast %61 : vector<32xf32> to vector<32x1xf32>
    %63 = vector.broadcast %4 : vector<1x128xf32> to vector<32x128xf32>
    %64 = vector.broadcast %58 : vector<32x1xf32> to vector<32x128xf32>
    %65 = arith.mulf %63, %64 : vector<32x128xf32>
    %66 = vector.broadcast %6 : vector<1x128xf32> to vector<32x128xf32>
    %67 = vector.broadcast %62 : vector<32x1xf32> to vector<32x128xf32>
    %68 = arith.mulf %66, %67 : vector<32x128xf32>
    %69 = arith.addf %65, %68 : vector<32x128xf32>
    %cst_18 = arith.constant 1.562500e-02 : f32
    %70 = vector.broadcast %cst_18 : f32 to vector<32x128xf32>
    %71 = arith.mulf %69, %70 : vector<32x128xf32>
    %72 = arith.mulf %53, %53 : vector<32x128xf32>
    %73 = arith.subf %71, %72 : vector<32x128xf32>
    %74 = arith.subf %30, %53 : vector<32x128xf32>
    %cst_19 = arith.constant 9.99999974E-6 : f32
    %75 = vector.broadcast %cst_19 : f32 to vector<32x128xf32>
    %76 = arith.addf %73, %75 : vector<32x128xf32>
    %77 = math.rsqrt %76 : vector<32x128xf32>
    %78 = arith.mulf %74, %77 : vector<32x128xf32>
    %79 = vector.broadcast %34 : vector<1x128xf32> to vector<32x128xf32>
    %80 = arith.mulf %78, %79 : vector<32x128xf32>
    %81 = vector.broadcast %36 : vector<1x128xf32> to vector<32x128xf32>
    %82 = arith.addf %80, %81 : vector<32x128xf32>
    %c0_20 = arith.constant 0 : index
    %c0_21 = arith.constant 0 : index
    %c0_22 = arith.constant 0 : index
    %83 = vector.load %arg7[%c0_20, %c0_21, %c0_22] : memref<2x128x128xbf16, #tpu.memory_space<vmem>>, vector<1x128x128xbf16>
    %84 = vector.shape_cast %83 : vector<1x128x128xbf16> to vector<128x128xbf16>
    %c0_23 = arith.constant 0 : index
    %c0_24 = arith.constant 0 : index
    %c0_25 = arith.constant 0 : index
    %85 = vector.load %arg8[%c0_23, %c0_24, %c0_25] : memref<2x1x128xf32, #tpu.memory_space<vmem>>, vector<1x1x128xf32>
    %86 = vector.shape_cast %85 : vector<1x1x128xf32> to vector<1x128xf32>
    %87 = arith.truncf %82 : vector<32x128xf32> to vector<32x128xbf16>
    %cst_26 = arith.constant dense<0.000000e+00> : vector<32x128xf32>
    %88 = tpu.matmul %87, %84, %cst_26 {dimension_numbers = #tpu.dot_dimension_numbers<[1], [0], [0], [1], [0, 0, 1, 1], [], []>} : vector<32x128xbf16>, vector<128x128xbf16>, vector<32x128xf32> -> vector<32x128xf32>
    %89 = vector.broadcast %86 : vector<1x128xf32> to vector<32x128xf32>
    %90 = arith.addf %88, %89 : vector<32x128xf32>
    %91 = vector.shape_cast %90 : vector<32x128xf32> to vector<1x32x128xf32>
    %cst_27 = arith.constant dense<0xFF800000> : vector<1x128xf32>
    %92 = vector.multi_reduction <maximumf>, %91, %cst_27 [1] : vector<1x32x128xf32> to vector<1x128xf32>
    %93 = vector.shape_cast %92 : vector<1x128xf32> to vector<1x1x128xf32>
    %94 = vector.broadcast %93 : vector<1x1x128xf32> to vector<1x32x128xf32>
    %95 = arith.subf %91, %94 : vector<1x32x128xf32>
    %96 = math.exp %95 : vector<1x32x128xf32>
    %cst_28 = arith.constant dense<0.000000e+00> : vector<1x128xf32>
    %97 = vector.multi_reduction <add>, %96, %cst_28 [1] : vector<1x32x128xf32> to vector<1x128xf32>
    %98 = vector.shape_cast %97 : vector<1x128xf32> to vector<1x1x128xf32>
    %99 = tpu.reciprocal %98 {approx = true} : vector<1x1x128xf32> -> vector<1x1x128xf32>
    %100 = vector.broadcast %99 : vector<1x1x128xf32> to vector<1x32x128xf32>
    %101 = arith.mulf %96, %100 : vector<1x32x128xf32>
    %102 = vector.shape_cast %101 : vector<1x32x128xf32> to vector<32x128xf32>
    %103 = arith.mulf %82, %102 : vector<32x128xf32>
    %104 = arith.addf %82, %103 : vector<32x128xf32>
    %c0_29 = arith.constant 0 : index
    %c0_30 = arith.constant 0 : index
    %c0_31 = arith.constant 0 : index
    %105 = vector.load %arg9[%c0_29, %c0_30, %c0_31] : memref<2x1x128xf32, #tpu.memory_space<vmem>>, vector<1x1x128xf32>
    %106 = vector.shape_cast %105 : vector<1x1x128xf32> to vector<1x128xf32>
    %c0_32 = arith.constant 0 : index
    %c0_33 = arith.constant 0 : index
    %c0_34 = arith.constant 0 : index
    %107 = vector.load %arg10[%c0_32, %c0_33, %c0_34] : memref<2x1x128xf32, #tpu.memory_space<vmem>>, vector<1x1x128xf32>
    %108 = vector.shape_cast %107 : vector<1x1x128xf32> to vector<1x128xf32>
    %109 = vector.broadcast %4 : vector<1x128xf32> to vector<32x128xf32>
    %110 = arith.mulf %104, %109 : vector<32x128xf32>
    %cst_35 = arith.constant dense<0.000000e+00> : vector<32xf32>
    %111 = vector.multi_reduction <add>, %110, %cst_35 [1] : vector<32x128xf32> to vector<32xf32>
    %112 = vector.shape_cast %111 : vector<32xf32> to vector<32x1xf32>
    %113 = vector.broadcast %6 : vector<1x128xf32> to vector<32x128xf32>
    %114 = arith.mulf %104, %113 : vector<32x128xf32>
    %cst_36 = arith.constant dense<0.000000e+00> : vector<32xf32>
    %115 = vector.multi_reduction <add>, %114, %cst_36 [1] : vector<32x128xf32> to vector<32xf32>
    %116 = vector.shape_cast %115 : vector<32xf32> to vector<32x1xf32>
    %117 = vector.broadcast %4 : vector<1x128xf32> to vector<32x128xf32>
    %118 = vector.broadcast %112 : vector<32x1xf32> to vector<32x128xf32>
    %119 = arith.mulf %117, %118 : vector<32x128xf32>
    %120 = vector.broadcast %6 : vector<1x128xf32> to vector<32x128xf32>
    %121 = vector.broadcast %116 : vector<32x1xf32> to vector<32x128xf32>
    %122 = arith.mulf %120, %121 : vector<32x128xf32>
    %123 = arith.addf %119, %122 : vector<32x128xf32>
    %cst_37 = arith.constant 1.562500e-02 : f32
    %124 = vector.broadcast %cst_37 : f32 to vector<32x128xf32>
    %125 = arith.mulf %123, %124 : vector<32x128xf32>
    %126 = arith.mulf %104, %104 : vector<32x128xf32>
    %127 = vector.broadcast %4 : vector<1x128xf32> to vector<32x128xf32>
    %128 = arith.mulf %126, %127 : vector<32x128xf32>
    %cst_38 = arith.constant dense<0.000000e+00> : vector<32xf32>
    %129 = vector.multi_reduction <add>, %128, %cst_38 [1] : vector<32x128xf32> to vector<32xf32>
    %130 = vector.shape_cast %129 : vector<32xf32> to vector<32x1xf32>
    %131 = vector.broadcast %6 : vector<1x128xf32> to vector<32x128xf32>
    %132 = arith.mulf %126, %131 : vector<32x128xf32>
    %cst_39 = arith.constant dense<0.000000e+00> : vector<32xf32>
    %133 = vector.multi_reduction <add>, %132, %cst_39 [1] : vector<32x128xf32> to vector<32xf32>
    %134 = vector.shape_cast %133 : vector<32xf32> to vector<32x1xf32>
    %135 = vector.broadcast %4 : vector<1x128xf32> to vector<32x128xf32>
    %136 = vector.broadcast %130 : vector<32x1xf32> to vector<32x128xf32>
    %137 = arith.mulf %135, %136 : vector<32x128xf32>
    %138 = vector.broadcast %6 : vector<1x128xf32> to vector<32x128xf32>
    %139 = vector.broadcast %134 : vector<32x1xf32> to vector<32x128xf32>
    %140 = arith.mulf %138, %139 : vector<32x128xf32>
    %141 = arith.addf %137, %140 : vector<32x128xf32>
    %cst_40 = arith.constant 1.562500e-02 : f32
    %142 = vector.broadcast %cst_40 : f32 to vector<32x128xf32>
    %143 = arith.mulf %141, %142 : vector<32x128xf32>
    %144 = arith.mulf %125, %125 : vector<32x128xf32>
    %145 = arith.subf %143, %144 : vector<32x128xf32>
    %146 = arith.subf %104, %125 : vector<32x128xf32>
    %cst_41 = arith.constant 9.99999974E-6 : f32
    %147 = vector.broadcast %cst_41 : f32 to vector<32x128xf32>
    %148 = arith.addf %145, %147 : vector<32x128xf32>
    %149 = math.rsqrt %148 : vector<32x128xf32>
    %150 = arith.mulf %146, %149 : vector<32x128xf32>
    %151 = vector.broadcast %106 : vector<1x128xf32> to vector<32x128xf32>
    %152 = arith.mulf %150, %151 : vector<32x128xf32>
    %153 = vector.broadcast %108 : vector<1x128xf32> to vector<32x128xf32>
    %154 = arith.addf %152, %153 : vector<32x128xf32>
    %c0_42 = arith.constant 0 : index
    %c0_43 = arith.constant 0 : index
    %c0_44 = arith.constant 0 : index
    %155 = vector.load %arg11[%c0_42, %c0_43, %c0_44] : memref<2x128x128xbf16, #tpu.memory_space<vmem>>, vector<1x128x128xbf16>
    %156 = vector.shape_cast %155 : vector<1x128x128xbf16> to vector<128x128xbf16>
    %c0_45 = arith.constant 0 : index
    %c0_46 = arith.constant 0 : index
    %c0_47 = arith.constant 0 : index
    %157 = vector.load %arg12[%c0_45, %c0_46, %c0_47] : memref<2x1x128xf32, #tpu.memory_space<vmem>>, vector<1x1x128xf32>
    %158 = vector.shape_cast %157 : vector<1x1x128xf32> to vector<1x128xf32>
    %159 = arith.truncf %154 : vector<32x128xf32> to vector<32x128xbf16>
    %cst_48 = arith.constant dense<0.000000e+00> : vector<32x128xf32>
    %160 = tpu.matmul %159, %156, %cst_48 {dimension_numbers = #tpu.dot_dimension_numbers<[1], [0], [0], [1], [0, 0, 1, 1], [], []>} : vector<32x128xbf16>, vector<128x128xbf16>, vector<32x128xf32> -> vector<32x128xf32>
    %161 = vector.broadcast %158 : vector<1x128xf32> to vector<32x128xf32>
    %162 = arith.addf %160, %161 : vector<32x128xf32>
    %cst_49 = arith.constant 5.000000e-01 : f32
    %163 = vector.broadcast %cst_49 : f32 to vector<32x128xf32>
    %164 = arith.mulf %163, %162 : vector<32x128xf32>
    %cst_50 = arith.constant 4.471500e-02 : f32
    %165 = vector.broadcast %cst_50 : f32 to vector<32x128xf32>
    %166 = arith.mulf %165, %162 : vector<32x128xf32>
    %167 = arith.mulf %166, %162 : vector<32x128xf32>
    %168 = arith.mulf %167, %162 : vector<32x128xf32>
    %169 = arith.addf %162, %168 : vector<32x128xf32>
    %cst_51 = arith.constant 0.797884583 : f32
    %170 = vector.broadcast %cst_51 : f32 to vector<32x128xf32>
    %171 = arith.mulf %170, %169 : vector<32x128xf32>
    %172 = math.tanh %171 : vector<32x128xf32>
    %cst_52 = arith.constant 1.000000e+00 : f32
    %173 = vector.broadcast %cst_52 : f32 to vector<32x128xf32>
    %174 = arith.addf %173, %172 : vector<32x128xf32>
    %175 = arith.mulf %164, %174 : vector<32x128xf32>
    %c0_53 = arith.constant 0 : index
    %c0_54 = arith.constant 0 : index
    %c0_55 = arith.constant 0 : index
    %176 = vector.load %arg13[%c0_53, %c0_54, %c0_55] : memref<2x128x128xbf16, #tpu.memory_space<vmem>>, vector<1x128x128xbf16>
    %177 = vector.shape_cast %176 : vector<1x128x128xbf16> to vector<128x128xbf16>
    %c0_56 = arith.constant 0 : index
    %c0_57 = arith.constant 0 : index
    %c0_58 = arith.constant 0 : index
    %178 = vector.load %arg14[%c0_56, %c0_57, %c0_58] : memref<2x1x128xf32, #tpu.memory_space<vmem>>, vector<1x1x128xf32>
    %179 = vector.shape_cast %178 : vector<1x1x128xf32> to vector<1x128xf32>
    %180 = arith.truncf %175 : vector<32x128xf32> to vector<32x128xbf16>
    %cst_59 = arith.constant dense<0.000000e+00> : vector<32x128xf32>
    %181 = tpu.matmul %180, %177, %cst_59 {dimension_numbers = #tpu.dot_dimension_numbers<[1], [0], [0], [1], [0, 0, 1, 1], [], []>} : vector<32x128xbf16>, vector<128x128xbf16>, vector<32x128xf32> -> vector<32x128xf32>
    %182 = vector.broadcast %179 : vector<1x128xf32> to vector<32x128xf32>
    %183 = arith.addf %181, %182 : vector<32x128xf32>
    %184 = arith.addf %154, %183 : vector<32x128xf32>
    %cst_60 = arith.constant 5.000000e-01 : f32
    %185 = vector.broadcast %cst_60 : f32 to vector<32x128xf32>
    %186 = arith.mulf %185, %184 : vector<32x128xf32>
    %cst_61 = arith.constant 4.471500e-02 : f32
    %187 = vector.broadcast %cst_61 : f32 to vector<32x128xf32>
    %188 = arith.mulf %187, %184 : vector<32x128xf32>
    %189 = arith.mulf %188, %184 : vector<32x128xf32>
    %190 = arith.mulf %189, %184 : vector<32x128xf32>
    %191 = arith.addf %184, %190 : vector<32x128xf32>
    %cst_62 = arith.constant 0.797884583 : f32
    %192 = vector.broadcast %cst_62 : f32 to vector<32x128xf32>
    %193 = arith.mulf %192, %191 : vector<32x128xf32>
    %194 = math.tanh %193 : vector<32x128xf32>
    %cst_63 = arith.constant 1.000000e+00 : f32
    %195 = vector.broadcast %cst_63 : f32 to vector<32x128xf32>
    %196 = arith.addf %195, %194 : vector<32x128xf32>
    %197 = arith.mulf %186, %196 : vector<32x128xf32>
    %c1 = arith.constant 1 : index
    %c0_64 = arith.constant 0 : index
    %c0_65 = arith.constant 0 : index
    %198 = vector.load %arg5[%c1, %c0_64, %c0_65] : memref<2x1x128xf32, #tpu.memory_space<vmem>>, vector<1x1x128xf32>
    %199 = vector.shape_cast %198 : vector<1x1x128xf32> to vector<1x128xf32>
    %c1_66 = arith.constant 1 : index
    %c0_67 = arith.constant 0 : index
    %c0_68 = arith.constant 0 : index
    %200 = vector.load %arg6[%c1_66, %c0_67, %c0_68] : memref<2x1x128xf32, #tpu.memory_space<vmem>>, vector<1x1x128xf32>
    %201 = vector.shape_cast %200 : vector<1x1x128xf32> to vector<1x128xf32>
    %202 = vector.broadcast %4 : vector<1x128xf32> to vector<32x128xf32>
    %203 = arith.mulf %197, %202 : vector<32x128xf32>
    %cst_69 = arith.constant dense<0.000000e+00> : vector<32xf32>
    %204 = vector.multi_reduction <add>, %203, %cst_69 [1] : vector<32x128xf32> to vector<32xf32>
    %205 = vector.shape_cast %204 : vector<32xf32> to vector<32x1xf32>
    %206 = vector.broadcast %6 : vector<1x128xf32> to vector<32x128xf32>
    %207 = arith.mulf %197, %206 : vector<32x128xf32>
    %cst_70 = arith.constant dense<0.000000e+00> : vector<32xf32>
    %208 = vector.multi_reduction <add>, %207, %cst_70 [1] : vector<32x128xf32> to vector<32xf32>
    %209 = vector.shape_cast %208 : vector<32xf32> to vector<32x1xf32>
    %210 = vector.broadcast %4 : vector<1x128xf32> to vector<32x128xf32>
    %211 = vector.broadcast %205 : vector<32x1xf32> to vector<32x128xf32>
    %212 = arith.mulf %210, %211 : vector<32x128xf32>
    %213 = vector.broadcast %6 : vector<1x128xf32> to vector<32x128xf32>
    %214 = vector.broadcast %209 : vector<32x1xf32> to vector<32x128xf32>
    %215 = arith.mulf %213, %214 : vector<32x128xf32>
    %216 = arith.addf %212, %215 : vector<32x128xf32>
    %cst_71 = arith.constant 1.562500e-02 : f32
    %217 = vector.broadcast %cst_71 : f32 to vector<32x128xf32>
    %218 = arith.mulf %216, %217 : vector<32x128xf32>
    %219 = arith.mulf %197, %197 : vector<32x128xf32>
    %220 = vector.broadcast %4 : vector<1x128xf32> to vector<32x128xf32>
    %221 = arith.mulf %219, %220 : vector<32x128xf32>
    %cst_72 = arith.constant dense<0.000000e+00> : vector<32xf32>
    %222 = vector.multi_reduction <add>, %221, %cst_72 [1] : vector<32x128xf32> to vector<32xf32>
    %223 = vector.shape_cast %222 : vector<32xf32> to vector<32x1xf32>
    %224 = vector.broadcast %6 : vector<1x128xf32> to vector<32x128xf32>
    %225 = arith.mulf %219, %224 : vector<32x128xf32>
    %cst_73 = arith.constant dense<0.000000e+00> : vector<32xf32>
    %226 = vector.multi_reduction <add>, %225, %cst_73 [1] : vector<32x128xf32> to vector<32xf32>
    %227 = vector.shape_cast %226 : vector<32xf32> to vector<32x1xf32>
    %228 = vector.broadcast %4 : vector<1x128xf32> to vector<32x128xf32>
    %229 = vector.broadcast %223 : vector<32x1xf32> to vector<32x128xf32>
    %230 = arith.mulf %228, %229 : vector<32x128xf32>
    %231 = vector.broadcast %6 : vector<1x128xf32> to vector<32x128xf32>
    %232 = vector.broadcast %227 : vector<32x1xf32> to vector<32x128xf32>
    %233 = arith.mulf %231, %232 : vector<32x128xf32>
    %234 = arith.addf %230, %233 : vector<32x128xf32>
    %cst_74 = arith.constant 1.562500e-02 : f32
    %235 = vector.broadcast %cst_74 : f32 to vector<32x128xf32>
    %236 = arith.mulf %234, %235 : vector<32x128xf32>
    %237 = arith.mulf %218, %218 : vector<32x128xf32>
    %238 = arith.subf %236, %237 : vector<32x128xf32>
    %239 = arith.subf %197, %218 : vector<32x128xf32>
    %cst_75 = arith.constant 9.99999974E-6 : f32
    %240 = vector.broadcast %cst_75 : f32 to vector<32x128xf32>
    %241 = arith.addf %238, %240 : vector<32x128xf32>
    %242 = math.rsqrt %241 : vector<32x128xf32>
    %243 = arith.mulf %239, %242 : vector<32x128xf32>
    %244 = vector.broadcast %199 : vector<1x128xf32> to vector<32x128xf32>
    %245 = arith.mulf %243, %244 : vector<32x128xf32>
    %246 = vector.broadcast %201 : vector<1x128xf32> to vector<32x128xf32>
    %247 = arith.addf %245, %246 : vector<32x128xf32>
    %c1_76 = arith.constant 1 : index
    %c0_77 = arith.constant 0 : index
    %c0_78 = arith.constant 0 : index
    %248 = vector.load %arg7[%c1_76, %c0_77, %c0_78] : memref<2x128x128xbf16, #tpu.memory_space<vmem>>, vector<1x128x128xbf16>
    %249 = vector.shape_cast %248 : vector<1x128x128xbf16> to vector<128x128xbf16>
    %c1_79 = arith.constant 1 : index
    %c0_80 = arith.constant 0 : index
    %c0_81 = arith.constant 0 : index
    %250 = vector.load %arg8[%c1_79, %c0_80, %c0_81] : memref<2x1x128xf32, #tpu.memory_space<vmem>>, vector<1x1x128xf32>
    %251 = vector.shape_cast %250 : vector<1x1x128xf32> to vector<1x128xf32>
    %252 = arith.truncf %247 : vector<32x128xf32> to vector<32x128xbf16>
    %cst_82 = arith.constant dense<0.000000e+00> : vector<32x128xf32>
    %253 = tpu.matmul %252, %249, %cst_82 {dimension_numbers = #tpu.dot_dimension_numbers<[1], [0], [0], [1], [0, 0, 1, 1], [], []>} : vector<32x128xbf16>, vector<128x128xbf16>, vector<32x128xf32> -> vector<32x128xf32>
    %254 = vector.broadcast %251 : vector<1x128xf32> to vector<32x128xf32>
    %255 = arith.addf %253, %254 : vector<32x128xf32>
    %256 = vector.shape_cast %255 : vector<32x128xf32> to vector<1x32x128xf32>
    %cst_83 = arith.constant dense<0xFF800000> : vector<1x128xf32>
    %257 = vector.multi_reduction <maximumf>, %256, %cst_83 [1] : vector<1x32x128xf32> to vector<1x128xf32>
    %258 = vector.shape_cast %257 : vector<1x128xf32> to vector<1x1x128xf32>
    %259 = vector.broadcast %258 : vector<1x1x128xf32> to vector<1x32x128xf32>
    %260 = arith.subf %256, %259 : vector<1x32x128xf32>
    %261 = math.exp %260 : vector<1x32x128xf32>
    %cst_84 = arith.constant dense<0.000000e+00> : vector<1x128xf32>
    %262 = vector.multi_reduction <add>, %261, %cst_84 [1] : vector<1x32x128xf32> to vector<1x128xf32>
    %263 = vector.shape_cast %262 : vector<1x128xf32> to vector<1x1x128xf32>
    %264 = tpu.reciprocal %263 {approx = true} : vector<1x1x128xf32> -> vector<1x1x128xf32>
    %265 = vector.broadcast %264 : vector<1x1x128xf32> to vector<1x32x128xf32>
    %266 = arith.mulf %261, %265 : vector<1x32x128xf32>
    %267 = vector.shape_cast %266 : vector<1x32x128xf32> to vector<32x128xf32>
    %268 = arith.mulf %247, %267 : vector<32x128xf32>
    %269 = arith.addf %247, %268 : vector<32x128xf32>
    %c1_85 = arith.constant 1 : index
    %c0_86 = arith.constant 0 : index
    %c0_87 = arith.constant 0 : index
    %270 = vector.load %arg9[%c1_85, %c0_86, %c0_87] : memref<2x1x128xf32, #tpu.memory_space<vmem>>, vector<1x1x128xf32>
    %271 = vector.shape_cast %270 : vector<1x1x128xf32> to vector<1x128xf32>
    %c1_88 = arith.constant 1 : index
    %c0_89 = arith.constant 0 : index
    %c0_90 = arith.constant 0 : index
    %272 = vector.load %arg10[%c1_88, %c0_89, %c0_90] : memref<2x1x128xf32, #tpu.memory_space<vmem>>, vector<1x1x128xf32>
    %273 = vector.shape_cast %272 : vector<1x1x128xf32> to vector<1x128xf32>
    %274 = vector.broadcast %4 : vector<1x128xf32> to vector<32x128xf32>
    %275 = arith.mulf %269, %274 : vector<32x128xf32>
    %cst_91 = arith.constant dense<0.000000e+00> : vector<32xf32>
    %276 = vector.multi_reduction <add>, %275, %cst_91 [1] : vector<32x128xf32> to vector<32xf32>
    %277 = vector.shape_cast %276 : vector<32xf32> to vector<32x1xf32>
    %278 = vector.broadcast %6 : vector<1x128xf32> to vector<32x128xf32>
    %279 = arith.mulf %269, %278 : vector<32x128xf32>
    %cst_92 = arith.constant dense<0.000000e+00> : vector<32xf32>
    %280 = vector.multi_reduction <add>, %279, %cst_92 [1] : vector<32x128xf32> to vector<32xf32>
    %281 = vector.shape_cast %280 : vector<32xf32> to vector<32x1xf32>
    %282 = vector.broadcast %4 : vector<1x128xf32> to vector<32x128xf32>
    %283 = vector.broadcast %277 : vector<32x1xf32> to vector<32x128xf32>
    %284 = arith.mulf %282, %283 : vector<32x128xf32>
    %285 = vector.broadcast %6 : vector<1x128xf32> to vector<32x128xf32>
    %286 = vector.broadcast %281 : vector<32x1xf32> to vector<32x128xf32>
    %287 = arith.mulf %285, %286 : vector<32x128xf32>
    %288 = arith.addf %284, %287 : vector<32x128xf32>
    %cst_93 = arith.constant 1.562500e-02 : f32
    %289 = vector.broadcast %cst_93 : f32 to vector<32x128xf32>
    %290 = arith.mulf %288, %289 : vector<32x128xf32>
    %291 = arith.mulf %269, %269 : vector<32x128xf32>
    %292 = vector.broadcast %4 : vector<1x128xf32> to vector<32x128xf32>
    %293 = arith.mulf %291, %292 : vector<32x128xf32>
    %cst_94 = arith.constant dense<0.000000e+00> : vector<32xf32>
    %294 = vector.multi_reduction <add>, %293, %cst_94 [1] : vector<32x128xf32> to vector<32xf32>
    %295 = vector.shape_cast %294 : vector<32xf32> to vector<32x1xf32>
    %296 = vector.broadcast %6 : vector<1x128xf32> to vector<32x128xf32>
    %297 = arith.mulf %291, %296 : vector<32x128xf32>
    %cst_95 = arith.constant dense<0.000000e+00> : vector<32xf32>
    %298 = vector.multi_reduction <add>, %297, %cst_95 [1] : vector<32x128xf32> to vector<32xf32>
    %299 = vector.shape_cast %298 : vector<32xf32> to vector<32x1xf32>
    %300 = vector.broadcast %4 : vector<1x128xf32> to vector<32x128xf32>
    %301 = vector.broadcast %295 : vector<32x1xf32> to vector<32x128xf32>
    %302 = arith.mulf %300, %301 : vector<32x128xf32>
    %303 = vector.broadcast %6 : vector<1x128xf32> to vector<32x128xf32>
    %304 = vector.broadcast %299 : vector<32x1xf32> to vector<32x128xf32>
    %305 = arith.mulf %303, %304 : vector<32x128xf32>
    %306 = arith.addf %302, %305 : vector<32x128xf32>
    %cst_96 = arith.constant 1.562500e-02 : f32
    %307 = vector.broadcast %cst_96 : f32 to vector<32x128xf32>
    %308 = arith.mulf %306, %307 : vector<32x128xf32>
    %309 = arith.mulf %290, %290 : vector<32x128xf32>
    %310 = arith.subf %308, %309 : vector<32x128xf32>
    %311 = arith.subf %269, %290 : vector<32x128xf32>
    %cst_97 = arith.constant 9.99999974E-6 : f32
    %312 = vector.broadcast %cst_97 : f32 to vector<32x128xf32>
    %313 = arith.addf %310, %312 : vector<32x128xf32>
    %314 = math.rsqrt %313 : vector<32x128xf32>
    %315 = arith.mulf %311, %314 : vector<32x128xf32>
    %316 = vector.broadcast %271 : vector<1x128xf32> to vector<32x128xf32>
    %317 = arith.mulf %315, %316 : vector<32x128xf32>
    %318 = vector.broadcast %273 : vector<1x128xf32> to vector<32x128xf32>
    %319 = arith.addf %317, %318 : vector<32x128xf32>
    %c1_98 = arith.constant 1 : index
    %c0_99 = arith.constant 0 : index
    %c0_100 = arith.constant 0 : index
    %320 = vector.load %arg11[%c1_98, %c0_99, %c0_100] : memref<2x128x128xbf16, #tpu.memory_space<vmem>>, vector<1x128x128xbf16>
    %321 = vector.shape_cast %320 : vector<1x128x128xbf16> to vector<128x128xbf16>
    %c1_101 = arith.constant 1 : index
    %c0_102 = arith.constant 0 : index
    %c0_103 = arith.constant 0 : index
    %322 = vector.load %arg12[%c1_101, %c0_102, %c0_103] : memref<2x1x128xf32, #tpu.memory_space<vmem>>, vector<1x1x128xf32>
    %323 = vector.shape_cast %322 : vector<1x1x128xf32> to vector<1x128xf32>
    %324 = arith.truncf %319 : vector<32x128xf32> to vector<32x128xbf16>
    %cst_104 = arith.constant dense<0.000000e+00> : vector<32x128xf32>
    %325 = tpu.matmul %324, %321, %cst_104 {dimension_numbers = #tpu.dot_dimension_numbers<[1], [0], [0], [1], [0, 0, 1, 1], [], []>} : vector<32x128xbf16>, vector<128x128xbf16>, vector<32x128xf32> -> vector<32x128xf32>
    %326 = vector.broadcast %323 : vector<1x128xf32> to vector<32x128xf32>
    %327 = arith.addf %325, %326 : vector<32x128xf32>
    %cst_105 = arith.constant 5.000000e-01 : f32
    %328 = vector.broadcast %cst_105 : f32 to vector<32x128xf32>
    %329 = arith.mulf %328, %327 : vector<32x128xf32>
    %cst_106 = arith.constant 4.471500e-02 : f32
    %330 = vector.broadcast %cst_106 : f32 to vector<32x128xf32>
    %331 = arith.mulf %330, %327 : vector<32x128xf32>
    %332 = arith.mulf %331, %327 : vector<32x128xf32>
    %333 = arith.mulf %332, %327 : vector<32x128xf32>
    %334 = arith.addf %327, %333 : vector<32x128xf32>
    %cst_107 = arith.constant 0.797884583 : f32
    %335 = vector.broadcast %cst_107 : f32 to vector<32x128xf32>
    %336 = arith.mulf %335, %334 : vector<32x128xf32>
    %337 = math.tanh %336 : vector<32x128xf32>
    %cst_108 = arith.constant 1.000000e+00 : f32
    %338 = vector.broadcast %cst_108 : f32 to vector<32x128xf32>
    %339 = arith.addf %338, %337 : vector<32x128xf32>
    %340 = arith.mulf %329, %339 : vector<32x128xf32>
    %c1_109 = arith.constant 1 : index
    %c0_110 = arith.constant 0 : index
    %c0_111 = arith.constant 0 : index
    %341 = vector.load %arg13[%c1_109, %c0_110, %c0_111] : memref<2x128x128xbf16, #tpu.memory_space<vmem>>, vector<1x128x128xbf16>
    %342 = vector.shape_cast %341 : vector<1x128x128xbf16> to vector<128x128xbf16>
    %c1_112 = arith.constant 1 : index
    %c0_113 = arith.constant 0 : index
    %c0_114 = arith.constant 0 : index
    %343 = vector.load %arg14[%c1_112, %c0_113, %c0_114] : memref<2x1x128xf32, #tpu.memory_space<vmem>>, vector<1x1x128xf32>
    %344 = vector.shape_cast %343 : vector<1x1x128xf32> to vector<1x128xf32>
    %345 = arith.truncf %340 : vector<32x128xf32> to vector<32x128xbf16>
    %cst_115 = arith.constant dense<0.000000e+00> : vector<32x128xf32>
    %346 = tpu.matmul %345, %342, %cst_115 {dimension_numbers = #tpu.dot_dimension_numbers<[1], [0], [0], [1], [0, 0, 1, 1], [], []>} : vector<32x128xbf16>, vector<128x128xbf16>, vector<32x128xf32> -> vector<32x128xf32>
    %347 = vector.broadcast %344 : vector<1x128xf32> to vector<32x128xf32>
    %348 = arith.addf %346, %347 : vector<32x128xf32>
    %349 = arith.addf %319, %348 : vector<32x128xf32>
    %cst_116 = arith.constant 5.000000e-01 : f32
    %350 = vector.broadcast %cst_116 : f32 to vector<32x128xf32>
    %351 = arith.mulf %350, %349 : vector<32x128xf32>
    %cst_117 = arith.constant 4.471500e-02 : f32
    %352 = vector.broadcast %cst_117 : f32 to vector<32x128xf32>
    %353 = arith.mulf %352, %349 : vector<32x128xf32>
    %354 = arith.mulf %353, %349 : vector<32x128xf32>
    %355 = arith.mulf %354, %349 : vector<32x128xf32>
    %356 = arith.addf %349, %355 : vector<32x128xf32>
    %cst_118 = arith.constant 0.797884583 : f32
    %357 = vector.broadcast %cst_118 : f32 to vector<32x128xf32>
    %358 = arith.mulf %357, %356 : vector<32x128xf32>
    %359 = math.tanh %358 : vector<32x128xf32>
    %cst_119 = arith.constant 1.000000e+00 : f32
    %360 = vector.broadcast %cst_119 : f32 to vector<32x128xf32>
    %361 = arith.addf %360, %359 : vector<32x128xf32>
    %362 = arith.mulf %351, %361 : vector<32x128xf32>
    %c0_120 = arith.constant 0 : index
    %c0_121 = arith.constant 0 : index
    %363 = vector.load %arg15[%c0_120, %c0_121] : memref<128x128xbf16, #tpu.memory_space<vmem>>, vector<128x128xbf16>
    %c0_122 = arith.constant 0 : index
    %c0_123 = arith.constant 0 : index
    %364 = vector.load %arg16[%c0_122, %c0_123] : memref<1x128xf32, #tpu.memory_space<vmem>>, vector<1x128xf32>
    %365 = arith.truncf %362 : vector<32x128xf32> to vector<32x128xbf16>
    %cst_124 = arith.constant dense<0.000000e+00> : vector<32x128xf32>
    %366 = tpu.matmul %365, %363, %cst_124 {dimension_numbers = #tpu.dot_dimension_numbers<[1], [0], [0], [1], [0, 0, 1, 1], [], []>} : vector<32x128xbf16>, vector<128x128xbf16>, vector<32x128xf32> -> vector<32x128xf32>
    %367 = vector.broadcast %364 : vector<1x128xf32> to vector<32x128xf32>
    %368 = arith.addf %366, %367 : vector<32x128xf32>
    %cst_125 = arith.constant 5.000000e-01 : f32
    %369 = vector.broadcast %cst_125 : f32 to vector<32x128xf32>
    %370 = arith.mulf %369, %368 : vector<32x128xf32>
    %cst_126 = arith.constant 4.471500e-02 : f32
    %371 = vector.broadcast %cst_126 : f32 to vector<32x128xf32>
    %372 = arith.mulf %371, %368 : vector<32x128xf32>
    %373 = arith.mulf %372, %368 : vector<32x128xf32>
    %374 = arith.mulf %373, %368 : vector<32x128xf32>
    %375 = arith.addf %368, %374 : vector<32x128xf32>
    %cst_127 = arith.constant 0.797884583 : f32
    %376 = vector.broadcast %cst_127 : f32 to vector<32x128xf32>
    %377 = arith.mulf %376, %375 : vector<32x128xf32>
    %378 = math.tanh %377 : vector<32x128xf32>
    %cst_128 = arith.constant 1.000000e+00 : f32
    %379 = vector.broadcast %cst_128 : f32 to vector<32x128xf32>
    %380 = arith.addf %379, %378 : vector<32x128xf32>
    %381 = arith.mulf %370, %380 : vector<32x128xf32>
    %c0_129 = arith.constant 0 : index
    %c0_130 = arith.constant 0 : index
    %382 = vector.load %arg17[%c0_129, %c0_130] : memref<128x128xbf16, #tpu.memory_space<vmem>>, vector<128x128xbf16>
    %c0_131 = arith.constant 0 : index
    %c0_132 = arith.constant 0 : index
    %383 = vector.load %arg18[%c0_131, %c0_132] : memref<1x128xf32, #tpu.memory_space<vmem>>, vector<1x128xf32>
    %384 = arith.truncf %381 : vector<32x128xf32> to vector<32x128xbf16>
    %cst_133 = arith.constant dense<0.000000e+00> : vector<32x128xf32>
    %385 = tpu.matmul %384, %382, %cst_133 {dimension_numbers = #tpu.dot_dimension_numbers<[1], [0], [0], [1], [0, 0, 1, 1], [], []>} : vector<32x128xbf16>, vector<128x128xbf16>, vector<32x128xf32> -> vector<32x128xf32>
    %386 = vector.broadcast %383 : vector<1x128xf32> to vector<32x128xf32>
    %387 = arith.addf %385, %386 : vector<32x128xf32>
    %388 = arith.truncf %387 : vector<32x128xf32> to vector<32x128xbf16>
    %389 = vector.shape_cast %388 : vector<32x128xbf16> to vector<1x1x32x128xbf16>
    %c0_134 = arith.constant 0 : index
    %c0_135 = arith.constant 0 : index
    %c0_136 = arith.constant 0 : index
    %c0_137 = arith.constant 0 : index
    %390 = vector.load %arg19[%c0_134, %c0_135, %c0_136, %c0_137] : memref<1x3x32x128xbf16, #tpu.memory_space<vmem>>, vector<1x1x32x128xbf16>
    tpu.vector_store %arg19[%c0_134, %c0_135, %c0_136, %c0_137], %389 {strides = array<i32>} : memref<1x3x32x128xbf16, #tpu.memory_space<vmem>>, vector<1x1x32x128xbf16>,
    %391 = arith.addf %381, %32 : vector<32x128xf32>
    %c0_138 = arith.constant 0 : index
    %c0_139 = arith.constant 0 : index
    %c0_140 = arith.constant 0 : index
    %392 = vector.load %arg5[%c0_138, %c0_139, %c0_140] : memref<2x1x128xf32, #tpu.memory_space<vmem>>, vector<1x1x128xf32>
    %393 = vector.shape_cast %392 : vector<1x1x128xf32> to vector<1x128xf32>
    %c0_141 = arith.constant 0 : index
    %c0_142 = arith.constant 0 : index
    %c0_143 = arith.constant 0 : index
    %394 = vector.load %arg6[%c0_141, %c0_142, %c0_143] : memref<2x1x128xf32, #tpu.memory_space<vmem>>, vector<1x1x128xf32>
    %395 = vector.shape_cast %394 : vector<1x1x128xf32> to vector<1x128xf32>
    %396 = vector.broadcast %4 : vector<1x128xf32> to vector<32x128xf32>
    %397 = arith.mulf %391, %396 : vector<32x128xf32>
    %cst_144 = arith.constant dense<0.000000e+00> : vector<32xf32>
    %398 = vector.multi_reduction <add>, %397, %cst_144 [1] : vector<32x128xf32> to vector<32xf32>
    %399 = vector.shape_cast %398 : vector<32xf32> to vector<32x1xf32>
    %400 = vector.broadcast %6 : vector<1x128xf32> to vector<32x128xf32>
    %401 = arith.mulf %391, %400 : vector<32x128xf32>
    %cst_145 = arith.constant dense<0.000000e+00> : vector<32xf32>
    %402 = vector.multi_reduction <add>, %401, %cst_145 [1] : vector<32x128xf32> to vector<32xf32>
    %403 = vector.shape_cast %402 : vector<32xf32> to vector<32x1xf32>
    %404 = vector.broadcast %4 : vector<1x128xf32> to vector<32x128xf32>
    %405 = vector.broadcast %399 : vector<32x1xf32> to vector<32x128xf32>
    %406 = arith.mulf %404, %405 : vector<32x128xf32>
    %407 = vector.broadcast %6 : vector<1x128xf32> to vector<32x128xf32>
    %408 = vector.broadcast %403 : vector<32x1xf32> to vector<32x128xf32>
    %409 = arith.mulf %407, %408 : vector<32x128xf32>
    %410 = arith.addf %406, %409 : vector<32x128xf32>
    %cst_146 = arith.constant 1.562500e-02 : f32
    %411 = vector.broadcast %cst_146 : f32 to vector<32x128xf32>
    %412 = arith.mulf %410, %411 : vector<32x128xf32>
    %413 = arith.mulf %391, %391 : vector<32x128xf32>
    %414 = vector.broadcast %4 : vector<1x128xf32> to vector<32x128xf32>
    %415 = arith.mulf %413, %414 : vector<32x128xf32>
    %cst_147 = arith.constant dense<0.000000e+00> : vector<32xf32>
    %416 = vector.multi_reduction <add>, %415, %cst_147 [1] : vector<32x128xf32> to vector<32xf32>
    %417 = vector.shape_cast %416 : vector<32xf32> to vector<32x1xf32>
    %418 = vector.broadcast %6 : vector<1x128xf32> to vector<32x128xf32>
    %419 = arith.mulf %413, %418 : vector<32x128xf32>
    %cst_148 = arith.constant dense<0.000000e+00> : vector<32xf32>
    %420 = vector.multi_reduction <add>, %419, %cst_148 [1] : vector<32x128xf32> to vector<32xf32>
    %421 = vector.shape_cast %420 : vector<32xf32> to vector<32x1xf32>
    %422 = vector.broadcast %4 : vector<1x128xf32> to vector<32x128xf32>
    %423 = vector.broadcast %417 : vector<32x1xf32> to vector<32x128xf32>
    %424 = arith.mulf %422, %423 : vector<32x128xf32>
    %425 = vector.broadcast %6 : vector<1x128xf32> to vector<32x128xf32>
    %426 = vector.broadcast %421 : vector<32x1xf32> to vector<32x128xf32>
    %427 = arith.mulf %425, %426 : vector<32x128xf32>
    %428 = arith.addf %424, %427 : vector<32x128xf32>
    %cst_149 = arith.constant 1.562500e-02 : f32
    %429 = vector.broadcast %cst_149 : f32 to vector<32x128xf32>
    %430 = arith.mulf %428, %429 : vector<32x128xf32>
    %431 = arith.mulf %412, %412 : vector<32x128xf32>
    %432 = arith.subf %430, %431 : vector<32x128xf32>
    %433 = arith.subf %391, %412 : vector<32x128xf32>
    %cst_150 = arith.constant 9.99999974E-6 : f32
    %434 = vector.broadcast %cst_150 : f32 to vector<32x128xf32>
    %435 = arith.addf %432, %434 : vector<32x128xf32>
    %436 = math.rsqrt %435 : vector<32x128xf32>
    %437 = arith.mulf %433, %436 : vector<32x128xf32>
    %438 = vector.broadcast %393 : vector<1x128xf32> to vector<32x128xf32>
    %439 = arith.mulf %437, %438 : vector<32x128xf32>
    %440 = vector.broadcast %395 : vector<1x128xf32> to vector<32x128xf32>
    %441 = arith.addf %439, %440 : vector<32x128xf32>
    %c0_151 = arith.constant 0 : index
    %c0_152 = arith.constant 0 : index
    %c0_153 = arith.constant 0 : index
    %442 = vector.load %arg7[%c0_151, %c0_152, %c0_153] : memref<2x128x128xbf16, #tpu.memory_space<vmem>>, vector<1x128x128xbf16>
    %443 = vector.shape_cast %442 : vector<1x128x128xbf16> to vector<128x128xbf16>
    %c0_154 = arith.constant 0 : index
    %c0_155 = arith.constant 0 : index
    %c0_156 = arith.constant 0 : index
    %444 = vector.load %arg8[%c0_154, %c0_155, %c0_156] : memref<2x1x128xf32, #tpu.memory_space<vmem>>, vector<1x1x128xf32>
    %445 = vector.shape_cast %444 : vector<1x1x128xf32> to vector<1x128xf32>
    %446 = arith.truncf %441 : vector<32x128xf32> to vector<32x128xbf16>
    %cst_157 = arith.constant dense<0.000000e+00> : vector<32x128xf32>
    %447 = tpu.matmul %446, %443, %cst_157 {dimension_numbers = #tpu.dot_dimension_numbers<[1], [0], [0], [1], [0, 0, 1, 1], [], []>} : vector<32x128xbf16>, vector<128x128xbf16>, vector<32x128xf32> -> vector<32x128xf32>
    %448 = vector.broadcast %445 : vector<1x128xf32> to vector<32x128xf32>
    %449 = arith.addf %447, %448 : vector<32x128xf32>
    %450 = vector.shape_cast %449 : vector<32x128xf32> to vector<1x32x128xf32>
    %cst_158 = arith.constant dense<0xFF800000> : vector<1x128xf32>
    %451 = vector.multi_reduction <maximumf>, %450, %cst_158 [1] : vector<1x32x128xf32> to vector<1x128xf32>
    %452 = vector.shape_cast %451 : vector<1x128xf32> to vector<1x1x128xf32>
    %453 = vector.broadcast %452 : vector<1x1x128xf32> to vector<1x32x128xf32>
    %454 = arith.subf %450, %453 : vector<1x32x128xf32>
    %455 = math.exp %454 : vector<1x32x128xf32>
    %cst_159 = arith.constant dense<0.000000e+00> : vector<1x128xf32>
    %456 = vector.multi_reduction <add>, %455, %cst_159 [1] : vector<1x32x128xf32> to vector<1x128xf32>
    %457 = vector.shape_cast %456 : vector<1x128xf32> to vector<1x1x128xf32>
    %458 = tpu.reciprocal %457 {approx = true} : vector<1x1x128xf32> -> vector<1x1x128xf32>
    %459 = vector.broadcast %458 : vector<1x1x128xf32> to vector<1x32x128xf32>
    %460 = arith.mulf %455, %459 : vector<1x32x128xf32>
    %461 = vector.shape_cast %460 : vector<1x32x128xf32> to vector<32x128xf32>
    %462 = arith.mulf %441, %461 : vector<32x128xf32>
    %463 = arith.addf %441, %462 : vector<32x128xf32>
    %c0_160 = arith.constant 0 : index
    %c0_161 = arith.constant 0 : index
    %c0_162 = arith.constant 0 : index
    %464 = vector.load %arg9[%c0_160, %c0_161, %c0_162] : memref<2x1x128xf32, #tpu.memory_space<vmem>>, vector<1x1x128xf32>
    %465 = vector.shape_cast %464 : vector<1x1x128xf32> to vector<1x128xf32>
    %c0_163 = arith.constant 0 : index
    %c0_164 = arith.constant 0 : index
    %c0_165 = arith.constant 0 : index
    %466 = vector.load %arg10[%c0_163, %c0_164, %c0_165] : memref<2x1x128xf32, #tpu.memory_space<vmem>>, vector<1x1x128xf32>
    %467 = vector.shape_cast %466 : vector<1x1x128xf32> to vector<1x128xf32>
    %468 = vector.broadcast %4 : vector<1x128xf32> to vector<32x128xf32>
    %469 = arith.mulf %463, %468 : vector<32x128xf32>
    %cst_166 = arith.constant dense<0.000000e+00> : vector<32xf32>
    %470 = vector.multi_reduction <add>, %469, %cst_166 [1] : vector<32x128xf32> to vector<32xf32>
    %471 = vector.shape_cast %470 : vector<32xf32> to vector<32x1xf32>
    %472 = vector.broadcast %6 : vector<1x128xf32> to vector<32x128xf32>
    %473 = arith.mulf %463, %472 : vector<32x128xf32>
    %cst_167 = arith.constant dense<0.000000e+00> : vector<32xf32>
    %474 = vector.multi_reduction <add>, %473, %cst_167 [1] : vector<32x128xf32> to vector<32xf32>
    %475 = vector.shape_cast %474 : vector<32xf32> to vector<32x1xf32>
    %476 = vector.broadcast %4 : vector<1x128xf32> to vector<32x128xf32>
    %477 = vector.broadcast %471 : vector<32x1xf32> to vector<32x128xf32>
    %478 = arith.mulf %476, %477 : vector<32x128xf32>
    %479 = vector.broadcast %6 : vector<1x128xf32> to vector<32x128xf32>
    %480 = vector.broadcast %475 : vector<32x1xf32> to vector<32x128xf32>
    %481 = arith.mulf %479, %480 : vector<32x128xf32>
    %482 = arith.addf %478, %481 : vector<32x128xf32>
    %cst_168 = arith.constant 1.562500e-02 : f32
    %483 = vector.broadcast %cst_168 : f32 to vector<32x128xf32>
    %484 = arith.mulf %482, %483 : vector<32x128xf32>
    %485 = arith.mulf %463, %463 : vector<32x128xf32>
    %486 = vector.broadcast %4 : vector<1x128xf32> to vector<32x128xf32>
    %487 = arith.mulf %485, %486 : vector<32x128xf32>
    %cst_169 = arith.constant dense<0.000000e+00> : vector<32xf32>
    %488 = vector.multi_reduction <add>, %487, %cst_169 [1] : vector<32x128xf32> to vector<32xf32>
    %489 = vector.shape_cast %488 : vector<32xf32> to vector<32x1xf32>
    %490 = vector.broadcast %6 : vector<1x128xf32> to vector<32x128xf32>
    %491 = arith.mulf %485, %490 : vector<32x128xf32>
    %cst_170 = arith.constant dense<0.000000e+00> : vector<32xf32>
    %492 = vector.multi_reduction <add>, %491, %cst_170 [1] : vector<32x128xf32> to vector<32xf32>
    %493 = vector.shape_cast %492 : vector<32xf32> to vector<32x1xf32>
    %494 = vector.broadcast %4 : vector<1x128xf32> to vector<32x128xf32>
    %495 = vector.broadcast %489 : vector<32x1xf32> to vector<32x128xf32>
    %496 = arith.mulf %494, %495 : vector<32x128xf32>
    %497 = vector.broadcast %6 : vector<1x128xf32> to vector<32x128xf32>
    %498 = vector.broadcast %493 : vector<32x1xf32> to vector<32x128xf32>
    %499 = arith.mulf %497, %498 : vector<32x128xf32>
    %500 = arith.addf %496, %499 : vector<32x128xf32>
    %cst_171 = arith.constant 1.562500e-02 : f32
    %501 = vector.broadcast %cst_171 : f32 to vector<32x128xf32>
    %502 = arith.mulf %500, %501 : vector<32x128xf32>
    %503 = arith.mulf %484, %484 : vector<32x128xf32>
    %504 = arith.subf %502, %503 : vector<32x128xf32>
    %505 = arith.subf %463, %484 : vector<32x128xf32>
    %cst_172 = arith.constant 9.99999974E-6 : f32
    %506 = vector.broadcast %cst_172 : f32 to vector<32x128xf32>
    %507 = arith.addf %504, %506 : vector<32x128xf32>
    %508 = math.rsqrt %507 : vector<32x128xf32>
    %509 = arith.mulf %505, %508 : vector<32x128xf32>
    %510 = vector.broadcast %465 : vector<1x128xf32> to vector<32x128xf32>
    %511 = arith.mulf %509, %510 : vector<32x128xf32>
    %512 = vector.broadcast %467 : vector<1x128xf32> to vector<32x128xf32>
    %513 = arith.addf %511, %512 : vector<32x128xf32>
    %c0_173 = arith.constant 0 : index
    %c0_174 = arith.constant 0 : index
    %c0_175 = arith.constant 0 : index
    %514 = vector.load %arg11[%c0_173, %c0_174, %c0_175] : memref<2x128x128xbf16, #tpu.memory_space<vmem>>, vector<1x128x128xbf16>
    %515 = vector.shape_cast %514 : vector<1x128x128xbf16> to vector<128x128xbf16>
    %c0_176 = arith.constant 0 : index
    %c0_177 = arith.constant 0 : index
    %c0_178 = arith.constant 0 : index
    %516 = vector.load %arg12[%c0_176, %c0_177, %c0_178] : memref<2x1x128xf32, #tpu.memory_space<vmem>>, vector<1x1x128xf32>
    %517 = vector.shape_cast %516 : vector<1x1x128xf32> to vector<1x128xf32>
    %518 = arith.truncf %513 : vector<32x128xf32> to vector<32x128xbf16>
    %cst_179 = arith.constant dense<0.000000e+00> : vector<32x128xf32>
    %519 = tpu.matmul %518, %515, %cst_179 {dimension_numbers = #tpu.dot_dimension_numbers<[1], [0], [0], [1], [0, 0, 1, 1], [], []>} : vector<32x128xbf16>, vector<128x128xbf16>, vector<32x128xf32> -> vector<32x128xf32>
    %520 = vector.broadcast %517 : vector<1x128xf32> to vector<32x128xf32>
    %521 = arith.addf %519, %520 : vector<32x128xf32>
    %cst_180 = arith.constant 5.000000e-01 : f32
    %522 = vector.broadcast %cst_180 : f32 to vector<32x128xf32>
    %523 = arith.mulf %522, %521 : vector<32x128xf32>
    %cst_181 = arith.constant 4.471500e-02 : f32
    %524 = vector.broadcast %cst_181 : f32 to vector<32x128xf32>
    %525 = arith.mulf %524, %521 : vector<32x128xf32>
    %526 = arith.mulf %525, %521 : vector<32x128xf32>
    %527 = arith.mulf %526, %521 : vector<32x128xf32>
    %528 = arith.addf %521, %527 : vector<32x128xf32>
    %cst_182 = arith.constant 0.797884583 : f32
    %529 = vector.broadcast %cst_182 : f32 to vector<32x128xf32>
    %530 = arith.mulf %529, %528 : vector<32x128xf32>
    %531 = math.tanh %530 : vector<32x128xf32>
    %cst_183 = arith.constant 1.000000e+00 : f32
    %532 = vector.broadcast %cst_183 : f32 to vector<32x128xf32>
    %533 = arith.addf %532, %531 : vector<32x128xf32>
    %534 = arith.mulf %523, %533 : vector<32x128xf32>
    %c0_184 = arith.constant 0 : index
    %c0_185 = arith.constant 0 : index
    %c0_186 = arith.constant 0 : index
    %535 = vector.load %arg13[%c0_184, %c0_185, %c0_186] : memref<2x128x128xbf16, #tpu.memory_space<vmem>>, vector<1x128x128xbf16>
    %536 = vector.shape_cast %535 : vector<1x128x128xbf16> to vector<128x128xbf16>
    %c0_187 = arith.constant 0 : index
    %c0_188 = arith.constant 0 : index
    %c0_189 = arith.constant 0 : index
    %537 = vector.load %arg14[%c0_187, %c0_188, %c0_189] : memref<2x1x128xf32, #tpu.memory_space<vmem>>, vector<1x1x128xf32>
    %538 = vector.shape_cast %537 : vector<1x1x128xf32> to vector<1x128xf32>
    %539 = arith.truncf %534 : vector<32x128xf32> to vector<32x128xbf16>
    %cst_190 = arith.constant dense<0.000000e+00> : vector<32x128xf32>
    %540 = tpu.matmul %539, %536, %cst_190 {dimension_numbers = #tpu.dot_dimension_numbers<[1], [0], [0], [1], [0, 0, 1, 1], [], []>} : vector<32x128xbf16>, vector<128x128xbf16>, vector<32x128xf32> -> vector<32x128xf32>
    %541 = vector.broadcast %538 : vector<1x128xf32> to vector<32x128xf32>
    %542 = arith.addf %540, %541 : vector<32x128xf32>
    %543 = arith.addf %513, %542 : vector<32x128xf32>
    %cst_191 = arith.constant 5.000000e-01 : f32
    %544 = vector.broadcast %cst_191 : f32 to vector<32x128xf32>
    %545 = arith.mulf %544, %543 : vector<32x128xf32>
    %cst_192 = arith.constant 4.471500e-02 : f32
    %546 = vector.broadcast %cst_192 : f32 to vector<32x128xf32>
    %547 = arith.mulf %546, %543 : vector<32x128xf32>
    %548 = arith.mulf %547, %543 : vector<32x128xf32>
    %549 = arith.mulf %548, %543 : vector<32x128xf32>
    %550 = arith.addf %543, %549 : vector<32x128xf32>
    %cst_193 = arith.constant 0.797884583 : f32
    %551 = vector.broadcast %cst_193 : f32 to vector<32x128xf32>
    %552 = arith.mulf %551, %550 : vector<32x128xf32>
    %553 = math.tanh %552 : vector<32x128xf32>
    %cst_194 = arith.constant 1.000000e+00 : f32
    %554 = vector.broadcast %cst_194 : f32 to vector<32x128xf32>
    %555 = arith.addf %554, %553 : vector<32x128xf32>
    %556 = arith.mulf %545, %555 : vector<32x128xf32>
    %c1_195 = arith.constant 1 : index
    %c0_196 = arith.constant 0 : index
    %c0_197 = arith.constant 0 : index
    %557 = vector.load %arg5[%c1_195, %c0_196, %c0_197] : memref<2x1x128xf32, #tpu.memory_space<vmem>>, vector<1x1x128xf32>
    %558 = vector.shape_cast %557 : vector<1x1x128xf32> to vector<1x128xf32>
    %c1_198 = arith.constant 1 : index
    %c0_199 = arith.constant 0 : index
    %c0_200 = arith.constant 0 : index
    %559 = vector.load %arg6[%c1_198, %c0_199, %c0_200] : memref<2x1x128xf32, #tpu.memory_space<vmem>>, vector<1x1x128xf32>
    %560 = vector.shape_cast %559 : vector<1x1x128xf32> to vector<1x128xf32>
    %561 = vector.broadcast %4 : vector<1x128xf32> to vector<32x128xf32>
    %562 = arith.mulf %556, %561 : vector<32x128xf32>
    %cst_201 = arith.constant dense<0.000000e+00> : vector<32xf32>
    %563 = vector.multi_reduction <add>, %562, %cst_201 [1] : vector<32x128xf32> to vector<32xf32>
    %564 = vector.shape_cast %563 : vector<32xf32> to vector<32x1xf32>
    %565 = vector.broadcast %6 : vector<1x128xf32> to vector<32x128xf32>
    %566 = arith.mulf %556, %565 : vector<32x128xf32>
    %cst_202 = arith.constant dense<0.000000e+00> : vector<32xf32>
    %567 = vector.multi_reduction <add>, %566, %cst_202 [1] : vector<32x128xf32> to vector<32xf32>
    %568 = vector.shape_cast %567 : vector<32xf32> to vector<32x1xf32>
    %569 = vector.broadcast %4 : vector<1x128xf32> to vector<32x128xf32>
    %570 = vector.broadcast %564 : vector<32x1xf32> to vector<32x128xf32>
    %571 = arith.mulf %569, %570 : vector<32x128xf32>
    %572 = vector.broadcast %6 : vector<1x128xf32> to vector<32x128xf32>
    %573 = vector.broadcast %568 : vector<32x1xf32> to vector<32x128xf32>
    %574 = arith.mulf %572, %573 : vector<32x128xf32>
    %575 = arith.addf %571, %574 : vector<32x128xf32>
    %cst_203 = arith.constant 1.562500e-02 : f32
    %576 = vector.broadcast %cst_203 : f32 to vector<32x128xf32>
    %577 = arith.mulf %575, %576 : vector<32x128xf32>
    %578 = arith.mulf %556, %556 : vector<32x128xf32>
    %579 = vector.broadcast %4 : vector<1x128xf32> to vector<32x128xf32>
    %580 = arith.mulf %578, %579 : vector<32x128xf32>
    %cst_204 = arith.constant dense<0.000000e+00> : vector<32xf32>
    %581 = vector.multi_reduction <add>, %580, %cst_204 [1] : vector<32x128xf32> to vector<32xf32>
    %582 = vector.shape_cast %581 : vector<32xf32> to vector<32x1xf32>
    %583 = vector.broadcast %6 : vector<1x128xf32> to vector<32x128xf32>
    %584 = arith.mulf %578, %583 : vector<32x128xf32>
    %cst_205 = arith.constant dense<0.000000e+00> : vector<32xf32>
    %585 = vector.multi_reduction <add>, %584, %cst_205 [1] : vector<32x128xf32> to vector<32xf32>
    %586 = vector.shape_cast %585 : vector<32xf32> to vector<32x1xf32>
    %587 = vector.broadcast %4 : vector<1x128xf32> to vector<32x128xf32>
    %588 = vector.broadcast %582 : vector<32x1xf32> to vector<32x128xf32>
    %589 = arith.mulf %587, %588 : vector<32x128xf32>
    %590 = vector.broadcast %6 : vector<1x128xf32> to vector<32x128xf32>
    %591 = vector.broadcast %586 : vector<32x1xf32> to vector<32x128xf32>
    %592 = arith.mulf %590, %591 : vector<32x128xf32>
    %593 = arith.addf %589, %592 : vector<32x128xf32>
    %cst_206 = arith.constant 1.562500e-02 : f32
    %594 = vector.broadcast %cst_206 : f32 to vector<32x128xf32>
    %595 = arith.mulf %593, %594 : vector<32x128xf32>
    %596 = arith.mulf %577, %577 : vector<32x128xf32>
    %597 = arith.subf %595, %596 : vector<32x128xf32>
    %598 = arith.subf %556, %577 : vector<32x128xf32>
    %cst_207 = arith.constant 9.99999974E-6 : f32
    %599 = vector.broadcast %cst_207 : f32 to vector<32x128xf32>
    %600 = arith.addf %597, %599 : vector<32x128xf32>
    %601 = math.rsqrt %600 : vector<32x128xf32>
    %602 = arith.mulf %598, %601 : vector<32x128xf32>
    %603 = vector.broadcast %558 : vector<1x128xf32> to vector<32x128xf32>
    %604 = arith.mulf %602, %603 : vector<32x128xf32>
    %605 = vector.broadcast %560 : vector<1x128xf32> to vector<32x128xf32>
    %606 = arith.addf %604, %605 : vector<32x128xf32>
    %c1_208 = arith.constant 1 : index
    %c0_209 = arith.constant 0 : index
    %c0_210 = arith.constant 0 : index
    %607 = vector.load %arg7[%c1_208, %c0_209, %c0_210] : memref<2x128x128xbf16, #tpu.memory_space<vmem>>, vector<1x128x128xbf16>
    %608 = vector.shape_cast %607 : vector<1x128x128xbf16> to vector<128x128xbf16>
    %c1_211 = arith.constant 1 : index
    %c0_212 = arith.constant 0 : index
    %c0_213 = arith.constant 0 : index
    %609 = vector.load %arg8[%c1_211, %c0_212, %c0_213] : memref<2x1x128xf32, #tpu.memory_space<vmem>>, vector<1x1x128xf32>
    %610 = vector.shape_cast %609 : vector<1x1x128xf32> to vector<1x128xf32>
    %611 = arith.truncf %606 : vector<32x128xf32> to vector<32x128xbf16>
    %cst_214 = arith.constant dense<0.000000e+00> : vector<32x128xf32>
    %612 = tpu.matmul %611, %608, %cst_214 {dimension_numbers = #tpu.dot_dimension_numbers<[1], [0], [0], [1], [0, 0, 1, 1], [], []>} : vector<32x128xbf16>, vector<128x128xbf16>, vector<32x128xf32> -> vector<32x128xf32>
    %613 = vector.broadcast %610 : vector<1x128xf32> to vector<32x128xf32>
    %614 = arith.addf %612, %613 : vector<32x128xf32>
    %615 = vector.shape_cast %614 : vector<32x128xf32> to vector<1x32x128xf32>
    %cst_215 = arith.constant dense<0xFF800000> : vector<1x128xf32>
    %616 = vector.multi_reduction <maximumf>, %615, %cst_215 [1] : vector<1x32x128xf32> to vector<1x128xf32>
    %617 = vector.shape_cast %616 : vector<1x128xf32> to vector<1x1x128xf32>
    %618 = vector.broadcast %617 : vector<1x1x128xf32> to vector<1x32x128xf32>
    %619 = arith.subf %615, %618 : vector<1x32x128xf32>
    %620 = math.exp %619 : vector<1x32x128xf32>
    %cst_216 = arith.constant dense<0.000000e+00> : vector<1x128xf32>
    %621 = vector.multi_reduction <add>, %620, %cst_216 [1] : vector<1x32x128xf32> to vector<1x128xf32>
    %622 = vector.shape_cast %621 : vector<1x128xf32> to vector<1x1x128xf32>
    %623 = tpu.reciprocal %622 {approx = true} : vector<1x1x128xf32> -> vector<1x1x128xf32>
    %624 = vector.broadcast %623 : vector<1x1x128xf32> to vector<1x32x128xf32>
    %625 = arith.mulf %620, %624 : vector<1x32x128xf32>
    %626 = vector.shape_cast %625 : vector<1x32x128xf32> to vector<32x128xf32>
    %627 = arith.mulf %606, %626 : vector<32x128xf32>
    %628 = arith.addf %606, %627 : vector<32x128xf32>
    %c1_217 = arith.constant 1 : index
    %c0_218 = arith.constant 0 : index
    %c0_219 = arith.constant 0 : index
    %629 = vector.load %arg9[%c1_217, %c0_218, %c0_219] : memref<2x1x128xf32, #tpu.memory_space<vmem>>, vector<1x1x128xf32>
    %630 = vector.shape_cast %629 : vector<1x1x128xf32> to vector<1x128xf32>
    %c1_220 = arith.constant 1 : index
    %c0_221 = arith.constant 0 : index
    %c0_222 = arith.constant 0 : index
    %631 = vector.load %arg10[%c1_220, %c0_221, %c0_222] : memref<2x1x128xf32, #tpu.memory_space<vmem>>, vector<1x1x128xf32>
    %632 = vector.shape_cast %631 : vector<1x1x128xf32> to vector<1x128xf32>
    %633 = vector.broadcast %4 : vector<1x128xf32> to vector<32x128xf32>
    %634 = arith.mulf %628, %633 : vector<32x128xf32>
    %cst_223 = arith.constant dense<0.000000e+00> : vector<32xf32>
    %635 = vector.multi_reduction <add>, %634, %cst_223 [1] : vector<32x128xf32> to vector<32xf32>
    %636 = vector.shape_cast %635 : vector<32xf32> to vector<32x1xf32>
    %637 = vector.broadcast %6 : vector<1x128xf32> to vector<32x128xf32>
    %638 = arith.mulf %628, %637 : vector<32x128xf32>
    %cst_224 = arith.constant dense<0.000000e+00> : vector<32xf32>
    %639 = vector.multi_reduction <add>, %638, %cst_224 [1] : vector<32x128xf32> to vector<32xf32>
    %640 = vector.shape_cast %639 : vector<32xf32> to vector<32x1xf32>
    %641 = vector.broadcast %4 : vector<1x128xf32> to vector<32x128xf32>
    %642 = vector.broadcast %636 : vector<32x1xf32> to vector<32x128xf32>
    %643 = arith.mulf %641, %642 : vector<32x128xf32>
    %644 = vector.broadcast %6 : vector<1x128xf32> to vector<32x128xf32>
    %645 = vector.broadcast %640 : vector<32x1xf32> to vector<32x128xf32>
    %646 = arith.mulf %644, %645 : vector<32x128xf32>
    %647 = arith.addf %643, %646 : vector<32x128xf32>
    %cst_225 = arith.constant 1.562500e-02 : f32
    %648 = vector.broadcast %cst_225 : f32 to vector<32x128xf32>
    %649 = arith.mulf %647, %648 : vector<32x128xf32>
    %650 = arith.mulf %628, %628 : vector<32x128xf32>
    %651 = vector.broadcast %4 : vector<1x128xf32> to vector<32x128xf32>
    %652 = arith.mulf %650, %651 : vector<32x128xf32>
    %cst_226 = arith.constant dense<0.000000e+00> : vector<32xf32>
    %653 = vector.multi_reduction <add>, %652, %cst_226 [1] : vector<32x128xf32> to vector<32xf32>
    %654 = vector.shape_cast %653 : vector<32xf32> to vector<32x1xf32>
    %655 = vector.broadcast %6 : vector<1x128xf32> to vector<32x128xf32>
    %656 = arith.mulf %650, %655 : vector<32x128xf32>
    %cst_227 = arith.constant dense<0.000000e+00> : vector<32xf32>
    %657 = vector.multi_reduction <add>, %656, %cst_227 [1] : vector<32x128xf32> to vector<32xf32>
    %658 = vector.shape_cast %657 : vector<32xf32> to vector<32x1xf32>
    %659 = vector.broadcast %4 : vector<1x128xf32> to vector<32x128xf32>
    %660 = vector.broadcast %654 : vector<32x1xf32> to vector<32x128xf32>
    %661 = arith.mulf %659, %660 : vector<32x128xf32>
    %662 = vector.broadcast %6 : vector<1x128xf32> to vector<32x128xf32>
    %663 = vector.broadcast %658 : vector<32x1xf32> to vector<32x128xf32>
    %664 = arith.mulf %662, %663 : vector<32x128xf32>
    %665 = arith.addf %661, %664 : vector<32x128xf32>
    %cst_228 = arith.constant 1.562500e-02 : f32
    %666 = vector.broadcast %cst_228 : f32 to vector<32x128xf32>
    %667 = arith.mulf %665, %666 : vector<32x128xf32>
    %668 = arith.mulf %649, %649 : vector<32x128xf32>
    %669 = arith.subf %667, %668 : vector<32x128xf32>
    %670 = arith.subf %628, %649 : vector<32x128xf32>
    %cst_229 = arith.constant 9.99999974E-6 : f32
    %671 = vector.broadcast %cst_229 : f32 to vector<32x128xf32>
    %672 = arith.addf %669, %671 : vector<32x128xf32>
    %673 = math.rsqrt %672 : vector<32x128xf32>
    %674 = arith.mulf %670, %673 : vector<32x128xf32>
    %675 = vector.broadcast %630 : vector<1x128xf32> to vector<32x128xf32>
    %676 = arith.mulf %674, %675 : vector<32x128xf32>
    %677 = vector.broadcast %632 : vector<1x128xf32> to vector<32x128xf32>
    %678 = arith.addf %676, %677 : vector<32x128xf32>
    %c1_230 = arith.constant 1 : index
    %c0_231 = arith.constant 0 : index
    %c0_232 = arith.constant 0 : index
    %679 = vector.load %arg11[%c1_230, %c0_231, %c0_232] : memref<2x128x128xbf16, #tpu.memory_space<vmem>>, vector<1x128x128xbf16>
    %680 = vector.shape_cast %679 : vector<1x128x128xbf16> to vector<128x128xbf16>
    %c1_233 = arith.constant 1 : index
    %c0_234 = arith.constant 0 : index
    %c0_235 = arith.constant 0 : index
    %681 = vector.load %arg12[%c1_233, %c0_234, %c0_235] : memref<2x1x128xf32, #tpu.memory_space<vmem>>, vector<1x1x128xf32>
    %682 = vector.shape_cast %681 : vector<1x1x128xf32> to vector<1x128xf32>
    %683 = arith.truncf %678 : vector<32x128xf32> to vector<32x128xbf16>
    %cst_236 = arith.constant dense<0.000000e+00> : vector<32x128xf32>
    %684 = tpu.matmul %683, %680, %cst_236 {dimension_numbers = #tpu.dot_dimension_numbers<[1], [0], [0], [1], [0, 0, 1, 1], [], []>} : vector<32x128xbf16>, vector<128x128xbf16>, vector<32x128xf32> -> vector<32x128xf32>
    %685 = vector.broadcast %682 : vector<1x128xf32> to vector<32x128xf32>
    %686 = arith.addf %684, %685 : vector<32x128xf32>
    %cst_237 = arith.constant 5.000000e-01 : f32
    %687 = vector.broadcast %cst_237 : f32 to vector<32x128xf32>
    %688 = arith.mulf %687, %686 : vector<32x128xf32>
    %cst_238 = arith.constant 4.471500e-02 : f32
    %689 = vector.broadcast %cst_238 : f32 to vector<32x128xf32>
    %690 = arith.mulf %689, %686 : vector<32x128xf32>
    %691 = arith.mulf %690, %686 : vector<32x128xf32>
    %692 = arith.mulf %691, %686 : vector<32x128xf32>
    %693 = arith.addf %686, %692 : vector<32x128xf32>
    %cst_239 = arith.constant 0.797884583 : f32
    %694 = vector.broadcast %cst_239 : f32 to vector<32x128xf32>
    %695 = arith.mulf %694, %693 : vector<32x128xf32>
    %696 = math.tanh %695 : vector<32x128xf32>
    %cst_240 = arith.constant 1.000000e+00 : f32
    %697 = vector.broadcast %cst_240 : f32 to vector<32x128xf32>
    %698 = arith.addf %697, %696 : vector<32x128xf32>
    %699 = arith.mulf %688, %698 : vector<32x128xf32>
    %c1_241 = arith.constant 1 : index
    %c0_242 = arith.constant 0 : index
    %c0_243 = arith.constant 0 : index
    %700 = vector.load %arg13[%c1_241, %c0_242, %c0_243] : memref<2x128x128xbf16, #tpu.memory_space<vmem>>, vector<1x128x128xbf16>
    %701 = vector.shape_cast %700 : vector<1x128x128xbf16> to vector<128x128xbf16>
    %c1_244 = arith.constant 1 : index
    %c0_245 = arith.constant 0 : index
    %c0_246 = arith.constant 0 : index
    %702 = vector.load %arg14[%c1_244, %c0_245, %c0_246] : memref<2x1x128xf32, #tpu.memory_space<vmem>>, vector<1x1x128xf32>
    %703 = vector.shape_cast %702 : vector<1x1x128xf32> to vector<1x128xf32>
    %704 = arith.truncf %699 : vector<32x128xf32> to vector<32x128xbf16>
    %cst_247 = arith.constant dense<0.000000e+00> : vector<32x128xf32>
    %705 = tpu.matmul %704, %701, %cst_247 {dimension_numbers = #tpu.dot_dimension_numbers<[1], [0], [0], [1], [0, 0, 1, 1], [], []>} : vector<32x128xbf16>, vector<128x128xbf16>, vector<32x128xf32> -> vector<32x128xf32>
    %706 = vector.broadcast %703 : vector<1x128xf32> to vector<32x128xf32>
    %707 = arith.addf %705, %706 : vector<32x128xf32>
    %708 = arith.addf %678, %707 : vector<32x128xf32>
    %cst_248 = arith.constant 5.000000e-01 : f32
    %709 = vector.broadcast %cst_248 : f32 to vector<32x128xf32>
    %710 = arith.mulf %709, %708 : vector<32x128xf32>
    %cst_249 = arith.constant 4.471500e-02 : f32
    %711 = vector.broadcast %cst_249 : f32 to vector<32x128xf32>
    %712 = arith.mulf %711, %708 : vector<32x128xf32>
    %713 = arith.mulf %712, %708 : vector<32x128xf32>
    %714 = arith.mulf %713, %708 : vector<32x128xf32>
    %715 = arith.addf %708, %714 : vector<32x128xf32>
    %cst_250 = arith.constant 0.797884583 : f32
    %716 = vector.broadcast %cst_250 : f32 to vector<32x128xf32>
    %717 = arith.mulf %716, %715 : vector<32x128xf32>
    %718 = math.tanh %717 : vector<32x128xf32>
    %cst_251 = arith.constant 1.000000e+00 : f32
    %719 = vector.broadcast %cst_251 : f32 to vector<32x128xf32>
    %720 = arith.addf %719, %718 : vector<32x128xf32>
    %721 = arith.mulf %710, %720 : vector<32x128xf32>
    %c0_252 = arith.constant 0 : index
    %c0_253 = arith.constant 0 : index
    %722 = vector.load %arg15[%c0_252, %c0_253] : memref<128x128xbf16, #tpu.memory_space<vmem>>, vector<128x128xbf16>
    %c0_254 = arith.constant 0 : index
    %c0_255 = arith.constant 0 : index
    %723 = vector.load %arg16[%c0_254, %c0_255] : memref<1x128xf32, #tpu.memory_space<vmem>>, vector<1x128xf32>
    %724 = arith.truncf %721 : vector<32x128xf32> to vector<32x128xbf16>
    %cst_256 = arith.constant dense<0.000000e+00> : vector<32x128xf32>
    %725 = tpu.matmul %724, %722, %cst_256 {dimension_numbers = #tpu.dot_dimension_numbers<[1], [0], [0], [1], [0, 0, 1, 1], [], []>} : vector<32x128xbf16>, vector<128x128xbf16>, vector<32x128xf32> -> vector<32x128xf32>
    %726 = vector.broadcast %723 : vector<1x128xf32> to vector<32x128xf32>
    %727 = arith.addf %725, %726 : vector<32x128xf32>
    %cst_257 = arith.constant 5.000000e-01 : f32
    %728 = vector.broadcast %cst_257 : f32 to vector<32x128xf32>
    %729 = arith.mulf %728, %727 : vector<32x128xf32>
    %cst_258 = arith.constant 4.471500e-02 : f32
    %730 = vector.broadcast %cst_258 : f32 to vector<32x128xf32>
    %731 = arith.mulf %730, %727 : vector<32x128xf32>
    %732 = arith.mulf %731, %727 : vector<32x128xf32>
    %733 = arith.mulf %732, %727 : vector<32x128xf32>
    %734 = arith.addf %727, %733 : vector<32x128xf32>
    %cst_259 = arith.constant 0.797884583 : f32
    %735 = vector.broadcast %cst_259 : f32 to vector<32x128xf32>
    %736 = arith.mulf %735, %734 : vector<32x128xf32>
    %737 = math.tanh %736 : vector<32x128xf32>
    %cst_260 = arith.constant 1.000000e+00 : f32
    %738 = vector.broadcast %cst_260 : f32 to vector<32x128xf32>
    %739 = arith.addf %738, %737 : vector<32x128xf32>
    %740 = arith.mulf %729, %739 : vector<32x128xf32>
    %c0_261 = arith.constant 0 : index
    %c0_262 = arith.constant 0 : index
    %741 = vector.load %arg17[%c0_261, %c0_262] : memref<128x128xbf16, #tpu.memory_space<vmem>>, vector<128x128xbf16>
    %c0_263 = arith.constant 0 : index
    %c0_264 = arith.constant 0 : index
    %742 = vector.load %arg18[%c0_263, %c0_264] : memref<1x128xf32, #tpu.memory_space<vmem>>, vector<1x128xf32>
    %743 = arith.truncf %740 : vector<32x128xf32> to vector<32x128xbf16>
    %cst_265 = arith.constant dense<0.000000e+00> : vector<32x128xf32>
    %744 = tpu.matmul %743, %741, %cst_265 {dimension_numbers = #tpu.dot_dimension_numbers<[1], [0], [0], [1], [0, 0, 1, 1], [], []>} : vector<32x128xbf16>, vector<128x128xbf16>, vector<32x128xf32> -> vector<32x128xf32>
    %745 = vector.broadcast %742 : vector<1x128xf32> to vector<32x128xf32>
    %746 = arith.addf %744, %745 : vector<32x128xf32>
    %747 = arith.truncf %746 : vector<32x128xf32> to vector<32x128xbf16>
    %748 = vector.shape_cast %747 : vector<32x128xbf16> to vector<1x1x32x128xbf16>
    %c0_266 = arith.constant 0 : index
    %c1_267 = arith.constant 1 : index
    %c0_268 = arith.constant 0 : index
    %c0_269 = arith.constant 0 : index
    %749 = vector.load %arg19[%c0_266, %c1_267, %c0_268, %c0_269] : memref<1x3x32x128xbf16, #tpu.memory_space<vmem>>, vector<1x1x32x128xbf16>
    tpu.vector_store %arg19[%c0_266, %c1_267, %c0_268, %c0_269], %748 {strides = array<i32>} : memref<1x3x32x128xbf16, #tpu.memory_space<vmem>>, vector<1x1x32x128xbf16>,
    %750 = arith.addf %740, %32 : vector<32x128xf32>
    %c0_270 = arith.constant 0 : index
    %c0_271 = arith.constant 0 : index
    %c0_272 = arith.constant 0 : index
    %751 = vector.load %arg5[%c0_270, %c0_271, %c0_272] : memref<2x1x128xf32, #tpu.memory_space<vmem>>, vector<1x1x128xf32>
    %752 = vector.shape_cast %751 : vector<1x1x128xf32> to vector<1x128xf32>
    %c0_273 = arith.constant 0 : index
    %c0_274 = arith.constant 0 : index
    %c0_275 = arith.constant 0 : index
    %753 = vector.load %arg6[%c0_273, %c0_274, %c0_275] : memref<2x1x128xf32, #tpu.memory_space<vmem>>, vector<1x1x128xf32>
    %754 = vector.shape_cast %753 : vector<1x1x128xf32> to vector<1x128xf32>
    %755 = vector.broadcast %4 : vector<1x128xf32> to vector<32x128xf32>
    %756 = arith.mulf %750, %755 : vector<32x128xf32>
    %cst_276 = arith.constant dense<0.000000e+00> : vector<32xf32>
    %757 = vector.multi_reduction <add>, %756, %cst_276 [1] : vector<32x128xf32> to vector<32xf32>
    %758 = vector.shape_cast %757 : vector<32xf32> to vector<32x1xf32>
    %759 = vector.broadcast %6 : vector<1x128xf32> to vector<32x128xf32>
    %760 = arith.mulf %750, %759 : vector<32x128xf32>
    %cst_277 = arith.constant dense<0.000000e+00> : vector<32xf32>
    %761 = vector.multi_reduction <add>, %760, %cst_277 [1] : vector<32x128xf32> to vector<32xf32>
    %762 = vector.shape_cast %761 : vector<32xf32> to vector<32x1xf32>
    %763 = vector.broadcast %4 : vector<1x128xf32> to vector<32x128xf32>
    %764 = vector.broadcast %758 : vector<32x1xf32> to vector<32x128xf32>
    %765 = arith.mulf %763, %764 : vector<32x128xf32>
    %766 = vector.broadcast %6 : vector<1x128xf32> to vector<32x128xf32>
    %767 = vector.broadcast %762 : vector<32x1xf32> to vector<32x128xf32>
    %768 = arith.mulf %766, %767 : vector<32x128xf32>
    %769 = arith.addf %765, %768 : vector<32x128xf32>
    %cst_278 = arith.constant 1.562500e-02 : f32
    %770 = vector.broadcast %cst_278 : f32 to vector<32x128xf32>
    %771 = arith.mulf %769, %770 : vector<32x128xf32>
    %772 = arith.mulf %750, %750 : vector<32x128xf32>
    %773 = vector.broadcast %4 : vector<1x128xf32> to vector<32x128xf32>
    %774 = arith.mulf %772, %773 : vector<32x128xf32>
    %cst_279 = arith.constant dense<0.000000e+00> : vector<32xf32>
    %775 = vector.multi_reduction <add>, %774, %cst_279 [1] : vector<32x128xf32> to vector<32xf32>
    %776 = vector.shape_cast %775 : vector<32xf32> to vector<32x1xf32>
    %777 = vector.broadcast %6 : vector<1x128xf32> to vector<32x128xf32>
    %778 = arith.mulf %772, %777 : vector<32x128xf32>
    %cst_280 = arith.constant dense<0.000000e+00> : vector<32xf32>
    %779 = vector.multi_reduction <add>, %778, %cst_280 [1] : vector<32x128xf32> to vector<32xf32>
    %780 = vector.shape_cast %779 : vector<32xf32> to vector<32x1xf32>
    %781 = vector.broadcast %4 : vector<1x128xf32> to vector<32x128xf32>
    %782 = vector.broadcast %776 : vector<32x1xf32> to vector<32x128xf32>
    %783 = arith.mulf %781, %782 : vector<32x128xf32>
    %784 = vector.broadcast %6 : vector<1x128xf32> to vector<32x128xf32>
    %785 = vector.broadcast %780 : vector<32x1xf32> to vector<32x128xf32>
    %786 = arith.mulf %784, %785 : vector<32x128xf32>
    %787 = arith.addf %783, %786 : vector<32x128xf32>
    %cst_281 = arith.constant 1.562500e-02 : f32
    %788 = vector.broadcast %cst_281 : f32 to vector<32x128xf32>
    %789 = arith.mulf %787, %788 : vector<32x128xf32>
    %790 = arith.mulf %771, %771 : vector<32x128xf32>
    %791 = arith.subf %789, %790 : vector<32x128xf32>
    %792 = arith.subf %750, %771 : vector<32x128xf32>
    %cst_282 = arith.constant 9.99999974E-6 : f32
    %793 = vector.broadcast %cst_282 : f32 to vector<32x128xf32>
    %794 = arith.addf %791, %793 : vector<32x128xf32>
    %795 = math.rsqrt %794 : vector<32x128xf32>
    %796 = arith.mulf %792, %795 : vector<32x128xf32>
    %797 = vector.broadcast %752 : vector<1x128xf32> to vector<32x128xf32>
    %798 = arith.mulf %796, %797 : vector<32x128xf32>
    %799 = vector.broadcast %754 : vector<1x128xf32> to vector<32x128xf32>
    %800 = arith.addf %798, %799 : vector<32x128xf32>
    %c0_283 = arith.constant 0 : index
    %c0_284 = arith.constant 0 : index
    %c0_285 = arith.constant 0 : index
    %801 = vector.load %arg7[%c0_283, %c0_284, %c0_285] : memref<2x128x128xbf16, #tpu.memory_space<vmem>>, vector<1x128x128xbf16>
    %802 = vector.shape_cast %801 : vector<1x128x128xbf16> to vector<128x128xbf16>
    %c0_286 = arith.constant 0 : index
    %c0_287 = arith.constant 0 : index
    %c0_288 = arith.constant 0 : index
    %803 = vector.load %arg8[%c0_286, %c0_287, %c0_288] : memref<2x1x128xf32, #tpu.memory_space<vmem>>, vector<1x1x128xf32>
    %804 = vector.shape_cast %803 : vector<1x1x128xf32> to vector<1x128xf32>
    %805 = arith.truncf %800 : vector<32x128xf32> to vector<32x128xbf16>
    %cst_289 = arith.constant dense<0.000000e+00> : vector<32x128xf32>
    %806 = tpu.matmul %805, %802, %cst_289 {dimension_numbers = #tpu.dot_dimension_numbers<[1], [0], [0], [1], [0, 0, 1, 1], [], []>} : vector<32x128xbf16>, vector<128x128xbf16>, vector<32x128xf32> -> vector<32x128xf32>
    %807 = vector.broadcast %804 : vector<1x128xf32> to vector<32x128xf32>
    %808 = arith.addf %806, %807 : vector<32x128xf32>
    %809 = vector.shape_cast %808 : vector<32x128xf32> to vector<1x32x128xf32>
    %cst_290 = arith.constant dense<0xFF800000> : vector<1x128xf32>
    %810 = vector.multi_reduction <maximumf>, %809, %cst_290 [1] : vector<1x32x128xf32> to vector<1x128xf32>
    %811 = vector.shape_cast %810 : vector<1x128xf32> to vector<1x1x128xf32>
    %812 = vector.broadcast %811 : vector<1x1x128xf32> to vector<1x32x128xf32>
    %813 = arith.subf %809, %812 : vector<1x32x128xf32>
    %814 = math.exp %813 : vector<1x32x128xf32>
    %cst_291 = arith.constant dense<0.000000e+00> : vector<1x128xf32>
    %815 = vector.multi_reduction <add>, %814, %cst_291 [1] : vector<1x32x128xf32> to vector<1x128xf32>
    %816 = vector.shape_cast %815 : vector<1x128xf32> to vector<1x1x128xf32>
    %817 = tpu.reciprocal %816 {approx = true} : vector<1x1x128xf32> -> vector<1x1x128xf32>
    %818 = vector.broadcast %817 : vector<1x1x128xf32> to vector<1x32x128xf32>
    %819 = arith.mulf %814, %818 : vector<1x32x128xf32>
    %820 = vector.shape_cast %819 : vector<1x32x128xf32> to vector<32x128xf32>
    %821 = arith.mulf %800, %820 : vector<32x128xf32>
    %822 = arith.addf %800, %821 : vector<32x128xf32>
    %c0_292 = arith.constant 0 : index
    %c0_293 = arith.constant 0 : index
    %c0_294 = arith.constant 0 : index
    %823 = vector.load %arg9[%c0_292, %c0_293, %c0_294] : memref<2x1x128xf32, #tpu.memory_space<vmem>>, vector<1x1x128xf32>
    %824 = vector.shape_cast %823 : vector<1x1x128xf32> to vector<1x128xf32>
    %c0_295 = arith.constant 0 : index
    %c0_296 = arith.constant 0 : index
    %c0_297 = arith.constant 0 : index
    %825 = vector.load %arg10[%c0_295, %c0_296, %c0_297] : memref<2x1x128xf32, #tpu.memory_space<vmem>>, vector<1x1x128xf32>
    %826 = vector.shape_cast %825 : vector<1x1x128xf32> to vector<1x128xf32>
    %827 = vector.broadcast %4 : vector<1x128xf32> to vector<32x128xf32>
    %828 = arith.mulf %822, %827 : vector<32x128xf32>
    %cst_298 = arith.constant dense<0.000000e+00> : vector<32xf32>
    %829 = vector.multi_reduction <add>, %828, %cst_298 [1] : vector<32x128xf32> to vector<32xf32>
    %830 = vector.shape_cast %829 : vector<32xf32> to vector<32x1xf32>
    %831 = vector.broadcast %6 : vector<1x128xf32> to vector<32x128xf32>
    %832 = arith.mulf %822, %831 : vector<32x128xf32>
    %cst_299 = arith.constant dense<0.000000e+00> : vector<32xf32>
    %833 = vector.multi_reduction <add>, %832, %cst_299 [1] : vector<32x128xf32> to vector<32xf32>
    %834 = vector.shape_cast %833 : vector<32xf32> to vector<32x1xf32>
    %835 = vector.broadcast %4 : vector<1x128xf32> to vector<32x128xf32>
    %836 = vector.broadcast %830 : vector<32x1xf32> to vector<32x128xf32>
    %837 = arith.mulf %835, %836 : vector<32x128xf32>
    %838 = vector.broadcast %6 : vector<1x128xf32> to vector<32x128xf32>
    %839 = vector.broadcast %834 : vector<32x1xf32> to vector<32x128xf32>
    %840 = arith.mulf %838, %839 : vector<32x128xf32>
    %841 = arith.addf %837, %840 : vector<32x128xf32>
    %cst_300 = arith.constant 1.562500e-02 : f32
    %842 = vector.broadcast %cst_300 : f32 to vector<32x128xf32>
    %843 = arith.mulf %841, %842 : vector<32x128xf32>
    %844 = arith.mulf %822, %822 : vector<32x128xf32>
    %845 = vector.broadcast %4 : vector<1x128xf32> to vector<32x128xf32>
    %846 = arith.mulf %844, %845 : vector<32x128xf32>
    %cst_301 = arith.constant dense<0.000000e+00> : vector<32xf32>
    %847 = vector.multi_reduction <add>, %846, %cst_301 [1] : vector<32x128xf32> to vector<32xf32>
    %848 = vector.shape_cast %847 : vector<32xf32> to vector<32x1xf32>
    %849 = vector.broadcast %6 : vector<1x128xf32> to vector<32x128xf32>
    %850 = arith.mulf %844, %849 : vector<32x128xf32>
    %cst_302 = arith.constant dense<0.000000e+00> : vector<32xf32>
    %851 = vector.multi_reduction <add>, %850, %cst_302 [1] : vector<32x128xf32> to vector<32xf32>
    %852 = vector.shape_cast %851 : vector<32xf32> to vector<32x1xf32>
    %853 = vector.broadcast %4 : vector<1x128xf32> to vector<32x128xf32>
    %854 = vector.broadcast %848 : vector<32x1xf32> to vector<32x128xf32>
    %855 = arith.mulf %853, %854 : vector<32x128xf32>
    %856 = vector.broadcast %6 : vector<1x128xf32> to vector<32x128xf32>
    %857 = vector.broadcast %852 : vector<32x1xf32> to vector<32x128xf32>
    %858 = arith.mulf %856, %857 : vector<32x128xf32>
    %859 = arith.addf %855, %858 : vector<32x128xf32>
    %cst_303 = arith.constant 1.562500e-02 : f32
    %860 = vector.broadcast %cst_303 : f32 to vector<32x128xf32>
    %861 = arith.mulf %859, %860 : vector<32x128xf32>
    %862 = arith.mulf %843, %843 : vector<32x128xf32>
    %863 = arith.subf %861, %862 : vector<32x128xf32>
    %864 = arith.subf %822, %843 : vector<32x128xf32>
    %cst_304 = arith.constant 9.99999974E-6 : f32
    %865 = vector.broadcast %cst_304 : f32 to vector<32x128xf32>
    %866 = arith.addf %863, %865 : vector<32x128xf32>
    %867 = math.rsqrt %866 : vector<32x128xf32>
    %868 = arith.mulf %864, %867 : vector<32x128xf32>
    %869 = vector.broadcast %824 : vector<1x128xf32> to vector<32x128xf32>
    %870 = arith.mulf %868, %869 : vector<32x128xf32>
    %871 = vector.broadcast %826 : vector<1x128xf32> to vector<32x128xf32>
    %872 = arith.addf %870, %871 : vector<32x128xf32>
    %c0_305 = arith.constant 0 : index
    %c0_306 = arith.constant 0 : index
    %c0_307 = arith.constant 0 : index
    %873 = vector.load %arg11[%c0_305, %c0_306, %c0_307] : memref<2x128x128xbf16, #tpu.memory_space<vmem>>, vector<1x128x128xbf16>
    %874 = vector.shape_cast %873 : vector<1x128x128xbf16> to vector<128x128xbf16>
    %c0_308 = arith.constant 0 : index
    %c0_309 = arith.constant 0 : index
    %c0_310 = arith.constant 0 : index
    %875 = vector.load %arg12[%c0_308, %c0_309, %c0_310] : memref<2x1x128xf32, #tpu.memory_space<vmem>>, vector<1x1x128xf32>
    %876 = vector.shape_cast %875 : vector<1x1x128xf32> to vector<1x128xf32>
    %877 = arith.truncf %872 : vector<32x128xf32> to vector<32x128xbf16>
    %cst_311 = arith.constant dense<0.000000e+00> : vector<32x128xf32>
    %878 = tpu.matmul %877, %874, %cst_311 {dimension_numbers = #tpu.dot_dimension_numbers<[1], [0], [0], [1], [0, 0, 1, 1], [], []>} : vector<32x128xbf16>, vector<128x128xbf16>, vector<32x128xf32> -> vector<32x128xf32>
    %879 = vector.broadcast %876 : vector<1x128xf32> to vector<32x128xf32>
    %880 = arith.addf %878, %879 : vector<32x128xf32>
    %cst_312 = arith.constant 5.000000e-01 : f32
    %881 = vector.broadcast %cst_312 : f32 to vector<32x128xf32>
    %882 = arith.mulf %881, %880 : vector<32x128xf32>
    %cst_313 = arith.constant 4.471500e-02 : f32
    %883 = vector.broadcast %cst_313 : f32 to vector<32x128xf32>
    %884 = arith.mulf %883, %880 : vector<32x128xf32>
    %885 = arith.mulf %884, %880 : vector<32x128xf32>
    %886 = arith.mulf %885, %880 : vector<32x128xf32>
    %887 = arith.addf %880, %886 : vector<32x128xf32>
    %cst_314 = arith.constant 0.797884583 : f32
    %888 = vector.broadcast %cst_314 : f32 to vector<32x128xf32>
    %889 = arith.mulf %888, %887 : vector<32x128xf32>
    %890 = math.tanh %889 : vector<32x128xf32>
    %cst_315 = arith.constant 1.000000e+00 : f32
    %891 = vector.broadcast %cst_315 : f32 to vector<32x128xf32>
    %892 = arith.addf %891, %890 : vector<32x128xf32>
    %893 = arith.mulf %882, %892 : vector<32x128xf32>
    %c0_316 = arith.constant 0 : index
    %c0_317 = arith.constant 0 : index
    %c0_318 = arith.constant 0 : index
    %894 = vector.load %arg13[%c0_316, %c0_317, %c0_318] : memref<2x128x128xbf16, #tpu.memory_space<vmem>>, vector<1x128x128xbf16>
    %895 = vector.shape_cast %894 : vector<1x128x128xbf16> to vector<128x128xbf16>
    %c0_319 = arith.constant 0 : index
    %c0_320 = arith.constant 0 : index
    %c0_321 = arith.constant 0 : index
    %896 = vector.load %arg14[%c0_319, %c0_320, %c0_321] : memref<2x1x128xf32, #tpu.memory_space<vmem>>, vector<1x1x128xf32>
    %897 = vector.shape_cast %896 : vector<1x1x128xf32> to vector<1x128xf32>
    %898 = arith.truncf %893 : vector<32x128xf32> to vector<32x128xbf16>
    %cst_322 = arith.constant dense<0.000000e+00> : vector<32x128xf32>
    %899 = tpu.matmul %898, %895, %cst_322 {dimension_numbers = #tpu.dot_dimension_numbers<[1], [0], [0], [1], [0, 0, 1, 1], [], []>} : vector<32x128xbf16>, vector<128x128xbf16>, vector<32x128xf32> -> vector<32x128xf32>
    %900 = vector.broadcast %897 : vector<1x128xf32> to vector<32x128xf32>
    %901 = arith.addf %899, %900 : vector<32x128xf32>
    %902 = arith.addf %872, %901 : vector<32x128xf32>
    %cst_323 = arith.constant 5.000000e-01 : f32
    %903 = vector.broadcast %cst_323 : f32 to vector<32x128xf32>
    %904 = arith.mulf %903, %902 : vector<32x128xf32>
    %cst_324 = arith.constant 4.471500e-02 : f32
    %905 = vector.broadcast %cst_324 : f32 to vector<32x128xf32>
    %906 = arith.mulf %905, %902 : vector<32x128xf32>
    %907 = arith.mulf %906, %902 : vector<32x128xf32>
    %908 = arith.mulf %907, %902 : vector<32x128xf32>
    %909 = arith.addf %902, %908 : vector<32x128xf32>
    %cst_325 = arith.constant 0.797884583 : f32
    %910 = vector.broadcast %cst_325 : f32 to vector<32x128xf32>
    %911 = arith.mulf %910, %909 : vector<32x128xf32>
    %912 = math.tanh %911 : vector<32x128xf32>
    %cst_326 = arith.constant 1.000000e+00 : f32
    %913 = vector.broadcast %cst_326 : f32 to vector<32x128xf32>
    %914 = arith.addf %913, %912 : vector<32x128xf32>
    %915 = arith.mulf %904, %914 : vector<32x128xf32>
    %c1_327 = arith.constant 1 : index
    %c0_328 = arith.constant 0 : index
    %c0_329 = arith.constant 0 : index
    %916 = vector.load %arg5[%c1_327, %c0_328, %c0_329] : memref<2x1x128xf32, #tpu.memory_space<vmem>>, vector<1x1x128xf32>
    %917 = vector.shape_cast %916 : vector<1x1x128xf32> to vector<1x128xf32>
    %c1_330 = arith.constant 1 : index
    %c0_331 = arith.constant 0 : index
    %c0_332 = arith.constant 0 : index
    %918 = vector.load %arg6[%c1_330, %c0_331, %c0_332] : memref<2x1x128xf32, #tpu.memory_space<vmem>>, vector<1x1x128xf32>
    %919 = vector.shape_cast %918 : vector<1x1x128xf32> to vector<1x128xf32>
    %920 = vector.broadcast %4 : vector<1x128xf32> to vector<32x128xf32>
    %921 = arith.mulf %915, %920 : vector<32x128xf32>
    %cst_333 = arith.constant dense<0.000000e+00> : vector<32xf32>
    %922 = vector.multi_reduction <add>, %921, %cst_333 [1] : vector<32x128xf32> to vector<32xf32>
    %923 = vector.shape_cast %922 : vector<32xf32> to vector<32x1xf32>
    %924 = vector.broadcast %6 : vector<1x128xf32> to vector<32x128xf32>
    %925 = arith.mulf %915, %924 : vector<32x128xf32>
    %cst_334 = arith.constant dense<0.000000e+00> : vector<32xf32>
    %926 = vector.multi_reduction <add>, %925, %cst_334 [1] : vector<32x128xf32> to vector<32xf32>
    %927 = vector.shape_cast %926 : vector<32xf32> to vector<32x1xf32>
    %928 = vector.broadcast %4 : vector<1x128xf32> to vector<32x128xf32>
    %929 = vector.broadcast %923 : vector<32x1xf32> to vector<32x128xf32>
    %930 = arith.mulf %928, %929 : vector<32x128xf32>
    %931 = vector.broadcast %6 : vector<1x128xf32> to vector<32x128xf32>
    %932 = vector.broadcast %927 : vector<32x1xf32> to vector<32x128xf32>
    %933 = arith.mulf %931, %932 : vector<32x128xf32>
    %934 = arith.addf %930, %933 : vector<32x128xf32>
    %cst_335 = arith.constant 1.562500e-02 : f32
    %935 = vector.broadcast %cst_335 : f32 to vector<32x128xf32>
    %936 = arith.mulf %934, %935 : vector<32x128xf32>
    %937 = arith.mulf %915, %915 : vector<32x128xf32>
    %938 = vector.broadcast %4 : vector<1x128xf32> to vector<32x128xf32>
    %939 = arith.mulf %937, %938 : vector<32x128xf32>
    %cst_336 = arith.constant dense<0.000000e+00> : vector<32xf32>
    %940 = vector.multi_reduction <add>, %939, %cst_336 [1] : vector<32x128xf32> to vector<32xf32>
    %941 = vector.shape_cast %940 : vector<32xf32> to vector<32x1xf32>
    %942 = vector.broadcast %6 : vector<1x128xf32> to vector<32x128xf32>
    %943 = arith.mulf %937, %942 : vector<32x128xf32>
    %cst_337 = arith.constant dense<0.000000e+00> : vector<32xf32>
    %944 = vector.multi_reduction <add>, %943, %cst_337 [1] : vector<32x128xf32> to vector<32xf32>
    %945 = vector.shape_cast %944 : vector<32xf32> to vector<32x1xf32>
    %946 = vector.broadcast %4 : vector<1x128xf32> to vector<32x128xf32>
    %947 = vector.broadcast %941 : vector<32x1xf32> to vector<32x128xf32>
    %948 = arith.mulf %946, %947 : vector<32x128xf32>
    %949 = vector.broadcast %6 : vector<1x128xf32> to vector<32x128xf32>
    %950 = vector.broadcast %945 : vector<32x1xf32> to vector<32x128xf32>
    %951 = arith.mulf %949, %950 : vector<32x128xf32>
    %952 = arith.addf %948, %951 : vector<32x128xf32>
    %cst_338 = arith.constant 1.562500e-02 : f32
    %953 = vector.broadcast %cst_338 : f32 to vector<32x128xf32>
    %954 = arith.mulf %952, %953 : vector<32x128xf32>
    %955 = arith.mulf %936, %936 : vector<32x128xf32>
    %956 = arith.subf %954, %955 : vector<32x128xf32>
    %957 = arith.subf %915, %936 : vector<32x128xf32>
    %cst_339 = arith.constant 9.99999974E-6 : f32
    %958 = vector.broadcast %cst_339 : f32 to vector<32x128xf32>
    %959 = arith.addf %956, %958 : vector<32x128xf32>
    %960 = math.rsqrt %959 : vector<32x128xf32>
    %961 = arith.mulf %957, %960 : vector<32x128xf32>
    %962 = vector.broadcast %917 : vector<1x128xf32> to vector<32x128xf32>
    %963 = arith.mulf %961, %962 : vector<32x128xf32>
    %964 = vector.broadcast %919 : vector<1x128xf32> to vector<32x128xf32>
    %965 = arith.addf %963, %964 : vector<32x128xf32>
    %c1_340 = arith.constant 1 : index
    %c0_341 = arith.constant 0 : index
    %c0_342 = arith.constant 0 : index
    %966 = vector.load %arg7[%c1_340, %c0_341, %c0_342] : memref<2x128x128xbf16, #tpu.memory_space<vmem>>, vector<1x128x128xbf16>
    %967 = vector.shape_cast %966 : vector<1x128x128xbf16> to vector<128x128xbf16>
    %c1_343 = arith.constant 1 : index
    %c0_344 = arith.constant 0 : index
    %c0_345 = arith.constant 0 : index
    %968 = vector.load %arg8[%c1_343, %c0_344, %c0_345] : memref<2x1x128xf32, #tpu.memory_space<vmem>>, vector<1x1x128xf32>
    %969 = vector.shape_cast %968 : vector<1x1x128xf32> to vector<1x128xf32>
    %970 = arith.truncf %965 : vector<32x128xf32> to vector<32x128xbf16>
    %cst_346 = arith.constant dense<0.000000e+00> : vector<32x128xf32>
    %971 = tpu.matmul %970, %967, %cst_346 {dimension_numbers = #tpu.dot_dimension_numbers<[1], [0], [0], [1], [0, 0, 1, 1], [], []>} : vector<32x128xbf16>, vector<128x128xbf16>, vector<32x128xf32> -> vector<32x128xf32>
    %972 = vector.broadcast %969 : vector<1x128xf32> to vector<32x128xf32>
    %973 = arith.addf %971, %972 : vector<32x128xf32>
    %974 = vector.shape_cast %973 : vector<32x128xf32> to vector<1x32x128xf32>
    %cst_347 = arith.constant dense<0xFF800000> : vector<1x128xf32>
    %975 = vector.multi_reduction <maximumf>, %974, %cst_347 [1] : vector<1x32x128xf32> to vector<1x128xf32>
    %976 = vector.shape_cast %975 : vector<1x128xf32> to vector<1x1x128xf32>
    %977 = vector.broadcast %976 : vector<1x1x128xf32> to vector<1x32x128xf32>
    %978 = arith.subf %974, %977 : vector<1x32x128xf32>
    %979 = math.exp %978 : vector<1x32x128xf32>
    %cst_348 = arith.constant dense<0.000000e+00> : vector<1x128xf32>
    %980 = vector.multi_reduction <add>, %979, %cst_348 [1] : vector<1x32x128xf32> to vector<1x128xf32>
    %981 = vector.shape_cast %980 : vector<1x128xf32> to vector<1x1x128xf32>
    %982 = tpu.reciprocal %981 {approx = true} : vector<1x1x128xf32> -> vector<1x1x128xf32>
    %983 = vector.broadcast %982 : vector<1x1x128xf32> to vector<1x32x128xf32>
    %984 = arith.mulf %979, %983 : vector<1x32x128xf32>
    %985 = vector.shape_cast %984 : vector<1x32x128xf32> to vector<32x128xf32>
    %986 = arith.mulf %965, %985 : vector<32x128xf32>
    %987 = arith.addf %965, %986 : vector<32x128xf32>
    %c1_349 = arith.constant 1 : index
    %c0_350 = arith.constant 0 : index
    %c0_351 = arith.constant 0 : index
    %988 = vector.load %arg9[%c1_349, %c0_350, %c0_351] : memref<2x1x128xf32, #tpu.memory_space<vmem>>, vector<1x1x128xf32>
    %989 = vector.shape_cast %988 : vector<1x1x128xf32> to vector<1x128xf32>
    %c1_352 = arith.constant 1 : index
    %c0_353 = arith.constant 0 : index
    %c0_354 = arith.constant 0 : index
    %990 = vector.load %arg10[%c1_352, %c0_353, %c0_354] : memref<2x1x128xf32, #tpu.memory_space<vmem>>, vector<1x1x128xf32>
    %991 = vector.shape_cast %990 : vector<1x1x128xf32> to vector<1x128xf32>
    %992 = vector.broadcast %4 : vector<1x128xf32> to vector<32x128xf32>
    %993 = arith.mulf %987, %992 : vector<32x128xf32>
    %cst_355 = arith.constant dense<0.000000e+00> : vector<32xf32>
    %994 = vector.multi_reduction <add>, %993, %cst_355 [1] : vector<32x128xf32> to vector<32xf32>
    %995 = vector.shape_cast %994 : vector<32xf32> to vector<32x1xf32>
    %996 = vector.broadcast %6 : vector<1x128xf32> to vector<32x128xf32>
    %997 = arith.mulf %987, %996 : vector<32x128xf32>
    %cst_356 = arith.constant dense<0.000000e+00> : vector<32xf32>
    %998 = vector.multi_reduction <add>, %997, %cst_356 [1] : vector<32x128xf32> to vector<32xf32>
    %999 = vector.shape_cast %998 : vector<32xf32> to vector<32x1xf32>
    %1000 = vector.broadcast %4 : vector<1x128xf32> to vector<32x128xf32>
    %1001 = vector.broadcast %995 : vector<32x1xf32> to vector<32x128xf32>
    %1002 = arith.mulf %1000, %1001 : vector<32x128xf32>
    %1003 = vector.broadcast %6 : vector<1x128xf32> to vector<32x128xf32>
    %1004 = vector.broadcast %999 : vector<32x1xf32> to vector<32x128xf32>
    %1005 = arith.mulf %1003, %1004 : vector<32x128xf32>
    %1006 = arith.addf %1002, %1005 : vector<32x128xf32>
    %cst_357 = arith.constant 1.562500e-02 : f32
    %1007 = vector.broadcast %cst_357 : f32 to vector<32x128xf32>
    %1008 = arith.mulf %1006, %1007 : vector<32x128xf32>
    %1009 = arith.mulf %987, %987 : vector<32x128xf32>
    %1010 = vector.broadcast %4 : vector<1x128xf32> to vector<32x128xf32>
    %1011 = arith.mulf %1009, %1010 : vector<32x128xf32>
    %cst_358 = arith.constant dense<0.000000e+00> : vector<32xf32>
    %1012 = vector.multi_reduction <add>, %1011, %cst_358 [1] : vector<32x128xf32> to vector<32xf32>
    %1013 = vector.shape_cast %1012 : vector<32xf32> to vector<32x1xf32>
    %1014 = vector.broadcast %6 : vector<1x128xf32> to vector<32x128xf32>
    %1015 = arith.mulf %1009, %1014 : vector<32x128xf32>
    %cst_359 = arith.constant dense<0.000000e+00> : vector<32xf32>
    %1016 = vector.multi_reduction <add>, %1015, %cst_359 [1] : vector<32x128xf32> to vector<32xf32>
    %1017 = vector.shape_cast %1016 : vector<32xf32> to vector<32x1xf32>
    %1018 = vector.broadcast %4 : vector<1x128xf32> to vector<32x128xf32>
    %1019 = vector.broadcast %1013 : vector<32x1xf32> to vector<32x128xf32>
    %1020 = arith.mulf %1018, %1019 : vector<32x128xf32>
    %1021 = vector.broadcast %6 : vector<1x128xf32> to vector<32x128xf32>
    %1022 = vector.broadcast %1017 : vector<32x1xf32> to vector<32x128xf32>
    %1023 = arith.mulf %1021, %1022 : vector<32x128xf32>
    %1024 = arith.addf %1020, %1023 : vector<32x128xf32>
    %cst_360 = arith.constant 1.562500e-02 : f32
    %1025 = vector.broadcast %cst_360 : f32 to vector<32x128xf32>
    %1026 = arith.mulf %1024, %1025 : vector<32x128xf32>
    %1027 = arith.mulf %1008, %1008 : vector<32x128xf32>
    %1028 = arith.subf %1026, %1027 : vector<32x128xf32>
    %1029 = arith.subf %987, %1008 : vector<32x128xf32>
    %cst_361 = arith.constant 9.99999974E-6 : f32
    %1030 = vector.broadcast %cst_361 : f32 to vector<32x128xf32>
    %1031 = arith.addf %1028, %1030 : vector<32x128xf32>
    %1032 = math.rsqrt %1031 : vector<32x128xf32>
    %1033 = arith.mulf %1029, %1032 : vector<32x128xf32>
    %1034 = vector.broadcast %989 : vector<1x128xf32> to vector<32x128xf32>
    %1035 = arith.mulf %1033, %1034 : vector<32x128xf32>
    %1036 = vector.broadcast %991 : vector<1x128xf32> to vector<32x128xf32>
    %1037 = arith.addf %1035, %1036 : vector<32x128xf32>
    %c1_362 = arith.constant 1 : index
    %c0_363 = arith.constant 0 : index
    %c0_364 = arith.constant 0 : index
    %1038 = vector.load %arg11[%c1_362, %c0_363, %c0_364] : memref<2x128x128xbf16, #tpu.memory_space<vmem>>, vector<1x128x128xbf16>
    %1039 = vector.shape_cast %1038 : vector<1x128x128xbf16> to vector<128x128xbf16>
    %c1_365 = arith.constant 1 : index
    %c0_366 = arith.constant 0 : index
    %c0_367 = arith.constant 0 : index
    %1040 = vector.load %arg12[%c1_365, %c0_366, %c0_367] : memref<2x1x128xf32, #tpu.memory_space<vmem>>, vector<1x1x128xf32>
    %1041 = vector.shape_cast %1040 : vector<1x1x128xf32> to vector<1x128xf32>
    %1042 = arith.truncf %1037 : vector<32x128xf32> to vector<32x128xbf16>
    %cst_368 = arith.constant dense<0.000000e+00> : vector<32x128xf32>
    %1043 = tpu.matmul %1042, %1039, %cst_368 {dimension_numbers = #tpu.dot_dimension_numbers<[1], [0], [0], [1], [0, 0, 1, 1], [], []>} : vector<32x128xbf16>, vector<128x128xbf16>, vector<32x128xf32> -> vector<32x128xf32>
    %1044 = vector.broadcast %1041 : vector<1x128xf32> to vector<32x128xf32>
    %1045 = arith.addf %1043, %1044 : vector<32x128xf32>
    %cst_369 = arith.constant 5.000000e-01 : f32
    %1046 = vector.broadcast %cst_369 : f32 to vector<32x128xf32>
    %1047 = arith.mulf %1046, %1045 : vector<32x128xf32>
    %cst_370 = arith.constant 4.471500e-02 : f32
    %1048 = vector.broadcast %cst_370 : f32 to vector<32x128xf32>
    %1049 = arith.mulf %1048, %1045 : vector<32x128xf32>
    %1050 = arith.mulf %1049, %1045 : vector<32x128xf32>
    %1051 = arith.mulf %1050, %1045 : vector<32x128xf32>
    %1052 = arith.addf %1045, %1051 : vector<32x128xf32>
    %cst_371 = arith.constant 0.797884583 : f32
    %1053 = vector.broadcast %cst_371 : f32 to vector<32x128xf32>
    %1054 = arith.mulf %1053, %1052 : vector<32x128xf32>
    %1055 = math.tanh %1054 : vector<32x128xf32>
    %cst_372 = arith.constant 1.000000e+00 : f32
    %1056 = vector.broadcast %cst_372 : f32 to vector<32x128xf32>
    %1057 = arith.addf %1056, %1055 : vector<32x128xf32>
    %1058 = arith.mulf %1047, %1057 : vector<32x128xf32>
    %c1_373 = arith.constant 1 : index
    %c0_374 = arith.constant 0 : index
    %c0_375 = arith.constant 0 : index
    %1059 = vector.load %arg13[%c1_373, %c0_374, %c0_375] : memref<2x128x128xbf16, #tpu.memory_space<vmem>>, vector<1x128x128xbf16>
    %1060 = vector.shape_cast %1059 : vector<1x128x128xbf16> to vector<128x128xbf16>
    %c1_376 = arith.constant 1 : index
    %c0_377 = arith.constant 0 : index
    %c0_378 = arith.constant 0 : index
    %1061 = vector.load %arg14[%c1_376, %c0_377, %c0_378] : memref<2x1x128xf32, #tpu.memory_space<vmem>>, vector<1x1x128xf32>
    %1062 = vector.shape_cast %1061 : vector<1x1x128xf32> to vector<1x128xf32>
    %1063 = arith.truncf %1058 : vector<32x128xf32> to vector<32x128xbf16>
    %cst_379 = arith.constant dense<0.000000e+00> : vector<32x128xf32>
    %1064 = tpu.matmul %1063, %1060, %cst_379 {dimension_numbers = #tpu.dot_dimension_numbers<[1], [0], [0], [1], [0, 0, 1, 1], [], []>} : vector<32x128xbf16>, vector<128x128xbf16>, vector<32x128xf32> -> vector<32x128xf32>
    %1065 = vector.broadcast %1062 : vector<1x128xf32> to vector<32x128xf32>
    %1066 = arith.addf %1064, %1065 : vector<32x128xf32>
    %1067 = arith.addf %1037, %1066 : vector<32x128xf32>
    %cst_380 = arith.constant 5.000000e-01 : f32
    %1068 = vector.broadcast %cst_380 : f32 to vector<32x128xf32>
    %1069 = arith.mulf %1068, %1067 : vector<32x128xf32>
    %cst_381 = arith.constant 4.471500e-02 : f32
    %1070 = vector.broadcast %cst_381 : f32 to vector<32x128xf32>
    %1071 = arith.mulf %1070, %1067 : vector<32x128xf32>
    %1072 = arith.mulf %1071, %1067 : vector<32x128xf32>
    %1073 = arith.mulf %1072, %1067 : vector<32x128xf32>
    %1074 = arith.addf %1067, %1073 : vector<32x128xf32>
    %cst_382 = arith.constant 0.797884583 : f32
    %1075 = vector.broadcast %cst_382 : f32 to vector<32x128xf32>
    %1076 = arith.mulf %1075, %1074 : vector<32x128xf32>
    %1077 = math.tanh %1076 : vector<32x128xf32>
    %cst_383 = arith.constant 1.000000e+00 : f32
    %1078 = vector.broadcast %cst_383 : f32 to vector<32x128xf32>
    %1079 = arith.addf %1078, %1077 : vector<32x128xf32>
    %1080 = arith.mulf %1069, %1079 : vector<32x128xf32>
    %c0_384 = arith.constant 0 : index
    %c0_385 = arith.constant 0 : index
    %1081 = vector.load %arg15[%c0_384, %c0_385] : memref<128x128xbf16, #tpu.memory_space<vmem>>, vector<128x128xbf16>
    %c0_386 = arith.constant 0 : index
    %c0_387 = arith.constant 0 : index
    %1082 = vector.load %arg16[%c0_386, %c0_387] : memref<1x128xf32, #tpu.memory_space<vmem>>, vector<1x128xf32>
    %1083 = arith.truncf %1080 : vector<32x128xf32> to vector<32x128xbf16>
    %cst_388 = arith.constant dense<0.000000e+00> : vector<32x128xf32>
    %1084 = tpu.matmul %1083, %1081, %cst_388 {dimension_numbers = #tpu.dot_dimension_numbers<[1], [0], [0], [1], [0, 0, 1, 1], [], []>} : vector<32x128xbf16>, vector<128x128xbf16>, vector<32x128xf32> -> vector<32x128xf32>
    %1085 = vector.broadcast %1082 : vector<1x128xf32> to vector<32x128xf32>
    %1086 = arith.addf %1084, %1085 : vector<32x128xf32>
    %cst_389 = arith.constant 5.000000e-01 : f32
    %1087 = vector.broadcast %cst_389 : f32 to vector<32x128xf32>
    %1088 = arith.mulf %1087, %1086 : vector<32x128xf32>
    %cst_390 = arith.constant 4.471500e-02 : f32
    %1089 = vector.broadcast %cst_390 : f32 to vector<32x128xf32>
    %1090 = arith.mulf %1089, %1086 : vector<32x128xf32>
    %1091 = arith.mulf %1090, %1086 : vector<32x128xf32>
    %1092 = arith.mulf %1091, %1086 : vector<32x128xf32>
    %1093 = arith.addf %1086, %1092 : vector<32x128xf32>
    %cst_391 = arith.constant 0.797884583 : f32
    %1094 = vector.broadcast %cst_391 : f32 to vector<32x128xf32>
    %1095 = arith.mulf %1094, %1093 : vector<32x128xf32>
    %1096 = math.tanh %1095 : vector<32x128xf32>
    %cst_392 = arith.constant 1.000000e+00 : f32
    %1097 = vector.broadcast %cst_392 : f32 to vector<32x128xf32>
    %1098 = arith.addf %1097, %1096 : vector<32x128xf32>
    %1099 = arith.mulf %1088, %1098 : vector<32x128xf32>
    %c0_393 = arith.constant 0 : index
    %c0_394 = arith.constant 0 : index
    %1100 = vector.load %arg17[%c0_393, %c0_394] : memref<128x128xbf16, #tpu.memory_space<vmem>>, vector<128x128xbf16>
    %c0_395 = arith.constant 0 : index
    %c0_396 = arith.constant 0 : index
    %1101 = vector.load %arg18[%c0_395, %c0_396] : memref<1x128xf32, #tpu.memory_space<vmem>>, vector<1x128xf32>
    %1102 = arith.truncf %1099 : vector<32x128xf32> to vector<32x128xbf16>
    %cst_397 = arith.constant dense<0.000000e+00> : vector<32x128xf32>
    %1103 = tpu.matmul %1102, %1100, %cst_397 {dimension_numbers = #tpu.dot_dimension_numbers<[1], [0], [0], [1], [0, 0, 1, 1], [], []>} : vector<32x128xbf16>, vector<128x128xbf16>, vector<32x128xf32> -> vector<32x128xf32>
    %1104 = vector.broadcast %1101 : vector<1x128xf32> to vector<32x128xf32>
    %1105 = arith.addf %1103, %1104 : vector<32x128xf32>
    %1106 = arith.truncf %1105 : vector<32x128xf32> to vector<32x128xbf16>
    %1107 = vector.shape_cast %1106 : vector<32x128xbf16> to vector<1x1x32x128xbf16>
    %c0_398 = arith.constant 0 : index
    %c2 = arith.constant 2 : index
    %c0_399 = arith.constant 0 : index
    %c0_400 = arith.constant 0 : index
    %1108 = vector.load %arg19[%c0_398, %c2, %c0_399, %c0_400] : memref<1x3x32x128xbf16, #tpu.memory_space<vmem>>, vector<1x1x32x128xbf16>
    tpu.vector_store %arg19[%c0_398, %c2, %c0_399, %c0_400], %1107 {strides = array<i32>} : memref<1x3x32x128xbf16, #tpu.memory_space<vmem>>, vector<1x1x32x128xbf16>,
    %1109 = arith.addf %1099, %32 : vector<32x128xf32>
    %c0_401 = arith.constant 0 : index
    %c0_402 = arith.constant 0 : index
    %1110 = vector.load %arg20[%c0_401, %c0_402] : memref<32x128xf32, #tpu.memory_space<vmem>>, vector<32x128xf32>
    tpu.vector_store %arg20[%c0_401, %c0_402], %1109 {strides = array<i32>} : memref<32x128xf32, #tpu.memory_space<vmem>>, vector<32x128xf32>,
    return
  }
  func.func @transform_0(%arg0: i32, %arg1: i32) -> (i32, i32) {
    %c0_i32 = arith.constant 0 : i32
    %c0_i32_0 = arith.constant 0 : i32
    return %arg0, %c0_i32 : i32, i32
  }
  func.func @transform_1(%arg0: i32, %arg1: i32) -> (i32, i32) {
    %c0_i32 = arith.constant 0 : i32
    %c0_i32_0 = arith.constant 0 : i32
    %c0_i32_1 = arith.constant 0 : i32
    return %c0_i32, %c0_i32_0 : i32, i32
  }
  func.func @transform_2(%arg0: i32, %arg1: i32) -> (i32, i32) {
    %c0_i32 = arith.constant 0 : i32
    %c0_i32_0 = arith.constant 0 : i32
    %c0_i32_1 = arith.constant 0 : i32
    return %c0_i32, %c0_i32_0 : i32, i32
  }
  func.func @transform_3(%arg0: i32, %arg1: i32) -> (i32, i32, i32) {
    %c0_i32 = arith.constant 0 : i32
    %c0_i32_0 = arith.constant 0 : i32
    %c0_i32_1 = arith.constant 0 : i32
    %c0_i32_2 = arith.constant 0 : i32
    return %c0_i32, %c0_i32_0, %c0_i32_1 : i32, i32, i32
  }
  func.func @transform_4(%arg0: i32, %arg1: i32) -> (i32, i32, i32) {
    %c0_i32 = arith.constant 0 : i32
    %c0_i32_0 = arith.constant 0 : i32
    %c0_i32_1 = arith.constant 0 : i32
    %c0_i32_2 = arith.constant 0 : i32
    return %c0_i32, %c0_i32_0, %c0_i32_1 : i32, i32, i32
  }
  func.func @transform_5(%arg0: i32, %arg1: i32) -> (i32, i32, i32) {
    %c0_i32 = arith.constant 0 : i32
    %c0_i32_0 = arith.constant 0 : i32
    %c0_i32_1 = arith.constant 0 : i32
    %c0_i32_2 = arith.constant 0 : i32
    return %c0_i32, %c0_i32_0, %c0_i32_1 : i32, i32, i32
  }
  func.func @transform_6(%arg0: i32, %arg1: i32) -> (i32, i32, i32) {
    %c0_i32 = arith.constant 0 : i32
    %c0_i32_0 = arith.constant 0 : i32
    %c0_i32_1 = arith.constant 0 : i32
    %c0_i32_2 = arith.constant 0 : i32
    return %c0_i32, %c0_i32_0, %c0_i32_1 : i32, i32, i32
  }
  func.func @transform_7(%arg0: i32, %arg1: i32) -> (i32, i32, i32) {
    %c0_i32 = arith.constant 0 : i32
    %c0_i32_0 = arith.constant 0 : i32
    %c0_i32_1 = arith.constant 0 : i32
    %c0_i32_2 = arith.constant 0 : i32
    return %c0_i32, %c0_i32_0, %c0_i32_1 : i32, i32, i32
  }
  func.func @transform_8(%arg0: i32, %arg1: i32) -> (i32, i32, i32) {
    %c0_i32 = arith.constant 0 : i32
    %c0_i32_0 = arith.constant 0 : i32
    %c0_i32_1 = arith.constant 0 : i32
    %c0_i32_2 = arith.constant 0 : i32
    return %c0_i32, %c0_i32_0, %c0_i32_1 : i32, i32, i32
  }
  func.func @transform_9(%arg0: i32, %arg1: i32) -> (i32, i32, i32) {
    %c0_i32 = arith.constant 0 : i32
    %c0_i32_0 = arith.constant 0 : i32
    %c0_i32_1 = arith.constant 0 : i32
    %c0_i32_2 = arith.constant 0 : i32
    return %c0_i32, %c0_i32_0, %c0_i32_1 : i32, i32, i32
  }
  func.func @transform_10(%arg0: i32, %arg1: i32) -> (i32, i32, i32) {
    %c0_i32 = arith.constant 0 : i32
    %c0_i32_0 = arith.constant 0 : i32
    %c0_i32_1 = arith.constant 0 : i32
    %c0_i32_2 = arith.constant 0 : i32
    return %c0_i32, %c0_i32_0, %c0_i32_1 : i32, i32, i32
  }
  func.func @transform_11(%arg0: i32, %arg1: i32) -> (i32, i32, i32) {
    %c0_i32 = arith.constant 0 : i32
    %c0_i32_0 = arith.constant 0 : i32
    %c0_i32_1 = arith.constant 0 : i32
    %c0_i32_2 = arith.constant 0 : i32
    return %c0_i32, %c0_i32_0, %c0_i32_1 : i32, i32, i32
  }
  func.func @transform_12(%arg0: i32, %arg1: i32) -> (i32, i32, i32) {
    %c0_i32 = arith.constant 0 : i32
    %c0_i32_0 = arith.constant 0 : i32
    %c0_i32_1 = arith.constant 0 : i32
    %c0_i32_2 = arith.constant 0 : i32
    return %c0_i32, %c0_i32_0, %c0_i32_1 : i32, i32, i32
  }
  func.func @transform_13(%arg0: i32, %arg1: i32) -> (i32, i32) {
    %c0_i32 = arith.constant 0 : i32
    %c0_i32_0 = arith.constant 0 : i32
    %c0_i32_1 = arith.constant 0 : i32
    return %c0_i32, %c0_i32_0 : i32, i32
  }
  func.func @transform_14(%arg0: i32, %arg1: i32) -> (i32, i32) {
    %c0_i32 = arith.constant 0 : i32
    %c0_i32_0 = arith.constant 0 : i32
    %c0_i32_1 = arith.constant 0 : i32
    return %c0_i32, %c0_i32_0 : i32, i32
  }
  func.func @transform_15(%arg0: i32, %arg1: i32) -> (i32, i32) {
    %c0_i32 = arith.constant 0 : i32
    %c0_i32_0 = arith.constant 0 : i32
    %c0_i32_1 = arith.constant 0 : i32
    return %c0_i32, %c0_i32_0 : i32, i32
  }
  func.func @transform_16(%arg0: i32, %arg1: i32) -> (i32, i32) {
    %c0_i32 = arith.constant 0 : i32
    %c0_i32_0 = arith.constant 0 : i32
    %c0_i32_1 = arith.constant 0 : i32
    return %c0_i32, %c0_i32_0 : i32, i32
  }
  func.func @transform_17(%arg0: i32, %arg1: i32) -> (i32, i32, i32, i32) {
    %c0_i32 = arith.constant 0 : i32
    %c0_i32_0 = arith.constant 0 : i32
    %c0_i32_1 = arith.constant 0 : i32
    return %arg0, %arg1, %c0_i32, %c0_i32_0 : i32, i32, i32, i32
  }
}

</mosaic_0001>

<bundles_post_ra>
// kernel: tpu_custom_call.1
= control target key start
LH: loop header
LB: loop body
LE: loop exit
PB: predicated region body
PF: predicated region fallthrough
CT: control target
= control target key end

     0   :  { %s8811_s0 = inlined_call_operand.hbm [shape: f32[32,128], index: 0, kind: input, shape index: {}]   ;;  %s8812_s1 = inlined_call_operand.hbm [shape: bf16[128,128], index: 1, kind: input, shape index: {}]   ;;  %s8813_s2 = inlined_call_operand.hbm [shape: f32[1,128], index: 2, kind: input, shape index: {}]   ;;  %s8814_s3 = inlined_call_operand.vmem [shape: f32[2,1,128], index: 3, kind: input, shape index: {}]   ;;  %s8815_s4 = inlined_call_operand.vmem [shape: f32[2,1,128], index: 4, kind: input, shape index: {}]   ;;  %s8816_s5 = inlined_call_operand.hbm [shape: bf16[2,128,128], index: 5, kind: input, shape index: {}]   ;;  %s8817_s6 = inlined_call_operand.vmem [shape: f32[2,1,128], index: 6, kind: input, shape index: {}]   ;;  %s8818_s7 = inlined_call_operand.vmem [shape: f32[2,1,128], index: 7, kind: input, shape index: {}]   ;;  %s8819_s8 = inlined_call_operand.vmem [shape: f32[2,1,128], index: 8, kind: input, shape index: {}]   ;;  %s8820_s9 = inlined_call_operand.hbm [shape: bf16[2,128,128], index: 9, kind: input, shape index: {}]   ;;  %s8821_s10 = inlined_call_operand.vmem [shape: f32[2,1,128], index: 10, kind: input, shape index: {}]   ;;  %s8822_s11 = inlined_call_operand.hbm [shape: bf16[2,128,128], index: 11, kind: input, shape index: {}]   ;;  %s8823_s12 = inlined_call_operand.vmem [shape: f32[2,1,128], index: 12, kind: input, shape index: {}]   ;;  %s8824_s13 = inlined_call_operand.hbm [shape: bf16[128,128], index: 13, kind: input, shape index: {}]   ;;  %s8825_s14 = inlined_call_operand.vmem [shape: f32[1,128], index: 14, kind: input, shape index: {}]   ;;  %s8826_s15 = inlined_call_operand.hbm [shape: bf16[128,128], index: 15, kind: input, shape index: {}]   ;;  %s8827_s16 = inlined_call_operand.vmem [shape: f32[1,128], index: 16, kind: input, shape index: {}]   ;;  %s8828_s17 = inlined_call_operand.hbm [shape: bf16[1,3,32,128], index: 17, kind: output, shape index: {}]  }
   0x1   :  { %8829 = sst [smem:[#allocation24_spill]] %s8811_s0 }
   0x2   :  { %8830 = sst [smem:[#allocation25_spill]] %s8812_s1 }
   0x3   :  { %22 = vsyncpa [#allocation4], 0 }
   0x4   :  { %23 = vsyncpa [#allocation7], 0 }
   0x5   :  { %24 = vsyncpa [#allocation10], 0 }
   0x6   :  { %25 = vsyncpa [#allocation13], 0 }
   0x7   :  { %26 = vsyncpa [#allocation16], 0 }
   0x8   :  { %27 = vsyncpa [#allocation5], 0  ;;  %s7556_s24 = smov [#allocation6]  }
   0x9   :  { %s45_s25 = sshll.u32 %s7556_s24, 4  ;;  %s46_s25 = int_to_ptr.vmem [resolvable:$true] %s45_s25 }
   0xa   :  { %s7372_s26 = scalar_lea.vmem %s46_s25, 1024  ;;  %p7377_p1 = scmp.lt.s32.totalorder %s46_s25, %s46_s25 }
   0xb   :  { %p7373_p0 = scmp.ne.s32.totalorder %s46_s25, %s7372_s26  ;;  %p7378_p2 = scmp.lt.s32.totalorder %s7372_s26, %s7372_s26 }
   0xd   :  { %p7379_p3 = por %p7378_p2, %p7377_p1 }
   0xf   :  { %p7380_p4 = pnand %p7379_p3, %p7373_p0 }
  0x11   :  { %7383 = shalt.err (!%p7380_p4)
}
  0x12   :  { %s7557_s27 = smov 64   ;;  %s7558_s28 = smov 4  }
  0x13   :  { %s8831_s30 = sld [smem:[#allocation25_spill]]  ;;  %s7559_s18 = smov [#allocation9]  }
  0x14   :  { %s71_s19 = sshll.u32 %s7559_s18, 4  ;;  %s7560_s1 = smov [#allocation12]   ;;  %s72_s19 = int_to_ptr.vmem [resolvable:$true] %s71_s19 }
  0x15   :  { %s103_s20 = sshll.u32 %s7560_s1, 4  ;;  %s7392_s21 = scalar_lea.vmem %s72_s19, 2048  ;;  %s104_s20 = int_to_ptr.vmem [resolvable:$true] %s103_s20 }
  0x16   :  { %p7393_p5 = scmp.ne.s32.totalorder %s72_s19, %s7392_s21  ;;  %p7397_p6 = scmp.lt.s32.totalorder %s72_s19, %s72_s19 }
  0x17   :  { %p7398_p7 = scmp.lt.s32.totalorder %s7392_s21, %s7392_s21 }
  0x19   :  { %51 = dma.hbm_to_vmem [thread:$0]  %s8831_s30, 1024, %s46_s25, [#allocation7], %s7557_s27, %s7557_s27, %s7558_s28  }
  0x1a   :  { %p7399_p8 = por %p7398_p7, %p7397_p6 }
  0x1c   :  { %p7400_p9 = pnand %p7399_p8, %p7393_p5 }
  0x1e   :  { %7403 = shalt.err (!%p7400_p9)
}
  0x1f   :  { %77 = dma.hbm_to_vmem [thread:$0]  %s8816_s5, 2048, %s72_s19, [#allocation10], %s7557_s27, %s7557_s27, %s7558_s28  }
  0x20   :  { %s7412_s24 = scalar_lea.vmem %s104_s20, 2048  ;;  %p7417_p11 = scmp.lt.s32.totalorder %s104_s20, %s104_s20 }
  0x21   :  { %p7413_p10 = scmp.ne.s32.totalorder %s104_s20, %s7412_s24  ;;  %p7418_p12 = scmp.lt.s32.totalorder %s7412_s24, %s7412_s24 }
  0x23   :  { %p7419_p13 = por %p7418_p12, %p7417_p11 }
  0x25   :  { %p7420_p0 = pnand %p7419_p13, %p7413_p10 }
  0x27   :  { %7423 = shalt.err (!%p7420_p0)
}
  0x28   :  { %109 = dma.hbm_to_vmem [thread:$0]  %s8822_s11, 2048, %s104_s20, [#allocation13], %s7557_s27, %s7557_s27, %s7558_s28  }
  0x29   :  { %s7561_s29 = smov [#allocation3]  }
  0x2a   :  { %s33_s0 = sshll.u32 %s7561_s29, 4  ;;  %s34_s0 = int_to_ptr.vmem [resolvable:$true] %s33_s0 }
  0x2b   :  { %s7432_s30 = scalar_lea.vmem %s34_s0, 512  ;;  %p7437_p2 = scmp.lt.s32.totalorder %s34_s0, %s34_s0 }
  0x2c   :  { %p7433_p1 = scmp.ne.s32.totalorder %s34_s0, %s7432_s30  ;;  %p7438_p3 = scmp.lt.s32.totalorder %s7432_s30, %s7432_s30 }
  0x2e   :  { %p7439_p4 = por %p7438_p3, %p7437_p2 }
  0x30   :  { %p7440_p5 = pnand %p7439_p4, %p7433_p1 }
  0x32   :  { %7443 = shalt.err (!%p7440_p5)
}
  0x33   :  { %s7562_s5 = smov 128   ;;  %s7563_s18 = smov 8  }
  0x34   :  { %s8832_s21 = sld [smem:[#allocation24_spill]]  ;;  %s7564_s22 = smov [#allocation8]  }
  0x35   :  { %s58_s23 = sshll.u32 %s7564_s22, 4  ;;  %s7565_s24 = smov [#allocation11]   ;;  %s59_s23 = int_to_ptr.vmem [resolvable:$true] %s58_s23 }
  0x36   :  { %s89_s11 = sshll.u32 %s7565_s24, 4  ;;  %s7452_s20 = scalar_lea.vmem %s59_s23, 16  ;;  %s90_s11 = int_to_ptr.vmem [resolvable:$true] %s89_s11 }
  0x37   :  { %p7453_p6 = scmp.ne.s32.totalorder %s59_s23, %s7452_s20  ;;  %s7456_s25 = scalar_lea.vmem %s59_s23, 32 }
  0x38   :  { %p7457_p7 = scmp.lt.s32.totalorder %s59_s23, %s59_s23  ;;  %p7458_p8 = scmp.lt.s32.totalorder %s7456_s25, %s7452_s20 }
  0x3a   :  { %39 = dma.hbm_to_vmem [thread:$0]  %s8832_s21, 512, %s34_s0, [#allocation4], %s7562_s5, %s7562_s5, %s7563_s18  }
  0x3b   :  { %p7459_p9 = por %p7458_p8, %p7457_p7 }
  0x3d   :  { %p7460_p10 = pnand %p7459_p9, %p7453_p6 }
  0x3f   :  { %7463 = shalt.err (!%p7460_p10)
}
  0x40   :  { %61 = dma.hbm_to_vmem [thread:$0]  %s8813_s2, 16, %s59_s23, [#allocation7]  }
  0x41   :  { %s7472_s30 = scalar_lea.vmem %s90_s11, 2048  ;;  %p7477_p12 = scmp.lt.s32.totalorder %s90_s11, %s90_s11 }
  0x42   :  { %p7473_p11 = scmp.ne.s32.totalorder %s90_s11, %s7472_s30  ;;  %p7478_p13 = scmp.lt.s32.totalorder %s7472_s30, %s7472_s30 }
  0x44   :  { %p7479_p0 = por %p7478_p13, %p7477_p12 }
  0x46   :  { %p7480_p1 = pnand %p7479_p0, %p7473_p11 }
  0x48   :  { %7483 = shalt.err (!%p7480_p1)
}
  0x49   :  { %95 = dma.hbm_to_vmem [thread:$0]  %s8820_s9, 2048, %s90_s11, [#allocation10], %s7557_s27, %s7557_s27, %s7558_s28  }
  0x4a   :  { %s7566_s18 = smov [#allocation14]   ;;  %s7567_s1 = smov [#allocation15]  }
  0x4b   :  { %s117_s19 = sshll.u32 %s7566_s18, 4  ;;  %s131_s21 = sshll.u32 %s7567_s1, 4  ;;  %s118_s19 = int_to_ptr.vmem [resolvable:$true] %s117_s19  ;;  %s132_s21 = int_to_ptr.vmem [resolvable:$true] %s131_s21 }
  0x4c   :  { %s7492_s2 = scalar_lea.vmem %s118_s19, 1024  ;;  %p7497_p3 = scmp.lt.s32.totalorder %s118_s19, %s118_s19 }
  0x4d   :  { %p7493_p2 = scmp.ne.s32.totalorder %s118_s19, %s7492_s2  ;;  %p7498_p4 = scmp.lt.s32.totalorder %s7492_s2, %s7492_s2 }
  0x4f   :  { %p7499_p5 = por %p7498_p4, %p7497_p3 }
  0x51   :  { %p7500_p6 = pnand %p7499_p5, %p7493_p2 }
  0x53   :  { %7503 = shalt.err (!%p7500_p6)
}
  0x54   :  { %123 = dma.hbm_to_vmem [thread:$0]  %s8824_s13, 1024, %s118_s19, [#allocation13], %s7557_s27, %s7557_s27, %s7558_s28  }
  0x55   :  { %s7512_s9 = scalar_lea.vmem %s132_s21, 1024  ;;  %p7517_p8 = scmp.lt.s32.totalorder %s132_s21, %s132_s21 }
  0x56   :  { %p7513_p7 = scmp.ne.s32.totalorder %s132_s21, %s7512_s9  ;;  %p7518_p9 = scmp.lt.s32.totalorder %s7512_s9, %s7512_s9 }
  0x58   :  { %p7519_p10 = por %p7518_p9, %p7517_p8 }
  0x5a   :  { %p7520_p11 = pnand %p7519_p10, %p7513_p7 }
  0x5c   :  { %7523 = shalt.err (!%p7520_p11)
}
  0x5d   :  { %137 = dma.hbm_to_vmem [thread:$0]  %s8826_s15, 1024, %s132_s21, [#allocation16], %s7557_s27, %s7557_s27, %s7558_s28  }
  0x5e   :  { %7544 = dma.done.wait [#allocation4], 512  }
  0x5f   :  { %7545 = vsyncadd [#allocation4], 4294966784 }
  0x60   :  { %7546 = dma.done.wait [#allocation7], 1040  }
  0x61   :  { %7547 = vsyncadd [#allocation7], 4294966256 }
  0x62   :  { %7548 = dma.done.wait [#allocation10], 4096  }
  0x63   :  { %7549 = vsyncadd [#allocation10], 4294963200 }
  0x64   :  { %7550 = dma.done.wait [#allocation13], 3072  }
  0x65   :  { %7551 = vsyncadd [#allocation13], 4294964224 }
  0x66   :  { %7552 = dma.done.wait [#allocation16], 1024  }
  0x67   :  { %7553 = vsyncadd [#allocation16], 4294966272  ;;  %v6880_v0 = vld [vmem:[#allocation6 + $0x38] sm:$0xff]   ;;  %v6881_v1 = vld [vmem:[#allocation6 + $0x30] sm:$0xff]   ;;  %v165_v14 = vlaneseq  ;;  %v7568_v17 = vmov 0.0   ;;  %s7569_s21 = smov [#allocation17]  }
  0x68   :  { %6366 = vmatprep.subr.bf16.mxu0 %v6880_v0  ;;  %v6882_v2 = vld [vmem:[#allocation6 + $0x28] sm:$0xff]   ;;  %v6883_v3 = vld [vmem:[#allocation6 + $0x20] sm:$0xff]   ;;  %v6884_v7 = vld [vmem:[#allocation6 + $0x18] sm:$0xff]   ;;  %s5771_s2 = sshll.u32 %s7569_s21, 4  ;;  %s5772_s2 = int_to_ptr.vmem [resolvable:$true] %s5771_s2 }
  0x69   :  { %6367 = vmatpush3.bf16.msra.mxu0 %v6880_v0  ;;  %v7702_v4 = vld [vmem:[#allocation3] sm:$0xff]  ;;  %v7704_v5 = vld [vmem:[#allocation3 + $0x8] sm:$0xff]  ;;  %v6885_v8 = vld [vmem:[#allocation6 + $0x10] sm:$0xff]   ;;  %v166_v15 = vand.u32 127, %v165_v14  ;;  %s7524_s22 = scalar_lea.vmem %s5772_s2, 768  ;;  %p7529_p13 = scmp.lt.s32.totalorder %s5772_s2, %s5772_s2 }
  0x6a   :  { %6368 = vmatprep.subr.bf16.mxu0 %v6881_v1  ;;  %v211_v6 = vpack.c.bf16 %v7704_v5, %v7702_v4  ;;  %v6886_v9 = vld [vmem:[#allocation6 + $0x8] sm:$0xff]   ;;  %v6887_v10 = vld [vmem:[#allocation6] sm:$0xff]   ;;  %v192_v11 = vld [vmem:[#allocation3 + $0x10] sm:$0xff]  ;;  %p7525_p12 = scmp.ne.s32.totalorder %s5772_s2, %s7524_s22  ;;  %p7530_p0 = scmp.lt.s32.totalorder %s7524_s22, %s7524_s22 }
  0x6b   :  { %v7708_v12 = vld [vmem:[#allocation3 + $0x18] sm:$0xff]  ;;  %v175_v16 = vand.u32 63, %v166_v15  ;;  %v5789_v19 = vld [vmem:[#allocation8] ss:$0 sm:$0xff]  ;;  %vm167_vm1 = vcmp.lt.s32.totalorder %v166_v15, 64 }
  0x6c   :  { %6382 = vmatprep.mubr.bf16.mxu0 %v211_v6  ;;  %v212_v13 = vpack.c.bf16 %v7708_v12, %v192_v11  ;;  %v7713_v56 = vsel %vm167_vm1, 1.0, %v7568_v17  ;;  %p7531_p1 = por %p7530_p0, %p7529_p13 }
  0x6d   :  { %6369 = vmatpush3.bf16.msra.mxu0 %v6881_v1  ;;  %vm183_vm0 = vcmp.ge.s32.totalorder %v175_v16, 32  ;;  %v7720_v0 = vsub.f32 1.0, %v7713_v56 }
  0x6e   :  { %6370 = vmatprep.subr.bf16.mxu0 %v6882_v2  ;;  %v7711_v18 = vsel %vm183_vm0, 1.0, %v7568_v17  ;;  %p7532_p2 = pnand %p7531_p1, %p7525_p12 }
  0x71   :  { %6371 = vmatpush3.bf16.msra.mxu0 %v6882_v2 }
  0x72   :  { %6372 = vmatprep.subr.bf16.mxu0 %v6883_v3 }
  0x75   :  { %6373 = vmatpush3.bf16.msra.mxu0 %v6883_v3 }
  0x76   :  { %6374 = vmatprep.subr.bf16.mxu0 %v6884_v7 }
  0x79   :  { %6375 = vmatpush3.bf16.msra.mxu0 %v6884_v7 }
  0x7a   :  { %6376 = vmatprep.subr.bf16.mxu0 %v6885_v8 }
  0x7d   :  { %6377 = vmatpush3.bf16.msra.mxu0 %v6885_v8 }
  0x7e   :  { %6378 = vmatprep.subr.bf16.mxu0 %v6886_v9 }
  0x81   :  { %6379 = vmatpush3.bf16.msra.mxu0 %v6886_v9 }
  0x82   :  { %6380 = vmatprep.subr.bf16.mxu0 %v6887_v10 }
  0x85   :  { %6381 = vmatpush3.bf16.msra.mxu0 %v6887_v10 }
  0x88   :  { %6383 = vmatmul.mubr.bf16.vlgmr.msra.gmra.mxu0 %v212_v13 }
 0x148   :  { %v6384_v20 = vpop.f32.mrf.mxu0 }
 0x149   :  { %v310_v21 = vadd.f32 %v6384_v20, %v5789_v19 }
 0x14a   :  { %v301_v22 = vpop.f32.mrf.mxu0 }
 0x14b   :  { %v322_v23 = vmul.f32 0.044715, %v310_v21  ;;  %v302_v24 = vadd.f32 %v5789_v19, %v301_v22  ;;  %v318_v49 = vmul.f32 0.5, %v310_v21 }
 0x14c   :  { %v6385_v25 = vpop.f32.mrf.mxu0 }
 0x14d   :  { %v326_v26 = vmul.f32 %v322_v23, %v310_v21  ;;  %v320_v27 = vmul.f32 0.044715, %v302_v24  ;;  %v313_v28 = vadd.f32 %v6385_v25, %v5789_v19  ;;  %v316_v52 = vmul.f32 0.5, %v302_v24 }
 0x14e   :  { %v304_v29 = vpop.f32.mrf.mxu0 }
 0x14f   :  { %v330_v30 = vmul.f32 %v326_v26, %v310_v21  ;;  %v324_v31 = vmul.f32 %v320_v27, %v302_v24  ;;  %v323_v32 = vmul.f32 0.044715, %v313_v28  ;;  %v305_v33 = vadd.f32 %v5789_v19, %v304_v29  ;;  %v6888_v27 = vld [vmem:[#allocation9 + $0x38] sm:$0xff]   ;;  %v6890_v29 = vld [vmem:[#allocation9 + $0x28] sm:$0xff]  }
 0x150   :  { %v319_v57 = vmul.f32 0.5, %v313_v28  ;;  %6386 = vmatprep.subr.bf16.mxu1 %v6888_v27 }
 0x151   :  { %v334_v34 = vadd.f32 %v330_v30, %v310_v21  ;;  %v328_v35 = vmul.f32 %v324_v31, %v302_v24  ;;  %v327_v36 = vmul.f32 %v323_v32, %v313_v28  ;;  %v321_v37 = vmul.f32 0.044715, %v305_v33  ;;  %6387 = vmatpush3.bf16.msra.mxu1 %v6888_v27  ;;  %v6891_v30 = vld [vmem:[#allocation9 + $0x20] sm:$0xff]   ;;  %v6892_v31 = vld [vmem:[#allocation9 + $0x18] sm:$0xff]   ;;  %v6893_v32 = vld [vmem:[#allocation9 + $0x10] sm:$0xff]  }
 0x152   :  { %v317_v7 = vmul.f32 0.5, %v305_v33 }
 0x153   :  { %v338_v38 = vmul.f32 0.7978846, %v334_v34  ;;  %v332_v39 = vadd.f32 %v328_v35, %v302_v24  ;;  %v331_v40 = vmul.f32 %v327_v36, %v313_v28  ;;  %v325_v41 = vmul.f32 %v321_v37, %v305_v33  ;;  %v6895_v34 = vld [vmem:[#allocation9] sm:$0xff]  }
 0x155   :  { %7080 = vtanh.f32 %v338_v38  ;;  %v336_v42 = vmul.f32 0.7978846, %v332_v39  ;;  %v335_v43 = vadd.f32 %v331_v40, %v313_v28  ;;  %v329_v44 = vmul.f32 %v325_v41, %v305_v33  ;;  %v6889_v28 = vld [vmem:[#allocation9 + $0x30] sm:$0xff]  }
 0x156   :  { %6388 = vmatprep.subr.bf16.mxu1 %v6889_v28 }
 0x157   :  { %7082 = vtanh.f32 %v336_v42  ;;  %v339_v45 = vmul.f32 0.7978846, %v335_v43  ;;  %v333_v46 = vadd.f32 %v329_v44, %v305_v33  ;;  %6389 = vmatpush3.bf16.msra.mxu1 %v6889_v28  ;;  %v6894_v33 = vld [vmem:[#allocation9 + $0x8] sm:$0xff]  }
 0x158   :  { %6390 = vmatprep.subr.bf16.mxu1 %v6890_v29 }
 0x159   :  { %7084 = vtanh.f32 %v339_v45  ;;  %v337_v47 = vmul.f32 0.7978846, %v333_v46 }
 0x15b   :  { %7086 = vtanh.f32 %v337_v47  ;;  %6391 = vmatpush3.bf16.msra.mxu1 %v6890_v29 }
 0x15c   :  { %6392 = vmatprep.subr.bf16.mxu1 %v6891_v30 }
 0x15f   :  { %6393 = vmatpush3.bf16.msra.mxu1 %v6891_v30 }
 0x160   :  { %6394 = vmatprep.subr.bf16.mxu1 %v6892_v31 }
 0x162   :  { %v7081_v48 = vpop.eup %7080 }
 0x163   :  { %v346_v50 = vadd.f32 1.0, %v7081_v48  ;;  %6395 = vmatpush3.bf16.msra.mxu1 %v6892_v31 }
 0x164   :  { %v7083_v51 = vpop.eup %7082  ;;  %6396 = vmatprep.subr.bf16.mxu1 %v6893_v32 }
 0x165   :  { %v350_v53 = vmul.f32 %v346_v50, %v318_v49  ;;  %v344_v54 = vadd.f32 1.0, %v7083_v51 }
 0x166   :  { %v7085_v55 = vpop.eup %7084 }
 0x167   :  { %v347_v58 = vadd.f32 1.0, %v7085_v55  ;;  %v7715_v59 = vadd.f32 %v350_v53, %v192_v11  ;;  %v348_v60 = vmul.f32 %v344_v54, %v316_v52  ;;  %6397 = vmatpush3.bf16.msra.mxu1 %v6893_v32 }
 0x168   :  { %v7087_v61 = vpop.eup %7086  ;;  %6398 = vmatprep.subr.bf16.mxu1 %v6894_v33 }
 0x169   :  { %v351_v62 = vmul.f32 %v347_v58, %v319_v57  ;;  %v372_v63 = vmul.f32 %v7713_v56, %v7715_v59  ;;  %v7723_v1 = vadd.f32 %v348_v60, %v7702_v4  ;;  %v345_v2 = vadd.f32 1.0, %v7087_v61 }
 0x16a   :  { %v384_v8 = vmul.f32 %v7715_v59, %v7720_v0  ;;  %v412_v11 = vmul.f32 %v7715_v59, %v7715_v59 }
 0x16b   :  { %378 = vadd.xlane.f32.xlu0 %v372_v63  ;;  %v382_v3 = vmul.f32 %v7723_v1, %v7720_v0  ;;  %v7728_v6 = vadd.f32 %v351_v62, %v7708_v12  ;;  %v349_v9 = vmul.f32 %v345_v2, %v317_v7  ;;  %v370_v4 = vmul.f32 %v7713_v56, %v7723_v1 }
 0x16c   :  { %v416_v14 = vmul.f32 %v7713_v56, %v412_v11  ;;  %v410_v15 = vmul.f32 %v7723_v1, %v7723_v1  ;;  %v428_v25 = vmul.f32 %v412_v11, %v7720_v0  ;;  %6399 = vmatpush3.bf16.msra.mxu1 %v6894_v33 }
 0x16d   :  { %386 = vadd.xlane.f32.xlu1 %v382_v3  ;;  %v373_v10 = vmul.f32 %v7713_v56, %v7728_v6  ;;  %v385_v12 = vmul.f32 %v7728_v6, %v7720_v0  ;;  %v7741_v13 = vadd.f32 %v349_v9, %v7704_v5  ;;  %v413_v17 = vmul.f32 %v7728_v6, %v7728_v6 }
 0x16e   :  { %v414_v19 = vmul.f32 %v7713_v56, %v410_v15  ;;  %v426_v21 = vmul.f32 %v410_v15, %v7720_v0  ;;  %6400 = vmatprep.subr.bf16.mxu1 %v6895_v34 }
 0x16f   :  { %390 = vadd.xlane.f32.xlu0 %v384_v8  ;;  %v383_v16 = vmul.f32 %v7741_v13, %v7720_v0  ;;  %v417_v5 = vmul.f32 %v7713_v56, %v413_v17  ;;  %v411_v20 = vmul.f32 %v7741_v13, %v7741_v13  ;;  %v371_v23 = vmul.f32 %v7713_v56, %v7741_v13 }
 0x170   :  { %v429_v26 = vmul.f32 %v413_v17, %v7720_v0  ;;  %6401 = vmatpush3.bf16.msra.mxu1 %v6895_v34 }
 0x171   :  { %380 = vadd.xlane.f32.xlu1 %v373_v10  ;;  %v415_v22 = vmul.f32 %v7713_v56, %v411_v20  ;;  %v427_v24 = vmul.f32 %v411_v20, %v7720_v0 }
 0x173   :  { %374 = vadd.xlane.f32.xlu0 %v370_v4 }
 0x175   :  { %392 = vadd.xlane.f32.xlu1 %v385_v12 }
 0x177   :  { %422 = vadd.xlane.f32.xlu0 %v416_v14 }
 0x179   :  { %388 = vadd.xlane.f32.xlu1 %v383_v16 }
 0x17b   :  { %418 = vadd.xlane.f32.xlu0 %v414_v19 }
 0x17d   :  { %424 = vadd.xlane.f32.xlu1 %v417_v5 }
 0x17f   :  { %430 = vadd.xlane.f32.xlu0 %v426_v21 }
 0x181   :  { %420 = vadd.xlane.f32.xlu1 %v415_v22 }
 0x183   :  { %376 = vadd.xlane.f32.xlu0 %v371_v23 }
 0x185   :  { %432 = vadd.xlane.f32.xlu1 %v427_v24 }
 0x187   :  { %434 = vadd.xlane.f32.xlu0 %v428_v25 }
 0x189   :  { %436 = vadd.xlane.f32.xlu1 %v429_v26 }
 0x1f4   :  { %v379_v35 = vpop.xlane.xlu0 %378 }
 0x1f5   :  { %v396_v55 = vmul.f32 %v7713_v56, %v379_v35 }
 0x1f6   :  { %v387_v36 = vpop.xlane.xlu1 %386 }
 0x1f7   :  { %v398_v44 = vmul.f32 %v387_v36, %v7720_v0 }
 0x1f8   :  { %v391_v37 = vpop.xlane.xlu0 %390 }
 0x1f9   :  { %v400_v52 = vmul.f32 %v391_v37, %v7720_v0 }
 0x1fa   :  { %v381_v38 = vpop.xlane.xlu1 %380 }
 0x1fb   :  { %v404_v2 = vadd.f32 %v400_v52, %v396_v55  ;;  %v397_v3 = vmul.f32 %v7713_v56, %v381_v38 }
 0x1fc   :  { %v375_v39 = vpop.xlane.xlu0 %374 }
 0x1fd   :  { %v394_v42 = vmul.f32 %v7713_v56, %v375_v39  ;;  %v408_v19 = vmul.f32 0.015625, %v404_v2 }
 0x1fe   :  { %v393_v40 = vpop.xlane.xlu1 %392 }
 0x1ff   :  { %v402_v46 = vadd.f32 %v398_v44, %v394_v42  ;;  %v401_v57 = vmul.f32 %v393_v40, %v7720_v0  ;;  %v456_v28 = vmul.f32 %v408_v19, %v408_v19 }
 0x200   :  { %v423_v41 = vpop.xlane.xlu0 %422 }
 0x201   :  { %v406_v49 = vmul.f32 0.015625, %v402_v46  ;;  %v405_v11 = vadd.f32 %v401_v57, %v397_v3  ;;  %v440_v5 = vmul.f32 %v7713_v56, %v423_v41  ;;  %v5798_v41 = vld [vmem:[%s8814_s3] ss:$0 sm:$0xff]  ;;  %v464_v46 = vsub.f32 %v7715_v59, %v408_v19 }
 0x202   :  { %v389_v43 = vpop.xlane.xlu1 %388 }
 0x203   :  { %v454_v60 = vmul.f32 %v406_v49, %v406_v49  ;;  %v399_v61 = vmul.f32 %v389_v43, %v7720_v0  ;;  %v409_v23 = vmul.f32 0.015625, %v405_v11  ;;  %v462_v39 = vsub.f32 %v7723_v1, %v406_v49 }
 0x204   :  { %v419_v45 = vpop.xlane.xlu0 %418 }
 0x205   :  { %v438_v50 = vmul.f32 %v7713_v56, %v419_v45  ;;  %v457_v32 = vmul.f32 %v409_v23, %v409_v23  ;;  %v465_v49 = vsub.f32 %v7728_v6, %v409_v23 }
 0x206   :  { %v425_v47 = vpop.xlane.xlu1 %424 }
 0x207   :  { %v441_v24 = vmul.f32 %v7713_v56, %v425_v47  ;;  %v5799_v47 = vld [vmem:[%s8815_s4] ss:$0 sm:$0xff] }
 0x208   :  { %v431_v48 = vpop.xlane.xlu0 %430 }
 0x209   :  { %v442_v51 = vmul.f32 %v431_v48, %v7720_v0 }
 0x20a   :  { %v421_v53 = vpop.xlane.xlu1 %420 }
 0x20b   :  { %v446_v54 = vadd.f32 %v442_v51, %v438_v50  ;;  %v439_v9 = vmul.f32 %v7713_v56, %v421_v53 }
 0x20c   :  { %v377_v58 = vpop.xlane.xlu0 %376 }
 0x20d   :  { %v450_v62 = vmul.f32 0.015625, %v446_v54  ;;  %v395_v63 = vmul.f32 %v7713_v56, %v377_v58 }
 0x20e   :  { %v433_v7 = vpop.xlane.xlu1 %432 }
 0x20f   :  { %v458_v8 = vsub.f32 %v450_v62, %v454_v60  ;;  %v403_v10 = vadd.f32 %v399_v61, %v395_v63  ;;  %v443_v4 = vmul.f32 %v433_v7, %v7720_v0  ;;  %v5800_v7 = vld [vmem:[%s8817_s6] ss:$0 sm:$0xff] }
 0x210   :  { %v435_v12 = vpop.xlane.xlu0 %434 }
 0x211   :  { %v466_v14 = vadd.f32 1e-05, %v458_v8  ;;  %v407_v15 = vmul.f32 0.015625, %v403_v10  ;;  %v447_v16 = vadd.f32 %v443_v4, %v439_v9  ;;  %v444_v17 = vmul.f32 %v435_v12, %v7720_v0 }
 0x212   :  { %v437_v20 = vpop.xlane.xlu1 %436 }
 0x213   :  { %7088 = vrsqrt.f32 %v466_v14  ;;  %v455_v21 = vmul.f32 %v407_v15, %v407_v15  ;;  %v451_v22 = vmul.f32 0.015625, %v447_v16  ;;  %v448_v25 = vadd.f32 %v444_v17, %v440_v5 }
 0x214   :  { %v445_v26 = vmul.f32 %v437_v20, %v7720_v0  ;;  %v463_v42 = vsub.f32 %v7741_v13, %v407_v15 }
 0x215   :  { %v459_v27 = vsub.f32 %v451_v22, %v455_v21  ;;  %v452_v29 = vmul.f32 0.015625, %v448_v25 }
 0x216   :  { %v449_v30 = vadd.f32 %v445_v26, %v441_v24 }
 0x217   :  { %v467_v31 = vadd.f32 1e-05, %v459_v27  ;;  %v460_v33 = vsub.f32 %v452_v29, %v456_v28 }
 0x218   :  { %v453_v34 = vmul.f32 0.015625, %v449_v30 }
 0x219   :  { %7090 = vrsqrt.f32 %v467_v31  ;;  %v468_v35 = vadd.f32 1e-05, %v460_v33 }
 0x21a   :  { %v461_v36 = vsub.f32 %v453_v34, %v457_v32 }
 0x21b   :  { %7092 = vrsqrt.f32 %v468_v35 }
 0x21c   :  { %v469_v37 = vadd.f32 1e-05, %v461_v36 }
 0x21e   :  { %7094 = vrsqrt.f32 %v469_v37 }
 0x220   :  { %v7089_v38 = vpop.eup %7088 }
 0x221   :  { %v474_v40 = vmul.f32 %v7089_v38, %v462_v39 }
 0x223   :  { %v484_v45 = vmul.f32 %v5798_v41, %v474_v40 }
 0x225   :  { %v7787_v53 = vadd.f32 %v5799_v47, %v484_v45 }
 0x226   :  { %v7091_v43 = vpop.eup %7090 }
 0x227   :  { %v475_v44 = vmul.f32 %v7091_v43, %v463_v42 }
 0x228   :  { %v7093_v48 = vpop.eup %7092 }
 0x229   :  { %v485_v50 = vmul.f32 %v5798_v41, %v475_v44  ;;  %v476_v51 = vmul.f32 %v7093_v48, %v464_v46 }
 0x22b   :  { %v7095_v52 = vpop.eup %7094  ;;  %v495_v54 = vadd.f32 %v5799_v47, %v485_v50  ;;  %v486_v57 = vmul.f32 %v5798_v41, %v476_v51 }
 0x22c   :  { %v477_v55 = vmul.f32 %v7095_v52, %v465_v49 }
 0x22d   :  { %v515_v58 = vpack.c.bf16 %v495_v54, %v7787_v53  ;;  %v7790_v61 = vadd.f32 %v5799_v47, %v486_v57 }
 0x22e   :  { %v487_v60 = vmul.f32 %v5798_v41, %v477_v55 }
 0x22f   :  { %6402 = vmatprep.mubr.bf16.mxu1 %v515_v58 }
 0x230   :  { %v7792_v62 = vadd.f32 %v5799_v47, %v487_v60 }
 0x232   :  { %v516_v63 = vpack.c.bf16 %v7792_v62, %v7790_v61 }
 0x234   :  { %6403 = vmatmul.mubr.bf16.vlgmr.msra.gmra.mxu1 %v516_v63 }
 0x2f4   :  { %v6404_v2 = vpop.f32.mrf.mxu1 }
 0x2f5   :  { %v614_v4 = vadd.f32 %v6404_v2, %v5800_v7 }
 0x2f6   :  { %v605_v3 = vpop.f32.mrf.mxu1 }
 0x2f7   :  { %v606_v11 = vadd.f32 %v5800_v7, %v605_v3 }
 0x2f8   :  { %v6405_v8 = vpop.f32.mrf.mxu1 }
 0x2f9   :  { %v617_v9 = vadd.f32 %v6405_v8, %v5800_v7 }
 0x2fa   :  { %v608_v10 = vpop.f32.mrf.mxu1 }
 0x2fb   :  { %v609_v12 = vadd.f32 %v5800_v7, %v608_v10  ;;  %v621_v14 = vmax.f32 %v614_v4, %v617_v9 }
 0x2fd   :  { %v620_v15 = vmax.f32 %v606_v11, %v609_v12 }
 0x2ff   :  { %v622_v16 = vmax.f32 %v620_v15, %v621_v14 }
 0x301   :  { %v623_v17 = vrot.slane %v622_v16, 4 }
 0x303   :  { %v624_v19 = vmax.f32 %v622_v16, %v623_v17 }
 0x305   :  { %v625_v5 = vrot.slane %v624_v19, 2 }
 0x307   :  { %v626_v20 = vmax.f32 %v624_v19, %v625_v5 }
 0x309   :  { %v627_v21 = vrot.slane %v626_v20, 1 }
 0x30b   :  { %v628_v22 = vmax.f32 %v626_v20, %v627_v21  ;;  %v6896_v20 = vld [vmem:[#allocation11 + $0x38] sm:$0xff]   ;;  %v6897_v21 = vld [vmem:[#allocation11 + $0x30] sm:$0xff]  }
 0x30c   :  { %6406 = vmatprep.subr.bf16.mxu0 %v6896_v20 }
 0x30d   :  { %v629_v23 = vsub.f32 %v606_v11, %v628_v22  ;;  %v630_v24 = vsub.f32 %v609_v12, %v628_v22  ;;  %v631_v25 = vsub.f32 %v614_v4, %v628_v22  ;;  %v632_v26 = vsub.f32 %v617_v9, %v628_v22  ;;  %6407 = vmatpush3.bf16.msra.mxu0 %v6896_v20  ;;  %v6898_v22 = vld [vmem:[#allocation11 + $0x28] sm:$0xff]  }
 0x30e   :  { %6408 = vmatprep.subr.bf16.mxu0 %v6897_v21 }
 0x30f   :  { %v633_v27 = vmul.f32 1.442695, %v629_v23  ;;  %v635_v28 = vmul.f32 1.442695, %v630_v24  ;;  %v637_v29 = vmul.f32 1.442695, %v631_v25 }
 0x310   :  { %v639_v30 = vmul.f32 1.442695, %v632_v26  ;;  %v6899_v23 = vld [vmem:[#allocation11 + $0x20] sm:$0xff]   ;;  %v6900_v24 = vld [vmem:[#allocation11 + $0x18] sm:$0xff]   ;;  %v6901_v25 = vld [vmem:[#allocation11 + $0x10] sm:$0xff]  }
 0x311   :  { %7096 = vpow2.f32 %v633_v27  ;;  %6409 = vmatpush3.bf16.msra.mxu0 %v6897_v21  ;;  %v6902_v26 = vld [vmem:[#allocation11 + $0x8] sm:$0xff]   ;;  %v6903_v27 = vld [vmem:[#allocation11] sm:$0xff]  }
 0x312   :  { %7098 = vpow2.f32 %v635_v28  ;;  %6410 = vmatprep.subr.bf16.mxu0 %v6898_v22 }
 0x313   :  { %7100 = vpow2.f32 %v637_v29 }
 0x314   :  { %7102 = vpow2.f32 %v639_v30 }
 0x315   :  { %6411 = vmatpush3.bf16.msra.mxu0 %v6898_v22 }
 0x316   :  { %6412 = vmatprep.subr.bf16.mxu0 %v6899_v23 }
 0x319   :  { %6413 = vmatpush3.bf16.msra.mxu0 %v6899_v23 }
 0x31a   :  { %6414 = vmatprep.subr.bf16.mxu0 %v6900_v24 }
 0x31d   :  { %6415 = vmatpush3.bf16.msra.mxu0 %v6900_v24 }
 0x31e   :  { %v7097_v31 = vpop.eup %7096  ;;  %6416 = vmatprep.subr.bf16.mxu0 %v6901_v25 }
 0x31f   :  { %v7099_v32 = vpop.eup %7098 }
 0x320   :  { %v641_v33 = vadd.f32 %v7099_v32, %v7097_v31  ;;  %v7101_v34 = vpop.eup %7100 }
 0x321   :  { %v7103_v36 = vpop.eup %7102  ;;  %6417 = vmatpush3.bf16.msra.mxu0 %v6901_v25 }
 0x322   :  { %v642_v35 = vadd.f32 %v7101_v34, %v641_v33  ;;  %6418 = vmatprep.subr.bf16.mxu0 %v6902_v26 }
 0x324   :  { %v643_v37 = vadd.f32 %v7103_v36, %v642_v35 }
 0x325   :  { %6419 = vmatpush3.bf16.msra.mxu0 %v6902_v26 }
 0x326   :  { %v644_v38 = vrot.slane %v643_v37, 4  ;;  %6420 = vmatprep.subr.bf16.mxu0 %v6903_v27 }
 0x328   :  { %v645_v39 = vadd.f32 %v644_v38, %v643_v37 }
 0x329   :  { %6421 = vmatpush3.bf16.msra.mxu0 %v6903_v27 }
 0x32a   :  { %v646_v40 = vrot.slane %v645_v39, 2 }
 0x32c   :  { %v647_v41 = vadd.f32 %v646_v40, %v645_v39 }
 0x32e   :  { %v648_v42 = vrot.slane %v647_v41, 1 }
 0x330   :  { %v649_v43 = vadd.f32 %v648_v42, %v647_v41 }
 0x332   :  { %7104 = vrcp.f32 %v649_v43 }
 0x33f   :  { %v7105_v44 = vpop.eup %7104 }
 0x340   :  { %v652_v45 = vmul.f32 %v7105_v44, %v7099_v32  ;;  %v651_v46 = vmul.f32 %v7105_v44, %v7097_v31  ;;  %v654_v50 = vmul.f32 %v7105_v44, %v7103_v36  ;;  %v653_v49 = vmul.f32 %v7105_v44, %v7101_v34 }
 0x342   :  { %v656_v47 = vmul.f32 %v652_v45, %v495_v54  ;;  %v655_v48 = vmul.f32 %v651_v46, %v7787_v53  ;;  %v658_v58 = vmul.f32 %v654_v50, %v7792_v62  ;;  %v657_v60 = vmul.f32 %v653_v49, %v7790_v61 }
 0x344   :  { %v7800_v51 = vadd.f32 %v656_v47, %v495_v54  ;;  %v7803_v52 = vadd.f32 %v655_v48, %v7787_v53  ;;  %v7816_v53 = vadd.f32 %v658_v58, %v7792_v62  ;;  %v7819_v2 = vadd.f32 %v657_v60, %v7790_v61 }
 0x346   :  { %v666_v55 = vmul.f32 %v7713_v56, %v7800_v51  ;;  %v665_v57 = vmul.f32 %v7713_v56, %v7803_v52  ;;  %v678_v63 = vmul.f32 %v7800_v51, %v7720_v0  ;;  %v677_v54 = vmul.f32 %v7803_v52, %v7720_v0 }
 0x347   :  { %v668_v3 = vmul.f32 %v7713_v56, %v7816_v53  ;;  %v667_v7 = vmul.f32 %v7713_v56, %v7819_v2  ;;  %v680_v8 = vmul.f32 %v7816_v53, %v7720_v0  ;;  %v679_v62 = vmul.f32 %v7819_v2, %v7720_v0 }
 0x348   :  { %671 = vadd.xlane.f32.xlu1 %v666_v55  ;;  %669 = vadd.xlane.f32.xlu0 %v665_v57  ;;  %v706_v61 = vmul.f32 %v7800_v51, %v7800_v51  ;;  %v705_v9 = vmul.f32 %v7803_v52, %v7803_v52  ;;  %v708_v14 = vmul.f32 %v7816_v53, %v7816_v53 }
 0x349   :  { %v707_v15 = vmul.f32 %v7819_v2, %v7819_v2 }
 0x34a   :  { %v710_v10 = vmul.f32 %v7713_v56, %v706_v61  ;;  %v709_v4 = vmul.f32 %v7713_v56, %v705_v9  ;;  %v722_v11 = vmul.f32 %v706_v61, %v7720_v0  ;;  %v721_v12 = vmul.f32 %v705_v9, %v7720_v0 }
 0x34b   :  { %v712_v16 = vmul.f32 %v7713_v56, %v708_v14  ;;  %v711_v17 = vmul.f32 %v7713_v56, %v707_v15  ;;  %v724_v19 = vmul.f32 %v708_v14, %v7720_v0  ;;  %v723_v5 = vmul.f32 %v707_v15, %v7720_v0 }
 0x34c   :  { %683 = vadd.xlane.f32.xlu1 %v678_v63  ;;  %681 = vadd.xlane.f32.xlu0 %v677_v54 }
 0x350   :  { %675 = vadd.xlane.f32.xlu1 %v668_v3  ;;  %673 = vadd.xlane.f32.xlu0 %v667_v7 }
 0x354   :  { %687 = vadd.xlane.f32.xlu1 %v680_v8  ;;  %685 = vadd.xlane.f32.xlu0 %v679_v62 }
 0x358   :  { %715 = vadd.xlane.f32.xlu1 %v710_v10  ;;  %713 = vadd.xlane.f32.xlu0 %v709_v4 }
 0x35c   :  { %727 = vadd.xlane.f32.xlu1 %v722_v11  ;;  %725 = vadd.xlane.f32.xlu0 %v721_v12 }
 0x360   :  { %719 = vadd.xlane.f32.xlu1 %v712_v16  ;;  %717 = vadd.xlane.f32.xlu0 %v711_v17 }
 0x364   :  { %731 = vadd.xlane.f32.xlu1 %v724_v19  ;;  %729 = vadd.xlane.f32.xlu0 %v723_v5 }
 0x3d1   :  { %v672_v28 = vpop.xlane.xlu1 %671  ;;  %v670_v29 = vpop.xlane.xlu0 %669 }
 0x3d2   :  { %v690_v38 = vmul.f32 %v7713_v56, %v672_v28  ;;  %v689_v39 = vmul.f32 %v7713_v56, %v670_v29 }
 0x3d5   :  { %v684_v30 = vpop.xlane.xlu1 %683  ;;  %v682_v31 = vpop.xlane.xlu0 %681 }
 0x3d6   :  { %v694_v34 = vmul.f32 %v684_v30, %v7720_v0  ;;  %v693_v35 = vmul.f32 %v682_v31, %v7720_v0 }
 0x3d8   :  { %v698_v40 = vadd.f32 %v694_v34, %v690_v38  ;;  %v697_v41 = vadd.f32 %v693_v35, %v689_v39  ;;  %v5809_v38 = vld [vmem:[%s8818_s7] ss:$0 sm:$0xff] }
 0x3d9   :  { %v676_v32 = vpop.xlane.xlu1 %675  ;;  %v674_v33 = vpop.xlane.xlu0 %673 }
 0x3da   :  { %v702_v44 = vmul.f32 0.015625, %v698_v40  ;;  %v701_v45 = vmul.f32 0.015625, %v697_v41  ;;  %v692_v60 = vmul.f32 %v7713_v56, %v676_v32  ;;  %v691_v63 = vmul.f32 %v7713_v56, %v674_v33  ;;  %v5810_v41 = vld [vmem:[%s8819_s8] ss:$0 sm:$0xff] }
 0x3dc   :  { %v750_v9 = vmul.f32 %v702_v44, %v702_v44  ;;  %v749_v10 = vmul.f32 %v701_v45, %v701_v45  ;;  %v758_v35 = vsub.f32 %v7800_v51, %v702_v44 }
 0x3dd   :  { %v688_v36 = vpop.xlane.xlu1 %687  ;;  %v686_v37 = vpop.xlane.xlu0 %685 }
 0x3de   :  { %v696_v46 = vmul.f32 %v688_v36, %v7720_v0  ;;  %v695_v47 = vmul.f32 %v686_v37, %v7720_v0  ;;  %v757_v37 = vsub.f32 %v7803_v52, %v701_v45 }
 0x3e0   :  { %v700_v7 = vadd.f32 %v696_v46, %v692_v60  ;;  %v699_v8 = vadd.f32 %v695_v47, %v691_v63 }
 0x3e1   :  { %v716_v42 = vpop.xlane.xlu1 %715  ;;  %v714_v43 = vpop.xlane.xlu0 %713 }
 0x3e2   :  { %v734_v49 = vmul.f32 %v7713_v56, %v716_v42  ;;  %v733_v55 = vmul.f32 %v7713_v56, %v714_v43  ;;  %v704_v15 = vmul.f32 0.015625, %v700_v7  ;;  %v703_v16 = vmul.f32 0.015625, %v699_v8  ;;  %v6907_v7 = vld [vmem:[#allocation12 + $0x20] sm:$0xff]   ;;  %v6908_v8 = vld [vmem:[#allocation12 + $0x18] sm:$0xff]  }
 0x3e4   :  { %v752_v27 = vmul.f32 %v704_v15, %v704_v15  ;;  %v751_v28 = vmul.f32 %v703_v16, %v703_v16  ;;  %v760_v51 = vsub.f32 %v7816_v53, %v704_v15  ;;  %v759_v44 = vsub.f32 %v7819_v2, %v703_v16  ;;  %v6904_v53 = vld [vmem:[#allocation12 + $0x38] sm:$0xff]   ;;  %v6905_v2 = vld [vmem:[#allocation12 + $0x30] sm:$0xff]  }
 0x3e5   :  { %v728_v48 = vpop.xlane.xlu1 %727  ;;  %v726_v50 = vpop.xlane.xlu0 %725  ;;  %6426 = vmatprep.subr.bf16.mxu1 %v6904_v53 }
 0x3e6   :  { %v738_v57 = vmul.f32 %v728_v48, %v7720_v0  ;;  %v737_v58 = vmul.f32 %v726_v50, %v7720_v0  ;;  %6427 = vmatpush3.bf16.msra.mxu1 %v6904_v53 }
 0x3e7   :  { %6428 = vmatprep.subr.bf16.mxu1 %v6905_v2 }
 0x3e8   :  { %v742_v54 = vadd.f32 %v738_v57, %v734_v49  ;;  %v741_v3 = vadd.f32 %v737_v58, %v733_v55 }
 0x3e9   :  { %v720_v62 = vpop.xlane.xlu1 %719  ;;  %v718_v61 = vpop.xlane.xlu0 %717 }
 0x3ea   :  { %v746_v4 = vmul.f32 0.015625, %v742_v54  ;;  %v745_v11 = vmul.f32 0.015625, %v741_v3  ;;  %v736_v17 = vmul.f32 %v7713_v56, %v720_v62  ;;  %v735_v19 = vmul.f32 %v7713_v56, %v718_v61  ;;  %6429 = vmatpush3.bf16.msra.mxu1 %v6905_v2  ;;  %v6906_v3 = vld [vmem:[#allocation12 + $0x28] sm:$0xff]   ;;  %v6909_v62 = vld [vmem:[#allocation12 + $0x10] sm:$0xff]  }
 0x3eb   :  { %6430 = vmatprep.subr.bf16.mxu1 %v6906_v3  ;;  %v6910_v61 = vld [vmem:[#allocation12 + $0x8] sm:$0xff]  }
 0x3ec   :  { %v754_v12 = vsub.f32 %v746_v4, %v750_v9  ;;  %v753_v14 = vsub.f32 %v745_v11, %v749_v10  ;;  %v6911_v9 = vld [vmem:[#allocation12] sm:$0xff]   ;;  %v5811_v10 = vld [vmem:[%s8821_s10] ss:$0 sm:$0xff] }
 0x3ed   :  { %v732_v5 = vpop.xlane.xlu1 %731  ;;  %v730_v20 = vpop.xlane.xlu0 %729 }
 0x3ee   :  { %v762_v21 = vadd.f32 1e-05, %v754_v12  ;;  %v761_v22 = vadd.f32 1e-05, %v753_v14  ;;  %v740_v23 = vmul.f32 %v732_v5, %v7720_v0  ;;  %v739_v24 = vmul.f32 %v730_v20, %v7720_v0  ;;  %6431 = vmatpush3.bf16.msra.mxu1 %v6906_v3  ;;  %v5820_v3 = vld [vmem:[%s8823_s12] ss:$0 sm:$0xff] }
 0x3ef   :  { %6432 = vmatprep.subr.bf16.mxu1 %v6907_v7 }
 0x3f0   :  { %7106 = vrsqrt.f32 %v762_v21  ;;  %v744_v25 = vadd.f32 %v740_v23, %v736_v17  ;;  %v743_v26 = vadd.f32 %v739_v24, %v735_v19 }
 0x3f1   :  { %7108 = vrsqrt.f32 %v761_v22 }
 0x3f2   :  { %v748_v29 = vmul.f32 0.015625, %v744_v25  ;;  %v747_v30 = vmul.f32 0.015625, %v743_v26  ;;  %6433 = vmatpush3.bf16.msra.mxu1 %v6907_v7 }
 0x3f3   :  { %6434 = vmatprep.subr.bf16.mxu1 %v6908_v8 }
 0x3f4   :  { %v756_v31 = vsub.f32 %v748_v29, %v752_v27  ;;  %v755_v32 = vsub.f32 %v747_v30, %v751_v28 }
 0x3f6   :  { %v764_v33 = vadd.f32 1e-05, %v756_v31  ;;  %v763_v34 = vadd.f32 1e-05, %v755_v32  ;;  %6435 = vmatpush3.bf16.msra.mxu1 %v6908_v8 }
 0x3f7   :  { %6436 = vmatprep.subr.bf16.mxu1 %v6909_v62 }
 0x3f8   :  { %7110 = vrsqrt.f32 %v764_v33 }
 0x3f9   :  { %7112 = vrsqrt.f32 %v763_v34 }
 0x3fa   :  { %6437 = vmatpush3.bf16.msra.mxu1 %v6909_v62 }
 0x3fb   :  { %6438 = vmatprep.subr.bf16.mxu1 %v6910_v61 }
 0x3fd   :  { %v7107_v36 = vpop.eup %7106 }
 0x3fe   :  { %v7109_v39 = vpop.eup %7108  ;;  %v770_v40 = vmul.f32 %v7107_v36, %v758_v35  ;;  %6439 = vmatpush3.bf16.msra.mxu1 %v6910_v61 }
 0x3ff   :  { %v769_v42 = vmul.f32 %v7109_v39, %v757_v37  ;;  %6440 = vmatprep.subr.bf16.mxu1 %v6911_v9 }
 0x400   :  { %v780_v43 = vmul.f32 %v5809_v38, %v770_v40 }
 0x401   :  { %v779_v46 = vmul.f32 %v5809_v38, %v769_v42 }
 0x402   :  { %v7869_v47 = vadd.f32 %v5810_v41, %v780_v43  ;;  %6441 = vmatpush3.bf16.msra.mxu1 %v6911_v9 }
 0x403   :  { %v7871_v48 = vadd.f32 %v5810_v41, %v779_v46 }
 0x405   :  { %v7111_v52 = vpop.eup %7110  ;;  %v810_v45 = vpack.c.bf16 %v7869_v47, %v7871_v48 }
 0x406   :  { %v7113_v50 = vpop.eup %7112  ;;  %v772_v49 = vmul.f32 %v7111_v52, %v760_v51 }
 0x407   :  { %6422 = vmatprep.mubr.bf16.mxu0 %v810_v45  ;;  %v771_v55 = vmul.f32 %v7113_v50, %v759_v44 }
 0x408   :  { %v782_v57 = vmul.f32 %v5809_v38, %v772_v49 }
 0x409   :  { %v781_v58 = vmul.f32 %v5809_v38, %v771_v55 }
 0x40a   :  { %v7877_v60 = vadd.f32 %v5810_v41, %v782_v57 }
 0x40b   :  { %v7879_v63 = vadd.f32 %v5810_v41, %v781_v58 }
 0x40d   :  { %v811_v54 = vpack.c.bf16 %v7877_v60, %v7879_v63 }
 0x40f   :  { %6423 = vmatmul.mubr.bf16.vlgmr.msra.gmra.mxu0 %v811_v54 }
 0x4cf   :  { %v6424_v4 = vpop.f32.mrf.mxu0 }
 0x4d0   :  { %v909_v11 = vadd.f32 %v6424_v4, %v5811_v10 }
 0x4d1   :  { %v900_v12 = vpop.f32.mrf.mxu0 }
 0x4d2   :  { %v921_v14 = vmul.f32 0.044715, %v909_v11  ;;  %v901_v15 = vadd.f32 %v5811_v10, %v900_v12  ;;  %v917_v49 = vmul.f32 0.5, %v909_v11 }
 0x4d3   :  { %v6425_v16 = vpop.f32.mrf.mxu0 }
 0x4d4   :  { %v925_v17 = vmul.f32 %v921_v14, %v909_v11  ;;  %v919_v19 = vmul.f32 0.044715, %v901_v15  ;;  %v912_v5 = vadd.f32 %v6425_v16, %v5811_v10  ;;  %v915_v44 = vmul.f32 0.5, %v901_v15 }
 0x4d5   :  { %v903_v20 = vpop.f32.mrf.mxu0 }
 0x4d6   :  { %v929_v21 = vmul.f32 %v925_v17, %v909_v11  ;;  %v923_v22 = vmul.f32 %v919_v19, %v901_v15  ;;  %v922_v23 = vmul.f32 0.044715, %v912_v5  ;;  %v904_v24 = vadd.f32 %v5811_v10, %v903_v20 }
 0x4d7   :  { %v918_v51 = vmul.f32 0.5, %v912_v5 }
 0x4d8   :  { %v933_v25 = vadd.f32 %v929_v21, %v909_v11  ;;  %v927_v26 = vmul.f32 %v923_v22, %v901_v15  ;;  %v926_v27 = vmul.f32 %v922_v23, %v912_v5  ;;  %v920_v28 = vmul.f32 0.044715, %v904_v24 }
 0x4d9   :  { %v916_v45 = vmul.f32 0.5, %v904_v24 }
 0x4da   :  { %v930_v29 = vmul.f32 %v926_v27, %v912_v5  ;;  %v924_v30 = vmul.f32 %v920_v28, %v904_v24  ;;  %v931_v31 = vadd.f32 %v927_v26, %v901_v15  ;;  %v937_v32 = vmul.f32 0.7978846, %v933_v25 }
 0x4dc   :  { %v934_v33 = vadd.f32 %v930_v29, %v912_v5  ;;  %v928_v34 = vmul.f32 %v924_v30, %v904_v24  ;;  %v935_v35 = vmul.f32 0.7978846, %v931_v31 }
 0x4de   :  { %v938_v36 = vmul.f32 0.7978846, %v934_v33  ;;  %v932_v37 = vadd.f32 %v928_v34, %v904_v24  ;;  %7114 = vtanh.f32 %v935_v35 }
 0x4df   :  { %7116 = vtanh.f32 %v937_v32 }
 0x4e0   :  { %7118 = vtanh.f32 %v938_v36  ;;  %v936_v38 = vmul.f32 0.7978846, %v932_v37 }
 0x4e2   :  { %7120 = vtanh.f32 %v936_v38 }
 0x4eb   :  { %v7115_v39 = vpop.eup %7114 }
 0x4ec   :  { %v7117_v40 = vpop.eup %7116  ;;  %v943_v42 = vadd.f32 1.0, %v7115_v39 }
 0x4ed   :  { %v7119_v41 = vpop.eup %7118  ;;  %v945_v52 = vadd.f32 1.0, %v7117_v40 }
 0x4ee   :  { %v946_v43 = vadd.f32 1.0, %v7119_v41  ;;  %v947_v57 = vmul.f32 %v943_v42, %v915_v44 }
 0x4ef   :  { %v7121_v46 = vpop.eup %7120  ;;  %v949_v54 = vmul.f32 %v945_v52, %v917_v49 }
 0x4f0   :  { %v944_v50 = vadd.f32 1.0, %v7121_v46  ;;  %v950_v55 = vmul.f32 %v946_v43, %v918_v51 }
 0x4f2   :  { %v948_v58 = vmul.f32 %v944_v50, %v916_v45  ;;  %v969_v2 = vpack.c.bf16 %v950_v55, %v949_v54 }
 0x4f4   :  { %v968_v53 = vpack.c.bf16 %v948_v58, %v947_v57 }
 0x4f6   :  { %6442 = vmatprep.mubr.bf16.mxu1 %v968_v53 }
 0x4f7   :  { %6443 = vmatmul.mubr.bf16.vlgmr.msra.gmra.mxu1 %v969_v2 }
 0x5b7   :  { %v6444_v7 = vpop.f32.mrf.mxu1 }
 0x5b8   :  { %v1067_v8 = vadd.f32 %v6444_v7, %v5820_v3 }
 0x5b9   :  { %v1058_v62 = vpop.f32.mrf.mxu1 }
 0x5ba   :  { %v1075_v61 = vadd.f32 %v1067_v8, %v7879_v63  ;;  %v1059_v9 = vadd.f32 %v5820_v3, %v1058_v62 }
 0x5bb   :  { %v6445_v10 = vpop.f32.mrf.mxu1 }
 0x5bc   :  { %v1083_v4 = vmul.f32 0.044715, %v1075_v61  ;;  %v1073_v11 = vadd.f32 %v1059_v9, %v7871_v48  ;;  %v1070_v12 = vadd.f32 %v6445_v10, %v5820_v3 }
 0x5bd   :  { %v1061_v14 = vpop.f32.mrf.mxu1 }
 0x5be   :  { %v1087_v15 = vmul.f32 %v1083_v4, %v1075_v61  ;;  %v1081_v16 = vmul.f32 0.044715, %v1073_v11  ;;  %v1076_v17 = vadd.f32 %v1070_v12, %v7877_v60  ;;  %v1062_v19 = vadd.f32 %v5820_v3, %v1061_v14 }
 0x5bf   :  { %v1077_v51 = vmul.f32 0.5, %v1073_v11 }
 0x5c0   :  { %v1091_v5 = vmul.f32 %v1087_v15, %v1075_v61  ;;  %v1085_v20 = vmul.f32 %v1081_v16, %v1073_v11  ;;  %v1084_v21 = vmul.f32 0.044715, %v1076_v17  ;;  %v1074_v22 = vadd.f32 %v1062_v19, %v7869_v47  ;;  %v6912_v16 = vld [vmem:[#allocation9 + $0x78] sm:$0xff]   ;;  %v6914_v19 = vld [vmem:[#allocation9 + $0x68] sm:$0xff]  }
 0x5c1   :  { %v1079_v47 = vmul.f32 0.5, %v1075_v61  ;;  %v1080_v40 = vmul.f32 0.5, %v1076_v17  ;;  %6446 = vmatprep.subr.bf16.mxu0 %v6912_v16 }
 0x5c2   :  { %v1095_v23 = vadd.f32 %v1091_v5, %v1075_v61  ;;  %v1089_v24 = vmul.f32 %v1085_v20, %v1073_v11  ;;  %v1088_v63 = vmul.f32 %v1084_v21, %v1076_v17  ;;  %v1082_v25 = vmul.f32 0.044715, %v1074_v22  ;;  %6447 = vmatpush3.bf16.msra.mxu0 %v6912_v16  ;;  %v6915_v5 = vld [vmem:[#allocation9 + $0x60] sm:$0xff]   ;;  %v6916_v20 = vld [vmem:[#allocation9 + $0x58] sm:$0xff]   ;;  %v6917_v21 = vld [vmem:[#allocation9 + $0x50] sm:$0xff]  }
 0x5c3   :  { %v1078_v49 = vmul.f32 0.5, %v1074_v22 }
 0x5c4   :  { %v1093_v26 = vadd.f32 %v1089_v24, %v1073_v11  ;;  %v1092_v27 = vmul.f32 %v1088_v63, %v1076_v17  ;;  %v1086_v28 = vmul.f32 %v1082_v25, %v1074_v22  ;;  %v1099_v48 = vmul.f32 0.7978846, %v1095_v23  ;;  %v6919_v23 = vld [vmem:[#allocation9 + $0x40] sm:$0xff]  }
 0x5c6   :  { %v1096_v29 = vadd.f32 %v1092_v27, %v1076_v17  ;;  %v1090_v30 = vmul.f32 %v1086_v28, %v1074_v22  ;;  %7122 = vtanh.f32 %v1099_v48  ;;  %v1097_v31 = vmul.f32 0.7978846, %v1093_v26  ;;  %v6913_v17 = vld [vmem:[#allocation9 + $0x70] sm:$0xff]  }
 0x5c7   :  { %6448 = vmatprep.subr.bf16.mxu0 %v6913_v17 }
 0x5c8   :  { %v1094_v32 = vadd.f32 %v1090_v30, %v1074_v22  ;;  %v1100_v60 = vmul.f32 0.7978846, %v1096_v29  ;;  %7124 = vtanh.f32 %v1097_v31  ;;  %6449 = vmatpush3.bf16.msra.mxu0 %v6913_v17  ;;  %v6918_v22 = vld [vmem:[#allocation9 + $0x48] sm:$0xff]  }
 0x5c9   :  { %6450 = vmatprep.subr.bf16.mxu0 %v6914_v19 }
 0x5ca   :  { %7126 = vtanh.f32 %v1100_v60  ;;  %v1098_v33 = vmul.f32 0.7978846, %v1094_v32 }
 0x5cc   :  { %7128 = vtanh.f32 %v1098_v33  ;;  %6451 = vmatpush3.bf16.msra.mxu0 %v6914_v19 }
 0x5cd   :  { %6452 = vmatprep.subr.bf16.mxu0 %v6915_v5 }
 0x5d0   :  { %6453 = vmatpush3.bf16.msra.mxu0 %v6915_v5 }
 0x5d1   :  { %6454 = vmatprep.subr.bf16.mxu0 %v6916_v20 }
 0x5d3   :  { %v7123_v34 = vpop.eup %7122 }
 0x5d4   :  { %v1107_v35 = vadd.f32 1.0, %v7123_v34  ;;  %6455 = vmatpush3.bf16.msra.mxu0 %v6916_v20 }
 0x5d5   :  { %v7125_v36 = vpop.eup %7124  ;;  %6456 = vmatprep.subr.bf16.mxu0 %v6917_v21 }
 0x5d6   :  { %v7893_v37 = vmul.f32 %v1107_v35, %v1079_v47  ;;  %v1105_v42 = vadd.f32 1.0, %v7125_v36 }
 0x5d7   :  { %v7127_v38 = vpop.eup %7126 }
 0x5d8   :  { %v1119_v39 = vmul.f32 %v7713_v56, %v7893_v37  ;;  %v1108_v41 = vadd.f32 1.0, %v7127_v38  ;;  %v1131_v52 = vmul.f32 %v7893_v37, %v7720_v0  ;;  %v7903_v45 = vmul.f32 %v1105_v42, %v1077_v51  ;;  %6457 = vmatpush3.bf16.msra.mxu0 %v6917_v21 }
 0x5d9   :  { %v7129_v43 = vpop.eup %7128  ;;  %v1159_v2 = vmul.f32 %v7893_v37, %v7893_v37  ;;  %6458 = vmatprep.subr.bf16.mxu0 %v6918_v22 }
 0x5da   :  { %1125 = vadd.xlane.f32.xlu0 %v1119_v39  ;;  %v7897_v46 = vmul.f32 %v1108_v41, %v1080_v40  ;;  %v1106_v50 = vadd.f32 1.0, %v7129_v43  ;;  %v1117_v57 = vmul.f32 %v7713_v56, %v7903_v45  ;;  %v1129_v53 = vmul.f32 %v7903_v45, %v7720_v0 }
 0x5db   :  { %v1163_v7 = vmul.f32 %v7713_v56, %v1159_v2  ;;  %v1157_v62 = vmul.f32 %v7903_v45, %v7903_v45  ;;  %v1175_v14 = vmul.f32 %v1159_v2, %v7720_v0 }
 0x5dc   :  { %v1120_v44 = vmul.f32 %v7713_v56, %v7897_v46  ;;  %v1132_v55 = vmul.f32 %v7897_v46, %v7720_v0  ;;  %v7909_v58 = vmul.f32 %v1106_v50, %v1078_v49  ;;  %v1160_v8 = vmul.f32 %v7897_v46, %v7897_v46  ;;  %6459 = vmatpush3.bf16.msra.mxu0 %v6918_v22 }
 0x5dd   :  { %v1161_v9 = vmul.f32 %v7713_v56, %v1157_v62  ;;  %v1173_v11 = vmul.f32 %v1157_v62, %v7720_v0  ;;  %6460 = vmatprep.subr.bf16.mxu0 %v6919_v23 }
 0x5de   :  { %1137 = vadd.xlane.f32.xlu0 %v1131_v52  ;;  %1127 = vadd.xlane.f32.xlu1 %v1120_v44  ;;  %v1118_v54 = vmul.f32 %v7713_v56, %v7909_v58  ;;  %v1130_v3 = vmul.f32 %v7909_v58, %v7720_v0  ;;  %v1164_v61 = vmul.f32 %v7713_v56, %v1160_v8 }
 0x5df   :  { %v1158_v10 = vmul.f32 %v7909_v58, %v7909_v58  ;;  %v1176_v15 = vmul.f32 %v1160_v8, %v7720_v0 }
 0x5e0   :  { %6461 = vmatpush3.bf16.msra.mxu0 %v6919_v23 }
 0x5e1   :  { %v1162_v4 = vmul.f32 %v7713_v56, %v1158_v10  ;;  %v1174_v12 = vmul.f32 %v1158_v10, %v7720_v0 }
 0x5e2   :  { %1139 = vadd.xlane.f32.xlu1 %v1132_v55  ;;  %1121 = vadd.xlane.f32.xlu0 %v1117_v57 }
 0x5e6   :  { %1123 = vadd.xlane.f32.xlu1 %v1118_v54  ;;  %1133 = vadd.xlane.f32.xlu0 %v1129_v53 }
 0x5ea   :  { %1135 = vadd.xlane.f32.xlu1 %v1130_v3  ;;  %1169 = vadd.xlane.f32.xlu0 %v1163_v7 }
 0x5ee   :  { %1171 = vadd.xlane.f32.xlu1 %v1164_v61  ;;  %1165 = vadd.xlane.f32.xlu0 %v1161_v9 }
 0x5f2   :  { %1167 = vadd.xlane.f32.xlu1 %v1162_v4  ;;  %1177 = vadd.xlane.f32.xlu0 %v1173_v11 }
 0x5f6   :  { %1179 = vadd.xlane.f32.xlu1 %v1174_v12  ;;  %1181 = vadd.xlane.f32.xlu0 %v1175_v14 }
 0x5fa   :  { %1183 = vadd.xlane.f32.xlu1 %v1176_v15 }
 0x663   :  { %v1126_v24 = vpop.xlane.xlu0 %1125 }
 0x664   :  { %v1143_v36 = vmul.f32 %v7713_v56, %v1126_v24 }
 0x667   :  { %v1138_v63 = vpop.xlane.xlu0 %1137  ;;  %v1128_v25 = vpop.xlane.xlu1 %1127 }
 0x668   :  { %v1147_v60 = vmul.f32 %v1138_v63, %v7720_v0  ;;  %v1144_v50 = vmul.f32 %v7713_v56, %v1128_v25 }
 0x66a   :  { %v1151_v39 = vadd.f32 %v1147_v60, %v1143_v36 }
 0x66b   :  { %v1140_v26 = vpop.xlane.xlu1 %1139  ;;  %v1122_v27 = vpop.xlane.xlu0 %1121 }
 0x66c   :  { %v1141_v32 = vmul.f32 %v7713_v56, %v1122_v27  ;;  %v1148_v40 = vmul.f32 %v1140_v26, %v7720_v0  ;;  %v1155_v49 = vmul.f32 0.015625, %v1151_v39 }
 0x66e   :  { %v1152_v57 = vadd.f32 %v1148_v40, %v1144_v50  ;;  %v1203_v12 = vmul.f32 %v1155_v49, %v1155_v49 }
 0x66f   :  { %v1124_v28 = vpop.xlane.xlu1 %1123  ;;  %v1134_v48 = vpop.xlane.xlu0 %1133 }
 0x670   :  { %v1145_v29 = vmul.f32 %v1134_v48, %v7720_v0  ;;  %v1142_v38 = vmul.f32 %v7713_v56, %v1124_v28  ;;  %v1156_v14 = vmul.f32 0.015625, %v1152_v57  ;;  %v5834_v57 = vld [vmem:[%s8817_s6 + $0x1] ss:$0 sm:$0xff] }
 0x672   :  { %v1149_v33 = vadd.f32 %v1145_v29, %v1141_v32  ;;  %v1204_v63 = vmul.f32 %v1156_v14, %v1156_v14  ;;  %v5831_v32 = vld [vmem:[%s8814_s3 + $0x1] ss:$0 sm:$0xff] }
 0x673   :  { %v1136_v30 = vpop.xlane.xlu1 %1135  ;;  %v1170_v31 = vpop.xlane.xlu0 %1169 }
 0x674   :  { %v1146_v34 = vmul.f32 %v1136_v30, %v7720_v0  ;;  %v1153_v41 = vmul.f32 0.015625, %v1149_v33  ;;  %v1187_v2 = vmul.f32 %v7713_v56, %v1170_v31 }
 0x676   :  { %v1150_v42 = vadd.f32 %v1146_v34, %v1142_v38  ;;  %v1201_v54 = vmul.f32 %v1153_v41, %v1153_v41  ;;  %v1209_v29 = vsub.f32 %v7903_v45, %v1153_v41  ;;  %v1211_v34 = vsub.f32 %v7893_v37, %v1155_v49  ;;  %v5832_v38 = vld [vmem:[%s8815_s4 + $0x1] ss:$0 sm:$0xff] }
 0x677   :  { %v1172_v47 = vpop.xlane.xlu1 %1171  ;;  %v1166_v35 = vpop.xlane.xlu0 %1165  ;;  %v1212_v45 = vsub.f32 %v7897_v46, %v1156_v14 }
 0x678   :  { %v1185_v52 = vmul.f32 %v7713_v56, %v1166_v35  ;;  %v1154_v53 = vmul.f32 0.015625, %v1150_v42  ;;  %v1188_v16 = vmul.f32 %v7713_v56, %v1172_v47 }
 0x67a   :  { %v1202_v15 = vmul.f32 %v1154_v53, %v1154_v53  ;;  %v1210_v60 = vsub.f32 %v7909_v58, %v1154_v53 }
 0x67b   :  { %v1168_v43 = vpop.xlane.xlu1 %1167  ;;  %v1178_v51 = vpop.xlane.xlu0 %1177 }
 0x67c   :  { %v1189_v44 = vmul.f32 %v1178_v51, %v7720_v0  ;;  %v1186_v8 = vmul.f32 %v7713_v56, %v1168_v43 }
 0x67e   :  { %v1193_v55 = vadd.f32 %v1189_v44, %v1185_v52 }
 0x67f   :  { %v1180_v3 = vpop.xlane.xlu1 %1179  ;;  %v1182_v7 = vpop.xlane.xlu0 %1181 }
 0x680   :  { %v1197_v62 = vmul.f32 0.015625, %v1193_v55  ;;  %v1190_v61 = vmul.f32 %v1180_v3, %v7720_v0  ;;  %v1191_v9 = vmul.f32 %v1182_v7, %v7720_v0 }
 0x682   :  { %v1205_v10 = vsub.f32 %v1197_v62, %v1201_v54  ;;  %v1194_v4 = vadd.f32 %v1190_v61, %v1186_v8  ;;  %v1195_v11 = vadd.f32 %v1191_v9, %v1187_v2 }
 0x683   :  { %v1184_v17 = vpop.xlane.xlu1 %1183 }
 0x684   :  { %v1213_v19 = vadd.f32 1e-05, %v1205_v10  ;;  %v1198_v5 = vmul.f32 0.015625, %v1194_v4  ;;  %v1199_v20 = vmul.f32 0.015625, %v1195_v11  ;;  %v1192_v21 = vmul.f32 %v1184_v17, %v7720_v0 }
 0x686   :  { %7130 = vrsqrt.f32 %v1213_v19  ;;  %v1206_v22 = vsub.f32 %v1198_v5, %v1202_v15  ;;  %v1207_v23 = vsub.f32 %v1199_v20, %v1203_v12  ;;  %v1196_v24 = vadd.f32 %v1192_v21, %v1188_v16 }
 0x688   :  { %v1214_v25 = vadd.f32 1e-05, %v1206_v22  ;;  %v1215_v26 = vadd.f32 1e-05, %v1207_v23  ;;  %v1200_v27 = vmul.f32 0.015625, %v1196_v24 }
 0x68a   :  { %7132 = vrsqrt.f32 %v1214_v25  ;;  %v1208_v28 = vsub.f32 %v1200_v27, %v1204_v63 }
 0x68b   :  { %7134 = vrsqrt.f32 %v1215_v26 }
 0x68c   :  { %v1216_v48 = vadd.f32 1e-05, %v1208_v28 }
 0x68e   :  { %7136 = vrsqrt.f32 %v1216_v48 }
 0x693   :  { %v7131_v30 = vpop.eup %7130 }
 0x694   :  { %v1221_v31 = vmul.f32 %v7131_v30, %v1209_v29 }
 0x696   :  { %v1231_v36 = vmul.f32 %v5831_v32, %v1221_v31 }
 0x697   :  { %v7133_v33 = vpop.eup %7132 }
 0x698   :  { %v7135_v47 = vpop.eup %7134  ;;  %v1222_v35 = vmul.f32 %v7133_v33, %v1210_v60  ;;  %v7959_v42 = vadd.f32 %v5832_v38, %v1231_v36 }
 0x699   :  { %v1223_v39 = vmul.f32 %v7135_v47, %v1211_v34 }
 0x69a   :  { %v1232_v40 = vmul.f32 %v5831_v32, %v1222_v35 }
 0x69b   :  { %v7137_v41 = vpop.eup %7136  ;;  %v1233_v58 = vmul.f32 %v5831_v32, %v1223_v39 }
 0x69c   :  { %v1242_v43 = vadd.f32 %v5832_v38, %v1232_v40  ;;  %v1224_v51 = vmul.f32 %v7137_v41, %v1212_v45 }
 0x69d   :  { %v7962_v44 = vadd.f32 %v5832_v38, %v1233_v58 }
 0x69e   :  { %v1264_v52 = vpack.c.bf16 %v1242_v43, %v7959_v42  ;;  %v1234_v37 = vmul.f32 %v5831_v32, %v1224_v51 }
 0x6a0   :  { %6462 = vmatprep.mubr.bf16.mxu0 %v1264_v52  ;;  %v7964_v50 = vadd.f32 %v5832_v38, %v1234_v37 }
 0x6a2   :  { %v1265_v49 = vpack.c.bf16 %v7964_v50, %v7962_v44 }
 0x6a4   :  { %6463 = vmatmul.mubr.bf16.vlgmr.msra.gmra.mxu0 %v1265_v49 }
 0x764   :  { %v6464_v46 = vpop.f32.mrf.mxu0 }
 0x765   :  { %v1363_v3 = vadd.f32 %v6464_v46, %v5834_v57 }
 0x766   :  { %v1354_v55 = vpop.f32.mrf.mxu0 }
 0x767   :  { %v1355_v7 = vadd.f32 %v5834_v57, %v1354_v55 }
 0x768   :  { %v6465_v54 = vpop.f32.mrf.mxu0 }
 0x769   :  { %v1366_v53 = vadd.f32 %v6465_v54, %v5834_v57 }
 0x76a   :  { %v1357_v2 = vpop.f32.mrf.mxu0 }
 0x76b   :  { %v1358_v8 = vadd.f32 %v5834_v57, %v1357_v2  ;;  %v1370_v62 = vmax.f32 %v1363_v3, %v1366_v53 }
 0x76d   :  { %v1369_v61 = vmax.f32 %v1355_v7, %v1358_v8 }
 0x76f   :  { %v1371_v9 = vmax.f32 %v1369_v61, %v1370_v62 }
 0x771   :  { %v1372_v10 = vrot.slane %v1371_v9, 4 }
 0x773   :  { %v1373_v4 = vmax.f32 %v1371_v9, %v1372_v10 }
 0x775   :  { %v1374_v11 = vrot.slane %v1373_v4, 2 }
 0x777   :  { %v1375_v12 = vmax.f32 %v1373_v4, %v1374_v11 }
 0x779   :  { %v1376_v14 = vrot.slane %v1375_v12, 1 }
 0x77b   :  { %v1377_v15 = vmax.f32 %v1375_v12, %v1376_v14  ;;  %v6920_v12 = vld [vmem:[#allocation11 + $0x78] sm:$0xff]   ;;  %v6921_v14 = vld [vmem:[#allocation11 + $0x70] sm:$0xff]  }
 0x77c   :  { %6466 = vmatprep.subr.bf16.mxu1 %v6920_v12 }
 0x77d   :  { %v1378_v16 = vsub.f32 %v1355_v7, %v1377_v15  ;;  %v1379_v17 = vsub.f32 %v1358_v8, %v1377_v15  ;;  %v1380_v19 = vsub.f32 %v1363_v3, %v1377_v15  ;;  %v1381_v5 = vsub.f32 %v1366_v53, %v1377_v15  ;;  %6467 = vmatpush3.bf16.msra.mxu1 %v6920_v12  ;;  %v6922_v15 = vld [vmem:[#allocation11 + $0x68] sm:$0xff]  }
 0x77e   :  { %6468 = vmatprep.subr.bf16.mxu1 %v6921_v14 }
 0x77f   :  { %v1382_v20 = vmul.f32 1.442695, %v1378_v16  ;;  %v1384_v21 = vmul.f32 1.442695, %v1379_v17  ;;  %v1386_v22 = vmul.f32 1.442695, %v1380_v19 }
 0x780   :  { %v1388_v23 = vmul.f32 1.442695, %v1381_v5  ;;  %v6923_v16 = vld [vmem:[#allocation11 + $0x60] sm:$0xff]   ;;  %v6924_v17 = vld [vmem:[#allocation11 + $0x58] sm:$0xff]   ;;  %v6925_v19 = vld [vmem:[#allocation11 + $0x50] sm:$0xff]  }
 0x781   :  { %7138 = vpow2.f32 %v1382_v20  ;;  %6469 = vmatpush3.bf16.msra.mxu1 %v6921_v14  ;;  %v6926_v5 = vld [vmem:[#allocation11 + $0x48] sm:$0xff]   ;;  %v6927_v20 = vld [vmem:[#allocation11 + $0x40] sm:$0xff]  }
 0x782   :  { %7140 = vpow2.f32 %v1384_v21  ;;  %6470 = vmatprep.subr.bf16.mxu1 %v6922_v15 }
 0x783   :  { %7142 = vpow2.f32 %v1386_v22 }
 0x784   :  { %7144 = vpow2.f32 %v1388_v23 }
 0x785   :  { %6471 = vmatpush3.bf16.msra.mxu1 %v6922_v15 }
 0x786   :  { %6472 = vmatprep.subr.bf16.mxu1 %v6923_v16 }
 0x789   :  { %6473 = vmatpush3.bf16.msra.mxu1 %v6923_v16 }
 0x78a   :  { %6474 = vmatprep.subr.bf16.mxu1 %v6924_v17 }
 0x78d   :  { %6475 = vmatpush3.bf16.msra.mxu1 %v6924_v17 }
 0x78e   :  { %v7139_v24 = vpop.eup %7138  ;;  %6476 = vmatprep.subr.bf16.mxu1 %v6925_v19 }
 0x78f   :  { %v7141_v63 = vpop.eup %7140 }
 0x790   :  { %v1390_v25 = vadd.f32 %v7141_v63, %v7139_v24  ;;  %v7143_v26 = vpop.eup %7142 }
 0x791   :  { %v7145_v28 = vpop.eup %7144  ;;  %6477 = vmatpush3.bf16.msra.mxu1 %v6925_v19 }
 0x792   :  { %v1391_v27 = vadd.f32 %v7143_v26, %v1390_v25  ;;  %6478 = vmatprep.subr.bf16.mxu1 %v6926_v5 }
 0x794   :  { %v1392_v48 = vadd.f32 %v7145_v28, %v1391_v27 }
 0x795   :  { %6479 = vmatpush3.bf16.msra.mxu1 %v6926_v5 }
 0x796   :  { %v1393_v29 = vrot.slane %v1392_v48, 4  ;;  %6480 = vmatprep.subr.bf16.mxu1 %v6927_v20 }
 0x798   :  { %v1394_v30 = vadd.f32 %v1393_v29, %v1392_v48 }
 0x799   :  { %6481 = vmatpush3.bf16.msra.mxu1 %v6927_v20 }
 0x79a   :  { %v1395_v31 = vrot.slane %v1394_v30, 2 }
 0x79c   :  { %v1396_v32 = vadd.f32 %v1395_v31, %v1394_v30 }
 0x79e   :  { %v1397_v60 = vrot.slane %v1396_v32, 1 }
 0x7a0   :  { %v1398_v33 = vadd.f32 %v1397_v60, %v1396_v32 }
 0x7a2   :  { %7146 = vrcp.f32 %v1398_v33 }
 0x7af   :  { %v7147_v34 = vpop.eup %7146 }
 0x7b0   :  { %v1401_v47 = vmul.f32 %v7147_v34, %v7141_v63  ;;  %v1400_v35 = vmul.f32 %v7147_v34, %v7139_v24  ;;  %v1403_v39 = vmul.f32 %v7147_v34, %v7145_v28  ;;  %v1402_v45 = vmul.f32 %v7147_v34, %v7143_v26 }
 0x7b2   :  { %v1405_v36 = vmul.f32 %v1401_v47, %v1242_v43  ;;  %v1404_v38 = vmul.f32 %v1400_v35, %v7959_v42  ;;  %v1407_v52 = vmul.f32 %v1403_v39, %v7964_v50  ;;  %v1406_v37 = vmul.f32 %v1402_v45, %v7962_v44 }
 0x7b4   :  { %v7972_v40 = vadd.f32 %v1405_v36, %v1242_v43  ;;  %v7975_v41 = vadd.f32 %v1404_v38, %v7959_v42  ;;  %v7988_v42 = vadd.f32 %v1407_v52, %v7964_v50  ;;  %v7991_v46 = vadd.f32 %v1406_v37, %v7962_v44 }
 0x7b6   :  { %v1417_v51 = vmul.f32 %v7713_v56, %v7972_v40  ;;  %v1416_v58 = vmul.f32 %v7713_v56, %v7975_v41  ;;  %v1429_v49 = vmul.f32 %v7972_v40, %v7720_v0  ;;  %v1428_v43 = vmul.f32 %v7975_v41, %v7720_v0 }
 0x7b7   :  { %v1419_v55 = vmul.f32 %v7713_v56, %v7988_v42  ;;  %v1418_v57 = vmul.f32 %v7713_v56, %v7991_v46  ;;  %v1431_v54 = vmul.f32 %v7988_v42, %v7720_v0  ;;  %v1430_v50 = vmul.f32 %v7991_v46, %v7720_v0 }
 0x7b8   :  { %1422 = vadd.xlane.f32.xlu1 %v1417_v51  ;;  %1420 = vadd.xlane.f32.xlu0 %v1416_v58  ;;  %v1457_v44 = vmul.f32 %v7972_v40, %v7972_v40  ;;  %v1456_v53 = vmul.f32 %v7975_v41, %v7975_v41  ;;  %v1459_v62 = vmul.f32 %v7988_v42, %v7988_v42 }
 0x7b9   :  { %v1458_v61 = vmul.f32 %v7991_v46, %v7991_v46 }
 0x7ba   :  { %v1461_v2 = vmul.f32 %v7713_v56, %v1457_v44  ;;  %v1460_v3 = vmul.f32 %v7713_v56, %v1456_v53  ;;  %v1473_v7 = vmul.f32 %v1457_v44, %v7720_v0  ;;  %v1472_v8 = vmul.f32 %v1456_v53, %v7720_v0 }
 0x7bb   :  { %v1463_v9 = vmul.f32 %v7713_v56, %v1459_v62  ;;  %v1462_v10 = vmul.f32 %v7713_v56, %v1458_v61  ;;  %v1475_v4 = vmul.f32 %v1459_v62, %v7720_v0  ;;  %v1474_v11 = vmul.f32 %v1458_v61, %v7720_v0 }
 0x7bc   :  { %1434 = vadd.xlane.f32.xlu1 %v1429_v49  ;;  %1432 = vadd.xlane.f32.xlu0 %v1428_v43 }
 0x7c0   :  { %1426 = vadd.xlane.f32.xlu1 %v1419_v55  ;;  %1424 = vadd.xlane.f32.xlu0 %v1418_v57 }
 0x7c4   :  { %1438 = vadd.xlane.f32.xlu1 %v1431_v54  ;;  %1436 = vadd.xlane.f32.xlu0 %v1430_v50 }
 0x7c8   :  { %1466 = vadd.xlane.f32.xlu1 %v1461_v2  ;;  %1464 = vadd.xlane.f32.xlu0 %v1460_v3 }
 0x7cc   :  { %1478 = vadd.xlane.f32.xlu1 %v1473_v7  ;;  %1476 = vadd.xlane.f32.xlu0 %v1472_v8 }
 0x7d0   :  { %1470 = vadd.xlane.f32.xlu1 %v1463_v9  ;;  %1468 = vadd.xlane.f32.xlu0 %v1462_v10 }
 0x7d4   :  { %1482 = vadd.xlane.f32.xlu1 %v1475_v4  ;;  %1480 = vadd.xlane.f32.xlu0 %v1474_v11 }
 0x841   :  { %v1423_v21 = vpop.xlane.xlu1 %1422  ;;  %v1421_v22 = vpop.xlane.xlu0 %1420 }
 0x842   :  { %v1441_v29 = vmul.f32 %v7713_v56, %v1423_v21  ;;  %v1440_v30 = vmul.f32 %v7713_v56, %v1421_v22 }
 0x845   :  { %v1435_v23 = vpop.xlane.xlu1 %1434  ;;  %v1433_v24 = vpop.xlane.xlu0 %1432 }
 0x846   :  { %v1445_v26 = vmul.f32 %v1435_v23, %v7720_v0  ;;  %v1444_v27 = vmul.f32 %v1433_v24, %v7720_v0 }
 0x848   :  { %v1449_v31 = vadd.f32 %v1445_v26, %v1441_v29  ;;  %v1448_v32 = vadd.f32 %v1444_v27, %v1440_v30  ;;  %v5845_v29 = vld [vmem:[%s8818_s7 + $0x1] ss:$0 sm:$0xff] }
 0x849   :  { %v1427_v63 = vpop.xlane.xlu1 %1426  ;;  %v1425_v25 = vpop.xlane.xlu0 %1424 }
 0x84a   :  { %v1453_v34 = vmul.f32 0.015625, %v1449_v31  ;;  %v1452_v47 = vmul.f32 0.015625, %v1448_v32  ;;  %v1443_v37 = vmul.f32 %v7713_v56, %v1427_v63  ;;  %v1442_v49 = vmul.f32 %v7713_v56, %v1425_v25  ;;  %v5846_v32 = vld [vmem:[%s8819_s8 + $0x1] ss:$0 sm:$0xff] }
 0x84c   :  { %v1501_v53 = vmul.f32 %v1453_v34, %v1453_v34  ;;  %v1500_v2 = vmul.f32 %v1452_v47, %v1452_v47  ;;  %v1509_v27 = vsub.f32 %v7972_v40, %v1453_v34 }
 0x84d   :  { %v1439_v28 = vpop.xlane.xlu1 %1438  ;;  %v1437_v48 = vpop.xlane.xlu0 %1436 }
 0x84e   :  { %v1447_v35 = vmul.f32 %v1439_v28, %v7720_v0  ;;  %v1446_v36 = vmul.f32 %v1437_v48, %v7720_v0  ;;  %v1508_v48 = vsub.f32 %v7975_v41, %v1452_v47 }
 0x850   :  { %v1451_v57 = vadd.f32 %v1447_v35, %v1443_v37  ;;  %v1450_v54 = vadd.f32 %v1446_v36, %v1442_v49 }
 0x851   :  { %v1467_v60 = vpop.xlane.xlu1 %1466  ;;  %v1465_v33 = vpop.xlane.xlu0 %1464 }
 0x852   :  { %v1485_v45 = vmul.f32 %v7713_v56, %v1467_v60  ;;  %v1484_v51 = vmul.f32 %v7713_v56, %v1465_v33  ;;  %v1455_v61 = vmul.f32 0.015625, %v1451_v57  ;;  %v1454_v9 = vmul.f32 0.015625, %v1450_v54  ;;  %v6931_v57 = vld [vmem:[#allocation12 + $0x60] sm:$0xff]   ;;  %v6932_v54 = vld [vmem:[#allocation12 + $0x58] sm:$0xff]  }
 0x854   :  { %v1503_v20 = vmul.f32 %v1455_v61, %v1455_v61  ;;  %v1502_v21 = vmul.f32 %v1454_v9, %v1454_v9  ;;  %v1511_v40 = vsub.f32 %v7988_v42, %v1455_v61  ;;  %v1510_v34 = vsub.f32 %v7991_v46, %v1454_v9  ;;  %v6928_v42 = vld [vmem:[#allocation12 + $0x78] sm:$0xff]   ;;  %v6929_v46 = vld [vmem:[#allocation12 + $0x70] sm:$0xff]  }
 0x855   :  { %v1479_v38 = vpop.xlane.xlu1 %1478  ;;  %v1477_v39 = vpop.xlane.xlu0 %1476  ;;  %6486 = vmatprep.subr.bf16.mxu0 %v6928_v42 }
 0x856   :  { %v1489_v58 = vmul.f32 %v1479_v38, %v7720_v0  ;;  %v1488_v52 = vmul.f32 %v1477_v39, %v7720_v0  ;;  %6487 = vmatpush3.bf16.msra.mxu0 %v6928_v42 }
 0x857   :  { %6488 = vmatprep.subr.bf16.mxu0 %v6929_v46 }
 0x858   :  { %v1493_v43 = vadd.f32 %v1489_v58, %v1485_v45  ;;  %v1492_v55 = vadd.f32 %v1488_v52, %v1484_v51 }
 0x859   :  { %v1471_v50 = vpop.xlane.xlu1 %1470  ;;  %v1469_v44 = vpop.xlane.xlu0 %1468 }
 0x85a   :  { %v1497_v3 = vmul.f32 0.015625, %v1493_v43  ;;  %v1496_v7 = vmul.f32 0.015625, %v1492_v55  ;;  %v1487_v10 = vmul.f32 %v7713_v56, %v1471_v50  ;;  %v1486_v4 = vmul.f32 %v7713_v56, %v1469_v44  ;;  %6489 = vmatpush3.bf16.msra.mxu0 %v6929_v46  ;;  %v6930_v55 = vld [vmem:[#allocation12 + $0x68] sm:$0xff]   ;;  %v6933_v50 = vld [vmem:[#allocation12 + $0x50] sm:$0xff]  }
 0x85b   :  { %6490 = vmatprep.subr.bf16.mxu0 %v6930_v55  ;;  %v6934_v44 = vld [vmem:[#allocation12 + $0x48] sm:$0xff]  }
 0x85c   :  { %v1505_v8 = vsub.f32 %v1497_v3, %v1501_v53  ;;  %v1504_v62 = vsub.f32 %v1496_v7, %v1500_v2  ;;  %v6935_v53 = vld [vmem:[#allocation12 + $0x40] sm:$0xff]   ;;  %v5848_v2 = vld [vmem:[%s8821_s10 + $0x1] ss:$0 sm:$0xff] }
 0x85d   :  { %v1483_v11 = vpop.xlane.xlu1 %1482  ;;  %v1481_v12 = vpop.xlane.xlu0 %1480 }
 0x85e   :  { %v1513_v14 = vadd.f32 1e-05, %v1505_v8  ;;  %v1512_v15 = vadd.f32 1e-05, %v1504_v62  ;;  %v1491_v16 = vmul.f32 %v1483_v11, %v7720_v0  ;;  %v1490_v17 = vmul.f32 %v1481_v12, %v7720_v0  ;;  %6491 = vmatpush3.bf16.msra.mxu0 %v6930_v55  ;;  %v6936_v55 = vld [vmem:[#allocation14 + $0x38] sm:$0xff]  }
 0x85f   :  { %6492 = vmatprep.subr.bf16.mxu0 %v6931_v57  ;;  %6506 = vmatprep.subr.bf16.mxu1 %v6936_v55 }
 0x860   :  { %7148 = vrsqrt.f32 %v1513_v14  ;;  %v1495_v19 = vadd.f32 %v1491_v16, %v1487_v10  ;;  %v1494_v5 = vadd.f32 %v1490_v17, %v1486_v4 }
 0x861   :  { %7150 = vrsqrt.f32 %v1512_v15 }
 0x862   :  { %v1499_v22 = vmul.f32 0.015625, %v1495_v19  ;;  %v1498_v23 = vmul.f32 0.015625, %v1494_v5  ;;  %6493 = vmatpush3.bf16.msra.mxu0 %v6931_v57  ;;  %v6937_v57 = vld [vmem:[#allocation14 + $0x30] sm:$0xff]  }
 0x863   :  { %6494 = vmatprep.subr.bf16.mxu0 %v6932_v54 }
 0x864   :  { %v1507_v24 = vsub.f32 %v1499_v22, %v1503_v20  ;;  %v1506_v63 = vsub.f32 %v1498_v23, %v1502_v21 }
 0x866   :  { %v1515_v25 = vadd.f32 1e-05, %v1507_v24  ;;  %v1514_v26 = vadd.f32 1e-05, %v1506_v63  ;;  %6495 = vmatpush3.bf16.msra.mxu0 %v6932_v54  ;;  %v6938_v54 = vld [vmem:[#allocation14 + $0x28] sm:$0xff]  }
 0x867   :  { %6496 = vmatprep.subr.bf16.mxu0 %v6933_v50 }
 0x868   :  { %7152 = vrsqrt.f32 %v1515_v25 }
 0x869   :  { %7154 = vrsqrt.f32 %v1514_v26 }
 0x86a   :  { %6497 = vmatpush3.bf16.msra.mxu0 %v6933_v50  ;;  %v6939_v50 = vld [vmem:[#allocation14 + $0x20] sm:$0xff]  }
 0x86b   :  { %6498 = vmatprep.subr.bf16.mxu0 %v6934_v44 }
 0x86d   :  { %v7149_v28 = vpop.eup %7148 }
 0x86e   :  { %v7151_v30 = vpop.eup %7150  ;;  %v1521_v31 = vmul.f32 %v7149_v28, %v1509_v27  ;;  %6499 = vmatpush3.bf16.msra.mxu0 %v6934_v44  ;;  %v6940_v44 = vld [vmem:[#allocation14 + $0x18] sm:$0xff]  }
 0x86f   :  { %v1520_v60 = vmul.f32 %v7151_v30, %v1508_v48  ;;  %6500 = vmatprep.subr.bf16.mxu0 %v6935_v53 }
 0x870   :  { %v1531_v33 = vmul.f32 %v5845_v29, %v1521_v31 }
 0x871   :  { %v1530_v35 = vmul.f32 %v5845_v29, %v1520_v60 }
 0x872   :  { %v8041_v36 = vadd.f32 %v5846_v32, %v1531_v33  ;;  %6501 = vmatpush3.bf16.msra.mxu0 %v6935_v53  ;;  %v6941_v53 = vld [vmem:[#allocation14 + $0x10] sm:$0xff]  }
 0x873   :  { %v8043_v38 = vadd.f32 %v5846_v32, %v1530_v35 }
 0x875   :  { %v7153_v41 = vpop.eup %7152  ;;  %v1563_v47 = vpack.c.bf16 %v8041_v36, %v8043_v38 }
 0x876   :  { %v7155_v39 = vpop.eup %7154  ;;  %v1523_v45 = vmul.f32 %v7153_v41, %v1511_v40 }
 0x877   :  { %6482 = vmatprep.mubr.bf16.mxu1 %v1563_v47  ;;  %v1522_v51 = vmul.f32 %v7155_v39, %v1510_v34 }
 0x878   :  { %v1533_v58 = vmul.f32 %v5845_v29, %v1523_v45 }
 0x879   :  { %v1532_v52 = vmul.f32 %v5845_v29, %v1522_v51 }
 0x87a   :  { %v8049_v37 = vadd.f32 %v5846_v32, %v1533_v58 }
 0x87b   :  { %v8051_v49 = vadd.f32 %v5846_v32, %v1532_v52 }
 0x87d   :  { %v1564_v43 = vpack.c.bf16 %v8049_v37, %v8051_v49 }
 0x87f   :  { %6483 = vmatmul.mubr.bf16.vlgmr.msra.gmra.mxu1 %v1564_v43 }
 0x880   :  { %6507 = vmatpush3.bf16.msra.mxu1 %v6936_v55 }
 0x881   :  { %6508 = vmatprep.subr.bf16.mxu1 %v6937_v57 }
 0x884   :  { %6509 = vmatpush3.bf16.msra.mxu1 %v6937_v57 }
 0x885   :  { %6510 = vmatprep.subr.bf16.mxu1 %v6938_v54 }
 0x888   :  { %6511 = vmatpush3.bf16.msra.mxu1 %v6938_v54  ;;  %v6944_v54 = vld [vmem:[#allocation15 + $0x38] sm:$0xff]  }
 0x889   :  { %6512 = vmatprep.subr.bf16.mxu1 %v6939_v50  ;;  %6526 = vmatprep.subr.bf16.mxu0 %v6944_v54 }
 0x88c   :  { %6513 = vmatpush3.bf16.msra.mxu1 %v6939_v50  ;;  %v6945_v50 = vld [vmem:[#allocation15 + $0x30] sm:$0xff]  }
 0x88d   :  { %6514 = vmatprep.subr.bf16.mxu1 %v6940_v44 }
 0x890   :  { %6515 = vmatpush3.bf16.msra.mxu1 %v6940_v44  ;;  %v6946_v44 = vld [vmem:[#allocation15 + $0x28] sm:$0xff]  }
 0x891   :  { %6516 = vmatprep.subr.bf16.mxu1 %v6941_v53 }
 0x894   :  { %6517 = vmatpush3.bf16.msra.mxu1 %v6941_v53  ;;  %v6947_v53 = vld [vmem:[#allocation15 + $0x20] sm:$0xff]  }
 0x93f   :  { %v6484_v3 = vpop.f32.mrf.mxu1 }
 0x940   :  { %v1662_v7 = vadd.f32 %v6484_v3, %v5848_v2  ;;  %v6943_v3 = vld [vmem:[#allocation14] sm:$0xff]  }
 0x941   :  { %v1653_v8 = vpop.f32.mrf.mxu1 }
 0x942   :  { %v1674_v62 = vmul.f32 0.044715, %v1662_v7  ;;  %v1654_v61 = vadd.f32 %v5848_v2, %v1653_v8  ;;  %v1670_v45 = vmul.f32 0.5, %v1662_v7 }
 0x943   :  { %v6485_v9 = vpop.f32.mrf.mxu1 }
 0x944   :  { %v1678_v10 = vmul.f32 %v1674_v62, %v1662_v7  ;;  %v1672_v4 = vmul.f32 0.044715, %v1654_v61  ;;  %v1665_v11 = vadd.f32 %v6485_v9, %v5848_v2  ;;  %v1668_v34 = vmul.f32 0.5, %v1654_v61 }
 0x945   :  { %v1656_v12 = vpop.f32.mrf.mxu1 }
 0x946   :  { %v1682_v14 = vmul.f32 %v1678_v10, %v1662_v7  ;;  %v1676_v15 = vmul.f32 %v1672_v4, %v1654_v61  ;;  %v1675_v16 = vmul.f32 0.044715, %v1665_v11  ;;  %v1657_v17 = vadd.f32 %v5848_v2, %v1656_v12  ;;  %v6942_v2 = vld [vmem:[#allocation14 + $0x8] sm:$0xff]  }
 0x947   :  { %v1671_v40 = vmul.f32 0.5, %v1665_v11  ;;  %6518 = vmatprep.subr.bf16.mxu1 %v6942_v2 }
 0x948   :  { %v1686_v19 = vadd.f32 %v1682_v14, %v1662_v7  ;;  %v1680_v5 = vmul.f32 %v1676_v15, %v1654_v61  ;;  %v1679_v20 = vmul.f32 %v1675_v16, %v1665_v11  ;;  %v1673_v21 = vmul.f32 0.044715, %v1657_v17  ;;  %6519 = vmatpush3.bf16.msra.mxu1 %v6942_v2  ;;  %v5858_v7 = vld [vmem:[%s8823_s12 + $0x1] ss:$0 sm:$0xff] }
 0x949   :  { %v1669_v47 = vmul.f32 0.5, %v1657_v17  ;;  %6520 = vmatprep.subr.bf16.mxu1 %v6943_v3  ;;  %v6948_v2 = vld [vmem:[#allocation15 + $0x18] sm:$0xff]  }
 0x94a   :  { %v1683_v22 = vmul.f32 %v1679_v20, %v1665_v11  ;;  %v1677_v23 = vmul.f32 %v1673_v21, %v1657_v17  ;;  %v1684_v24 = vadd.f32 %v1680_v5, %v1654_v61  ;;  %v1690_v63 = vmul.f32 0.7978846, %v1686_v19 }
 0x94c   :  { %v1687_v25 = vadd.f32 %v1683_v22, %v1665_v11  ;;  %v1681_v26 = vmul.f32 %v1677_v23, %v1657_v17  ;;  %v1688_v27 = vmul.f32 0.7978846, %v1684_v24  ;;  %6521 = vmatpush3.bf16.msra.mxu1 %v6943_v3  ;;  %v6949_v3 = vld [vmem:[#allocation15 + $0x10] sm:$0xff]  }
 0x94e   :  { %v1691_v28 = vmul.f32 0.7978846, %v1687_v25  ;;  %v1685_v48 = vadd.f32 %v1681_v26, %v1657_v17  ;;  %7156 = vtanh.f32 %v1688_v27 }
 0x94f   :  { %7158 = vtanh.f32 %v1690_v63 }
 0x950   :  { %7160 = vtanh.f32 %v1691_v28  ;;  %v1689_v29 = vmul.f32 0.7978846, %v1685_v48 }
 0x952   :  { %7162 = vtanh.f32 %v1689_v29 }
 0x95b   :  { %v7157_v30 = vpop.eup %7156 }
 0x95c   :  { %v7159_v31 = vpop.eup %7158  ;;  %v1696_v60 = vadd.f32 1.0, %v7157_v30 }
 0x95d   :  { %v7161_v32 = vpop.eup %7160  ;;  %v1698_v41 = vadd.f32 1.0, %v7159_v31 }
 0x95e   :  { %v1699_v33 = vadd.f32 1.0, %v7161_v32  ;;  %v1700_v58 = vmul.f32 %v1696_v60, %v1668_v34 }
 0x95f   :  { %v7163_v35 = vpop.eup %7162  ;;  %v1702_v43 = vmul.f32 %v1698_v41, %v1670_v45 }
 0x960   :  { %v1697_v39 = vadd.f32 1.0, %v7163_v35  ;;  %v1703_v51 = vmul.f32 %v1699_v33, %v1671_v40 }
 0x962   :  { %v1701_v52 = vmul.f32 %v1697_v39, %v1669_v47  ;;  %v1724_v46 = vpack.c.bf16 %v1703_v51, %v1702_v43 }
 0x964   :  { %v1723_v42 = vpack.c.bf16 %v1701_v52, %v1700_v58 }
 0x966   :  { %6502 = vmatprep.mubr.bf16.mxu0 %v1723_v42 }
 0x967   :  { %6503 = vmatmul.mubr.bf16.vlgmr.msra.gmra.mxu0 %v1724_v46 }
 0x968   :  { %6527 = vmatpush3.bf16.msra.mxu0 %v6944_v54 }
 0x969   :  { %6528 = vmatprep.subr.bf16.mxu0 %v6945_v50 }
 0x96c   :  { %6529 = vmatpush3.bf16.msra.mxu0 %v6945_v50 }
 0x96d   :  { %6530 = vmatprep.subr.bf16.mxu0 %v6946_v44 }
 0x970   :  { %6531 = vmatpush3.bf16.msra.mxu0 %v6946_v44 }
 0x971   :  { %6532 = vmatprep.subr.bf16.mxu0 %v6947_v53 }
 0x974   :  { %6533 = vmatpush3.bf16.msra.mxu0 %v6947_v53 }
 0x975   :  { %6534 = vmatprep.subr.bf16.mxu0 %v6948_v2 }
 0x978   :  { %6535 = vmatpush3.bf16.msra.mxu0 %v6948_v2  ;;  %v8097_v2 = vmul.f32 %v7711_v18, %v7741_v13 }
 0x979   :  { %6536 = vmatprep.subr.bf16.mxu0 %v6949_v3 }
 0x97c   :  { %6537 = vmatpush3.bf16.msra.mxu0 %v6949_v3 }
 0xa27   :  { %v6504_v8 = vpop.f32.mrf.mxu0 }
 0xa28   :  { %v1822_v62 = vadd.f32 %v6504_v8, %v5858_v7  ;;  %v6951_v8 = vld [vmem:[#allocation15] sm:$0xff]  }
 0xa29   :  { %v1813_v61 = vpop.f32.mrf.mxu0 }
 0xa2a   :  { %v1830_v9 = vadd.f32 %v1822_v62, %v8051_v49  ;;  %v1814_v10 = vadd.f32 %v5858_v7, %v1813_v61  ;;  %v5867_v62 = vld [vmem:[%s8825_s14] ss:$0 sm:$0xff] }
 0xa2b   :  { %v6505_v4 = vpop.f32.mrf.mxu0 }
 0xa2c   :  { %v1838_v11 = vmul.f32 0.044715, %v1830_v9  ;;  %v1828_v12 = vadd.f32 %v1814_v10, %v8043_v38  ;;  %v1825_v14 = vadd.f32 %v6505_v4, %v5858_v7  ;;  %v1834_v58 = vmul.f32 0.5, %v1830_v9 }
 0xa2d   :  { %v1816_v15 = vpop.f32.mrf.mxu0 }
 0xa2e   :  { %v1842_v16 = vmul.f32 %v1838_v11, %v1830_v9  ;;  %v1836_v17 = vmul.f32 0.044715, %v1828_v12  ;;  %v1831_v19 = vadd.f32 %v1825_v14, %v8049_v37  ;;  %v1817_v5 = vadd.f32 %v5858_v7, %v1816_v15  ;;  %v6950_v7 = vld [vmem:[#allocation15 + $0x8] sm:$0xff]  }
 0xa2f   :  { %v1832_v39 = vmul.f32 0.5, %v1828_v12  ;;  %6538 = vmatprep.subr.bf16.mxu0 %v6950_v7 }
 0xa30   :  { %v1846_v20 = vmul.f32 %v1842_v16, %v1830_v9  ;;  %v1840_v21 = vmul.f32 %v1836_v17, %v1828_v12  ;;  %v1839_v22 = vmul.f32 0.044715, %v1831_v19  ;;  %v1829_v23 = vadd.f32 %v1817_v5, %v8041_v36  ;;  %6539 = vmatpush3.bf16.msra.mxu0 %v6950_v7 }
 0xa31   :  { %v1835_v34 = vmul.f32 0.5, %v1831_v19  ;;  %6540 = vmatprep.subr.bf16.mxu0 %v6951_v8 }
 0xa32   :  { %v1850_v24 = vadd.f32 %v1846_v20, %v1830_v9  ;;  %v1843_v63 = vmul.f32 %v1839_v22, %v1831_v19  ;;  %v1837_v49 = vmul.f32 0.044715, %v1829_v23  ;;  %v1844_v25 = vmul.f32 %v1840_v21, %v1828_v12 }
 0xa33   :  { %v1833_v45 = vmul.f32 0.5, %v1829_v23 }
 0xa34   :  { %v1847_v26 = vmul.f32 %v1843_v63, %v1831_v19  ;;  %v1841_v27 = vmul.f32 %v1837_v49, %v1829_v23  ;;  %v1854_v28 = vmul.f32 0.7978846, %v1850_v24  ;;  %v1848_v38 = vadd.f32 %v1844_v25, %v1828_v12  ;;  %6541 = vmatpush3.bf16.msra.mxu0 %v6951_v8 }
 0xa36   :  { %v1851_v48 = vadd.f32 %v1847_v26, %v1831_v19  ;;  %v1845_v29 = vmul.f32 %v1841_v27, %v1829_v23  ;;  %v1852_v30 = vmul.f32 0.7978846, %v1848_v38  ;;  %7164 = vtanh.f32 %v1854_v28 }
 0xa38   :  { %v1849_v31 = vadd.f32 %v1845_v29, %v1829_v23  ;;  %v1855_v32 = vmul.f32 0.7978846, %v1851_v48  ;;  %7166 = vtanh.f32 %v1852_v30 }
 0xa3a   :  { %v1853_v37 = vmul.f32 0.7978846, %v1849_v31  ;;  %7168 = vtanh.f32 %v1855_v32 }
 0xa3c   :  { %7170 = vtanh.f32 %v1853_v37 }
 0xa43   :  { %v7165_v60 = vpop.eup %7164 }
 0xa44   :  { %v1862_v47 = vadd.f32 1.0, %v7165_v60 }
 0xa45   :  { %v7167_v36 = vpop.eup %7166 }
 0xa46   :  { %v1860_v35 = vadd.f32 1.0, %v7167_v36  ;;  %v1866_v46 = vmul.f32 %v1862_v47, %v1834_v58 }
 0xa47   :  { %v7169_v33 = vpop.eup %7168 }
 0xa48   :  { %v1863_v40 = vadd.f32 1.0, %v7169_v33  ;;  %v1864_v43 = vmul.f32 %v1860_v35, %v1832_v39  ;;  %v8070_v33 = vmul.f32 %v7711_v18, %v7715_v59 }
 0xa49   :  { %v7171_v41 = vpop.eup %7170 }
 0xa4a   :  { %v1861_v51 = vadd.f32 1.0, %v7171_v41  ;;  %v1867_v52 = vmul.f32 %v1863_v40, %v1835_v34 }
 0xa4c   :  { %v1865_v42 = vmul.f32 %v1861_v51, %v1833_v45  ;;  %v1886_v57 = vpack.c.bf16 %v1867_v52, %v1866_v46  ;;  %v8079_v52 = vmul.f32 %v7711_v18, %v7728_v6 }
 0xa4e   :  { %v1885_v55 = vpack.c.bf16 %v1865_v42, %v1864_v43 }
 0xa50   :  { %6522 = vmatprep.mubr.bf16.mxu1 %v1885_v55 }
 0xa51   :  { %6523 = vmatmul.mubr.bf16.vlgmr.msra.gmra.mxu1 %v1886_v57  ;;  %v8086_v57 = vmul.f32 %v7711_v18, %v7723_v1 }
 0xb11   :  { %v6524_v61 = vpop.f32.mrf.mxu1 }
 0xb12   :  { %v1984_v9 = vadd.f32 %v6524_v61, %v5867_v62 }
 0xb13   :  { %v1975_v10 = vpop.f32.mrf.mxu1 }
 0xb14   :  { %v1996_v4 = vmul.f32 0.044715, %v1984_v9  ;;  %v1976_v11 = vadd.f32 %v5867_v62, %v1975_v10  ;;  %v1992_v37 = vmul.f32 0.5, %v1984_v9 }
 0xb15   :  { %v6525_v12 = vpop.f32.mrf.mxu1 }
 0xb16   :  { %v2000_v14 = vmul.f32 %v1996_v4, %v1984_v9  ;;  %v1994_v15 = vmul.f32 0.044715, %v1976_v11  ;;  %v1987_v16 = vadd.f32 %v6525_v12, %v5867_v62  ;;  %v1990_v45 = vmul.f32 0.5, %v1976_v11 }
 0xb17   :  { %v1978_v17 = vpop.f32.mrf.mxu1 }
 0xb18   :  { %v2004_v19 = vmul.f32 %v2000_v14, %v1984_v9  ;;  %v1998_v5 = vmul.f32 %v1994_v15, %v1976_v11  ;;  %v1997_v20 = vmul.f32 0.044715, %v1987_v16  ;;  %v1979_v21 = vadd.f32 %v5867_v62, %v1978_v17 }
 0xb19   :  { %v1993_v34 = vmul.f32 0.5, %v1987_v16 }
 0xb1a   :  { %v2008_v22 = vadd.f32 %v2004_v19, %v1984_v9  ;;  %v2002_v23 = vmul.f32 %v1998_v5, %v1976_v11  ;;  %v2001_v24 = vmul.f32 %v1997_v20, %v1987_v16  ;;  %v1995_v63 = vmul.f32 0.044715, %v1979_v21  ;;  %v6952_v20 = vld [vmem:[#allocation9 + $0x38] sm:$0xff]  }
 0xb1b   :  { %v1991_v42 = vmul.f32 0.5, %v1979_v21  ;;  %6546 = vmatprep.subr.bf16.mxu1 %v6952_v20 }
 0xb1c   :  { %v2012_v49 = vmul.f32 0.7978846, %v2008_v22  ;;  %v2005_v25 = vmul.f32 %v2001_v24, %v1987_v16  ;;  %v2006_v26 = vadd.f32 %v2002_v23, %v1976_v11  ;;  %v1999_v27 = vmul.f32 %v1995_v63, %v1979_v21  ;;  %6547 = vmatpush3.bf16.msra.mxu1 %v6952_v20  ;;  %v6954_v22 = vld [vmem:[#allocation9 + $0x28] sm:$0xff]   ;;  %v6955_v23 = vld [vmem:[#allocation9 + $0x20] sm:$0xff]   ;;  %v6956_v24 = vld [vmem:[#allocation9 + $0x18] sm:$0xff]  }
 0xb1d   :  { %v6957_v63 = vld [vmem:[#allocation9 + $0x10] sm:$0xff]  }
 0xb1e   :  { %7172 = vtanh.f32 %v2012_v49  ;;  %v2009_v28 = vadd.f32 %v2005_v25, %v1987_v16  ;;  %v2010_v38 = vmul.f32 0.7978846, %v2006_v26  ;;  %v2003_v48 = vmul.f32 %v1999_v27, %v1979_v21  ;;  %v6958_v49 = vld [vmem:[#allocation9 + $0x8] sm:$0xff]   ;;  %v6959_v25 = vld [vmem:[#allocation9] sm:$0xff]  }
 0xb20   :  { %v2013_v29 = vmul.f32 0.7978846, %v2009_v28  ;;  %7174 = vtanh.f32 %v2010_v38  ;;  %v2007_v30 = vadd.f32 %v2003_v48, %v1979_v21  ;;  %v6953_v21 = vld [vmem:[#allocation9 + $0x30] sm:$0xff]  }
 0xb21   :  { %6548 = vmatprep.subr.bf16.mxu1 %v6953_v21 }
 0xb22   :  { %7176 = vtanh.f32 %v2013_v29  ;;  %v2011_v31 = vmul.f32 0.7978846, %v2007_v30  ;;  %6549 = vmatpush3.bf16.msra.mxu1 %v6953_v21 }
 0xb23   :  { %6550 = vmatprep.subr.bf16.mxu1 %v6954_v22 }
 0xb24   :  { %7178 = vtanh.f32 %v2011_v31 }
 0xb26   :  { %6551 = vmatpush3.bf16.msra.mxu1 %v6954_v22 }
 0xb27   :  { %6552 = vmatprep.subr.bf16.mxu1 %v6955_v23 }
 0xb2a   :  { %6553 = vmatpush3.bf16.msra.mxu1 %v6955_v23 }
 0xb2b   :  { %v7173_v32 = vpop.eup %7172  ;;  %6554 = vmatprep.subr.bf16.mxu1 %v6956_v24 }
 0xb2c   :  { %v2020_v60 = vadd.f32 1.0, %v7173_v32 }
 0xb2d   :  { %v7175_v36 = vpop.eup %7174 }
 0xb2e   :  { %v2024_v35 = vmul.f32 %v2020_v60, %v1992_v37  ;;  %v2018_v40 = vadd.f32 1.0, %v7175_v36  ;;  %6555 = vmatpush3.bf16.msra.mxu1 %v6956_v24 }
 0xb2f   :  { %v7177_v41 = vpop.eup %7176  ;;  %6556 = vmatprep.subr.bf16.mxu1 %v6957_v63 }
 0xb30   :  { %v8073_v47 = vadd.f32 %v2024_v35, %v8070_v33  ;;  %v2021_v39 = vadd.f32 1.0, %v7177_v41  ;;  %v2022_v59 = vmul.f32 %v2018_v40, %v1990_v45 }
 0xb31   :  { %v7179_v51 = vpop.eup %7178 }
 0xb32   :  { %v2176_v58 = vmul.f32 %v7713_v56, %v8073_v47  ;;  %v2025_v43 = vmul.f32 %v2021_v39, %v1993_v34  ;;  %v2019_v46 = vadd.f32 1.0, %v7179_v51  ;;  %v2188_v50 = vmul.f32 %v8073_v47, %v7720_v0  ;;  %6557 = vmatpush3.bf16.msra.mxu1 %v6957_v63 }
 0xb33   :  { %v8093_v44 = vadd.f32 %v2022_v59, %v8086_v57  ;;  %v2216_v13 = vmul.f32 %v8073_v47, %v8073_v47  ;;  %6558 = vmatprep.subr.bf16.mxu1 %v6958_v49 }
 0xb34   :  { %2182 = vadd.xlane.f32.xlu0 %v2176_v58  ;;  %v8082_v55 = vadd.f32 %v2025_v43, %v8079_v52  ;;  %v2023_v54 = vmul.f32 %v2019_v46, %v1991_v42  ;;  %v2044_v3 = vpack.c.bf16 %v2025_v43, %v2024_v35 }
 0xb35   :  { %v2174_v8 = vmul.f32 %v7713_v56, %v8093_v44  ;;  %v2186_v18 = vmul.f32 %v8093_v44, %v7720_v0  ;;  %v2220_v9 = vmul.f32 %v7713_v56, %v2216_v13  ;;  %v2214_v4 = vmul.f32 %v8093_v44, %v8093_v44 }
 0xb36   :  { %v2177_v6 = vmul.f32 %v7713_v56, %v8082_v55  ;;  %v2043_v53 = vpack.c.bf16 %v2023_v54, %v2022_v59  ;;  %v8100_v1 = vadd.f32 %v2023_v54, %v8097_v2  ;;  %v2189_v7 = vmul.f32 %v8082_v55, %v7720_v0  ;;  %6559 = vmatpush3.bf16.msra.mxu1 %v6958_v49 }
 0xb37   :  { %v2217_v10 = vmul.f32 %v8082_v55, %v8082_v55  ;;  %v2218_v12 = vmul.f32 %v7713_v56, %v2214_v4  ;;  %v2230_v16 = vmul.f32 %v2214_v4, %v7720_v0  ;;  %v2232_v19 = vmul.f32 %v2216_v13, %v7720_v0  ;;  %6560 = vmatprep.subr.bf16.mxu1 %v6959_v25 }
 0xb38   :  { %2194 = vadd.xlane.f32.xlu0 %v2188_v50  ;;  %2184 = vadd.xlane.f32.xlu1 %v2177_v6  ;;  %v2175_v62 = vmul.f32 %v7713_v56, %v8100_v1  ;;  %v2187_v61 = vmul.f32 %v8100_v1, %v7720_v0  ;;  %v2215_v14 = vmul.f32 %v8100_v1, %v8100_v1 }
 0xb39   :  { %6542 = vmatprep.mubr.bf16.mxu0 %v2043_v53  ;;  %v2221_v11 = vmul.f32 %v7713_v56, %v2217_v10  ;;  %v2233_v5 = vmul.f32 %v2217_v10, %v7720_v0 }
 0xb3a   :  { %6543 = vmatmul.mubr.bf16.vlgmr.msra.gmra.mxu0 %v2044_v3  ;;  %v2219_v15 = vmul.f32 %v7713_v56, %v2215_v14  ;;  %v2231_v17 = vmul.f32 %v2215_v14, %v7720_v0  ;;  %6561 = vmatpush3.bf16.msra.mxu1 %v6959_v25 }
 0xb3c   :  { %2196 = vadd.xlane.f32.xlu1 %v2189_v7  ;;  %2178 = vadd.xlane.f32.xlu0 %v2174_v8 }
 0xb40   :  { %2180 = vadd.xlane.f32.xlu1 %v2175_v62  ;;  %2190 = vadd.xlane.f32.xlu0 %v2186_v18 }
 0xb44   :  { %2192 = vadd.xlane.f32.xlu1 %v2187_v61  ;;  %2226 = vadd.xlane.f32.xlu0 %v2220_v9 }
 0xb48   :  { %2228 = vadd.xlane.f32.xlu1 %v2221_v11  ;;  %2222 = vadd.xlane.f32.xlu0 %v2218_v12 }
 0xb4c   :  { %2224 = vadd.xlane.f32.xlu1 %v2219_v15  ;;  %2234 = vadd.xlane.f32.xlu0 %v2230_v16 }
 0xb50   :  { %2236 = vadd.xlane.f32.xlu1 %v2231_v17  ;;  %2238 = vadd.xlane.f32.xlu0 %v2232_v19 }
 0xb54   :  { %2240 = vadd.xlane.f32.xlu1 %v2233_v5 }
 0xbbd   :  { %v2183_v26 = vpop.xlane.xlu0 %2182 }
 0xbbe   :  { %v2200_v39 = vmul.f32 %v7713_v56, %v2183_v26 }
 0xbc1   :  { %v2195_v27 = vpop.xlane.xlu0 %2194  ;;  %v2185_v28 = vpop.xlane.xlu1 %2184 }
 0xbc2   :  { %v2204_v36 = vmul.f32 %v2195_v27, %v7720_v0  ;;  %v2201_v6 = vmul.f32 %v7713_v56, %v2185_v28 }
 0xbc4   :  { %v2208_v51 = vadd.f32 %v2204_v36, %v2200_v39  ;;  %v5890_v39 = vld [vmem:[%s8815_s4] ss:$0 sm:$0xff] }
 0xbc5   :  { %v2197_v38 = vpop.xlane.xlu1 %2196  ;;  %v2179_v48 = vpop.xlane.xlu0 %2178 }
 0xbc6   :  { %v2198_v60 = vmul.f32 %v7713_v56, %v2179_v48  ;;  %v2205_v58 = vmul.f32 %v2197_v38, %v7720_v0  ;;  %v2212_v53 = vmul.f32 0.015625, %v2208_v51 }
 0xbc8   :  { %v2209_v7 = vadd.f32 %v2205_v58, %v2201_v6  ;;  %v2260_v16 = vmul.f32 %v2212_v53, %v2212_v53 }
 0xbc9   :  { %v2181_v29 = vpop.xlane.xlu1 %2180  ;;  %v2191_v30 = vpop.xlane.xlu0 %2190 }
 0xbca   :  { %v2202_v31 = vmul.f32 %v2191_v30, %v7720_v0  ;;  %v2199_v45 = vmul.f32 %v7713_v56, %v2181_v29  ;;  %v2213_v17 = vmul.f32 0.015625, %v2209_v7 }
 0xbcc   :  { %v2206_v35 = vadd.f32 %v2202_v31, %v2198_v60  ;;  %v2261_v26 = vmul.f32 %v2213_v17, %v2213_v17 }
 0xbcd   :  { %v2193_v32 = vpop.xlane.xlu1 %2192  ;;  %v2227_v37 = vpop.xlane.xlu0 %2226 }
 0xbce   :  { %v2203_v40 = vmul.f32 %v2193_v32, %v7720_v0  ;;  %v2210_v43 = vmul.f32 0.015625, %v2206_v35  ;;  %v2244_v18 = vmul.f32 %v7713_v56, %v2227_v37  ;;  %v5889_v37 = vld [vmem:[%s8814_s3] ss:$0 sm:$0xff]  ;;  %v2268_v35 = vsub.f32 %v8073_v47, %v2212_v53 }
 0xbd0   :  { %v2207_v59 = vadd.f32 %v2203_v40, %v2199_v45  ;;  %v2258_v8 = vmul.f32 %v2210_v43, %v2210_v43  ;;  %v2266_v30 = vsub.f32 %v8093_v44, %v2210_v43  ;;  %v2269_v44 = vsub.f32 %v8082_v55, %v2213_v17  ;;  %v5876_v55 = vld [vmem:[%s8827_s16] ss:$0 sm:$0xff] }
 0xbd1   :  { %v2229_v41 = vpop.xlane.xlu1 %2228  ;;  %v2223_v34 = vpop.xlane.xlu0 %2222 }
 0xbd2   :  { %v2242_v54 = vmul.f32 %v7713_v56, %v2223_v34  ;;  %v2211_v62 = vmul.f32 0.015625, %v2207_v59  ;;  %v2245_v5 = vmul.f32 %v7713_v56, %v2229_v41 }
 0xbd4   :  { %v2259_v19 = vmul.f32 %v2211_v62, %v2211_v62  ;;  %v2267_v60 = vsub.f32 %v8100_v1, %v2211_v62 }
 0xbd5   :  { %v2225_v42 = vpop.xlane.xlu1 %2224  ;;  %v2235_v46 = vpop.xlane.xlu0 %2234 }
 0xbd6   :  { %v2246_v50 = vmul.f32 %v2235_v46, %v7720_v0  ;;  %v2243_v9 = vmul.f32 %v7713_v56, %v2225_v42 }
 0xbd8   :  { %v2250_v3 = vadd.f32 %v2246_v50, %v2242_v54 }
 0xbd9   :  { %v2237_v13 = vpop.xlane.xlu1 %2236  ;;  %v2239_v61 = vpop.xlane.xlu0 %2238 }
 0xbda   :  { %v2254_v10 = vmul.f32 0.015625, %v2250_v3  ;;  %v2247_v4 = vmul.f32 %v2237_v13, %v7720_v0  ;;  %v2248_v11 = vmul.f32 %v2239_v61, %v7720_v0 }
 0xbdc   :  { %v2262_v12 = vsub.f32 %v2254_v10, %v2258_v8  ;;  %v2251_v14 = vadd.f32 %v2247_v4, %v2243_v9  ;;  %v2252_v15 = vadd.f32 %v2248_v11, %v2244_v18 }
 0xbdd   :  { %v2241_v20 = vpop.xlane.xlu1 %2240 }
 0xbde   :  { %v2270_v21 = vadd.f32 1e-05, %v2262_v12  ;;  %v2255_v22 = vmul.f32 0.015625, %v2251_v14  ;;  %v2256_v23 = vmul.f32 0.015625, %v2252_v15  ;;  %v2249_v24 = vmul.f32 %v2241_v20, %v7720_v0  ;;  %v5891_v12 = vld [vmem:[%s8817_s6] ss:$0 sm:$0xff] }
 0xbe0   :  { %7180 = vrsqrt.f32 %v2270_v21  ;;  %v2263_v63 = vsub.f32 %v2255_v22, %v2259_v19  ;;  %v2264_v49 = vsub.f32 %v2256_v23, %v2260_v16  ;;  %v2253_v25 = vadd.f32 %v2249_v24, %v2245_v5 }
 0xbe2   :  { %v2271_v27 = vadd.f32 1e-05, %v2263_v63  ;;  %v2272_v28 = vadd.f32 1e-05, %v2264_v49  ;;  %v2257_v38 = vmul.f32 0.015625, %v2253_v25 }
 0xbe4   :  { %7182 = vrsqrt.f32 %v2271_v27  ;;  %v2265_v48 = vsub.f32 %v2257_v38, %v2261_v26 }
 0xbe5   :  { %7184 = vrsqrt.f32 %v2272_v28 }
 0xbe6   :  { %v2273_v29 = vadd.f32 1e-05, %v2265_v48 }
 0xbe8   :  { %7186 = vrsqrt.f32 %v2273_v29 }
 0xbed   :  { %v7181_v31 = vpop.eup %7180 }
 0xbee   :  { %v2278_v32 = vmul.f32 %v7181_v31, %v2266_v30 }
 0xbf0   :  { %v2288_v34 = vmul.f32 %v5889_v37, %v2278_v32 }
 0xbf1   :  { %v7183_v36 = vpop.eup %7182 }
 0xbf2   :  { %v7185_v40 = vpop.eup %7184  ;;  %v2279_v41 = vmul.f32 %v7183_v36, %v2267_v60  ;;  %v8154_v43 = vadd.f32 %v5890_v39, %v2288_v34 }
 0xbf3   :  { %v2280_v45 = vmul.f32 %v7185_v40, %v2268_v35 }
 0xbf4   :  { %v2289_v51 = vmul.f32 %v5889_v37, %v2279_v41 }
 0xbf5   :  { %v7187_v58 = vpop.eup %7186  ;;  %v2290_v42 = vmul.f32 %v5889_v37, %v2280_v45 }
 0xbf6   :  { %v8156_v59 = vadd.f32 %v5890_v39, %v2289_v51  ;;  %v2281_v1 = vmul.f32 %v7187_v58, %v2269_v44 }
 0xbf7   :  { %v8160_v50 = vadd.f32 %v5890_v39, %v2290_v42 }
 0xbf8   :  { %v2319_v47 = vpack.c.bf16 %v8156_v59, %v8154_v43  ;;  %v2291_v46 = vmul.f32 %v5889_v37, %v2281_v1 }
 0xbfa   :  { %v6544_v54 = vpop.f32.mrf.mxu0  ;;  %6562 = vmatprep.mubr.bf16.mxu1 %v2319_v47  ;;  %v8162_v6 = vadd.f32 %v5890_v39, %v2291_v46 }
 0xbfb   :  { %v2142_v8 = vadd.f32 %v6544_v54, %v5876_v55 }
 0xbfc   :  { %v2133_v53 = vpop.f32.mrf.mxu0  ;;  %v2320_v3 = vpack.c.bf16 %v8162_v6, %v8160_v50 }
 0xbfd   :  { %v2134_v13 = vadd.f32 %v5876_v55, %v2133_v53 }
 0xbfe   :  { %v6545_v7 = vpop.f32.mrf.mxu0  ;;  %6563 = vmatmul.mubr.bf16.vlgmr.msra.gmra.mxu1 %v2320_v3 }
 0xbff   :  { %v2145_v62 = vadd.f32 %v6545_v7, %v5876_v55 }
 0xc00   :  { %v2136_v18 = vpop.f32.mrf.mxu0 }
 0xc01   :  { %v6091_v61 = vpack.c.bf16 %v2145_v62, %v2142_v8  ;;  %v2137_v9 = vadd.f32 %v5876_v55, %v2136_v18 }
 0xc03   :  { %6113 = vst [vmem:[#allocation17 + $0x8] sm:$0xff] %v6091_v61   ;;  %v6086_v10 = vpack.c.bf16 %v2137_v9, %v2134_v13 }
 0xc05   :  { %6087 = vst [vmem:[#allocation17] sm:$0xff] %v6086_v10  }
 0xcbe   :  { %v6564_v4 = vpop.f32.mrf.mxu1 }
 0xcbf   :  { %v2418_v17 = vadd.f32 %v6564_v4, %v5891_v12 }
 0xcc0   :  { %v2409_v11 = vpop.f32.mrf.mxu1 }
 0xcc1   :  { %v2410_v19 = vadd.f32 %v5891_v12, %v2409_v11 }
 0xcc2   :  { %v6565_v14 = vpop.f32.mrf.mxu1 }
 0xcc3   :  { %v2421_v15 = vadd.f32 %v6565_v14, %v5891_v12 }
 0xcc4   :  { %v2412_v16 = vpop.f32.mrf.mxu1 }
 0xcc5   :  { %v2413_v5 = vadd.f32 %v5891_v12, %v2412_v16  ;;  %v2425_v20 = vmax.f32 %v2418_v17, %v2421_v15 }
 0xcc7   :  { %v2424_v21 = vmax.f32 %v2410_v19, %v2413_v5 }
 0xcc9   :  { %v2426_v22 = vmax.f32 %v2424_v21, %v2425_v20 }
 0xccb   :  { %v2427_v23 = vrot.slane %v2426_v22, 4 }
 0xccd   :  { %v2428_v24 = vmax.f32 %v2426_v22, %v2427_v23 }
 0xccf   :  { %v2429_v63 = vrot.slane %v2428_v24, 2 }
 0xcd1   :  { %v2430_v49 = vmax.f32 %v2428_v24, %v2429_v63  ;;  %v6960_v63 = vld [vmem:[#allocation11 + $0x38] sm:$0xff]  }
 0xcd2   :  { %6566 = vmatprep.subr.bf16.mxu0 %v6960_v63 }
 0xcd3   :  { %v2431_v25 = vrot.slane %v2430_v49, 1  ;;  %6567 = vmatpush3.bf16.msra.mxu0 %v6960_v63 }
 0xcd5   :  { %v2432_v26 = vmax.f32 %v2430_v49, %v2431_v25  ;;  %v6961_v49 = vld [vmem:[#allocation11 + $0x30] sm:$0xff]   ;;  %v6962_v25 = vld [vmem:[#allocation11 + $0x28] sm:$0xff]  }
 0xcd6   :  { %6568 = vmatprep.subr.bf16.mxu0 %v6961_v49 }
 0xcd7   :  { %v2433_v27 = vsub.f32 %v2410_v19, %v2432_v26  ;;  %v2434_v28 = vsub.f32 %v2413_v5, %v2432_v26  ;;  %v2435_v38 = vsub.f32 %v2418_v17, %v2432_v26  ;;  %v2436_v48 = vsub.f32 %v2421_v15, %v2432_v26  ;;  %6569 = vmatpush3.bf16.msra.mxu0 %v6961_v49  ;;  %v6963_v26 = vld [vmem:[#allocation11 + $0x20] sm:$0xff]  }
 0xcd8   :  { %6570 = vmatprep.subr.bf16.mxu0 %v6962_v25 }
 0xcd9   :  { %v2437_v29 = vmul.f32 1.442695, %v2433_v27  ;;  %v2439_v30 = vmul.f32 1.442695, %v2434_v28  ;;  %v2441_v31 = vmul.f32 1.442695, %v2435_v38 }
 0xcda   :  { %v2443_v32 = vmul.f32 1.442695, %v2436_v48  ;;  %v6964_v27 = vld [vmem:[#allocation11 + $0x18] sm:$0xff]   ;;  %v6965_v28 = vld [vmem:[#allocation11 + $0x10] sm:$0xff]   ;;  %v6966_v38 = vld [vmem:[#allocation11 + $0x8] sm:$0xff]  }
 0xcdb   :  { %7188 = vpow2.f32 %v2437_v29  ;;  %6571 = vmatpush3.bf16.msra.mxu0 %v6962_v25  ;;  %v6967_v48 = vld [vmem:[#allocation11] sm:$0xff]  }
 0xcdc   :  { %7190 = vpow2.f32 %v2439_v30  ;;  %6572 = vmatprep.subr.bf16.mxu0 %v6963_v26 }
 0xcdd   :  { %7192 = vpow2.f32 %v2441_v31 }
 0xcde   :  { %7194 = vpow2.f32 %v2443_v32 }
 0xcdf   :  { %6573 = vmatpush3.bf16.msra.mxu0 %v6963_v26 }
 0xce0   :  { %6574 = vmatprep.subr.bf16.mxu0 %v6964_v27 }
 0xce3   :  { %6575 = vmatpush3.bf16.msra.mxu0 %v6964_v27 }
 0xce4   :  { %6576 = vmatprep.subr.bf16.mxu0 %v6965_v28 }
 0xce7   :  { %6577 = vmatpush3.bf16.msra.mxu0 %v6965_v28 }
 0xce8   :  { %v7189_v37 = vpop.eup %7188  ;;  %6578 = vmatprep.subr.bf16.mxu0 %v6966_v38 }
 0xce9   :  { %v7191_v60 = vpop.eup %7190 }
 0xcea   :  { %v2445_v36 = vadd.f32 %v7191_v60, %v7189_v37  ;;  %v7193_v35 = vpop.eup %7192 }
 0xceb   :  { %v7195_v41 = vpop.eup %7194  ;;  %6579 = vmatpush3.bf16.msra.mxu0 %v6966_v38 }
 0xcec   :  { %v2446_v40 = vadd.f32 %v7193_v35, %v2445_v36  ;;  %6580 = vmatprep.subr.bf16.mxu0 %v6967_v48 }
 0xcee   :  { %v2447_v34 = vadd.f32 %v7195_v41, %v2446_v40 }
 0xcef   :  { %6581 = vmatpush3.bf16.msra.mxu0 %v6967_v48 }
 0xcf0   :  { %v2448_v39 = vrot.slane %v2447_v34, 4 }
 0xcf2   :  { %v2449_v45 = vadd.f32 %v2448_v39, %v2447_v34 }
 0xcf4   :  { %v2450_v44 = vrot.slane %v2449_v45, 2 }
 0xcf6   :  { %v2451_v51 = vadd.f32 %v2450_v44, %v2449_v45 }
 0xcf8   :  { %v2452_v58 = vrot.slane %v2451_v51, 1 }
 0xcfa   :  { %v2453_v1 = vadd.f32 %v2452_v58, %v2451_v51 }
 0xcfc   :  { %7196 = vrcp.f32 %v2453_v1 }
 0xd09   :  { %v7197_v42 = vpop.eup %7196 }
 0xd0a   :  { %v2456_v47 = vmul.f32 %v7197_v42, %v7191_v60  ;;  %v2455_v46 = vmul.f32 %v7197_v42, %v7189_v37  ;;  %v2458_v53 = vmul.f32 %v7197_v42, %v7195_v41  ;;  %v2457_v3 = vmul.f32 %v7197_v42, %v7193_v35 }
 0xd0c   :  { %v2460_v54 = vmul.f32 %v2456_v47, %v8156_v59  ;;  %v2459_v55 = vmul.f32 %v2455_v46, %v8154_v43  ;;  %v2462_v13 = vmul.f32 %v2458_v53, %v8162_v6  ;;  %v2461_v61 = vmul.f32 %v2457_v3, %v8160_v50 }
 0xd0e   :  { %v8175_v7 = vadd.f32 %v2460_v54, %v8156_v59  ;;  %v8178_v8 = vadd.f32 %v2459_v55, %v8154_v43  ;;  %v8191_v43 = vadd.f32 %v2462_v13, %v8162_v6  ;;  %v8194_v10 = vadd.f32 %v2461_v61, %v8160_v50 }
 0xd10   :  { %v2470_v62 = vmul.f32 %v7713_v56, %v8175_v7  ;;  %v2469_v18 = vmul.f32 %v7713_v56, %v8178_v8  ;;  %v2482_v9 = vmul.f32 %v8175_v7, %v7720_v0  ;;  %v2481_v59 = vmul.f32 %v8178_v8, %v7720_v0 }
 0xd11   :  { %v2472_v4 = vmul.f32 %v7713_v56, %v8191_v43  ;;  %v2471_v11 = vmul.f32 %v7713_v56, %v8194_v10  ;;  %v2484_v12 = vmul.f32 %v8191_v43, %v7720_v0  ;;  %v2483_v6 = vmul.f32 %v8194_v10, %v7720_v0 }
 0xd12   :  { %2475 = vadd.xlane.f32.xlu1 %v2470_v62  ;;  %2473 = vadd.xlane.f32.xlu0 %v2469_v18  ;;  %v2510_v50 = vmul.f32 %v8175_v7, %v8175_v7  ;;  %v2509_v14 = vmul.f32 %v8178_v8, %v8178_v8  ;;  %v2512_v5 = vmul.f32 %v8191_v43, %v8191_v43 }
 0xd13   :  { %v2511_v20 = vmul.f32 %v8194_v10, %v8194_v10 }
 0xd14   :  { %v2514_v15 = vmul.f32 %v7713_v56, %v2510_v50  ;;  %v2513_v16 = vmul.f32 %v7713_v56, %v2509_v14  ;;  %v2526_v17 = vmul.f32 %v2510_v50, %v7720_v0  ;;  %v2525_v19 = vmul.f32 %v2509_v14, %v7720_v0 }
 0xd15   :  { %v2516_v21 = vmul.f32 %v7713_v56, %v2512_v5  ;;  %v2515_v22 = vmul.f32 %v7713_v56, %v2511_v20  ;;  %v2528_v23 = vmul.f32 %v2512_v5, %v7720_v0  ;;  %v2527_v24 = vmul.f32 %v2511_v20, %v7720_v0 }
 0xd16   :  { %2487 = vadd.xlane.f32.xlu1 %v2482_v9  ;;  %2485 = vadd.xlane.f32.xlu0 %v2481_v59 }
 0xd1a   :  { %2479 = vadd.xlane.f32.xlu1 %v2472_v4  ;;  %2477 = vadd.xlane.f32.xlu0 %v2471_v11 }
 0xd1e   :  { %2491 = vadd.xlane.f32.xlu1 %v2484_v12  ;;  %2489 = vadd.xlane.f32.xlu0 %v2483_v6 }
 0xd22   :  { %2519 = vadd.xlane.f32.xlu1 %v2514_v15  ;;  %2517 = vadd.xlane.f32.xlu0 %v2513_v16 }
 0xd26   :  { %2531 = vadd.xlane.f32.xlu1 %v2526_v17  ;;  %2529 = vadd.xlane.f32.xlu0 %v2525_v19 }
 0xd2a   :  { %2523 = vadd.xlane.f32.xlu1 %v2516_v21  ;;  %2521 = vadd.xlane.f32.xlu0 %v2515_v22 }
 0xd2e   :  { %2535 = vadd.xlane.f32.xlu1 %v2528_v23  ;;  %2533 = vadd.xlane.f32.xlu0 %v2527_v24 }
 0xd9b   :  { %v2476_v29 = vpop.xlane.xlu1 %2475  ;;  %v2474_v30 = vpop.xlane.xlu0 %2473 }
 0xd9c   :  { %v2494_v34 = vmul.f32 %v7713_v56, %v2476_v29  ;;  %v2493_v39 = vmul.f32 %v7713_v56, %v2474_v30 }
 0xd9f   :  { %v2488_v31 = vpop.xlane.xlu1 %2487  ;;  %v2486_v32 = vpop.xlane.xlu0 %2485 }
 0xda0   :  { %v2498_v36 = vmul.f32 %v2488_v31, %v7720_v0  ;;  %v2497_v35 = vmul.f32 %v2486_v32, %v7720_v0 }
 0xda2   :  { %v2502_v45 = vadd.f32 %v2498_v36, %v2494_v34  ;;  %v2501_v44 = vadd.f32 %v2497_v35, %v2493_v39 }
 0xda3   :  { %v2480_v37 = vpop.xlane.xlu1 %2479  ;;  %v2478_v60 = vpop.xlane.xlu0 %2477 }
 0xda4   :  { %v2506_v1 = vmul.f32 0.015625, %v2502_v45  ;;  %v2505_v42 = vmul.f32 0.015625, %v2501_v44  ;;  %v2496_v13 = vmul.f32 %v7713_v56, %v2480_v37  ;;  %v2495_v61 = vmul.f32 %v7713_v56, %v2478_v60  ;;  %v5901_v45 = vld [vmem:[%s8819_s8] ss:$0 sm:$0xff] }
 0xda6   :  { %v2554_v50 = vmul.f32 %v2506_v1, %v2506_v1  ;;  %v2553_v14 = vmul.f32 %v2505_v42, %v2505_v42  ;;  %v2562_v36 = vsub.f32 %v8175_v7, %v2506_v1 }
 0xda7   :  { %v2492_v40 = vpop.xlane.xlu1 %2491  ;;  %v2490_v41 = vpop.xlane.xlu0 %2489 }
 0xda8   :  { %v2500_v47 = vmul.f32 %v2492_v40, %v7720_v0  ;;  %v2499_v46 = vmul.f32 %v2490_v41, %v7720_v0  ;;  %v2561_v40 = vsub.f32 %v8178_v8, %v2505_v42  ;;  %v5900_v41 = vld [vmem:[%s8818_s7] ss:$0 sm:$0xff] }
 0xdaa   :  { %v2504_v4 = vadd.f32 %v2500_v47, %v2496_v13  ;;  %v2503_v11 = vadd.f32 %v2499_v46, %v2495_v61 }
 0xdab   :  { %v2520_v51 = vpop.xlane.xlu1 %2519  ;;  %v2518_v58 = vpop.xlane.xlu0 %2517 }
 0xdac   :  { %v2538_v53 = vmul.f32 %v7713_v56, %v2520_v51  ;;  %v2537_v3 = vmul.f32 %v7713_v56, %v2518_v58  ;;  %v2508_v5 = vmul.f32 0.015625, %v2504_v4  ;;  %v2507_v20 = vmul.f32 0.015625, %v2503_v11  ;;  %v6972_v4 = vld [vmem:[#allocation12 + $0x18] sm:$0xff]   ;;  %v6973_v11 = vld [vmem:[#allocation12 + $0x10] sm:$0xff]  }
 0xdae   :  { %v2556_v38 = vmul.f32 %v2508_v5, %v2508_v5  ;;  %v2555_v48 = vmul.f32 %v2507_v20, %v2507_v20  ;;  %v2564_v7 = vsub.f32 %v8191_v43, %v2508_v5  ;;  %v2563_v1 = vsub.f32 %v8194_v10, %v2507_v20  ;;  %v6968_v43 = vld [vmem:[#allocation12 + $0x38] sm:$0xff]   ;;  %v6969_v10 = vld [vmem:[#allocation12 + $0x30] sm:$0xff]  }
 0xdaf   :  { %v2532_v54 = vpop.xlane.xlu1 %2531  ;;  %v2530_v55 = vpop.xlane.xlu0 %2529  ;;  %6586 = vmatprep.subr.bf16.mxu1 %v6968_v43 }
 0xdb0   :  { %v2542_v62 = vmul.f32 %v2532_v54, %v7720_v0  ;;  %v2541_v18 = vmul.f32 %v2530_v55, %v7720_v0  ;;  %6587 = vmatpush3.bf16.msra.mxu1 %v6968_v43 }
 0xdb1   :  { %6588 = vmatprep.subr.bf16.mxu1 %v6969_v10 }
 0xdb2   :  { %v2546_v9 = vadd.f32 %v2542_v62, %v2538_v53  ;;  %v2545_v59 = vadd.f32 %v2541_v18, %v2537_v3 }
 0xdb3   :  { %v2524_v12 = vpop.xlane.xlu1 %2523  ;;  %v2522_v6 = vpop.xlane.xlu0 %2521 }
 0xdb4   :  { %v2550_v15 = vmul.f32 0.015625, %v2546_v9  ;;  %v2549_v16 = vmul.f32 0.015625, %v2545_v59  ;;  %v2540_v21 = vmul.f32 %v7713_v56, %v2524_v12  ;;  %v2539_v22 = vmul.f32 %v7713_v56, %v2522_v6  ;;  %6589 = vmatpush3.bf16.msra.mxu1 %v6969_v10  ;;  %v6970_v9 = vld [vmem:[#allocation12 + $0x28] sm:$0xff]   ;;  %v6971_v59 = vld [vmem:[#allocation12 + $0x20] sm:$0xff]   ;;  %v5911_v10 = vld [vmem:[%s8823_s12] ss:$0 sm:$0xff] }
 0xdb5   :  { %6590 = vmatprep.subr.bf16.mxu1 %v6970_v9  ;;  %v6974_v12 = vld [vmem:[#allocation12 + $0x8] sm:$0xff]   ;;  %v6975_v6 = vld [vmem:[#allocation12] sm:$0xff]  }
 0xdb6   :  { %v2558_v17 = vsub.f32 %v2550_v15, %v2554_v50  ;;  %v2557_v19 = vsub.f32 %v2549_v16, %v2553_v14  ;;  %v5902_v50 = vld [vmem:[%s8821_s10] ss:$0 sm:$0xff] }
 0xdb7   :  { %v2536_v23 = vpop.xlane.xlu1 %2535  ;;  %v2534_v24 = vpop.xlane.xlu0 %2533 }
 0xdb8   :  { %v2566_v63 = vadd.f32 1e-05, %v2558_v17  ;;  %v2565_v49 = vadd.f32 1e-05, %v2557_v19  ;;  %v2544_v25 = vmul.f32 %v2536_v23, %v7720_v0  ;;  %v2543_v26 = vmul.f32 %v2534_v24, %v7720_v0  ;;  %6591 = vmatpush3.bf16.msra.mxu1 %v6970_v9 }
 0xdb9   :  { %6592 = vmatprep.subr.bf16.mxu1 %v6971_v59 }
 0xdba   :  { %7198 = vrsqrt.f32 %v2566_v63  ;;  %v2548_v27 = vadd.f32 %v2544_v25, %v2540_v21  ;;  %v2547_v28 = vadd.f32 %v2543_v26, %v2539_v22 }
 0xdbb   :  { %7200 = vrsqrt.f32 %v2565_v49 }
 0xdbc   :  { %v2552_v29 = vmul.f32 0.015625, %v2548_v27  ;;  %v2551_v30 = vmul.f32 0.015625, %v2547_v28  ;;  %6593 = vmatpush3.bf16.msra.mxu1 %v6971_v59 }
 0xdbd   :  { %6594 = vmatprep.subr.bf16.mxu1 %v6972_v4 }
 0xdbe   :  { %v2560_v31 = vsub.f32 %v2552_v29, %v2556_v38  ;;  %v2559_v32 = vsub.f32 %v2551_v30, %v2555_v48 }
 0xdc0   :  { %v2568_v37 = vadd.f32 1e-05, %v2560_v31  ;;  %v2567_v60 = vadd.f32 1e-05, %v2559_v32  ;;  %6595 = vmatpush3.bf16.msra.mxu1 %v6972_v4 }
 0xdc1   :  { %6596 = vmatprep.subr.bf16.mxu1 %v6973_v11 }
 0xdc2   :  { %7202 = vrsqrt.f32 %v2568_v37 }
 0xdc3   :  { %7204 = vrsqrt.f32 %v2567_v60 }
 0xdc4   :  { %6597 = vmatpush3.bf16.msra.mxu1 %v6973_v11 }
 0xdc5   :  { %6598 = vmatprep.subr.bf16.mxu1 %v6974_v12 }
 0xdc7   :  { %v7199_v35 = vpop.eup %7198 }
 0xdc8   :  { %v7201_v34 = vpop.eup %7200  ;;  %v2574_v39 = vmul.f32 %v7199_v35, %v2562_v36  ;;  %6599 = vmatpush3.bf16.msra.mxu1 %v6974_v12 }
 0xdc9   :  { %v2573_v44 = vmul.f32 %v7201_v34, %v2561_v40  ;;  %6600 = vmatprep.subr.bf16.mxu1 %v6975_v6 }
 0xdca   :  { %v2584_v51 = vmul.f32 %v5900_v41, %v2574_v39 }
 0xdcb   :  { %v2583_v58 = vmul.f32 %v5900_v41, %v2573_v44 }
 0xdcc   :  { %v8244_v47 = vadd.f32 %v5901_v45, %v2584_v51  ;;  %6601 = vmatpush3.bf16.msra.mxu1 %v6975_v6 }
 0xdcd   :  { %v8246_v46 = vadd.f32 %v5901_v45, %v2583_v58 }
 0xdcf   :  { %v7203_v8 = vpop.eup %7202  ;;  %v2614_v42 = vpack.c.bf16 %v8244_v47, %v8246_v46 }
 0xdd0   :  { %v7205_v54 = vpop.eup %7204  ;;  %v2576_v55 = vmul.f32 %v7203_v8, %v2564_v7 }
 0xdd1   :  { %6582 = vmatprep.mubr.bf16.mxu0 %v2614_v42  ;;  %v2575_v53 = vmul.f32 %v7205_v54, %v2563_v1 }
 0xdd2   :  { %v2586_v3 = vmul.f32 %v5900_v41, %v2576_v55 }
 0xdd3   :  { %v2585_v62 = vmul.f32 %v5900_v41, %v2575_v53 }
 0xdd4   :  { %v8252_v18 = vadd.f32 %v5901_v45, %v2586_v3 }
 0xdd5   :  { %v8254_v13 = vadd.f32 %v5901_v45, %v2585_v62 }
 0xdd7   :  { %v2615_v61 = vpack.c.bf16 %v8252_v18, %v8254_v13 }
 0xdd9   :  { %6583 = vmatmul.mubr.bf16.vlgmr.msra.gmra.mxu0 %v2615_v61 }
 0xe99   :  { %v6584_v14 = vpop.f32.mrf.mxu0 }
 0xe9a   :  { %v2713_v15 = vadd.f32 %v6584_v14, %v5902_v50 }
 0xe9b   :  { %v2704_v16 = vpop.f32.mrf.mxu0 }
 0xe9c   :  { %v2725_v17 = vmul.f32 0.044715, %v2713_v15  ;;  %v2705_v19 = vadd.f32 %v5902_v50, %v2704_v16  ;;  %v2721_v54 = vmul.f32 0.5, %v2713_v15 }
 0xe9d   :  { %v6585_v5 = vpop.f32.mrf.mxu0 }
 0xe9e   :  { %v2729_v20 = vmul.f32 %v2725_v17, %v2713_v15  ;;  %v2723_v21 = vmul.f32 0.044715, %v2705_v19  ;;  %v2716_v22 = vadd.f32 %v6585_v5, %v5902_v50  ;;  %v2719_v8 = vmul.f32 0.5, %v2705_v19 }
 0xe9f   :  { %v2707_v23 = vpop.f32.mrf.mxu0 }
 0xea0   :  { %v2733_v24 = vmul.f32 %v2729_v20, %v2713_v15  ;;  %v2727_v63 = vmul.f32 %v2723_v21, %v2705_v19  ;;  %v2726_v49 = vmul.f32 0.044715, %v2716_v22  ;;  %v2708_v25 = vadd.f32 %v5902_v50, %v2707_v23 }
 0xea1   :  { %v2722_v58 = vmul.f32 0.5, %v2716_v22 }
 0xea2   :  { %v2737_v26 = vadd.f32 %v2733_v24, %v2713_v15  ;;  %v2731_v27 = vmul.f32 %v2727_v63, %v2705_v19  ;;  %v2730_v28 = vmul.f32 %v2726_v49, %v2716_v22  ;;  %v2724_v38 = vmul.f32 0.044715, %v2708_v25 }
 0xea3   :  { %v2720_v1 = vmul.f32 0.5, %v2708_v25 }
 0xea4   :  { %v2734_v48 = vmul.f32 %v2730_v28, %v2716_v22  ;;  %v2728_v29 = vmul.f32 %v2724_v38, %v2708_v25  ;;  %v2735_v30 = vadd.f32 %v2731_v27, %v2705_v19  ;;  %v2741_v31 = vmul.f32 0.7978846, %v2737_v26 }
 0xea6   :  { %v2738_v32 = vadd.f32 %v2734_v48, %v2716_v22  ;;  %v2732_v37 = vmul.f32 %v2728_v29, %v2708_v25  ;;  %v2739_v60 = vmul.f32 0.7978846, %v2735_v30 }
 0xea8   :  { %v2742_v36 = vmul.f32 0.7978846, %v2738_v32  ;;  %v2736_v35 = vadd.f32 %v2732_v37, %v2708_v25  ;;  %7206 = vtanh.f32 %v2739_v60 }
 0xea9   :  { %7208 = vtanh.f32 %v2741_v31 }
 0xeaa   :  { %7210 = vtanh.f32 %v2742_v36  ;;  %v2740_v40 = vmul.f32 0.7978846, %v2736_v35 }
 0xeac   :  { %7212 = vtanh.f32 %v2740_v40 }
 0xeb5   :  { %v7207_v41 = vpop.eup %7206 }
 0xeb6   :  { %v7209_v34 = vpop.eup %7208  ;;  %v2747_v45 = vadd.f32 1.0, %v7207_v41 }
 0xeb7   :  { %v7211_v39 = vpop.eup %7210  ;;  %v2749_v7 = vadd.f32 1.0, %v7209_v34 }
 0xeb8   :  { %v2750_v44 = vadd.f32 1.0, %v7211_v39  ;;  %v2751_v53 = vmul.f32 %v2747_v45, %v2719_v8 }
 0xeb9   :  { %v7213_v51 = vpop.eup %7212  ;;  %v2753_v62 = vmul.f32 %v2749_v7, %v2721_v54 }
 0xeba   :  { %v2748_v42 = vadd.f32 1.0, %v7213_v51  ;;  %v2754_v55 = vmul.f32 %v2750_v44, %v2722_v58 }
 0xebc   :  { %v2752_v3 = vmul.f32 %v2748_v42, %v2720_v1  ;;  %v2773_v43 = vpack.c.bf16 %v2754_v55, %v2753_v62 }
 0xebe   :  { %v2772_v61 = vpack.c.bf16 %v2752_v3, %v2751_v53 }
 0xec0   :  { %6602 = vmatprep.mubr.bf16.mxu1 %v2772_v61 }
 0xec1   :  { %6603 = vmatmul.mubr.bf16.vlgmr.msra.gmra.mxu1 %v2773_v43 }
 0xf81   :  { %v6604_v9 = vpop.f32.mrf.mxu1 }
 0xf82   :  { %v2871_v59 = vadd.f32 %v6604_v9, %v5911_v10 }
 0xf83   :  { %v2862_v4 = vpop.f32.mrf.mxu1 }
 0xf84   :  { %v2879_v11 = vadd.f32 %v2871_v59, %v8254_v13  ;;  %v2863_v12 = vadd.f32 %v5911_v10, %v2862_v4 }
 0xf85   :  { %v6605_v6 = vpop.f32.mrf.mxu1 }
 0xf86   :  { %v2887_v50 = vmul.f32 0.044715, %v2879_v11  ;;  %v2877_v14 = vadd.f32 %v2863_v12, %v8246_v46  ;;  %v2874_v15 = vadd.f32 %v6605_v6, %v5911_v10 }
 0xf87   :  { %v2865_v16 = vpop.f32.mrf.mxu1 }
 0xf88   :  { %v2891_v17 = vmul.f32 %v2887_v50, %v2879_v11  ;;  %v2885_v19 = vmul.f32 0.044715, %v2877_v14  ;;  %v2880_v5 = vadd.f32 %v2874_v15, %v8252_v18  ;;  %v2866_v20 = vadd.f32 %v5911_v10, %v2865_v16 }
 0xf89   :  { %v2881_v51 = vmul.f32 0.5, %v2877_v14 }
 0xf8a   :  { %v2895_v21 = vmul.f32 %v2891_v17, %v2879_v11  ;;  %v2889_v22 = vmul.f32 %v2885_v19, %v2877_v14  ;;  %v2888_v23 = vmul.f32 0.044715, %v2880_v5  ;;  %v2878_v24 = vadd.f32 %v2866_v20, %v8244_v47  ;;  %v6976_v17 = vld [vmem:[#allocation9 + $0x78] sm:$0xff]   ;;  %v6977_v19 = vld [vmem:[#allocation9 + $0x70] sm:$0xff]   ;;  %v6979_v20 = vld [vmem:[#allocation9 + $0x60] sm:$0xff]  }
 0xf8b   :  { %v2883_v47 = vmul.f32 0.5, %v2879_v11  ;;  %v2884_v41 = vmul.f32 0.5, %v2880_v5  ;;  %6606 = vmatprep.subr.bf16.mxu0 %v6976_v17 }
 0xf8c   :  { %v2899_v63 = vadd.f32 %v2895_v21, %v2879_v11  ;;  %v2893_v49 = vmul.f32 %v2889_v22, %v2877_v14  ;;  %v2892_v13 = vmul.f32 %v2888_v23, %v2880_v5  ;;  %v2886_v25 = vmul.f32 0.044715, %v2878_v24  ;;  %6607 = vmatpush3.bf16.msra.mxu0 %v6976_v17  ;;  %v6980_v21 = vld [vmem:[#allocation9 + $0x58] sm:$0xff]   ;;  %v6981_v22 = vld [vmem:[#allocation9 + $0x50] sm:$0xff]   ;;  %v6982_v23 = vld [vmem:[#allocation9 + $0x48] sm:$0xff]  }
 0xf8d   :  { %v2882_v42 = vmul.f32 0.5, %v2878_v24  ;;  %6608 = vmatprep.subr.bf16.mxu0 %v6977_v19 }
 0xf8e   :  { %v2897_v26 = vadd.f32 %v2893_v49, %v2877_v14  ;;  %v2896_v27 = vmul.f32 %v2892_v13, %v2880_v5  ;;  %v2890_v28 = vmul.f32 %v2886_v25, %v2878_v24  ;;  %v2903_v46 = vmul.f32 0.7978846, %v2899_v63 }
 0xf90   :  { %v2901_v38 = vmul.f32 0.7978846, %v2897_v26  ;;  %v2900_v48 = vadd.f32 %v2896_v27, %v2880_v5  ;;  %v2894_v29 = vmul.f32 %v2890_v28, %v2878_v24  ;;  %7214 = vtanh.f32 %v2903_v46  ;;  %6609 = vmatpush3.bf16.msra.mxu0 %v6977_v19  ;;  %v6978_v5 = vld [vmem:[#allocation9 + $0x68] sm:$0xff]  }
 0xf91   :  { %6610 = vmatprep.subr.bf16.mxu0 %v6978_v5 }
 0xf92   :  { %7216 = vtanh.f32 %v2901_v38  ;;  %v2898_v18 = vadd.f32 %v2894_v29, %v2878_v24  ;;  %v2904_v30 = vmul.f32 0.7978846, %v2900_v48  ;;  %v6983_v24 = vld [vmem:[#allocation9 + $0x40] sm:$0xff]  }
 0xf94   :  { %v2902_v31 = vmul.f32 0.7978846, %v2898_v18  ;;  %7218 = vtanh.f32 %v2904_v30  ;;  %6611 = vmatpush3.bf16.msra.mxu0 %v6978_v5 }
 0xf95   :  { %6612 = vmatprep.subr.bf16.mxu0 %v6979_v20 }
 0xf96   :  { %7220 = vtanh.f32 %v2902_v31 }
 0xf98   :  { %6613 = vmatpush3.bf16.msra.mxu0 %v6979_v20 }
 0xf99   :  { %6614 = vmatprep.subr.bf16.mxu0 %v6980_v21 }
 0xf9c   :  { %6615 = vmatpush3.bf16.msra.mxu0 %v6980_v21 }
 0xf9d   :  { %v7215_v32 = vpop.eup %7214  ;;  %6616 = vmatprep.subr.bf16.mxu0 %v6981_v22 }
 0xf9e   :  { %v2911_v37 = vadd.f32 1.0, %v7215_v32 }
 0xf9f   :  { %v7217_v60 = vpop.eup %7216 }
 0xfa0   :  { %v8268_v36 = vmul.f32 %v2911_v37, %v2883_v47  ;;  %v2909_v39 = vadd.f32 1.0, %v7217_v60  ;;  %6617 = vmatpush3.bf16.msra.mxu0 %v6981_v22 }
 0xfa1   :  { %v7219_v35 = vpop.eup %7218  ;;  %6618 = vmatprep.subr.bf16.mxu0 %v6982_v23 }
 0xfa2   :  { %v2921_v40 = vmul.f32 %v7713_v56, %v8268_v36  ;;  %v2912_v34 = vadd.f32 1.0, %v7219_v35  ;;  %v2933_v58 = vmul.f32 %v8268_v36, %v7720_v0  ;;  %v8278_v8 = vmul.f32 %v2909_v39, %v2881_v51 }
 0xfa3   :  { %v7221_v45 = vpop.eup %7220  ;;  %v2961_v61 = vmul.f32 %v8268_v36, %v8268_v36 }
 0xfa4   :  { %2927 = vadd.xlane.f32.xlu0 %v2921_v40  ;;  %v8272_v44 = vmul.f32 %v2912_v34, %v2884_v41  ;;  %v2910_v1 = vadd.f32 1.0, %v7221_v45  ;;  %v2919_v55 = vmul.f32 %v7713_v56, %v8278_v8  ;;  %v2931_v62 = vmul.f32 %v8278_v8, %v7720_v0  ;;  %6619 = vmatpush3.bf16.msra.mxu0 %v6982_v23 }
 0xfa5   :  { %v2965_v10 = vmul.f32 %v7713_v56, %v2961_v61  ;;  %v2959_v59 = vmul.f32 %v8278_v8, %v8278_v8  ;;  %v2977_v15 = vmul.f32 %v2961_v61, %v7720_v0  ;;  %6620 = vmatprep.subr.bf16.mxu0 %v6983_v24 }
 0xfa6   :  { %v2922_v7 = vmul.f32 %v7713_v56, %v8272_v44  ;;  %v2934_v54 = vmul.f32 %v8272_v44, %v7720_v0  ;;  %v8284_v53 = vmul.f32 %v2910_v1, %v2882_v42  ;;  %v2962_v9 = vmul.f32 %v8272_v44, %v8272_v44 }
 0xfa7   :  { %v2963_v11 = vmul.f32 %v7713_v56, %v2959_v59  ;;  %v2975_v50 = vmul.f32 %v2959_v59, %v7720_v0 }
 0xfa8   :  { %2939 = vadd.xlane.f32.xlu0 %v2933_v58  ;;  %2929 = vadd.xlane.f32.xlu1 %v2922_v7  ;;  %v2920_v3 = vmul.f32 %v7713_v56, %v8284_v53  ;;  %v2932_v43 = vmul.f32 %v8284_v53, %v7720_v0  ;;  %v2966_v4 = vmul.f32 %v7713_v56, %v2962_v9 }
 0xfa9   :  { %v2960_v12 = vmul.f32 %v8284_v53, %v8284_v53  ;;  %v2978_v16 = vmul.f32 %v2962_v9, %v7720_v0  ;;  %6621 = vmatpush3.bf16.msra.mxu0 %v6983_v24 }
 0xfab   :  { %v2964_v6 = vmul.f32 %v7713_v56, %v2960_v12  ;;  %v2976_v14 = vmul.f32 %v2960_v12, %v7720_v0 }
 0xfac   :  { %2941 = vadd.xlane.f32.xlu1 %v2934_v54  ;;  %2923 = vadd.xlane.f32.xlu0 %v2919_v55 }
 0xfb0   :  { %2925 = vadd.xlane.f32.xlu1 %v2920_v3  ;;  %2935 = vadd.xlane.f32.xlu0 %v2931_v62 }
 0xfb4   :  { %2937 = vadd.xlane.f32.xlu1 %v2932_v43  ;;  %2971 = vadd.xlane.f32.xlu0 %v2965_v10 }
 0xfb8   :  { %2973 = vadd.xlane.f32.xlu1 %v2966_v4  ;;  %2967 = vadd.xlane.f32.xlu0 %v2963_v11 }
 0xfbc   :  { %2969 = vadd.xlane.f32.xlu1 %v2964_v6  ;;  %2979 = vadd.xlane.f32.xlu0 %v2975_v50 }
 0xfc0   :  { %2981 = vadd.xlane.f32.xlu1 %v2976_v14  ;;  %2983 = vadd.xlane.f32.xlu0 %v2977_v15 }
 0xfc4   :  { %2985 = vadd.xlane.f32.xlu1 %v2978_v16 }
0x102d   :  { %v2928_v63 = vpop.xlane.xlu0 %2927 }
0x102e   :  { %v2945_v37 = vmul.f32 %v7713_v56, %v2928_v63 }
0x1031   :  { %v2940_v49 = vpop.xlane.xlu0 %2939  ;;  %v2930_v13 = vpop.xlane.xlu1 %2929 }
0x1032   :  { %v2949_v18 = vmul.f32 %v2940_v49, %v7720_v0  ;;  %v2946_v7 = vmul.f32 %v7713_v56, %v2930_v13 }
0x1034   :  { %v2953_v35 = vadd.f32 %v2949_v18, %v2945_v37  ;;  %v5923_v37 = vld [vmem:[%s8815_s4 + $0x1] ss:$0 sm:$0xff] }
0x1035   :  { %v2942_v25 = vpop.xlane.xlu1 %2941  ;;  %v2924_v26 = vpop.xlane.xlu0 %2923 }
0x1036   :  { %v2943_v29 = vmul.f32 %v7713_v56, %v2924_v26  ;;  %v2950_v40 = vmul.f32 %v2942_v25, %v7720_v0  ;;  %v2957_v1 = vmul.f32 0.015625, %v2953_v35 }
0x1038   :  { %v2954_v54 = vadd.f32 %v2950_v40, %v2946_v7  ;;  %v3005_v50 = vmul.f32 %v2957_v1, %v2957_v1 }
0x1039   :  { %v2926_v27 = vpop.xlane.xlu1 %2925  ;;  %v2936_v28 = vpop.xlane.xlu0 %2935 }
0x103a   :  { %v2947_v46 = vmul.f32 %v2936_v28, %v7720_v0  ;;  %v2944_v60 = vmul.f32 %v7713_v56, %v2926_v27  ;;  %v2958_v14 = vmul.f32 0.015625, %v2954_v54 }
0x103c   :  { %v2951_v30 = vadd.f32 %v2947_v46, %v2943_v29  ;;  %v3006_v63 = vmul.f32 %v2958_v14, %v2958_v14 }
0x103d   :  { %v2938_v38 = vpop.xlane.xlu1 %2937  ;;  %v2972_v48 = vpop.xlane.xlu0 %2971 }
0x103e   :  { %v2948_v31 = vmul.f32 %v2938_v38, %v7720_v0  ;;  %v2955_v41 = vmul.f32 0.015625, %v2951_v30  ;;  %v2989_v62 = vmul.f32 %v7713_v56, %v2972_v48  ;;  %v5922_v48 = vld [vmem:[%s8814_s3 + $0x1] ss:$0 sm:$0xff]  ;;  %v3013_v30 = vsub.f32 %v8268_v36, %v2957_v1 }
0x1040   :  { %v2952_v34 = vadd.f32 %v2948_v31, %v2944_v60  ;;  %v3003_v55 = vmul.f32 %v2955_v41, %v2955_v41  ;;  %v3011_v28 = vsub.f32 %v8278_v8, %v2955_v41  ;;  %v3014_v8 = vsub.f32 %v8272_v44, %v2958_v14 }
0x1041   :  { %v2974_v32 = vpop.xlane.xlu1 %2973  ;;  %v2968_v47 = vpop.xlane.xlu0 %2967 }
0x1042   :  { %v2987_v51 = vmul.f32 %v7713_v56, %v2968_v47  ;;  %v2956_v3 = vmul.f32 0.015625, %v2952_v34  ;;  %v2990_v16 = vmul.f32 %v7713_v56, %v2974_v32 }
0x1044   :  { %v3004_v15 = vmul.f32 %v2956_v3, %v2956_v3  ;;  %v3012_v29 = vsub.f32 %v8284_v53, %v2956_v3 }
0x1045   :  { %v2970_v39 = vpop.xlane.xlu1 %2969  ;;  %v2980_v45 = vpop.xlane.xlu0 %2979 }
0x1046   :  { %v2991_v58 = vmul.f32 %v2980_v45, %v7720_v0  ;;  %v2988_v10 = vmul.f32 %v7713_v56, %v2970_v39 }
0x1048   :  { %v2995_v42 = vadd.f32 %v2991_v58, %v2987_v51 }
0x1049   :  { %v2982_v61 = vpop.xlane.xlu1 %2981  ;;  %v2984_v43 = vpop.xlane.xlu0 %2983 }
0x104a   :  { %v2999_v9 = vmul.f32 0.015625, %v2995_v42  ;;  %v2992_v59 = vmul.f32 %v2982_v61, %v7720_v0  ;;  %v2993_v4 = vmul.f32 %v2984_v43, %v7720_v0  ;;  %v5925_v42 = vld [vmem:[%s8817_s6 + $0x1] ss:$0 sm:$0xff] }
0x104c   :  { %v3007_v11 = vsub.f32 %v2999_v9, %v3003_v55  ;;  %v2996_v12 = vadd.f32 %v2992_v59, %v2988_v10  ;;  %v2997_v6 = vadd.f32 %v2993_v4, %v2989_v62 }
0x104d   :  { %v2986_v17 = vpop.xlane.xlu1 %2985 }
0x104e   :  { %v3015_v19 = vadd.f32 1e-05, %v3007_v11  ;;  %v3000_v5 = vmul.f32 0.015625, %v2996_v12  ;;  %v3001_v20 = vmul.f32 0.015625, %v2997_v6  ;;  %v2994_v21 = vmul.f32 %v2986_v17, %v7720_v0 }
0x1050   :  { %7222 = vrsqrt.f32 %v3015_v19  ;;  %v3008_v22 = vsub.f32 %v3000_v5, %v3004_v15  ;;  %v3009_v23 = vsub.f32 %v3001_v20, %v3005_v50  ;;  %v2998_v24 = vadd.f32 %v2994_v21, %v2990_v16 }
0x1052   :  { %v3016_v49 = vadd.f32 1e-05, %v3008_v22  ;;  %v3017_v13 = vadd.f32 1e-05, %v3009_v23  ;;  %v3002_v25 = vmul.f32 0.015625, %v2998_v24 }
0x1054   :  { %7224 = vrsqrt.f32 %v3016_v49  ;;  %v3010_v26 = vsub.f32 %v3002_v25, %v3006_v63 }
0x1055   :  { %7226 = vrsqrt.f32 %v3017_v13 }
0x1056   :  { %v3018_v27 = vadd.f32 1e-05, %v3010_v26 }
0x1058   :  { %7228 = vrsqrt.f32 %v3018_v27 }
0x105d   :  { %v7223_v46 = vpop.eup %7222 }
0x105e   :  { %v3023_v38 = vmul.f32 %v7223_v46, %v3011_v28 }
0x1060   :  { %v3033_v47 = vmul.f32 %v5922_v48, %v3023_v38 }
0x1061   :  { %v7225_v18 = vpop.eup %7224 }
0x1062   :  { %v7227_v31 = vpop.eup %7226  ;;  %v3024_v32 = vmul.f32 %v7225_v18, %v3012_v29  ;;  %v8334_v41 = vadd.f32 %v5923_v37, %v3033_v47 }
0x1063   :  { %v3025_v60 = vmul.f32 %v7227_v31, %v3013_v30 }
0x1064   :  { %v3034_v35 = vmul.f32 %v5922_v48, %v3024_v32 }
0x1065   :  { %v7229_v40 = vpop.eup %7228  ;;  %v3035_v53 = vmul.f32 %v5922_v48, %v3025_v60 }
0x1066   :  { %v3044_v34 = vadd.f32 %v5923_v37, %v3034_v35  ;;  %v3026_v39 = vmul.f32 %v7229_v40, %v3014_v8 }
0x1067   :  { %v8337_v51 = vadd.f32 %v5923_v37, %v3035_v53 }
0x1068   :  { %v3064_v45 = vpack.c.bf16 %v3044_v34, %v8334_v41  ;;  %v3036_v36 = vmul.f32 %v5922_v48, %v3026_v39 }
0x106a   :  { %6622 = vmatprep.mubr.bf16.mxu0 %v3064_v45  ;;  %v8339_v58 = vadd.f32 %v5923_v37, %v3036_v36 }
0x106c   :  { %v3065_v7 = vpack.c.bf16 %v8339_v58, %v8337_v51 }
0x106e   :  { %6623 = vmatmul.mubr.bf16.vlgmr.msra.gmra.mxu0 %v3065_v7 }
0x112e   :  { %v6624_v44 = vpop.f32.mrf.mxu0 }
0x112f   :  { %v3163_v62 = vadd.f32 %v6624_v44, %v5925_v42 }
0x1130   :  { %v3154_v1 = vpop.f32.mrf.mxu0 }
0x1131   :  { %v3155_v61 = vadd.f32 %v5925_v42, %v3154_v1 }
0x1132   :  { %v6625_v54 = vpop.f32.mrf.mxu0 }
0x1133   :  { %v3166_v55 = vadd.f32 %v6625_v54, %v5925_v42 }
0x1134   :  { %v3157_v3 = vpop.f32.mrf.mxu0 }
0x1135   :  { %v3158_v43 = vadd.f32 %v5925_v42, %v3157_v3  ;;  %v3170_v10 = vmax.f32 %v3163_v62, %v3166_v55 }
0x1137   :  { %v3169_v9 = vmax.f32 %v3155_v61, %v3158_v43 }
0x1139   :  { %v3171_v59 = vmax.f32 %v3169_v9, %v3170_v10 }
0x113b   :  { %v3172_v4 = vrot.slane %v3171_v59, 4 }
0x113d   :  { %v3173_v11 = vmax.f32 %v3171_v59, %v3172_v4 }
0x113f   :  { %v3174_v12 = vrot.slane %v3173_v11, 2 }
0x1141   :  { %v3175_v6 = vmax.f32 %v3173_v11, %v3174_v12  ;;  %v6984_v12 = vld [vmem:[#allocation11 + $0x78] sm:$0xff]  }
0x1142   :  { %6626 = vmatprep.subr.bf16.mxu1 %v6984_v12 }
0x1143   :  { %v3176_v50 = vrot.slane %v3175_v6, 1  ;;  %6627 = vmatpush3.bf16.msra.mxu1 %v6984_v12 }
0x1145   :  { %v3177_v14 = vmax.f32 %v3175_v6, %v3176_v50  ;;  %v6985_v6 = vld [vmem:[#allocation11 + $0x70] sm:$0xff]   ;;  %v6986_v50 = vld [vmem:[#allocation11 + $0x68] sm:$0xff]  }
0x1146   :  { %6628 = vmatprep.subr.bf16.mxu1 %v6985_v6 }
0x1147   :  { %v3178_v15 = vsub.f32 %v3155_v61, %v3177_v14  ;;  %v3179_v16 = vsub.f32 %v3158_v43, %v3177_v14  ;;  %v3180_v17 = vsub.f32 %v3163_v62, %v3177_v14  ;;  %v3181_v19 = vsub.f32 %v3166_v55, %v3177_v14  ;;  %6629 = vmatpush3.bf16.msra.mxu1 %v6985_v6  ;;  %v6987_v14 = vld [vmem:[#allocation11 + $0x60] sm:$0xff]  }
0x1148   :  { %6630 = vmatprep.subr.bf16.mxu1 %v6986_v50 }
0x1149   :  { %v3182_v5 = vmul.f32 1.442695, %v3178_v15  ;;  %v3184_v20 = vmul.f32 1.442695, %v3179_v16  ;;  %v3186_v21 = vmul.f32 1.442695, %v3180_v17 }
0x114a   :  { %v3188_v22 = vmul.f32 1.442695, %v3181_v19  ;;  %v6988_v15 = vld [vmem:[#allocation11 + $0x58] sm:$0xff]   ;;  %v6989_v16 = vld [vmem:[#allocation11 + $0x50] sm:$0xff]   ;;  %v6990_v17 = vld [vmem:[#allocation11 + $0x48] sm:$0xff]  }
0x114b   :  { %7230 = vpow2.f32 %v3182_v5  ;;  %6631 = vmatpush3.bf16.msra.mxu1 %v6986_v50  ;;  %v6991_v19 = vld [vmem:[#allocation11 + $0x40] sm:$0xff]  }
0x114c   :  { %7232 = vpow2.f32 %v3184_v20  ;;  %6632 = vmatprep.subr.bf16.mxu1 %v6987_v14 }
0x114d   :  { %7234 = vpow2.f32 %v3186_v21 }
0x114e   :  { %7236 = vpow2.f32 %v3188_v22 }
0x114f   :  { %6633 = vmatpush3.bf16.msra.mxu1 %v6987_v14 }
0x1150   :  { %6634 = vmatprep.subr.bf16.mxu1 %v6988_v15 }
0x1153   :  { %6635 = vmatpush3.bf16.msra.mxu1 %v6988_v15 }
0x1154   :  { %6636 = vmatprep.subr.bf16.mxu1 %v6989_v16 }
0x1157   :  { %6637 = vmatpush3.bf16.msra.mxu1 %v6989_v16 }
0x1158   :  { %v7231_v23 = vpop.eup %7230  ;;  %6638 = vmatprep.subr.bf16.mxu1 %v6990_v17 }
0x1159   :  { %v7233_v24 = vpop.eup %7232 }
0x115a   :  { %v3190_v63 = vadd.f32 %v7233_v24, %v7231_v23  ;;  %v7235_v49 = vpop.eup %7234 }
0x115b   :  { %v7237_v25 = vpop.eup %7236  ;;  %6639 = vmatpush3.bf16.msra.mxu1 %v6990_v17 }
0x115c   :  { %v3191_v13 = vadd.f32 %v7235_v49, %v3190_v63  ;;  %6640 = vmatprep.subr.bf16.mxu1 %v6991_v19 }
0x115e   :  { %v3192_v26 = vadd.f32 %v7237_v25, %v3191_v13 }
0x115f   :  { %6641 = vmatpush3.bf16.msra.mxu1 %v6991_v19 }
0x1160   :  { %v3193_v27 = vrot.slane %v3192_v26, 4 }
0x1162   :  { %v3194_v28 = vadd.f32 %v3193_v27, %v3192_v26 }
0x1164   :  { %v3195_v46 = vrot.slane %v3194_v28, 2 }
0x1166   :  { %v3196_v38 = vadd.f32 %v3195_v46, %v3194_v28 }
0x1168   :  { %v3197_v48 = vrot.slane %v3196_v38, 1 }
0x116a   :  { %v3198_v29 = vadd.f32 %v3197_v48, %v3196_v38 }
0x116c   :  { %7238 = vrcp.f32 %v3198_v29 }
0x1179   :  { %v7239_v18 = vpop.eup %7238 }
0x117a   :  { %v3201_v30 = vmul.f32 %v7239_v18, %v7233_v24  ;;  %v3200_v31 = vmul.f32 %v7239_v18, %v7231_v23  ;;  %v3203_v37 = vmul.f32 %v7239_v18, %v7237_v25  ;;  %v3202_v60 = vmul.f32 %v7239_v18, %v7235_v49 }
0x117c   :  { %v3205_v32 = vmul.f32 %v3201_v30, %v3044_v34  ;;  %v3204_v47 = vmul.f32 %v3200_v31, %v8334_v41  ;;  %v3207_v53 = vmul.f32 %v3203_v37, %v8339_v58  ;;  %v3206_v45 = vmul.f32 %v3202_v60, %v8337_v51 }
0x117e   :  { %v8347_v8 = vadd.f32 %v3205_v32, %v3044_v34  ;;  %v8350_v35 = vadd.f32 %v3204_v47, %v8334_v41  ;;  %v8363_v41 = vadd.f32 %v3207_v53, %v8339_v58  ;;  %v8366_v7 = vadd.f32 %v3206_v45, %v8337_v51 }
0x1180   :  { %v3215_v40 = vmul.f32 %v7713_v56, %v8347_v8  ;;  %v3214_v39 = vmul.f32 %v7713_v56, %v8350_v35  ;;  %v3227_v36 = vmul.f32 %v8347_v8, %v7720_v0  ;;  %v3226_v34 = vmul.f32 %v8350_v35, %v7720_v0 }
0x1181   :  { %v3217_v44 = vmul.f32 %v7713_v56, %v8363_v41  ;;  %v3216_v1 = vmul.f32 %v7713_v56, %v8366_v7  ;;  %v3229_v42 = vmul.f32 %v8363_v41, %v7720_v0  ;;  %v3228_v58 = vmul.f32 %v8366_v7, %v7720_v0 }
0x1182   :  { %3220 = vadd.xlane.f32.xlu1 %v3215_v40  ;;  %3218 = vadd.xlane.f32.xlu0 %v3214_v39  ;;  %v3255_v51 = vmul.f32 %v8347_v8, %v8347_v8  ;;  %v3254_v54 = vmul.f32 %v8350_v35, %v8350_v35  ;;  %v3257_v43 = vmul.f32 %v8363_v41, %v8363_v41 }
0x1183   :  { %v3256_v10 = vmul.f32 %v8366_v7, %v8366_v7 }
0x1184   :  { %v3259_v55 = vmul.f32 %v7713_v56, %v3255_v51  ;;  %v3258_v3 = vmul.f32 %v7713_v56, %v3254_v54  ;;  %v3271_v62 = vmul.f32 %v3255_v51, %v7720_v0  ;;  %v3270_v61 = vmul.f32 %v3254_v54, %v7720_v0 }
0x1185   :  { %v3261_v9 = vmul.f32 %v7713_v56, %v3257_v43  ;;  %v3260_v59 = vmul.f32 %v7713_v56, %v3256_v10  ;;  %v3273_v4 = vmul.f32 %v3257_v43, %v7720_v0  ;;  %v3272_v11 = vmul.f32 %v3256_v10, %v7720_v0 }
0x1186   :  { %3232 = vadd.xlane.f32.xlu1 %v3227_v36  ;;  %3230 = vadd.xlane.f32.xlu0 %v3226_v34 }
0x118a   :  { %3224 = vadd.xlane.f32.xlu1 %v3217_v44  ;;  %3222 = vadd.xlane.f32.xlu0 %v3216_v1 }
0x118e   :  { %3236 = vadd.xlane.f32.xlu1 %v3229_v42  ;;  %3234 = vadd.xlane.f32.xlu0 %v3228_v58 }
0x1192   :  { %3264 = vadd.xlane.f32.xlu1 %v3259_v55  ;;  %3262 = vadd.xlane.f32.xlu0 %v3258_v3 }
0x1196   :  { %3276 = vadd.xlane.f32.xlu1 %v3271_v62  ;;  %3274 = vadd.xlane.f32.xlu0 %v3270_v61 }
0x119a   :  { %3268 = vadd.xlane.f32.xlu1 %v3261_v9  ;;  %3266 = vadd.xlane.f32.xlu0 %v3260_v59 }
0x119e   :  { %3280 = vadd.xlane.f32.xlu1 %v3273_v4  ;;  %3278 = vadd.xlane.f32.xlu0 %v3272_v11 }
0x120b   :  { %v3221_v5 = vpop.xlane.xlu1 %3220  ;;  %v3219_v20 = vpop.xlane.xlu0 %3218 }
0x120c   :  { %v3239_v26 = vmul.f32 %v7713_v56, %v3221_v5  ;;  %v3238_v27 = vmul.f32 %v7713_v56, %v3219_v20 }
0x120f   :  { %v3233_v21 = vpop.xlane.xlu1 %3232  ;;  %v3231_v22 = vpop.xlane.xlu0 %3230 }
0x1210   :  { %v3243_v63 = vmul.f32 %v3233_v21, %v7720_v0  ;;  %v3242_v49 = vmul.f32 %v3231_v22, %v7720_v0 }
0x1212   :  { %v3247_v28 = vadd.f32 %v3243_v63, %v3239_v26  ;;  %v3246_v46 = vadd.f32 %v3242_v49, %v3238_v27 }
0x1213   :  { %v3225_v23 = vpop.xlane.xlu1 %3224  ;;  %v3223_v24 = vpop.xlane.xlu0 %3222 }
0x1214   :  { %v3251_v29 = vmul.f32 0.015625, %v3247_v28  ;;  %v3250_v18 = vmul.f32 0.015625, %v3246_v46  ;;  %v3241_v53 = vmul.f32 %v7713_v56, %v3225_v23  ;;  %v3240_v45 = vmul.f32 %v7713_v56, %v3223_v24  ;;  %v5937_v28 = vld [vmem:[%s8819_s8 + $0x1] ss:$0 sm:$0xff] }
0x1216   :  { %v3299_v51 = vmul.f32 %v3251_v29, %v3251_v29  ;;  %v3298_v54 = vmul.f32 %v3250_v18, %v3250_v18  ;;  %v3307_v63 = vsub.f32 %v8347_v8, %v3251_v29 }
0x1217   :  { %v3237_v13 = vpop.xlane.xlu1 %3236  ;;  %v3235_v25 = vpop.xlane.xlu0 %3234 }
0x1218   :  { %v3245_v30 = vmul.f32 %v3237_v13, %v7720_v0  ;;  %v3244_v31 = vmul.f32 %v3235_v25, %v7720_v0  ;;  %v3306_v13 = vsub.f32 %v8350_v35, %v3250_v18  ;;  %v5936_v25 = vld [vmem:[%s8818_s7 + $0x1] ss:$0 sm:$0xff] }
0x121a   :  { %v3249_v44 = vadd.f32 %v3245_v30, %v3241_v53  ;;  %v3248_v1 = vadd.f32 %v3244_v31, %v3240_v45 }
0x121b   :  { %v3265_v38 = vpop.xlane.xlu1 %3264  ;;  %v3263_v48 = vpop.xlane.xlu0 %3262 }
0x121c   :  { %v3283_v37 = vmul.f32 %v7713_v56, %v3265_v38  ;;  %v3282_v60 = vmul.f32 %v7713_v56, %v3263_v48  ;;  %v3253_v43 = vmul.f32 0.015625, %v3249_v44  ;;  %v3252_v10 = vmul.f32 0.015625, %v3248_v1  ;;  %v6996_v44 = vld [vmem:[#allocation12 + $0x58] sm:$0xff]   ;;  %v6997_v1 = vld [vmem:[#allocation12 + $0x50] sm:$0xff]  }
0x121e   :  { %v3301_v17 = vmul.f32 %v3253_v43, %v3253_v43  ;;  %v3300_v19 = vmul.f32 %v3252_v10, %v3252_v10  ;;  %v3309_v8 = vsub.f32 %v8363_v41, %v3253_v43  ;;  %v3308_v29 = vsub.f32 %v8366_v7, %v3252_v10  ;;  %v6992_v41 = vld [vmem:[#allocation12 + $0x78] sm:$0xff]   ;;  %v6993_v7 = vld [vmem:[#allocation12 + $0x70] sm:$0xff]  }
0x121f   :  { %v3277_v32 = vpop.xlane.xlu1 %3276  ;;  %v3275_v47 = vpop.xlane.xlu0 %3274  ;;  %6646 = vmatprep.subr.bf16.mxu0 %v6992_v41 }
0x1220   :  { %v3287_v40 = vmul.f32 %v3277_v32, %v7720_v0  ;;  %v3286_v39 = vmul.f32 %v3275_v47, %v7720_v0  ;;  %6647 = vmatpush3.bf16.msra.mxu0 %v6992_v41 }
0x1221   :  { %6648 = vmatprep.subr.bf16.mxu0 %v6993_v7 }
0x1222   :  { %v3291_v36 = vadd.f32 %v3287_v40, %v3283_v37  ;;  %v3290_v34 = vadd.f32 %v3286_v39, %v3282_v60 }
0x1223   :  { %v3269_v42 = vpop.xlane.xlu1 %3268  ;;  %v3267_v58 = vpop.xlane.xlu0 %3266 }
0x1224   :  { %v3295_v55 = vmul.f32 0.015625, %v3291_v36  ;;  %v3294_v3 = vmul.f32 0.015625, %v3290_v34  ;;  %v3285_v9 = vmul.f32 %v7713_v56, %v3269_v42  ;;  %v3284_v59 = vmul.f32 %v7713_v56, %v3267_v58  ;;  %6649 = vmatpush3.bf16.msra.mxu0 %v6993_v7  ;;  %v6994_v36 = vld [vmem:[#allocation12 + $0x68] sm:$0xff]   ;;  %v6995_v34 = vld [vmem:[#allocation12 + $0x60] sm:$0xff]   ;;  %v7000_v7 = vld [vmem:[#allocation14 + $0x38] sm:$0xff]  }
0x1225   :  { %6650 = vmatprep.subr.bf16.mxu0 %v6994_v36  ;;  %v6998_v42 = vld [vmem:[#allocation12 + $0x48] sm:$0xff]   ;;  %v6999_v58 = vld [vmem:[#allocation12 + $0x40] sm:$0xff]   ;;  %6666 = vmatprep.subr.bf16.mxu1 %v7000_v7 }
0x1226   :  { %v3303_v62 = vsub.f32 %v3295_v55, %v3299_v51  ;;  %v3302_v61 = vsub.f32 %v3294_v3, %v3298_v54  ;;  %v5939_v51 = vld [vmem:[%s8821_s10 + $0x1] ss:$0 sm:$0xff] }
0x1227   :  { %v3281_v4 = vpop.xlane.xlu1 %3280  ;;  %v3279_v11 = vpop.xlane.xlu0 %3278 }
0x1228   :  { %v3311_v12 = vadd.f32 1e-05, %v3303_v62  ;;  %v3310_v6 = vadd.f32 1e-05, %v3302_v61  ;;  %v3289_v50 = vmul.f32 %v3281_v4, %v7720_v0  ;;  %v3288_v14 = vmul.f32 %v3279_v11, %v7720_v0  ;;  %6651 = vmatpush3.bf16.msra.mxu0 %v6994_v36  ;;  %v7001_v36 = vld [vmem:[#allocation14 + $0x30] sm:$0xff]  }
0x1229   :  { %6652 = vmatprep.subr.bf16.mxu0 %v6995_v34 }
0x122a   :  { %7240 = vrsqrt.f32 %v3311_v12  ;;  %v3293_v15 = vadd.f32 %v3289_v50, %v3285_v9  ;;  %v3292_v16 = vadd.f32 %v3288_v14, %v3284_v59 }
0x122b   :  { %7242 = vrsqrt.f32 %v3310_v6 }
0x122c   :  { %v3297_v5 = vmul.f32 0.015625, %v3293_v15  ;;  %v3296_v20 = vmul.f32 0.015625, %v3292_v16  ;;  %6653 = vmatpush3.bf16.msra.mxu0 %v6995_v34  ;;  %v7002_v34 = vld [vmem:[#allocation14 + $0x28] sm:$0xff]  }
0x122d   :  { %6654 = vmatprep.subr.bf16.mxu0 %v6996_v44 }
0x122e   :  { %v3305_v21 = vsub.f32 %v3297_v5, %v3301_v17  ;;  %v3304_v22 = vsub.f32 %v3296_v20, %v3300_v19 }
0x1230   :  { %v3313_v23 = vadd.f32 1e-05, %v3305_v21  ;;  %v3312_v24 = vadd.f32 1e-05, %v3304_v22  ;;  %6655 = vmatpush3.bf16.msra.mxu0 %v6996_v44  ;;  %v7003_v44 = vld [vmem:[#allocation14 + $0x20] sm:$0xff]  }
0x1231   :  { %6656 = vmatprep.subr.bf16.mxu0 %v6997_v1 }
0x1232   :  { %7244 = vrsqrt.f32 %v3313_v23 }
0x1233   :  { %7246 = vrsqrt.f32 %v3312_v24 }
0x1234   :  { %6657 = vmatpush3.bf16.msra.mxu0 %v6997_v1  ;;  %v7004_v1 = vld [vmem:[#allocation14 + $0x18] sm:$0xff]  }
0x1235   :  { %6658 = vmatprep.subr.bf16.mxu0 %v6998_v42 }
0x1237   :  { %v7241_v49 = vpop.eup %7240 }
0x1238   :  { %v7243_v26 = vpop.eup %7242  ;;  %v3319_v27 = vmul.f32 %v7241_v49, %v3307_v63  ;;  %6659 = vmatpush3.bf16.msra.mxu0 %v6998_v42  ;;  %v7005_v42 = vld [vmem:[#allocation14 + $0x10] sm:$0xff]  }
0x1239   :  { %v3318_v46 = vmul.f32 %v7243_v26, %v3306_v13  ;;  %6660 = vmatprep.subr.bf16.mxu0 %v6999_v58 }
0x123a   :  { %v3329_v38 = vmul.f32 %v5936_v25, %v3319_v27 }
0x123b   :  { %v3328_v48 = vmul.f32 %v5936_v25, %v3318_v46 }
0x123c   :  { %v8416_v30 = vadd.f32 %v5937_v28, %v3329_v38  ;;  %6661 = vmatpush3.bf16.msra.mxu0 %v6999_v58  ;;  %v7006_v58 = vld [vmem:[#allocation14 + $0x8] sm:$0xff]  }
0x123d   :  { %v8418_v31 = vadd.f32 %v5937_v28, %v3328_v48 }
0x123f   :  { %v7245_v35 = vpop.eup %7244  ;;  %v3359_v18 = vpack.c.bf16 %v8416_v30, %v8418_v31 }
0x1240   :  { %v7247_v32 = vpop.eup %7246  ;;  %v3321_v47 = vmul.f32 %v7245_v35, %v3309_v8 }
0x1241   :  { %6642 = vmatprep.mubr.bf16.mxu1 %v3359_v18  ;;  %v3320_v37 = vmul.f32 %v7247_v32, %v3308_v29 }
0x1242   :  { %v3331_v60 = vmul.f32 %v5936_v25, %v3321_v47 }
0x1243   :  { %v3330_v40 = vmul.f32 %v5936_v25, %v3320_v37 }
0x1244   :  { %v8424_v39 = vadd.f32 %v5937_v28, %v3331_v60 }
0x1245   :  { %v8426_v53 = vadd.f32 %v5937_v28, %v3330_v40 }
0x1247   :  { %v3360_v45 = vpack.c.bf16 %v8424_v39, %v8426_v53 }
0x1249   :  { %6643 = vmatmul.mubr.bf16.vlgmr.msra.gmra.mxu1 %v3360_v45 }
0x124a   :  { %6667 = vmatpush3.bf16.msra.mxu1 %v7000_v7 }
0x124b   :  { %6668 = vmatprep.subr.bf16.mxu1 %v7001_v36 }
0x124e   :  { %6669 = vmatpush3.bf16.msra.mxu1 %v7001_v36  ;;  %v7008_v36 = vld [vmem:[#allocation15 + $0x38] sm:$0xff]  }
0x124f   :  { %6670 = vmatprep.subr.bf16.mxu1 %v7002_v34  ;;  %6686 = vmatprep.subr.bf16.mxu0 %v7008_v36 }
0x1252   :  { %6671 = vmatpush3.bf16.msra.mxu1 %v7002_v34  ;;  %v7009_v34 = vld [vmem:[#allocation15 + $0x30] sm:$0xff]  }
0x1253   :  { %6672 = vmatprep.subr.bf16.mxu1 %v7003_v44 }
0x1256   :  { %6673 = vmatpush3.bf16.msra.mxu1 %v7003_v44  ;;  %v7010_v44 = vld [vmem:[#allocation15 + $0x28] sm:$0xff]  }
0x1257   :  { %6674 = vmatprep.subr.bf16.mxu1 %v7004_v1 }
0x125a   :  { %6675 = vmatpush3.bf16.msra.mxu1 %v7004_v1  ;;  %v7011_v1 = vld [vmem:[#allocation15 + $0x20] sm:$0xff]  }
0x125b   :  { %6676 = vmatprep.subr.bf16.mxu1 %v7005_v42 }
0x125e   :  { %6677 = vmatpush3.bf16.msra.mxu1 %v7005_v42  ;;  %v7012_v42 = vld [vmem:[#allocation15 + $0x18] sm:$0xff]  }
0x125f   :  { %6678 = vmatprep.subr.bf16.mxu1 %v7006_v58 }
0x1262   :  { %6679 = vmatpush3.bf16.msra.mxu1 %v7006_v58  ;;  %v7013_v58 = vld [vmem:[#allocation15 + $0x10] sm:$0xff]  }
0x1309   :  { %v6644_v54 = vpop.f32.mrf.mxu1 }
0x130a   :  { %v3458_v55 = vadd.f32 %v6644_v54, %v5939_v51  ;;  %v5949_v54 = vld [vmem:[%s8823_s12 + $0x1] ss:$0 sm:$0xff] }
0x130b   :  { %v3449_v3 = vpop.f32.mrf.mxu1 }
0x130c   :  { %v3470_v62 = vmul.f32 0.044715, %v3458_v55  ;;  %v3450_v61 = vadd.f32 %v5939_v51, %v3449_v3  ;;  %v3466_v32 = vmul.f32 0.5, %v3458_v55 }
0x130d   :  { %v6645_v43 = vpop.f32.mrf.mxu1 }
0x130e   :  { %v3474_v10 = vmul.f32 %v3470_v62, %v3458_v55  ;;  %v3468_v9 = vmul.f32 0.044715, %v3450_v61  ;;  %v3461_v59 = vadd.f32 %v6645_v43, %v5939_v51  ;;  %v3464_v35 = vmul.f32 0.5, %v3450_v61 }
0x130f   :  { %v3452_v4 = vpop.f32.mrf.mxu1 }
0x1310   :  { %v3478_v11 = vmul.f32 %v3474_v10, %v3458_v55  ;;  %v3472_v12 = vmul.f32 %v3468_v9, %v3450_v61  ;;  %v3471_v6 = vmul.f32 0.044715, %v3461_v59  ;;  %v3453_v50 = vadd.f32 %v5939_v51, %v3452_v4  ;;  %v7007_v51 = vld [vmem:[#allocation14] sm:$0xff]  }
0x1311   :  { %v3467_v48 = vmul.f32 0.5, %v3461_v59  ;;  %6680 = vmatprep.subr.bf16.mxu1 %v7007_v51 }
0x1312   :  { %v3482_v14 = vadd.f32 %v3478_v11, %v3458_v55  ;;  %v3476_v15 = vmul.f32 %v3472_v12, %v3450_v61  ;;  %v3475_v16 = vmul.f32 %v3471_v6, %v3461_v59  ;;  %v3469_v17 = vmul.f32 0.044715, %v3453_v50  ;;  %6681 = vmatpush3.bf16.msra.mxu1 %v7007_v51  ;;  %v7014_v51 = vld [vmem:[#allocation15 + $0x8] sm:$0xff]  }
0x1313   :  { %v3465_v29 = vmul.f32 0.5, %v3453_v50 }
0x1314   :  { %v3479_v19 = vmul.f32 %v3475_v16, %v3461_v59  ;;  %v3473_v5 = vmul.f32 %v3469_v17, %v3453_v50  ;;  %v3480_v20 = vadd.f32 %v3476_v15, %v3450_v61  ;;  %v3486_v21 = vmul.f32 0.7978846, %v3482_v14 }
0x1316   :  { %v3483_v22 = vadd.f32 %v3479_v19, %v3461_v59  ;;  %v3477_v23 = vmul.f32 %v3473_v5, %v3453_v50  ;;  %v3484_v24 = vmul.f32 0.7978846, %v3480_v20 }
0x1318   :  { %v3487_v63 = vmul.f32 0.7978846, %v3483_v22  ;;  %v3481_v49 = vadd.f32 %v3477_v23, %v3453_v50  ;;  %7248 = vtanh.f32 %v3484_v24 }
0x1319   :  { %7250 = vtanh.f32 %v3486_v21 }
0x131a   :  { %7252 = vtanh.f32 %v3487_v63  ;;  %v3485_v13 = vmul.f32 0.7978846, %v3481_v49 }
0x131c   :  { %7254 = vtanh.f32 %v3485_v13 }
0x1325   :  { %v7249_v25 = vpop.eup %7248 }
0x1326   :  { %v7251_v26 = vpop.eup %7250  ;;  %v3492_v28 = vadd.f32 1.0, %v7249_v25 }
0x1327   :  { %v7253_v27 = vpop.eup %7252  ;;  %v3494_v8 = vadd.f32 1.0, %v7251_v26 }
0x1328   :  { %v3495_v46 = vadd.f32 1.0, %v7253_v27  ;;  %v3496_v37 = vmul.f32 %v3492_v28, %v3464_v35 }
0x1329   :  { %v7255_v38 = vpop.eup %7254  ;;  %v3498_v40 = vmul.f32 %v3494_v8, %v3466_v32 }
0x132a   :  { %v3493_v18 = vadd.f32 1.0, %v7255_v38  ;;  %v3499_v47 = vmul.f32 %v3495_v46, %v3467_v48 }
0x132c   :  { %v3497_v60 = vmul.f32 %v3493_v18, %v3465_v29  ;;  %v3518_v41 = vpack.c.bf16 %v3499_v47, %v3498_v40 }
0x132e   :  { %v3517_v45 = vpack.c.bf16 %v3497_v60, %v3496_v37 }
0x1330   :  { %6662 = vmatprep.mubr.bf16.mxu0 %v3517_v45 }
0x1331   :  { %6663 = vmatmul.mubr.bf16.vlgmr.msra.gmra.mxu0 %v3518_v41 }
0x1332   :  { %6687 = vmatpush3.bf16.msra.mxu0 %v7008_v36 }
0x1333   :  { %6688 = vmatprep.subr.bf16.mxu0 %v7009_v34 }
0x1336   :  { %6689 = vmatpush3.bf16.msra.mxu0 %v7009_v34 }
0x1337   :  { %6690 = vmatprep.subr.bf16.mxu0 %v7010_v44 }
0x133a   :  { %6691 = vmatpush3.bf16.msra.mxu0 %v7010_v44 }
0x133b   :  { %6692 = vmatprep.subr.bf16.mxu0 %v7011_v1 }
0x133e   :  { %6693 = vmatpush3.bf16.msra.mxu0 %v7011_v1 }
0x133f   :  { %6694 = vmatprep.subr.bf16.mxu0 %v7012_v42 }
0x1342   :  { %6695 = vmatpush3.bf16.msra.mxu0 %v7012_v42 }
0x1343   :  { %6696 = vmatprep.subr.bf16.mxu0 %v7013_v58 }
0x1346   :  { %6697 = vmatpush3.bf16.msra.mxu0 %v7013_v58 }
0x1347   :  { %6698 = vmatprep.subr.bf16.mxu0 %v7014_v51 }
0x134a   :  { %6699 = vmatpush3.bf16.msra.mxu0 %v7014_v51 }
0x13f1   :  { %v6664_v55 = vpop.f32.mrf.mxu0 }
0x13f2   :  { %v3616_v3 = vadd.f32 %v6664_v55, %v5949_v54  ;;  %v5958_v55 = vld [vmem:[%s8825_s14] ss:$0 sm:$0xff] }
0x13f3   :  { %v3607_v62 = vpop.f32.mrf.mxu0 }
0x13f4   :  { %v3624_v61 = vadd.f32 %v3616_v3, %v8426_v53  ;;  %v3608_v43 = vadd.f32 %v5949_v54, %v3607_v62 }
0x13f5   :  { %v6665_v10 = vpop.f32.mrf.mxu0 }
0x13f6   :  { %v3632_v9 = vmul.f32 0.044715, %v3624_v61  ;;  %v3622_v59 = vadd.f32 %v3608_v43, %v8418_v31  ;;  %v3619_v4 = vadd.f32 %v6665_v10, %v5949_v54  ;;  %v3628_v47 = vmul.f32 0.5, %v3624_v61 }
0x13f7   :  { %v3610_v11 = vpop.f32.mrf.mxu0 }
0x13f8   :  { %v3636_v12 = vmul.f32 %v3632_v9, %v3624_v61  ;;  %v3630_v6 = vmul.f32 0.044715, %v3622_v59  ;;  %v3625_v50 = vadd.f32 %v3619_v4, %v8424_v39  ;;  %v3611_v14 = vadd.f32 %v5949_v54, %v3610_v11  ;;  %v7015_v54 = vld [vmem:[#allocation15] sm:$0xff]  }
0x13f9   :  { %v3626_v29 = vmul.f32 0.5, %v3622_v59  ;;  %6700 = vmatprep.subr.bf16.mxu0 %v7015_v54 }
0x13fa   :  { %v3640_v15 = vmul.f32 %v3636_v12, %v3624_v61  ;;  %v3634_v16 = vmul.f32 %v3630_v6, %v3622_v59  ;;  %v3633_v17 = vmul.f32 0.044715, %v3625_v50  ;;  %v3623_v19 = vadd.f32 %v3611_v14, %v8416_v30  ;;  %6701 = vmatpush3.bf16.msra.mxu0 %v7015_v54 }
0x13fb   :  { %v3629_v8 = vmul.f32 0.5, %v3625_v50 }
0x13fc   :  { %v3644_v5 = vadd.f32 %v3640_v15, %v3624_v61  ;;  %v3637_v20 = vmul.f32 %v3633_v17, %v3625_v50  ;;  %v3631_v53 = vmul.f32 0.044715, %v3623_v19  ;;  %v3638_v21 = vmul.f32 %v3634_v16, %v3622_v59 }
0x13fd   :  { %v3627_v18 = vmul.f32 0.5, %v3623_v19 }
0x13fe   :  { %v3641_v22 = vmul.f32 %v3637_v20, %v3625_v50  ;;  %v3635_v23 = vmul.f32 %v3631_v53, %v3623_v19  ;;  %v3648_v24 = vmul.f32 0.7978846, %v3644_v5  ;;  %v3642_v31 = vadd.f32 %v3638_v21, %v3622_v59 }
0x1400   :  { %v3645_v63 = vadd.f32 %v3641_v22, %v3625_v50  ;;  %v3639_v49 = vmul.f32 %v3635_v23, %v3623_v19  ;;  %v3646_v13 = vmul.f32 0.7978846, %v3642_v31  ;;  %7256 = vtanh.f32 %v3648_v24 }
0x1402   :  { %v3643_v25 = vadd.f32 %v3639_v49, %v3623_v19  ;;  %v3649_v26 = vmul.f32 0.7978846, %v3645_v63  ;;  %7258 = vtanh.f32 %v3646_v13 }
0x1404   :  { %v3647_v39 = vmul.f32 0.7978846, %v3643_v25  ;;  %7260 = vtanh.f32 %v3649_v26 }
0x1406   :  { %7262 = vtanh.f32 %v3647_v39 }
0x140d   :  { %v7257_v27 = vpop.eup %7256 }
0x140e   :  { %v3656_v35 = vadd.f32 1.0, %v7257_v27 }
0x140f   :  { %v7259_v30 = vpop.eup %7258 }
0x1410   :  { %v3654_v46 = vadd.f32 1.0, %v7259_v30  ;;  %v3660_v45 = vmul.f32 %v3656_v35, %v3628_v47 }
0x1411   :  { %v7261_v28 = vpop.eup %7260 }
0x1412   :  { %v3657_v38 = vadd.f32 1.0, %v7261_v28  ;;  %v3658_v60 = vmul.f32 %v3654_v46, %v3626_v29 }
0x1413   :  { %v7263_v48 = vpop.eup %7262 }
0x1414   :  { %v3655_v32 = vadd.f32 1.0, %v7263_v48  ;;  %v3661_v37 = vmul.f32 %v3657_v38, %v3629_v8 }
0x1416   :  { %v3659_v40 = vmul.f32 %v3655_v32, %v3627_v18  ;;  %v3680_v7 = vpack.c.bf16 %v3661_v37, %v3660_v45 }
0x1418   :  { %v3679_v41 = vpack.c.bf16 %v3659_v40, %v3658_v60 }
0x141a   :  { %6682 = vmatprep.mubr.bf16.mxu1 %v3679_v41 }
0x141b   :  { %6683 = vmatmul.mubr.bf16.vlgmr.msra.gmra.mxu1 %v3680_v7 }
0x14db   :  { %v6684_v3 = vpop.f32.mrf.mxu1 }
0x14dc   :  { %v3778_v62 = vadd.f32 %v6684_v3, %v5958_v55 }
0x14dd   :  { %v3769_v61 = vpop.f32.mrf.mxu1 }
0x14de   :  { %v3790_v43 = vmul.f32 0.044715, %v3778_v62  ;;  %v3770_v10 = vadd.f32 %v5958_v55, %v3769_v61  ;;  %v3786_v26 = vmul.f32 0.5, %v3778_v62 }
0x14df   :  { %v6685_v9 = vpop.f32.mrf.mxu1 }
0x14e0   :  { %v3794_v59 = vmul.f32 %v3790_v43, %v3778_v62  ;;  %v3788_v4 = vmul.f32 0.044715, %v3770_v10  ;;  %v3781_v11 = vadd.f32 %v6685_v9, %v5958_v55  ;;  %v3784_v35 = vmul.f32 0.5, %v3770_v10 }
0x14e1   :  { %v3772_v12 = vpop.f32.mrf.mxu1 }
0x14e2   :  { %v3798_v6 = vmul.f32 %v3794_v59, %v3778_v62  ;;  %v3792_v50 = vmul.f32 %v3788_v4, %v3770_v10  ;;  %v3791_v14 = vmul.f32 0.044715, %v3781_v11  ;;  %v3773_v15 = vadd.f32 %v5958_v55, %v3772_v12  ;;  %v7017_v12 = vld [vmem:[#allocation9 + $0x30] sm:$0xff]  }
0x14e3   :  { %v3787_v38 = vmul.f32 0.5, %v3781_v11 }
0x14e4   :  { %v3802_v16 = vadd.f32 %v3798_v6, %v3778_v62  ;;  %v3796_v17 = vmul.f32 %v3792_v50, %v3770_v10  ;;  %v3795_v19 = vmul.f32 %v3791_v14, %v3781_v11  ;;  %v3789_v5 = vmul.f32 0.044715, %v3773_v15  ;;  %v7018_v6 = vld [vmem:[#allocation9 + $0x28] sm:$0xff]   ;;  %v7019_v50 = vld [vmem:[#allocation9 + $0x20] sm:$0xff]   ;;  %v7020_v14 = vld [vmem:[#allocation9 + $0x18] sm:$0xff]  }
0x14e5   :  { %v3785_v37 = vmul.f32 0.5, %v3773_v15 }
0x14e6   :  { %v3806_v20 = vmul.f32 0.7978846, %v3802_v16  ;;  %v3799_v53 = vmul.f32 %v3795_v19, %v3781_v11  ;;  %v3800_v21 = vadd.f32 %v3796_v17, %v3770_v10  ;;  %v3793_v22 = vmul.f32 %v3789_v5, %v3773_v15  ;;  %v7022_v16 = vld [vmem:[#allocation9 + $0x8] sm:$0xff]   ;;  %v7023_v17 = vld [vmem:[#allocation9] sm:$0xff]  }
0x14e8   :  { %7264 = vtanh.f32 %v3806_v20  ;;  %v3803_v23 = vadd.f32 %v3799_v53, %v3781_v11  ;;  %v3804_v24 = vmul.f32 0.7978846, %v3800_v21  ;;  %v3797_v31 = vmul.f32 %v3793_v22, %v3773_v15  ;;  %v7016_v11 = vld [vmem:[#allocation9 + $0x38] sm:$0xff]  }
0x14e9   :  { %6706 = vmatprep.subr.bf16.mxu1 %v7016_v11 }
0x14ea   :  { %v3807_v63 = vmul.f32 0.7978846, %v3803_v23  ;;  %7266 = vtanh.f32 %v3804_v24  ;;  %v3801_v49 = vadd.f32 %v3797_v31, %v3773_v15  ;;  %6707 = vmatpush3.bf16.msra.mxu1 %v7016_v11  ;;  %v7021_v15 = vld [vmem:[#allocation9 + $0x10] sm:$0xff]  }
0x14eb   :  { %6708 = vmatprep.subr.bf16.mxu1 %v7017_v12 }
0x14ec   :  { %7268 = vtanh.f32 %v3807_v63  ;;  %v3805_v13 = vmul.f32 0.7978846, %v3801_v49 }
0x14ee   :  { %7270 = vtanh.f32 %v3805_v13  ;;  %6709 = vmatpush3.bf16.msra.mxu1 %v7017_v12 }
0x14ef   :  { %6710 = vmatprep.subr.bf16.mxu1 %v7018_v6 }
0x14f2   :  { %6711 = vmatpush3.bf16.msra.mxu1 %v7018_v6 }
0x14f3   :  { %6712 = vmatprep.subr.bf16.mxu1 %v7019_v50 }
0x14f5   :  { %v7265_v25 = vpop.eup %7264 }
0x14f6   :  { %v3814_v39 = vadd.f32 1.0, %v7265_v25  ;;  %6713 = vmatpush3.bf16.msra.mxu1 %v7019_v50 }
0x14f7   :  { %v7267_v27 = vpop.eup %7266  ;;  %6714 = vmatprep.subr.bf16.mxu1 %v7020_v14 }
0x14f8   :  { %v3818_v30 = vmul.f32 %v3814_v39, %v3786_v26  ;;  %v3812_v28 = vadd.f32 1.0, %v7267_v27 }
0x14f9   :  { %v7269_v46 = vpop.eup %7268 }
0x14fa   :  { %v8444_v48 = vadd.f32 %v3818_v30, %v8070_v33  ;;  %v3815_v8 = vadd.f32 1.0, %v7269_v46  ;;  %v3816_v47 = vmul.f32 %v3812_v28, %v3784_v35  ;;  %6715 = vmatpush3.bf16.msra.mxu1 %v7020_v14 }
0x14fb   :  { %v7271_v29 = vpop.eup %7270  ;;  %6716 = vmatprep.subr.bf16.mxu1 %v7021_v15 }
0x14fc   :  { %v3971_v18 = vmul.f32 %v7713_v56, %v8444_v48  ;;  %v3819_v32 = vmul.f32 %v3815_v8, %v3787_v38  ;;  %v3813_v60 = vadd.f32 1.0, %v7271_v29  ;;  %v3983_v41 = vmul.f32 %v8444_v48, %v7720_v0 }
0x14fd   :  { %v8456_v7 = vadd.f32 %v3816_v47, %v8086_v57  ;;  %v4011_v58 = vmul.f32 %v8444_v48, %v8444_v48 }
0x14fe   :  { %3977 = vadd.xlane.f32.xlu0 %v3971_v18  ;;  %v8449_v40 = vadd.f32 %v3819_v32, %v8079_v52  ;;  %v3817_v45 = vmul.f32 %v3813_v60, %v3785_v37  ;;  %v3838_v34 = vpack.c.bf16 %v3819_v32, %v3818_v30  ;;  %6717 = vmatpush3.bf16.msra.mxu1 %v7021_v15 }
0x14ff   :  { %v3969_v1 = vmul.f32 %v7713_v56, %v8456_v7  ;;  %v3981_v42 = vmul.f32 %v8456_v7, %v7720_v0  ;;  %v4015_v51 = vmul.f32 %v7713_v56, %v4011_v58  ;;  %v4009_v55 = vmul.f32 %v8456_v7, %v8456_v7  ;;  %6718 = vmatprep.subr.bf16.mxu1 %v7022_v16 }
0x1500   :  { %v3972_v33 = vmul.f32 %v7713_v56, %v8449_v40  ;;  %v3837_v36 = vpack.c.bf16 %v3817_v45, %v3816_v47  ;;  %v8459_v44 = vadd.f32 %v3817_v45, %v8097_v2  ;;  %v3984_v52 = vmul.f32 %v8449_v40, %v7720_v0 }
0x1501   :  { %v4012_v54 = vmul.f32 %v8449_v40, %v8449_v40  ;;  %v4013_v62 = vmul.f32 %v7713_v56, %v4009_v55  ;;  %v4025_v10 = vmul.f32 %v4009_v55, %v7720_v0  ;;  %v4027_v59 = vmul.f32 %v4011_v58, %v7720_v0 }
0x1502   :  { %3989 = vadd.xlane.f32.xlu0 %v3983_v41  ;;  %3979 = vadd.xlane.f32.xlu1 %v3972_v33  ;;  %v3970_v57 = vmul.f32 %v7713_v56, %v8459_v44  ;;  %v3982_v2 = vmul.f32 %v8459_v44, %v7720_v0  ;;  %v4010_v61 = vmul.f32 %v8459_v44, %v8459_v44 }
0x1503   :  { %6702 = vmatprep.mubr.bf16.mxu0 %v3837_v36  ;;  %v4016_v3 = vmul.f32 %v7713_v56, %v4012_v54  ;;  %v4028_v4 = vmul.f32 %v4012_v54, %v7720_v0  ;;  %6719 = vmatpush3.bf16.msra.mxu1 %v7022_v16 }
0x1504   :  { %6703 = vmatmul.mubr.bf16.vlgmr.msra.gmra.mxu0 %v3838_v34  ;;  %v4014_v43 = vmul.f32 %v7713_v56, %v4010_v61  ;;  %v4026_v9 = vmul.f32 %v4010_v61, %v7720_v0  ;;  %6720 = vmatprep.subr.bf16.mxu1 %v7023_v17 }
0x1506   :  { %3991 = vadd.xlane.f32.xlu1 %v3984_v52  ;;  %3973 = vadd.xlane.f32.xlu0 %v3969_v1 }
0x1507   :  { %6721 = vmatpush3.bf16.msra.mxu1 %v7023_v17 }
0x150a   :  { %3975 = vadd.xlane.f32.xlu1 %v3970_v57  ;;  %3985 = vadd.xlane.f32.xlu0 %v3981_v42 }
0x150e   :  { %3987 = vadd.xlane.f32.xlu1 %v3982_v2  ;;  %4021 = vadd.xlane.f32.xlu0 %v4015_v51 }
0x1512   :  { %4023 = vadd.xlane.f32.xlu1 %v4016_v3  ;;  %4017 = vadd.xlane.f32.xlu0 %v4013_v62 }
0x1516   :  { %4019 = vadd.xlane.f32.xlu1 %v4014_v43  ;;  %4029 = vadd.xlane.f32.xlu0 %v4025_v10 }
0x151a   :  { %4031 = vadd.xlane.f32.xlu1 %v4026_v9  ;;  %4033 = vadd.xlane.f32.xlu0 %v4027_v59 }
0x151e   :  { %4035 = vadd.xlane.f32.xlu1 %v4028_v4 }
0x1587   :  { %v3978_v19 = vpop.xlane.xlu0 %3977 }
0x1588   :  { %v3995_v30 = vmul.f32 %v7713_v56, %v3978_v19 }
0x158b   :  { %v3990_v5 = vpop.xlane.xlu0 %3989  ;;  %v3980_v20 = vpop.xlane.xlu1 %3979 }
0x158c   :  { %v3999_v13 = vmul.f32 %v3990_v5, %v7720_v0  ;;  %v3996_v37 = vmul.f32 %v7713_v56, %v3980_v20 }
0x158e   :  { %v4003_v46 = vadd.f32 %v3999_v13, %v3995_v30 }
0x158f   :  { %v3992_v53 = vpop.xlane.xlu1 %3991  ;;  %v3974_v21 = vpop.xlane.xlu0 %3973 }
0x1590   :  { %v3993_v49 = vmul.f32 %v7713_v56, %v3974_v21  ;;  %v4000_v38 = vmul.f32 %v3992_v53, %v7720_v0  ;;  %v4007_v60 = vmul.f32 0.015625, %v4003_v46 }
0x1592   :  { %v4004_v41 = vadd.f32 %v4000_v38, %v3996_v37  ;;  %v4055_v3 = vmul.f32 %v4007_v60, %v4007_v60 }
0x1593   :  { %v3976_v22 = vpop.xlane.xlu1 %3975  ;;  %v3986_v23 = vpop.xlane.xlu0 %3985 }
0x1594   :  { %v3997_v24 = vmul.f32 %v3986_v23, %v7720_v0  ;;  %v3994_v28 = vmul.f32 %v7713_v56, %v3976_v22  ;;  %v4008_v62 = vmul.f32 0.015625, %v4004_v41  ;;  %v5980_v22 = vld [vmem:[%s8814_s3] ss:$0 sm:$0xff] }
0x1596   :  { %v4001_v25 = vadd.f32 %v3997_v24, %v3993_v49  ;;  %v4056_v14 = vmul.f32 %v4008_v62, %v4008_v62 }
0x1597   :  { %v3988_v31 = vpop.xlane.xlu1 %3987  ;;  %v4022_v63 = vpop.xlane.xlu0 %4021 }
0x1598   :  { %v3998_v26 = vmul.f32 %v3988_v31, %v7720_v0  ;;  %v4005_v8 = vmul.f32 0.015625, %v4001_v25  ;;  %v4039_v34 = vmul.f32 %v7713_v56, %v4022_v63  ;;  %v4063_v31 = vsub.f32 %v8444_v48, %v4007_v60  ;;  %v5981_v25 = vld [vmem:[%s8815_s4] ss:$0 sm:$0xff] }
0x159a   :  { %v4002_v35 = vadd.f32 %v3998_v26, %v3994_v28  ;;  %v4053_v33 = vmul.f32 %v4005_v8, %v4005_v8  ;;  %v4061_v20 = vsub.f32 %v8456_v7, %v4005_v8  ;;  %v4064_v7 = vsub.f32 %v8449_v40, %v4008_v62  ;;  %v5967_v40 = vld [vmem:[%s8827_s16] ss:$0 sm:$0xff] }
0x159b   :  { %v4024_v39 = vpop.xlane.xlu1 %4023  ;;  %v4018_v27 = vpop.xlane.xlu0 %4017 }
0x159c   :  { %v4037_v32 = vmul.f32 %v7713_v56, %v4018_v27  ;;  %v4006_v36 = vmul.f32 0.015625, %v4002_v35  ;;  %v4040_v43 = vmul.f32 %v7713_v56, %v4024_v39 }
0x159e   :  { %v4054_v61 = vmul.f32 %v4006_v36, %v4006_v36  ;;  %v4062_v23 = vsub.f32 %v8459_v44, %v4006_v36 }
0x159f   :  { %v4020_v29 = vpop.xlane.xlu1 %4019  ;;  %v4030_v18 = vpop.xlane.xlu0 %4029 }
0x15a0   :  { %v4041_v47 = vmul.f32 %v4030_v18, %v7720_v0  ;;  %v4038_v57 = vmul.f32 %v7713_v56, %v4020_v29 }
0x15a2   :  { %v4045_v45 = vadd.f32 %v4041_v47, %v4037_v32 }
0x15a3   :  { %v4032_v52 = vpop.xlane.xlu1 %4031  ;;  %v4034_v1 = vpop.xlane.xlu0 %4033 }
0x15a4   :  { %v4049_v42 = vmul.f32 0.015625, %v4045_v45  ;;  %v4042_v58 = vmul.f32 %v4032_v52, %v7720_v0  ;;  %v4043_v2 = vmul.f32 %v4034_v1, %v7720_v0 }
0x15a6   :  { %v4057_v51 = vsub.f32 %v4049_v42, %v4053_v33  ;;  %v4046_v54 = vadd.f32 %v4042_v58, %v4038_v57  ;;  %v4047_v55 = vadd.f32 %v4043_v2, %v4039_v34  ;;  %v5982_v57 = vld [vmem:[%s8817_s6] ss:$0 sm:$0xff] }
0x15a7   :  { %v4036_v10 = vpop.xlane.xlu1 %4035 }
0x15a8   :  { %v4065_v9 = vadd.f32 1e-05, %v4057_v51  ;;  %v4050_v59 = vmul.f32 0.015625, %v4046_v54  ;;  %v4051_v4 = vmul.f32 0.015625, %v4047_v55  ;;  %v4044_v11 = vmul.f32 %v4036_v10, %v7720_v0 }
0x15aa   :  { %7272 = vrsqrt.f32 %v4065_v9  ;;  %v4058_v12 = vsub.f32 %v4050_v59, %v4054_v61  ;;  %v4059_v6 = vsub.f32 %v4051_v4, %v4055_v3  ;;  %v4048_v50 = vadd.f32 %v4044_v11, %v4040_v43 }
0x15ac   :  { %v4066_v15 = vadd.f32 1e-05, %v4058_v12  ;;  %v4067_v16 = vadd.f32 1e-05, %v4059_v6  ;;  %v4052_v17 = vmul.f32 0.015625, %v4048_v50 }
0x15ae   :  { %7274 = vrsqrt.f32 %v4066_v15  ;;  %v4060_v19 = vsub.f32 %v4052_v17, %v4056_v14 }
0x15af   :  { %7276 = vrsqrt.f32 %v4067_v16 }
0x15b0   :  { %v4068_v5 = vadd.f32 1e-05, %v4060_v19 }
0x15b2   :  { %7278 = vrsqrt.f32 %v4068_v5 }
0x15b7   :  { %v7273_v53 = vpop.eup %7272 }
0x15b8   :  { %v4073_v21 = vmul.f32 %v7273_v53, %v4061_v20 }
0x15ba   :  { %v4083_v13 = vmul.f32 %v5980_v22, %v4073_v21 }
0x15bb   :  { %v7275_v24 = vpop.eup %7274 }
0x15bc   :  { %v7277_v63 = vpop.eup %7276  ;;  %v4074_v49 = vmul.f32 %v7275_v24, %v4062_v23  ;;  %v8513_v30 = vadd.f32 %v5981_v25, %v4083_v13 }
0x15bd   :  { %v4075_v26 = vmul.f32 %v7277_v63, %v4063_v31 }
0x15be   :  { %v4084_v39 = vmul.f32 %v5980_v22, %v4074_v49 }
0x15bf   :  { %v7279_v27 = vpop.eup %7278  ;;  %v4085_v46 = vmul.f32 %v5980_v22, %v4075_v26 }
0x15c0   :  { %v8515_v28 = vadd.f32 %v5981_v25, %v4084_v39  ;;  %v4076_v44 = vmul.f32 %v7279_v27, %v4064_v7 }
0x15c1   :  { %v8519_v35 = vadd.f32 %v5981_v25, %v4085_v46 }
0x15c2   :  { %v4114_v48 = vpack.c.bf16 %v8515_v28, %v8513_v30  ;;  %v4086_v38 = vmul.f32 %v5980_v22, %v4076_v44 }
0x15c4   :  { %v6704_v8 = vpop.f32.mrf.mxu0  ;;  %6722 = vmatprep.mubr.bf16.mxu1 %v4114_v48  ;;  %v8521_v29 = vadd.f32 %v5981_v25, %v4086_v38 }
0x15c5   :  { %v3936_v37 = vadd.f32 %v6704_v8, %v5967_v40 }
0x15c6   :  { %v3927_v18 = vpop.f32.mrf.mxu0  ;;  %v4115_v32 = vpack.c.bf16 %v8521_v29, %v8519_v35 }
0x15c7   :  { %v3928_v41 = vadd.f32 %v5967_v40, %v3927_v18 }
0x15c8   :  { %v6705_v47 = vpop.f32.mrf.mxu0  ;;  %6723 = vmatmul.mubr.bf16.vlgmr.msra.gmra.mxu1 %v4115_v32 }
0x15c9   :  { %v3939_v60 = vadd.f32 %v6705_v47, %v5967_v40 }
0x15ca   :  { %v3930_v45 = vpop.f32.mrf.mxu0 }
0x15cb   :  { %v6101_v33 = vpack.c.bf16 %v3939_v60, %v3936_v37  ;;  %v3931_v36 = vadd.f32 %v5967_v40, %v3930_v45 }
0x15cd   :  { %6114 = vst [vmem:[#allocation17 + $0x18] sm:$0xff] %v6101_v33   ;;  %v6096_v34 = vpack.c.bf16 %v3931_v36, %v3928_v41 }
0x15cf   :  { %6097 = vst [vmem:[#allocation17 + $0x10] sm:$0xff] %v6096_v34  }
0x1688   :  { %v6724_v52 = vpop.f32.mrf.mxu1 }
0x1689   :  { %v4213_v51 = vadd.f32 %v6724_v52, %v5982_v57 }
0x168a   :  { %v4204_v1 = vpop.f32.mrf.mxu1 }
0x168b   :  { %v4205_v54 = vadd.f32 %v5982_v57, %v4204_v1 }
0x168c   :  { %v6725_v42 = vpop.f32.mrf.mxu1 }
0x168d   :  { %v4216_v58 = vadd.f32 %v6725_v42, %v5982_v57 }
0x168e   :  { %v4207_v2 = vpop.f32.mrf.mxu1 }
0x168f   :  { %v4208_v55 = vadd.f32 %v5982_v57, %v4207_v2  ;;  %v4220_v3 = vmax.f32 %v4213_v51, %v4216_v58 }
0x1691   :  { %v4219_v62 = vmax.f32 %v4205_v54, %v4208_v55 }
0x1693   :  { %v4221_v61 = vmax.f32 %v4219_v62, %v4220_v3  ;;  %v7024_v62 = vld [vmem:[#allocation11 + $0x38] sm:$0xff]  }
0x1694   :  { %6726 = vmatprep.subr.bf16.mxu0 %v7024_v62 }
0x1695   :  { %v4222_v43 = vrot.slane %v4221_v61, 4  ;;  %6727 = vmatpush3.bf16.msra.mxu0 %v7024_v62 }
0x1697   :  { %v4223_v10 = vmax.f32 %v4221_v61, %v4222_v43  ;;  %v7025_v61 = vld [vmem:[#allocation11 + $0x30] sm:$0xff]   ;;  %v7026_v43 = vld [vmem:[#allocation11 + $0x28] sm:$0xff]  }
0x1698   :  { %6728 = vmatprep.subr.bf16.mxu0 %v7025_v61 }
0x1699   :  { %v4224_v9 = vrot.slane %v4223_v10, 2  ;;  %6729 = vmatpush3.bf16.msra.mxu0 %v7025_v61 }
0x169a   :  { %6730 = vmatprep.subr.bf16.mxu0 %v7026_v43 }
0x169b   :  { %v4225_v59 = vmax.f32 %v4223_v10, %v4224_v9  ;;  %v7027_v10 = vld [vmem:[#allocation11 + $0x20] sm:$0xff]   ;;  %v7028_v9 = vld [vmem:[#allocation11 + $0x18] sm:$0xff]  }
0x169d   :  { %v4226_v4 = vrot.slane %v4225_v59, 1  ;;  %6731 = vmatpush3.bf16.msra.mxu0 %v7026_v43 }
0x169e   :  { %6732 = vmatprep.subr.bf16.mxu0 %v7027_v10 }
0x169f   :  { %v4227_v11 = vmax.f32 %v4225_v59, %v4226_v4  ;;  %v7029_v59 = vld [vmem:[#allocation11 + $0x10] sm:$0xff]   ;;  %v7030_v4 = vld [vmem:[#allocation11 + $0x8] sm:$0xff]  }
0x16a1   :  { %v4228_v12 = vsub.f32 %v4205_v54, %v4227_v11  ;;  %v4229_v6 = vsub.f32 %v4208_v55, %v4227_v11  ;;  %v4230_v50 = vsub.f32 %v4213_v51, %v4227_v11  ;;  %v4231_v14 = vsub.f32 %v4216_v58, %v4227_v11  ;;  %6733 = vmatpush3.bf16.msra.mxu0 %v7027_v10  ;;  %v7031_v11 = vld [vmem:[#allocation11] sm:$0xff]  }
0x16a2   :  { %6734 = vmatprep.subr.bf16.mxu0 %v7028_v9 }
0x16a3   :  { %v4232_v15 = vmul.f32 1.442695, %v4228_v12  ;;  %v4234_v16 = vmul.f32 1.442695, %v4229_v6  ;;  %v4236_v17 = vmul.f32 1.442695, %v4230_v50 }
0x16a4   :  { %v4238_v19 = vmul.f32 1.442695, %v4231_v14 }
0x16a5   :  { %7280 = vpow2.f32 %v4232_v15  ;;  %6735 = vmatpush3.bf16.msra.mxu0 %v7028_v9 }
0x16a6   :  { %7282 = vpow2.f32 %v4234_v16  ;;  %6736 = vmatprep.subr.bf16.mxu0 %v7029_v59 }
0x16a7   :  { %7284 = vpow2.f32 %v4236_v17 }
0x16a8   :  { %7286 = vpow2.f32 %v4238_v19 }
0x16a9   :  { %6737 = vmatpush3.bf16.msra.mxu0 %v7029_v59 }
0x16aa   :  { %6738 = vmatprep.subr.bf16.mxu0 %v7030_v4 }
0x16ad   :  { %6739 = vmatpush3.bf16.msra.mxu0 %v7030_v4 }
0x16ae   :  { %6740 = vmatprep.subr.bf16.mxu0 %v7031_v11 }
0x16b1   :  { %6741 = vmatpush3.bf16.msra.mxu0 %v7031_v11 }
0x16b2   :  { %v7281_v5 = vpop.eup %7280 }
0x16b3   :  { %v7283_v20 = vpop.eup %7282 }
0x16b4   :  { %v4240_v53 = vadd.f32 %v7283_v20, %v7281_v5  ;;  %v7285_v21 = vpop.eup %7284 }
0x16b5   :  { %v7287_v23 = vpop.eup %7286 }
0x16b6   :  { %v4241_v22 = vadd.f32 %v7285_v21, %v4240_v53 }
0x16b8   :  { %v4242_v24 = vadd.f32 %v7287_v23, %v4241_v22 }
0x16ba   :  { %v4243_v31 = vrot.slane %v4242_v24, 4 }
0x16bc   :  { %v4244_v63 = vadd.f32 %v4243_v31, %v4242_v24 }
0x16be   :  { %v4245_v49 = vrot.slane %v4244_v63, 2 }
0x16c0   :  { %v4246_v13 = vadd.f32 %v4245_v49, %v4244_v63 }
0x16c2   :  { %v4247_v25 = vrot.slane %v4246_v13, 1 }
0x16c4   :  { %v4248_v26 = vadd.f32 %v4247_v25, %v4246_v13 }
0x16c6   :  { %7288 = vrcp.f32 %v4248_v26 }
0x16d3   :  { %v7289_v7 = vpop.eup %7288 }
0x16d4   :  { %v4251_v39 = vmul.f32 %v7289_v7, %v7283_v20  ;;  %v4250_v27 = vmul.f32 %v7289_v7, %v7281_v5  ;;  %v4253_v48 = vmul.f32 %v7289_v7, %v7287_v23  ;;  %v4252_v38 = vmul.f32 %v7289_v7, %v7285_v21 }
0x16d6   :  { %v4255_v44 = vmul.f32 %v4251_v39, %v8515_v28  ;;  %v4254_v46 = vmul.f32 %v4250_v27, %v8513_v30  ;;  %v4257_v47 = vmul.f32 %v4253_v48, %v8521_v29  ;;  %v4256_v37 = vmul.f32 %v4252_v38, %v8519_v35 }
0x16d8   :  { %v8534_v8 = vadd.f32 %v4255_v44, %v8515_v28  ;;  %v8537_v40 = vadd.f32 %v4254_v46, %v8513_v30  ;;  %v8550_v30 = vadd.f32 %v4257_v47, %v8521_v29  ;;  %v8553_v45 = vadd.f32 %v4256_v37, %v8519_v35 }
0x16da   :  { %v4265_v18 = vmul.f32 %v7713_v56, %v8534_v8  ;;  %v4264_v32 = vmul.f32 %v7713_v56, %v8537_v40  ;;  %v4277_v60 = vmul.f32 %v8534_v8, %v7720_v0  ;;  %v4276_v28 = vmul.f32 %v8537_v40, %v7720_v0 }
0x16db   :  { %v4267_v41 = vmul.f32 %v7713_v56, %v8550_v30  ;;  %v4266_v33 = vmul.f32 %v7713_v56, %v8553_v45  ;;  %v4279_v36 = vmul.f32 %v8550_v30, %v7720_v0  ;;  %v4278_v29 = vmul.f32 %v8553_v45, %v7720_v0 }
0x16dc   :  { %4270 = vadd.xlane.f32.xlu1 %v4265_v18  ;;  %4268 = vadd.xlane.f32.xlu0 %v4264_v32  ;;  %v4305_v35 = vmul.f32 %v8534_v8, %v8534_v8  ;;  %v4304_v34 = vmul.f32 %v8537_v40, %v8537_v40  ;;  %v4307_v58 = vmul.f32 %v8550_v30, %v8550_v30 }
0x16dd   :  { %v4306_v2 = vmul.f32 %v8553_v45, %v8553_v45 }
0x16de   :  { %v4309_v52 = vmul.f32 %v7713_v56, %v4305_v35  ;;  %v4308_v1 = vmul.f32 %v7713_v56, %v4304_v34  ;;  %v4321_v57 = vmul.f32 %v4305_v35, %v7720_v0  ;;  %v4320_v42 = vmul.f32 %v4304_v34, %v7720_v0 }
0x16df   :  { %v4311_v51 = vmul.f32 %v7713_v56, %v4307_v58  ;;  %v4310_v54 = vmul.f32 %v7713_v56, %v4306_v2  ;;  %v4323_v55 = vmul.f32 %v4307_v58, %v7720_v0  ;;  %v4322_v3 = vmul.f32 %v4306_v2, %v7720_v0 }
0x16e0   :  { %4282 = vadd.xlane.f32.xlu1 %v4277_v60  ;;  %4280 = vadd.xlane.f32.xlu0 %v4276_v28 }
0x16e4   :  { %4274 = vadd.xlane.f32.xlu1 %v4267_v41  ;;  %4272 = vadd.xlane.f32.xlu0 %v4266_v33 }
0x16e8   :  { %4286 = vadd.xlane.f32.xlu1 %v4279_v36  ;;  %4284 = vadd.xlane.f32.xlu0 %v4278_v29 }
0x16ec   :  { %4314 = vadd.xlane.f32.xlu1 %v4309_v52  ;;  %4312 = vadd.xlane.f32.xlu0 %v4308_v1 }
0x16f0   :  { %4326 = vadd.xlane.f32.xlu1 %v4321_v57  ;;  %4324 = vadd.xlane.f32.xlu0 %v4320_v42 }
0x16f4   :  { %4318 = vadd.xlane.f32.xlu1 %v4311_v51  ;;  %4316 = vadd.xlane.f32.xlu0 %v4310_v54 }
0x16f8   :  { %4330 = vadd.xlane.f32.xlu1 %v4323_v55  ;;  %4328 = vadd.xlane.f32.xlu0 %v4322_v3 }
0x1765   :  { %v4271_v12 = vpop.xlane.xlu1 %4270  ;;  %v4269_v6 = vpop.xlane.xlu0 %4268 }
0x1766   :  { %v4289_v53 = vmul.f32 %v7713_v56, %v4271_v12  ;;  %v4288_v21 = vmul.f32 %v7713_v56, %v4269_v6 }
0x1769   :  { %v4283_v50 = vpop.xlane.xlu1 %4282  ;;  %v4281_v14 = vpop.xlane.xlu0 %4280 }
0x176a   :  { %v4293_v17 = vmul.f32 %v4283_v50, %v7720_v0  ;;  %v4292_v19 = vmul.f32 %v4281_v14, %v7720_v0 }
0x176c   :  { %v4297_v22 = vadd.f32 %v4293_v17, %v4289_v53  ;;  %v4296_v23 = vadd.f32 %v4292_v19, %v4288_v21 }
0x176d   :  { %v4275_v15 = vpop.xlane.xlu1 %4274  ;;  %v4273_v16 = vpop.xlane.xlu0 %4272 }
0x176e   :  { %v4301_v63 = vmul.f32 0.015625, %v4297_v22  ;;  %v4300_v49 = vmul.f32 0.015625, %v4296_v23  ;;  %v4291_v48 = vmul.f32 %v7713_v56, %v4275_v15  ;;  %v4290_v38 = vmul.f32 %v7713_v56, %v4273_v16  ;;  %v5991_v16 = vld [vmem:[%s8818_s7] ss:$0 sm:$0xff] }
0x1770   :  { %v4349_v41 = vmul.f32 %v4301_v63, %v4301_v63  ;;  %v4348_v33 = vmul.f32 %v4300_v49, %v4300_v49  ;;  %v4357_v50 = vsub.f32 %v8534_v8, %v4301_v63  ;;  %v4356_v15 = vsub.f32 %v8537_v40, %v4300_v49 }
0x1771   :  { %v4287_v5 = vpop.xlane.xlu1 %4286  ;;  %v4285_v20 = vpop.xlane.xlu0 %4284 }
0x1772   :  { %v4295_v13 = vmul.f32 %v4287_v5, %v7720_v0  ;;  %v4294_v25 = vmul.f32 %v4285_v20, %v7720_v0  ;;  %v5992_v5 = vld [vmem:[%s8819_s8] ss:$0 sm:$0xff] }
0x1774   :  { %v4299_v47 = vadd.f32 %v4295_v13, %v4291_v48  ;;  %v4298_v37 = vadd.f32 %v4294_v25, %v4290_v38  ;;  %v7036_v48 = vld [vmem:[#allocation12 + $0x18] sm:$0xff]   ;;  %v7037_v38 = vld [vmem:[#allocation12 + $0x10] sm:$0xff]  }
0x1775   :  { %v4315_v24 = vpop.xlane.xlu1 %4314  ;;  %v4313_v31 = vpop.xlane.xlu0 %4312 }
0x1776   :  { %v4333_v39 = vmul.f32 %v7713_v56, %v4315_v24  ;;  %v4332_v27 = vmul.f32 %v7713_v56, %v4313_v31  ;;  %v4303_v52 = vmul.f32 0.015625, %v4299_v47  ;;  %v4302_v1 = vmul.f32 0.015625, %v4298_v37  ;;  %v5993_v47 = vld [vmem:[%s8821_s10] ss:$0 sm:$0xff] }
0x1778   :  { %v4351_v43 = vmul.f32 %v4303_v52, %v4303_v52  ;;  %v4350_v10 = vmul.f32 %v4302_v1, %v4302_v1  ;;  %v4359_v8 = vsub.f32 %v8550_v30, %v4303_v52  ;;  %v4358_v24 = vsub.f32 %v8553_v45, %v4302_v1  ;;  %v7032_v30 = vld [vmem:[#allocation12 + $0x38] sm:$0xff]   ;;  %v7033_v45 = vld [vmem:[#allocation12 + $0x30] sm:$0xff]  }
0x1779   :  { %v4327_v26 = vpop.xlane.xlu1 %4326  ;;  %v4325_v7 = vpop.xlane.xlu0 %4324  ;;  %6746 = vmatprep.subr.bf16.mxu1 %v7032_v30 }
0x177a   :  { %v4337_v44 = vmul.f32 %v4327_v26, %v7720_v0  ;;  %v4336_v46 = vmul.f32 %v4325_v7, %v7720_v0  ;;  %6747 = vmatpush3.bf16.msra.mxu1 %v7032_v30 }
0x177b   :  { %6748 = vmatprep.subr.bf16.mxu1 %v7033_v45 }
0x177c   :  { %v4341_v18 = vadd.f32 %v4337_v44, %v4333_v39  ;;  %v4340_v32 = vadd.f32 %v4336_v46, %v4332_v27  ;;  %v7034_v44 = vld [vmem:[#allocation12 + $0x28] sm:$0xff]   ;;  %v7035_v46 = vld [vmem:[#allocation12 + $0x20] sm:$0xff]  }
0x177d   :  { %v4319_v60 = vpop.xlane.xlu1 %4318  ;;  %v4317_v28 = vpop.xlane.xlu0 %4316 }
0x177e   :  { %v4345_v36 = vmul.f32 0.015625, %v4341_v18  ;;  %v4344_v29 = vmul.f32 0.015625, %v4340_v32  ;;  %v4335_v57 = vmul.f32 %v7713_v56, %v4319_v60  ;;  %v4334_v42 = vmul.f32 %v7713_v56, %v4317_v28  ;;  %6749 = vmatpush3.bf16.msra.mxu1 %v7033_v45  ;;  %v7038_v18 = vld [vmem:[#allocation12 + $0x8] sm:$0xff]   ;;  %v7039_v32 = vld [vmem:[#allocation12] sm:$0xff]  }
0x177f   :  { %6750 = vmatprep.subr.bf16.mxu1 %v7034_v44 }
0x1780   :  { %v4353_v35 = vsub.f32 %v4345_v36, %v4349_v41  ;;  %v4352_v34 = vsub.f32 %v4344_v29, %v4348_v33 }
0x1781   :  { %v4331_v58 = vpop.xlane.xlu1 %4330  ;;  %v4329_v2 = vpop.xlane.xlu0 %4328 }
0x1782   :  { %v4361_v51 = vadd.f32 1e-05, %v4353_v35  ;;  %v4360_v54 = vadd.f32 1e-05, %v4352_v34  ;;  %v4339_v55 = vmul.f32 %v4331_v58, %v7720_v0  ;;  %v4338_v3 = vmul.f32 %v4329_v2, %v7720_v0  ;;  %6751 = vmatpush3.bf16.msra.mxu1 %v7034_v44 }
0x1783   :  { %6752 = vmatprep.subr.bf16.mxu1 %v7035_v46 }
0x1784   :  { %7290 = vrsqrt.f32 %v4361_v51  ;;  %v4343_v62 = vadd.f32 %v4339_v55, %v4335_v57  ;;  %v4342_v61 = vadd.f32 %v4338_v3, %v4334_v42 }
0x1785   :  { %7292 = vrsqrt.f32 %v4360_v54 }
0x1786   :  { %v4347_v9 = vmul.f32 0.015625, %v4343_v62  ;;  %v4346_v59 = vmul.f32 0.015625, %v4342_v61  ;;  %6753 = vmatpush3.bf16.msra.mxu1 %v7035_v46 }
0x1787   :  { %6754 = vmatprep.subr.bf16.mxu1 %v7036_v48 }
0x1788   :  { %v4355_v4 = vsub.f32 %v4347_v9, %v4351_v43  ;;  %v4354_v11 = vsub.f32 %v4346_v59, %v4350_v10 }
0x178a   :  { %v4363_v12 = vadd.f32 1e-05, %v4355_v4  ;;  %v4362_v6 = vadd.f32 1e-05, %v4354_v11  ;;  %6755 = vmatpush3.bf16.msra.mxu1 %v7036_v48 }
0x178b   :  { %6756 = vmatprep.subr.bf16.mxu1 %v7037_v38 }
0x178c   :  { %7294 = vrsqrt.f32 %v4363_v12 }
0x178d   :  { %7296 = vrsqrt.f32 %v4362_v6 }
0x178e   :  { %6757 = vmatpush3.bf16.msra.mxu1 %v7037_v38 }
0x178f   :  { %6758 = vmatprep.subr.bf16.mxu1 %v7038_v18 }
0x1791   :  { %v7291_v14 = vpop.eup %7290 }
0x1792   :  { %v7293_v17 = vpop.eup %7292  ;;  %v4369_v19 = vmul.f32 %v7291_v14, %v4357_v50  ;;  %6759 = vmatpush3.bf16.msra.mxu1 %v7038_v18 }
0x1793   :  { %v4368_v20 = vmul.f32 %v7293_v17, %v4356_v15  ;;  %6760 = vmatprep.subr.bf16.mxu1 %v7039_v32 }
0x1794   :  { %v4379_v53 = vmul.f32 %v5991_v16, %v4369_v19 }
0x1795   :  { %v4378_v21 = vmul.f32 %v5991_v16, %v4368_v20 }
0x1796   :  { %v8603_v22 = vadd.f32 %v5992_v5, %v4379_v53  ;;  %6761 = vmatpush3.bf16.msra.mxu1 %v7039_v32 }
0x1797   :  { %v8605_v23 = vadd.f32 %v5992_v5, %v4378_v21 }
0x1799   :  { %v7295_v40 = vpop.eup %7294  ;;  %v4409_v31 = vpack.c.bf16 %v8603_v22, %v8605_v23 }
0x179a   :  { %v7297_v63 = vpop.eup %7296  ;;  %v4371_v49 = vmul.f32 %v7295_v40, %v4359_v8 }
0x179b   :  { %6742 = vmatprep.mubr.bf16.mxu0 %v4409_v31  ;;  %v4370_v13 = vmul.f32 %v7297_v63, %v4358_v24 }
0x179c   :  { %v4381_v25 = vmul.f32 %v5991_v16, %v4371_v49 }
0x179d   :  { %v4380_v26 = vmul.f32 %v5991_v16, %v4370_v13 }
0x179e   :  { %v8611_v7 = vadd.f32 %v5992_v5, %v4381_v25  ;;  %v6002_v25 = vld [vmem:[%s8823_s12] ss:$0 sm:$0xff] }
0x179f   :  { %v8613_v39 = vadd.f32 %v5992_v5, %v4380_v26 }
0x17a1   :  { %v4410_v27 = vpack.c.bf16 %v8611_v7, %v8613_v39 }
0x17a3   :  { %6743 = vmatmul.mubr.bf16.vlgmr.msra.gmra.mxu0 %v4410_v27 }
0x1863   :  { %v6744_v37 = vpop.f32.mrf.mxu0 }
0x1864   :  { %v4508_v60 = vadd.f32 %v6744_v37, %v5993_v47 }
0x1865   :  { %v4499_v28 = vpop.f32.mrf.mxu0 }
0x1866   :  { %v4520_v41 = vmul.f32 0.044715, %v4508_v60  ;;  %v4500_v33 = vadd.f32 %v5993_v47, %v4499_v28  ;;  %v4516_v8 = vmul.f32 0.5, %v4508_v60 }
0x1867   :  { %v6745_v36 = vpop.f32.mrf.mxu0 }
0x1868   :  { %v4524_v29 = vmul.f32 %v4520_v41, %v4508_v60  ;;  %v4518_v35 = vmul.f32 0.044715, %v4500_v33  ;;  %v4511_v34 = vadd.f32 %v6745_v36, %v5993_v47  ;;  %v4514_v20 = vmul.f32 0.5, %v4500_v33 }
0x1869   :  { %v4502_v52 = vpop.f32.mrf.mxu0 }
0x186a   :  { %v4528_v1 = vmul.f32 %v4524_v29, %v4508_v60  ;;  %v4522_v57 = vmul.f32 %v4518_v35, %v4500_v33  ;;  %v4521_v42 = vmul.f32 0.044715, %v4511_v34  ;;  %v4503_v58 = vadd.f32 %v5993_v47, %v4502_v52 }
0x186b   :  { %v4517_v19 = vmul.f32 0.5, %v4511_v34 }
0x186c   :  { %v4532_v2 = vadd.f32 %v4528_v1, %v4508_v60  ;;  %v4526_v51 = vmul.f32 %v4522_v57, %v4500_v33  ;;  %v4525_v54 = vmul.f32 %v4521_v42, %v4511_v34  ;;  %v4519_v55 = vmul.f32 0.044715, %v4503_v58 }
0x186d   :  { %v4515_v53 = vmul.f32 0.5, %v4503_v58 }
0x186e   :  { %v4529_v3 = vmul.f32 %v4525_v54, %v4511_v34  ;;  %v4523_v62 = vmul.f32 %v4519_v55, %v4503_v58  ;;  %v4530_v61 = vadd.f32 %v4526_v51, %v4500_v33  ;;  %v4536_v43 = vmul.f32 0.7978846, %v4532_v2 }
0x1870   :  { %v4533_v10 = vadd.f32 %v4529_v3, %v4511_v34  ;;  %v4527_v9 = vmul.f32 %v4523_v62, %v4503_v58  ;;  %v4534_v59 = vmul.f32 0.7978846, %v4530_v61 }
0x1872   :  { %v4537_v4 = vmul.f32 0.7978846, %v4533_v10  ;;  %v4531_v11 = vadd.f32 %v4527_v9, %v4503_v58  ;;  %7298 = vtanh.f32 %v4534_v59 }
0x1873   :  { %7300 = vtanh.f32 %v4536_v43 }
0x1874   :  { %7302 = vtanh.f32 %v4537_v4  ;;  %v4535_v12 = vmul.f32 0.7978846, %v4531_v11 }
0x1876   :  { %7304 = vtanh.f32 %v4535_v12 }
0x187f   :  { %v7299_v6 = vpop.eup %7298 }
0x1880   :  { %v7301_v50 = vpop.eup %7300  ;;  %v4542_v15 = vadd.f32 1.0, %v7299_v6 }
0x1881   :  { %v7303_v14 = vpop.eup %7302  ;;  %v4544_v5 = vadd.f32 1.0, %v7301_v50 }
0x1882   :  { %v4545_v16 = vadd.f32 1.0, %v7303_v14  ;;  %v4546_v24 = vmul.f32 %v4542_v15, %v4514_v20 }
0x1883   :  { %v7305_v17 = vpop.eup %7304  ;;  %v4548_v63 = vmul.f32 %v4544_v5, %v4516_v8 }
0x1884   :  { %v4543_v21 = vadd.f32 1.0, %v7305_v17  ;;  %v4549_v40 = vmul.f32 %v4545_v16, %v4517_v19 }
0x1886   :  { %v4547_v31 = vmul.f32 %v4543_v21, %v4515_v53  ;;  %v4568_v13 = vpack.c.bf16 %v4549_v40, %v4548_v63 }
0x1888   :  { %v4567_v49 = vpack.c.bf16 %v4547_v31, %v4546_v24 }
0x188a   :  { %6762 = vmatprep.mubr.bf16.mxu1 %v4567_v49 }
0x188b   :  { %6763 = vmatmul.mubr.bf16.vlgmr.msra.gmra.mxu1 %v4568_v13 }
0x194b   :  { %v6764_v26 = vpop.f32.mrf.mxu1 }
0x194c   :  { %v4666_v27 = vadd.f32 %v6764_v26, %v6002_v25 }
0x194d   :  { %v4657_v30 = vpop.f32.mrf.mxu1 }
0x194e   :  { %v4674_v45 = vadd.f32 %v4666_v27, %v8613_v39  ;;  %v4658_v44 = vadd.f32 %v6002_v25, %v4657_v30 }
0x194f   :  { %v6765_v46 = vpop.f32.mrf.mxu1 }
0x1950   :  { %v4682_v48 = vmul.f32 0.044715, %v4674_v45  ;;  %v4672_v38 = vadd.f32 %v4658_v44, %v8605_v23  ;;  %v4669_v18 = vadd.f32 %v6765_v46, %v6002_v25 }
0x1951   :  { %v4660_v32 = vpop.f32.mrf.mxu1 }
0x1952   :  { %v4686_v47 = vmul.f32 %v4682_v48, %v4674_v45  ;;  %v4680_v37 = vmul.f32 0.044715, %v4672_v38  ;;  %v4675_v60 = vadd.f32 %v4669_v18, %v8611_v7  ;;  %v4661_v28 = vadd.f32 %v6002_v25, %v4660_v32  ;;  %v7040_v48 = vld [vmem:[#allocation9 + $0x78] sm:$0xff]   ;;  %v7042_v18 = vld [vmem:[#allocation9 + $0x68] sm:$0xff]   ;;  %v7043_v32 = vld [vmem:[#allocation9 + $0x60] sm:$0xff]  }
0x1953   :  { %v4676_v50 = vmul.f32 0.5, %v4672_v38  ;;  %6766 = vmatprep.subr.bf16.mxu0 %v7040_v48 }
0x1954   :  { %v4690_v41 = vmul.f32 %v4686_v47, %v4674_v45  ;;  %v4684_v33 = vmul.f32 %v4680_v37, %v4672_v38  ;;  %v4683_v36 = vmul.f32 0.044715, %v4675_v60  ;;  %v4673_v29 = vadd.f32 %v4661_v28, %v8603_v22  ;;  %6767 = vmatpush3.bf16.msra.mxu0 %v7040_v48  ;;  %v7044_v47 = vld [vmem:[#allocation9 + $0x58] sm:$0xff]   ;;  %v7045_v37 = vld [vmem:[#allocation9 + $0x50] sm:$0xff]   ;;  %v7047_v28 = vld [vmem:[#allocation9 + $0x40] sm:$0xff]  }
0x1955   :  { %v4678_v22 = vmul.f32 0.5, %v4674_v45  ;;  %v4679_v59 = vmul.f32 0.5, %v4675_v60 }
0x1956   :  { %v4694_v35 = vadd.f32 %v4690_v41, %v4674_v45  ;;  %v4688_v34 = vmul.f32 %v4684_v33, %v4672_v38  ;;  %v4687_v39 = vmul.f32 %v4683_v36, %v4675_v60  ;;  %v4681_v52 = vmul.f32 0.044715, %v4673_v29 }
0x1957   :  { %v4677_v19 = vmul.f32 0.5, %v4673_v29 }
0x1958   :  { %v4698_v1 = vmul.f32 0.7978846, %v4694_v35  ;;  %v4692_v57 = vadd.f32 %v4688_v34, %v4672_v38  ;;  %v4691_v42 = vmul.f32 %v4687_v39, %v4675_v60  ;;  %v4685_v23 = vmul.f32 %v4681_v52, %v4673_v29  ;;  %v7041_v38 = vld [vmem:[#allocation9 + $0x70] sm:$0xff]  }
0x1959   :  { %6768 = vmatprep.subr.bf16.mxu0 %v7041_v38 }
0x195a   :  { %7306 = vtanh.f32 %v4698_v1  ;;  %v4696_v58 = vmul.f32 0.7978846, %v4692_v57  ;;  %v4695_v2 = vadd.f32 %v4691_v42, %v4675_v60  ;;  %v4689_v51 = vmul.f32 %v4685_v23, %v4673_v29  ;;  %6769 = vmatpush3.bf16.msra.mxu0 %v7041_v38  ;;  %v7046_v60 = vld [vmem:[#allocation9 + $0x48] sm:$0xff]  }
0x195b   :  { %6770 = vmatprep.subr.bf16.mxu0 %v7042_v18 }
0x195c   :  { %7308 = vtanh.f32 %v4696_v58  ;;  %v4699_v7 = vmul.f32 0.7978846, %v4695_v2  ;;  %v4693_v54 = vadd.f32 %v4689_v51, %v4673_v29 }
0x195e   :  { %7310 = vtanh.f32 %v4699_v7  ;;  %v4697_v55 = vmul.f32 0.7978846, %v4693_v54  ;;  %6771 = vmatpush3.bf16.msra.mxu0 %v7042_v18 }
0x195f   :  { %6772 = vmatprep.subr.bf16.mxu0 %v7043_v32 }
0x1960   :  { %7312 = vtanh.f32 %v4697_v55 }
0x1962   :  { %6773 = vmatpush3.bf16.msra.mxu0 %v7043_v32 }
0x1963   :  { %6774 = vmatprep.subr.bf16.mxu0 %v7044_v47 }
0x1966   :  { %6775 = vmatpush3.bf16.msra.mxu0 %v7044_v47 }
0x1967   :  { %v7307_v3 = vpop.eup %7306  ;;  %6776 = vmatprep.subr.bf16.mxu0 %v7045_v37 }
0x1968   :  { %v4706_v62 = vadd.f32 1.0, %v7307_v3 }
0x1969   :  { %v7309_v61 = vpop.eup %7308 }
0x196a   :  { %v8627_v43 = vmul.f32 %v4706_v62, %v4678_v22  ;;  %v4704_v11 = vadd.f32 1.0, %v7309_v61  ;;  %6777 = vmatpush3.bf16.msra.mxu0 %v7045_v37 }
0x196b   :  { %v7311_v10 = vpop.eup %7310  ;;  %6778 = vmatprep.subr.bf16.mxu0 %v7046_v60 }
0x196c   :  { %v4716_v9 = vmul.f32 %v7713_v56, %v8627_v43  ;;  %v4707_v4 = vadd.f32 1.0, %v7311_v10  ;;  %v4728_v14 = vmul.f32 %v8627_v43, %v7720_v0  ;;  %v8637_v16 = vmul.f32 %v4704_v11, %v4676_v50 }
0x196d   :  { %v7313_v12 = vpop.eup %7312  ;;  %v4756_v40 = vmul.f32 %v8627_v43, %v8627_v43 }
0x196e   :  { %4722 = vadd.xlane.f32.xlu0 %v4716_v9  ;;  %v8631_v6 = vmul.f32 %v4707_v4, %v4679_v59  ;;  %v4705_v17 = vadd.f32 1.0, %v7313_v12  ;;  %v4714_v20 = vmul.f32 %v7713_v56, %v8637_v16  ;;  %v4726_v8 = vmul.f32 %v8637_v16, %v7720_v0  ;;  %6779 = vmatpush3.bf16.msra.mxu0 %v7046_v60 }
0x196f   :  { %v4760_v31 = vmul.f32 %v7713_v56, %v4756_v40  ;;  %v4754_v49 = vmul.f32 %v8637_v16, %v8637_v16  ;;  %v4772_v44 = vmul.f32 %v4756_v40, %v7720_v0  ;;  %6780 = vmatprep.subr.bf16.mxu0 %v7047_v28 }
0x1970   :  { %v4717_v15 = vmul.f32 %v7713_v56, %v8631_v6  ;;  %v4729_v5 = vmul.f32 %v8631_v6, %v7720_v0  ;;  %v8643_v53 = vmul.f32 %v4705_v17, %v4677_v19  ;;  %v4757_v63 = vmul.f32 %v8631_v6, %v8631_v6 }
0x1971   :  { %v4758_v25 = vmul.f32 %v7713_v56, %v4754_v49  ;;  %v4770_v30 = vmul.f32 %v4754_v49, %v7720_v0 }
0x1972   :  { %4734 = vadd.xlane.f32.xlu0 %v4728_v14  ;;  %4724 = vadd.xlane.f32.xlu1 %v4717_v15  ;;  %v4715_v21 = vmul.f32 %v7713_v56, %v8643_v53  ;;  %v4727_v24 = vmul.f32 %v8643_v53, %v7720_v0  ;;  %v4761_v13 = vmul.f32 %v7713_v56, %v4757_v63 }
0x1973   :  { %v4755_v26 = vmul.f32 %v8643_v53, %v8643_v53  ;;  %v4773_v46 = vmul.f32 %v4757_v63, %v7720_v0  ;;  %6781 = vmatpush3.bf16.msra.mxu0 %v7047_v28 }
0x1975   :  { %v4759_v27 = vmul.f32 %v7713_v56, %v4755_v26  ;;  %v4771_v45 = vmul.f32 %v4755_v26, %v7720_v0 }
0x1976   :  { %4736 = vadd.xlane.f32.xlu1 %v4729_v5  ;;  %4718 = vadd.xlane.f32.xlu0 %v4714_v20 }
0x197a   :  { %4720 = vadd.xlane.f32.xlu1 %v4715_v21  ;;  %4730 = vadd.xlane.f32.xlu0 %v4726_v8 }
0x197e   :  { %4732 = vadd.xlane.f32.xlu1 %v4727_v24  ;;  %4766 = vadd.xlane.f32.xlu0 %v4760_v31 }
0x1982   :  { %4768 = vadd.xlane.f32.xlu1 %v4761_v13  ;;  %4762 = vadd.xlane.f32.xlu0 %v4758_v25 }
0x1986   :  { %4764 = vadd.xlane.f32.xlu1 %v4759_v27  ;;  %4774 = vadd.xlane.f32.xlu0 %v4770_v30 }
0x198a   :  { %4776 = vadd.xlane.f32.xlu1 %v4771_v45  ;;  %4778 = vadd.xlane.f32.xlu0 %v4772_v44 }
0x198e   :  { %4780 = vadd.xlane.f32.xlu1 %v4773_v46 }
0x19f7   :  { %v4723_v41 = vpop.xlane.xlu0 %4722 }
0x19f8   :  { %v4740_v54 = vmul.f32 %v7713_v56, %v4723_v41 }
0x19fb   :  { %v4735_v33 = vpop.xlane.xlu0 %4734  ;;  %v4725_v36 = vpop.xlane.xlu1 %4724 }
0x19fc   :  { %v4744_v23 = vmul.f32 %v4735_v33, %v7720_v0  ;;  %v4741_v11 = vmul.f32 %v7713_v56, %v4725_v36 }
0x19fe   :  { %v4748_v3 = vadd.f32 %v4744_v23, %v4740_v54 }
0x19ff   :  { %v4737_v29 = vpop.xlane.xlu1 %4736  ;;  %v4719_v35 = vpop.xlane.xlu0 %4718 }
0x1a00   :  { %v4738_v42 = vmul.f32 %v7713_v56, %v4719_v35  ;;  %v4745_v22 = vmul.f32 %v4737_v29, %v7720_v0  ;;  %v4752_v12 = vmul.f32 0.015625, %v4748_v3 }
0x1a02   :  { %v4749_v14 = vadd.f32 %v4745_v22, %v4741_v11  ;;  %v4800_v13 = vmul.f32 %v4752_v12, %v4752_v12 }
0x1a03   :  { %v4721_v34 = vpop.xlane.xlu1 %4720  ;;  %v4731_v39 = vpop.xlane.xlu0 %4730 }
0x1a04   :  { %v4742_v52 = vmul.f32 %v4731_v39, %v7720_v0  ;;  %v4739_v55 = vmul.f32 %v7713_v56, %v4721_v34  ;;  %v4753_v25 = vmul.f32 0.015625, %v4749_v14  ;;  %v6013_v34 = vld [vmem:[%s8814_s3 + $0x1] ss:$0 sm:$0xff] }
0x1a06   :  { %v4746_v58 = vadd.f32 %v4742_v52, %v4738_v42  ;;  %v4801_v47 = vmul.f32 %v4753_v25, %v4753_v25 }
0x1a07   :  { %v4733_v1 = vpop.xlane.xlu1 %4732  ;;  %v4767_v57 = vpop.xlane.xlu0 %4766 }
0x1a08   :  { %v4743_v2 = vmul.f32 %v4733_v1, %v7720_v0  ;;  %v4750_v62 = vmul.f32 0.015625, %v4746_v58  ;;  %v4784_v19 = vmul.f32 %v7713_v56, %v4767_v57  ;;  %v4808_v1 = vsub.f32 %v8627_v43, %v4752_v12  ;;  %v6014_v58 = vld [vmem:[%s8815_s4 + $0x1] ss:$0 sm:$0xff] }
0x1a0a   :  { %v4747_v61 = vadd.f32 %v4743_v2, %v4739_v55  ;;  %v4798_v15 = vmul.f32 %v4750_v62, %v4750_v62  ;;  %v4806_v36 = vsub.f32 %v8637_v16, %v4750_v62  ;;  %v4809_v16 = vsub.f32 %v8631_v6, %v4753_v25 }
0x1a0b   :  { %v4769_v51 = vpop.xlane.xlu1 %4768  ;;  %v4763_v7 = vpop.xlane.xlu0 %4762 }
0x1a0c   :  { %v4782_v59 = vmul.f32 %v7713_v56, %v4763_v7  ;;  %v4751_v17 = vmul.f32 0.015625, %v4747_v61  ;;  %v4785_v27 = vmul.f32 %v7713_v56, %v4769_v51 }
0x1a0e   :  { %v4799_v26 = vmul.f32 %v4751_v17, %v4751_v17  ;;  %v4807_v39 = vsub.f32 %v8643_v53, %v4751_v17 }
0x1a0f   :  { %v4765_v10 = vpop.xlane.xlu1 %4764  ;;  %v4775_v9 = vpop.xlane.xlu0 %4774 }
0x1a10   :  { %v4786_v4 = vmul.f32 %v4775_v9, %v7720_v0  ;;  %v4783_v21 = vmul.f32 %v7713_v56, %v4765_v10 }
0x1a12   :  { %v4790_v50 = vadd.f32 %v4786_v4, %v4782_v59  ;;  %v6016_v59 = vld [vmem:[%s8817_s6 + $0x1] ss:$0 sm:$0xff] }
0x1a13   :  { %v4777_v5 = vpop.xlane.xlu1 %4776  ;;  %v4779_v20 = vpop.xlane.xlu0 %4778 }
0x1a14   :  { %v4794_v8 = vmul.f32 0.015625, %v4790_v50  ;;  %v4787_v40 = vmul.f32 %v4777_v5, %v7720_v0  ;;  %v4788_v24 = vmul.f32 %v4779_v20, %v7720_v0 }
0x1a16   :  { %v4802_v31 = vsub.f32 %v4794_v8, %v4798_v15  ;;  %v4791_v63 = vadd.f32 %v4787_v40, %v4783_v21  ;;  %v4792_v49 = vadd.f32 %v4788_v24, %v4784_v19 }
0x1a17   :  { %v4781_v30 = vpop.xlane.xlu1 %4780 }
0x1a18   :  { %v4810_v45 = vadd.f32 1e-05, %v4802_v31  ;;  %v4795_v44 = vmul.f32 0.015625, %v4791_v63  ;;  %v4796_v46 = vmul.f32 0.015625, %v4792_v49  ;;  %v4789_v48 = vmul.f32 %v4781_v30, %v7720_v0 }
0x1a1a   :  { %7314 = vrsqrt.f32 %v4810_v45  ;;  %v4803_v38 = vsub.f32 %v4795_v44, %v4799_v26  ;;  %v4804_v18 = vsub.f32 %v4796_v46, %v4800_v13  ;;  %v4793_v32 = vadd.f32 %v4789_v48, %v4785_v27 }
0x1a1c   :  { %v4811_v37 = vadd.f32 1e-05, %v4803_v38  ;;  %v4812_v60 = vadd.f32 1e-05, %v4804_v18  ;;  %v4797_v28 = vmul.f32 0.015625, %v4793_v32 }
0x1a1e   :  { %7316 = vrsqrt.f32 %v4811_v37  ;;  %v4805_v41 = vsub.f32 %v4797_v28, %v4801_v47 }
0x1a1f   :  { %7318 = vrsqrt.f32 %v4812_v60 }
0x1a20   :  { %v4813_v33 = vadd.f32 1e-05, %v4805_v41 }
0x1a22   :  { %7320 = vrsqrt.f32 %v4813_v33 }
0x1a27   :  { %v7315_v29 = vpop.eup %7314 }
0x1a28   :  { %v4818_v35 = vmul.f32 %v7315_v29, %v4806_v36 }
0x1a2a   :  { %v4828_v23 = vmul.f32 %v6013_v34, %v4818_v35 }
0x1a2b   :  { %v7317_v52 = vpop.eup %7316 }
0x1a2c   :  { %v7319_v57 = vpop.eup %7318  ;;  %v4819_v42 = vmul.f32 %v7317_v52, %v4807_v39  ;;  %v8693_v54 = vadd.f32 %v6014_v58, %v4828_v23 }
0x1a2d   :  { %v4820_v2 = vmul.f32 %v7319_v57, %v4808_v1 }
0x1a2e   :  { %v4829_v51 = vmul.f32 %v6013_v34, %v4819_v42 }
0x1a2f   :  { %v7321_v7 = vpop.eup %7320  ;;  %v4830_v53 = vmul.f32 %v6013_v34, %v4820_v2 }
0x1a30   :  { %v4839_v55 = vadd.f32 %v6014_v58, %v4829_v51  ;;  %v4821_v3 = vmul.f32 %v7321_v7, %v4809_v16 }
0x1a31   :  { %v8696_v62 = vadd.f32 %v6014_v58, %v4830_v53 }
0x1a32   :  { %v4859_v22 = vpack.c.bf16 %v4839_v55, %v8693_v54  ;;  %v4831_v43 = vmul.f32 %v6013_v34, %v4821_v3 }
0x1a34   :  { %6782 = vmatprep.mubr.bf16.mxu0 %v4859_v22  ;;  %v8698_v61 = vadd.f32 %v6014_v58, %v4831_v43 }
0x1a36   :  { %v4860_v10 = vpack.c.bf16 %v8698_v61, %v8696_v62 }
0x1a38   :  { %6783 = vmatmul.mubr.bf16.vlgmr.msra.gmra.mxu0 %v4860_v10 }
0x1af8   :  { %v6784_v6 = vpop.f32.mrf.mxu0 }
0x1af9   :  { %v4958_v50 = vadd.f32 %v6784_v6, %v6016_v59 }
0x1afa   :  { %v4949_v9 = vpop.f32.mrf.mxu0 }
0x1afb   :  { %v4950_v14 = vadd.f32 %v6016_v59, %v4949_v9 }
0x1afc   :  { %v6785_v4 = vpop.f32.mrf.mxu0 }
0x1afd   :  { %v4961_v11 = vadd.f32 %v6785_v4, %v6016_v59 }
0x1afe   :  { %v4952_v12 = vpop.f32.mrf.mxu0 }
0x1aff   :  { %v4953_v15 = vadd.f32 %v6016_v59, %v4952_v12  ;;  %v4965_v17 = vmax.f32 %v4958_v50, %v4961_v11 }
0x1b01   :  { %v4964_v19 = vmax.f32 %v4950_v14, %v4953_v15 }
0x1b03   :  { %v4966_v5 = vmax.f32 %v4964_v19, %v4965_v17  ;;  %v7048_v19 = vld [vmem:[#allocation11 + $0x78] sm:$0xff]  }
0x1b04   :  { %6786 = vmatprep.subr.bf16.mxu1 %v7048_v19 }
0x1b05   :  { %v4967_v20 = vrot.slane %v4966_v5, 4  ;;  %6787 = vmatpush3.bf16.msra.mxu1 %v7048_v19 }
0x1b07   :  { %v4968_v21 = vmax.f32 %v4966_v5, %v4967_v20  ;;  %v7049_v5 = vld [vmem:[#allocation11 + $0x70] sm:$0xff]   ;;  %v7050_v20 = vld [vmem:[#allocation11 + $0x68] sm:$0xff]  }
0x1b08   :  { %6788 = vmatprep.subr.bf16.mxu1 %v7049_v5 }
0x1b09   :  { %v4969_v8 = vrot.slane %v4968_v21, 2  ;;  %6789 = vmatpush3.bf16.msra.mxu1 %v7049_v5 }
0x1b0a   :  { %6790 = vmatprep.subr.bf16.mxu1 %v7050_v20 }
0x1b0b   :  { %v4970_v40 = vmax.f32 %v4968_v21, %v4969_v8  ;;  %v7051_v21 = vld [vmem:[#allocation11 + $0x60] sm:$0xff]   ;;  %v7052_v8 = vld [vmem:[#allocation11 + $0x58] sm:$0xff]  }
0x1b0d   :  { %v4971_v24 = vrot.slane %v4970_v40, 1  ;;  %6791 = vmatpush3.bf16.msra.mxu1 %v7050_v20 }
0x1b0e   :  { %6792 = vmatprep.subr.bf16.mxu1 %v7051_v21 }
0x1b0f   :  { %v4972_v31 = vmax.f32 %v4970_v40, %v4971_v24  ;;  %v7053_v40 = vld [vmem:[#allocation11 + $0x50] sm:$0xff]   ;;  %v7054_v24 = vld [vmem:[#allocation11 + $0x48] sm:$0xff]  }
0x1b11   :  { %v4973_v63 = vsub.f32 %v4950_v14, %v4972_v31  ;;  %v4974_v49 = vsub.f32 %v4953_v15, %v4972_v31  ;;  %v4975_v13 = vsub.f32 %v4958_v50, %v4972_v31  ;;  %v4976_v25 = vsub.f32 %v4961_v11, %v4972_v31  ;;  %6793 = vmatpush3.bf16.msra.mxu1 %v7051_v21  ;;  %v7055_v31 = vld [vmem:[#allocation11 + $0x40] sm:$0xff]  }
0x1b12   :  { %6794 = vmatprep.subr.bf16.mxu1 %v7052_v8 }
0x1b13   :  { %v4977_v26 = vmul.f32 1.442695, %v4973_v63  ;;  %v4979_v27 = vmul.f32 1.442695, %v4974_v49  ;;  %v4981_v30 = vmul.f32 1.442695, %v4975_v13 }
0x1b14   :  { %v4983_v45 = vmul.f32 1.442695, %v4976_v25 }
0x1b15   :  { %7322 = vpow2.f32 %v4977_v26  ;;  %6795 = vmatpush3.bf16.msra.mxu1 %v7052_v8 }
0x1b16   :  { %7324 = vpow2.f32 %v4979_v27  ;;  %6796 = vmatprep.subr.bf16.mxu1 %v7053_v40 }
0x1b17   :  { %7326 = vpow2.f32 %v4981_v30 }
0x1b18   :  { %7328 = vpow2.f32 %v4983_v45 }
0x1b19   :  { %6797 = vmatpush3.bf16.msra.mxu1 %v7053_v40 }
0x1b1a   :  { %6798 = vmatprep.subr.bf16.mxu1 %v7054_v24 }
0x1b1d   :  { %6799 = vmatpush3.bf16.msra.mxu1 %v7054_v24 }
0x1b1e   :  { %6800 = vmatprep.subr.bf16.mxu1 %v7055_v31 }
0x1b21   :  { %6801 = vmatpush3.bf16.msra.mxu1 %v7055_v31 }
0x1b22   :  { %v7323_v44 = vpop.eup %7322 }
0x1b23   :  { %v7325_v46 = vpop.eup %7324 }
0x1b24   :  { %v4985_v48 = vadd.f32 %v7325_v46, %v7323_v44  ;;  %v7327_v38 = vpop.eup %7326 }
0x1b25   :  { %v7329_v32 = vpop.eup %7328 }
0x1b26   :  { %v4986_v18 = vadd.f32 %v7327_v38, %v4985_v48 }
0x1b28   :  { %v4987_v47 = vadd.f32 %v7329_v32, %v4986_v18 }
0x1b2a   :  { %v4988_v37 = vrot.slane %v4987_v47, 4 }
0x1b2c   :  { %v4989_v60 = vadd.f32 %v4988_v37, %v4987_v47 }
0x1b2e   :  { %v4990_v28 = vrot.slane %v4989_v60, 2 }
0x1b30   :  { %v4991_v41 = vadd.f32 %v4990_v28, %v4989_v60 }
0x1b32   :  { %v4992_v33 = vrot.slane %v4991_v41, 1 }
0x1b34   :  { %v4993_v36 = vadd.f32 %v4992_v33, %v4991_v41 }
0x1b36   :  { %7330 = vrcp.f32 %v4993_v36 }
0x1b43   :  { %v7331_v29 = vpop.eup %7330 }
0x1b44   :  { %v4996_v35 = vmul.f32 %v7331_v29, %v7325_v46  ;;  %v4995_v34 = vmul.f32 %v7331_v29, %v7323_v44  ;;  %v4998_v1 = vmul.f32 %v7331_v29, %v7329_v32  ;;  %v4997_v57 = vmul.f32 %v7331_v29, %v7327_v38 }
0x1b46   :  { %v5000_v39 = vmul.f32 %v4996_v35, %v4839_v55  ;;  %v4999_v52 = vmul.f32 %v4995_v34, %v8693_v54  ;;  %v5002_v16 = vmul.f32 %v4998_v1, %v8698_v61  ;;  %v5001_v51 = vmul.f32 %v4997_v57, %v8696_v62 }
0x1b48   :  { %v8706_v42 = vadd.f32 %v5000_v39, %v4839_v55  ;;  %v8709_v23 = vadd.f32 %v4999_v52, %v8693_v54  ;;  %v8722_v54 = vadd.f32 %v5002_v16, %v8698_v61  ;;  %v8725_v3 = vadd.f32 %v5001_v51, %v8696_v62 }
0x1b4a   :  { %v5010_v58 = vmul.f32 %v7713_v56, %v8706_v42  ;;  %v5009_v2 = vmul.f32 %v7713_v56, %v8709_v23  ;;  %v5022_v7 = vmul.f32 %v8706_v42, %v7720_v0  ;;  %v5021_v55 = vmul.f32 %v8709_v23, %v7720_v0 }
0x1b4b   :  { %v5012_v53 = vmul.f32 %v7713_v56, %v8722_v54  ;;  %v5011_v22 = vmul.f32 %v7713_v56, %v8725_v3  ;;  %v5024_v43 = vmul.f32 %v8722_v54, %v7720_v0  ;;  %v5023_v61 = vmul.f32 %v8725_v3, %v7720_v0 }
0x1b4c   :  { %5015 = vadd.xlane.f32.xlu1 %v5010_v58  ;;  %5013 = vadd.xlane.f32.xlu0 %v5009_v2  ;;  %v5050_v62 = vmul.f32 %v8706_v42, %v8706_v42  ;;  %v5049_v10 = vmul.f32 %v8709_v23, %v8709_v23  ;;  %v5052_v11 = vmul.f32 %v8722_v54, %v8722_v54 }
0x1b4d   :  { %v5051_v12 = vmul.f32 %v8725_v3, %v8725_v3 }
0x1b4e   :  { %v5054_v6 = vmul.f32 %v7713_v56, %v5050_v62  ;;  %v5053_v9 = vmul.f32 %v7713_v56, %v5049_v10  ;;  %v5066_v59 = vmul.f32 %v5050_v62, %v7720_v0  ;;  %v5065_v4 = vmul.f32 %v5049_v10, %v7720_v0 }
0x1b4f   :  { %v5056_v50 = vmul.f32 %v7713_v56, %v5052_v11  ;;  %v5055_v14 = vmul.f32 %v7713_v56, %v5051_v12  ;;  %v5068_v15 = vmul.f32 %v5052_v11, %v7720_v0  ;;  %v5067_v17 = vmul.f32 %v5051_v12, %v7720_v0 }
0x1b50   :  { %5027 = vadd.xlane.f32.xlu1 %v5022_v7  ;;  %5025 = vadd.xlane.f32.xlu0 %v5021_v55 }
0x1b54   :  { %5019 = vadd.xlane.f32.xlu1 %v5012_v53  ;;  %5017 = vadd.xlane.f32.xlu0 %v5011_v22 }
0x1b58   :  { %5031 = vadd.xlane.f32.xlu1 %v5024_v43  ;;  %5029 = vadd.xlane.f32.xlu0 %v5023_v61 }
0x1b5c   :  { %5059 = vadd.xlane.f32.xlu1 %v5054_v6  ;;  %5057 = vadd.xlane.f32.xlu0 %v5053_v9 }
0x1b60   :  { %5071 = vadd.xlane.f32.xlu1 %v5066_v59  ;;  %5069 = vadd.xlane.f32.xlu0 %v5065_v4 }
0x1b64   :  { %5063 = vadd.xlane.f32.xlu1 %v5056_v50  ;;  %5061 = vadd.xlane.f32.xlu0 %v5055_v14 }
0x1b68   :  { %5075 = vadd.xlane.f32.xlu1 %v5068_v15  ;;  %5073 = vadd.xlane.f32.xlu0 %v5067_v17 }
0x1bd5   :  { %v5016_v63 = vpop.xlane.xlu1 %5015  ;;  %v5014_v49 = vpop.xlane.xlu0 %5013 }
0x1bd6   :  { %v5034_v48 = vmul.f32 %v7713_v56, %v5016_v63  ;;  %v5033_v38 = vmul.f32 %v7713_v56, %v5014_v49 }
0x1bd9   :  { %v5028_v13 = vpop.xlane.xlu1 %5027  ;;  %v5026_v25 = vpop.xlane.xlu0 %5025 }
0x1bda   :  { %v5038_v30 = vmul.f32 %v5028_v13, %v7720_v0  ;;  %v5037_v45 = vmul.f32 %v5026_v25, %v7720_v0 }
0x1bdc   :  { %v5042_v18 = vadd.f32 %v5038_v30, %v5034_v48  ;;  %v5041_v32 = vadd.f32 %v5037_v45, %v5033_v38  ;;  %v6028_v30 = vld [vmem:[%s8819_s8 + $0x1] ss:$0 sm:$0xff] }
0x1bdd   :  { %v5020_v26 = vpop.xlane.xlu1 %5019  ;;  %v5018_v27 = vpop.xlane.xlu0 %5017 }
0x1bde   :  { %v5046_v60 = vmul.f32 0.015625, %v5042_v18  ;;  %v5045_v28 = vmul.f32 0.015625, %v5041_v32  ;;  %v5036_v1 = vmul.f32 %v7713_v56, %v5020_v26  ;;  %v5035_v57 = vmul.f32 %v7713_v56, %v5018_v27 }
0x1be0   :  { %v5094_v53 = vmul.f32 %v5046_v60, %v5046_v60  ;;  %v5093_v22 = vmul.f32 %v5045_v28, %v5045_v28  ;;  %v5102_v49 = vsub.f32 %v8706_v42, %v5046_v60  ;;  %v5101_v25 = vsub.f32 %v8709_v23, %v5045_v28 }
0x1be1   :  { %v5032_v44 = vpop.xlane.xlu1 %5031  ;;  %v5030_v46 = vpop.xlane.xlu0 %5029 }
0x1be2   :  { %v5040_v41 = vmul.f32 %v5032_v44, %v7720_v0  ;;  %v5039_v33 = vmul.f32 %v5030_v46, %v7720_v0 }
0x1be4   :  { %v5044_v16 = vadd.f32 %v5040_v41, %v5036_v1  ;;  %v5043_v51 = vadd.f32 %v5039_v33, %v5035_v57  ;;  %v7062_v1 = vld [vmem:[#allocation12 + $0x48] sm:$0xff]   ;;  %v7063_v57 = vld [vmem:[#allocation12 + $0x40] sm:$0xff]  }
0x1be5   :  { %v5060_v47 = vpop.xlane.xlu1 %5059  ;;  %v5058_v37 = vpop.xlane.xlu0 %5057 }
0x1be6   :  { %v5078_v35 = vmul.f32 %v7713_v56, %v5060_v47  ;;  %v5077_v34 = vmul.f32 %v7713_v56, %v5058_v37  ;;  %v5048_v6 = vmul.f32 0.015625, %v5044_v16  ;;  %v5047_v9 = vmul.f32 0.015625, %v5043_v51 }
0x1be8   :  { %v5096_v20 = vmul.f32 %v5048_v6, %v5048_v6  ;;  %v5095_v21 = vmul.f32 %v5047_v9, %v5047_v9  ;;  %v5104_v42 = vsub.f32 %v8722_v54, %v5048_v6  ;;  %v5103_v18 = vsub.f32 %v8725_v3, %v5047_v9  ;;  %v7056_v54 = vld [vmem:[#allocation12 + $0x78] sm:$0xff]   ;;  %v7057_v3 = vld [vmem:[#allocation12 + $0x70] sm:$0xff]  }
0x1be9   :  { %v5072_v36 = vpop.xlane.xlu1 %5071  ;;  %v5070_v29 = vpop.xlane.xlu0 %5069  ;;  %6806 = vmatprep.subr.bf16.mxu0 %v7056_v54 }
0x1bea   :  { %v5082_v39 = vmul.f32 %v5072_v36, %v7720_v0  ;;  %v5081_v52 = vmul.f32 %v5070_v29, %v7720_v0  ;;  %6807 = vmatpush3.bf16.msra.mxu0 %v7056_v54  ;;  %v7069_v54 = vld [vmem:[#allocation14 + $0x10] sm:$0xff]  }
0x1beb   :  { %6808 = vmatprep.subr.bf16.mxu0 %v7057_v3 }
0x1bec   :  { %v5086_v58 = vadd.f32 %v5082_v39, %v5078_v35  ;;  %v5085_v2 = vadd.f32 %v5081_v52, %v5077_v34  ;;  %v7058_v35 = vld [vmem:[#allocation12 + $0x68] sm:$0xff]   ;;  %v7059_v34 = vld [vmem:[#allocation12 + $0x60] sm:$0xff]   ;;  %v7060_v39 = vld [vmem:[#allocation12 + $0x58] sm:$0xff]  }
0x1bed   :  { %v5064_v7 = vpop.xlane.xlu1 %5063  ;;  %v5062_v55 = vpop.xlane.xlu0 %5061  ;;  %v7061_v52 = vld [vmem:[#allocation12 + $0x50] sm:$0xff]  }
0x1bee   :  { %v5090_v43 = vmul.f32 0.015625, %v5086_v58  ;;  %v5089_v61 = vmul.f32 0.015625, %v5085_v2  ;;  %v5080_v59 = vmul.f32 %v7713_v56, %v5064_v7  ;;  %v5079_v4 = vmul.f32 %v7713_v56, %v5062_v55  ;;  %6809 = vmatpush3.bf16.msra.mxu0 %v7057_v3  ;;  %v6030_v58 = vld [vmem:[%s8821_s10 + $0x1] ss:$0 sm:$0xff]  ;;  %v7070_v3 = vld [vmem:[#allocation14 + $0x8] sm:$0xff]  }
0x1bef   :  { %6810 = vmatprep.subr.bf16.mxu0 %v7058_v35 }
0x1bf0   :  { %v5098_v62 = vsub.f32 %v5090_v43, %v5094_v53  ;;  %v5097_v10 = vsub.f32 %v5089_v61, %v5093_v22 }
0x1bf1   :  { %v5076_v11 = vpop.xlane.xlu1 %5075  ;;  %v5074_v12 = vpop.xlane.xlu0 %5073 }
0x1bf2   :  { %v5106_v50 = vadd.f32 1e-05, %v5098_v62  ;;  %v5105_v14 = vadd.f32 1e-05, %v5097_v10  ;;  %v5084_v15 = vmul.f32 %v5076_v11, %v7720_v0  ;;  %v5083_v17 = vmul.f32 %v5074_v12, %v7720_v0  ;;  %v6027_v0 = vld [vmem:[%s8818_s7 + $0x1] ss:$0 sm:$0xff]  ;;  %6811 = vmatpush3.bf16.msra.mxu0 %v7058_v35 }
0x1bf3   :  { %6812 = vmatprep.subr.bf16.mxu0 %v7059_v34  ;;  %v7071_v35 = vld [vmem:[#allocation14] sm:$0xff]  }
0x1bf4   :  { %7332 = vrsqrt.f32 %v5106_v50  ;;  %v5088_v19 = vadd.f32 %v5084_v15, %v5080_v59  ;;  %v5087_v5 = vadd.f32 %v5083_v17, %v5079_v4 }
0x1bf5   :  { %7334 = vrsqrt.f32 %v5105_v14 }
0x1bf6   :  { %v5092_v8 = vmul.f32 0.015625, %v5088_v19  ;;  %v5091_v40 = vmul.f32 0.015625, %v5087_v5  ;;  %6813 = vmatpush3.bf16.msra.mxu0 %v7059_v34  ;;  %v6040_v34 = vld [vmem:[%s8823_s12 + $0x1] ss:$0 sm:$0xff] }
0x1bf7   :  { %6814 = vmatprep.subr.bf16.mxu0 %v7060_v39 }
0x1bf8   :  { %v5100_v24 = vsub.f32 %v5092_v8, %v5096_v20  ;;  %v5099_v31 = vsub.f32 %v5091_v40, %v5095_v21 }
0x1bfa   :  { %v5108_v63 = vadd.f32 1e-05, %v5100_v24  ;;  %v5107_v56 = vadd.f32 1e-05, %v5099_v31  ;;  %6815 = vmatpush3.bf16.msra.mxu0 %v7060_v39 }
0x1bfb   :  { %6816 = vmatprep.subr.bf16.mxu0 %v7061_v52 }
0x1bfc   :  { %7336 = vrsqrt.f32 %v5108_v63 }
0x1bfd   :  { %7338 = vrsqrt.f32 %v5107_v56 }
0x1bfe   :  { %6817 = vmatpush3.bf16.msra.mxu0 %v7061_v52 }
0x1bff   :  { %6818 = vmatprep.subr.bf16.mxu0 %v7062_v1 }
0x1c01   :  { %v7333_v13 = vpop.eup %7332 }
0x1c02   :  { %v7335_v26 = vpop.eup %7334  ;;  %v5114_v27 = vmul.f32 %v7333_v13, %v5102_v49  ;;  %6819 = vmatpush3.bf16.msra.mxu0 %v7062_v1 }
0x1c03   :  { %v5113_v45 = vmul.f32 %v7335_v26, %v5101_v25  ;;  %6820 = vmatprep.subr.bf16.mxu0 %v7063_v57 }
0x1c04   :  { %v5124_v44 = vmul.f32 %v6027_v0, %v5114_v27 }
0x1c05   :  { %v5123_v46 = vmul.f32 %v6027_v0, %v5113_v45 }
0x1c06   :  { %v8775_v48 = vadd.f32 %v6028_v30, %v5124_v44  ;;  %6821 = vmatpush3.bf16.msra.mxu0 %v7063_v57 }
0x1c07   :  { %v8777_v38 = vadd.f32 %v6028_v30, %v5123_v46 }
0x1c09   :  { %v7337_v23 = vpop.eup %7336  ;;  %v5154_v32 = vpack.c.bf16 %v8775_v48, %v8777_v38 }
0x1c0a   :  { %v7339_v47 = vpop.eup %7338  ;;  %v5116_v37 = vmul.f32 %v7337_v23, %v5104_v42 }
0x1c0b   :  { %6802 = vmatprep.mubr.bf16.mxu1 %v5154_v32  ;;  %v5115_v60 = vmul.f32 %v7339_v47, %v5103_v18 }
0x1c0c   :  { %v5126_v28 = vmul.f32 %v6027_v0, %v5116_v37  ;;  %v7064_v37 = vld [vmem:[#allocation14 + $0x38] sm:$0xff]  }
0x1c0d   :  { %v5125_v41 = vmul.f32 %v6027_v0, %v5115_v60  ;;  %6826 = vmatprep.subr.bf16.mxu1 %v7064_v37  ;;  %v7065_v60 = vld [vmem:[#allocation14 + $0x30] sm:$0xff]  }
0x1c0e   :  { %v8783_v33 = vadd.f32 %v6028_v30, %v5126_v28  ;;  %v7066_v28 = vld [vmem:[#allocation14 + $0x28] sm:$0xff]  }
0x1c0f   :  { %v8785_v36 = vadd.f32 %v6028_v30, %v5125_v41  ;;  %v7067_v41 = vld [vmem:[#allocation14 + $0x20] sm:$0xff]  }
0x1c11   :  { %v5155_v29 = vpack.c.bf16 %v8783_v33, %v8785_v36 }
0x1c13   :  { %6803 = vmatmul.mubr.bf16.vlgmr.msra.gmra.mxu1 %v5155_v29  ;;  %v7068_v29 = vld [vmem:[#allocation14 + $0x18] sm:$0xff]  }
0x1c14   :  { %6827 = vmatpush3.bf16.msra.mxu1 %v7064_v37  ;;  %v7077_v37 = vld [vmem:[#allocation15 + $0x10] sm:$0xff]  }
0x1c15   :  { %6828 = vmatprep.subr.bf16.mxu1 %v7065_v60 }
0x1c18   :  { %6829 = vmatpush3.bf16.msra.mxu1 %v7065_v60  ;;  %v7078_v60 = vld [vmem:[#allocation15 + $0x8] sm:$0xff]  }
0x1c19   :  { %6830 = vmatprep.subr.bf16.mxu1 %v7066_v28 }
0x1c1c   :  { %6831 = vmatpush3.bf16.msra.mxu1 %v7066_v28  ;;  %v7079_v28 = vld [vmem:[#allocation15] sm:$0xff]  }
0x1c1d   :  { %6832 = vmatprep.subr.bf16.mxu1 %v7067_v41 }
0x1c20   :  { %6833 = vmatpush3.bf16.msra.mxu1 %v7067_v41  ;;  %v6049_v41 = vld [vmem:[%s8825_s14] ss:$0 sm:$0xff] }
0x1c21   :  { %6834 = vmatprep.subr.bf16.mxu1 %v7068_v29 }
0x1c24   :  { %6835 = vmatpush3.bf16.msra.mxu1 %v7068_v29 }
0x1c25   :  { %6836 = vmatprep.subr.bf16.mxu1 %v7069_v54 }
0x1c28   :  { %6837 = vmatpush3.bf16.msra.mxu1 %v7069_v54 }
0x1c29   :  { %6838 = vmatprep.subr.bf16.mxu1 %v7070_v3 }
0x1c2c   :  { %6839 = vmatpush3.bf16.msra.mxu1 %v7070_v3 }
0x1c2d   :  { %6840 = vmatprep.subr.bf16.mxu1 %v7071_v35 }
0x1c30   :  { %6841 = vmatpush3.bf16.msra.mxu1 %v7071_v35 }
0x1cd3   :  { %v6804_v2 = vpop.f32.mrf.mxu1 }
0x1cd4   :  { %v5253_v16 = vadd.f32 %v6804_v2, %v6030_v58 }
0x1cd5   :  { %v5244_v51 = vpop.f32.mrf.mxu1 }
0x1cd6   :  { %v5265_v7 = vmul.f32 0.044715, %v5253_v16  ;;  %v5245_v55 = vadd.f32 %v6030_v58, %v5244_v51  ;;  %v5261_v44 = vmul.f32 0.5, %v5253_v16 }
0x1cd7   :  { %v6805_v53 = vpop.f32.mrf.mxu1 }
0x1cd8   :  { %v5269_v22 = vmul.f32 %v5265_v7, %v5253_v16  ;;  %v5263_v43 = vmul.f32 0.044715, %v5245_v55  ;;  %v5256_v61 = vadd.f32 %v6805_v53, %v6030_v58  ;;  %v5259_v27 = vmul.f32 0.5, %v5245_v55 }
0x1cd9   :  { %v5247_v62 = vpop.f32.mrf.mxu1 }
0x1cda   :  { %v5273_v10 = vmul.f32 %v5269_v22, %v5253_v16  ;;  %v5267_v6 = vmul.f32 %v5263_v43, %v5245_v55  ;;  %v5266_v9 = vmul.f32 0.044715, %v5256_v61  ;;  %v5248_v59 = vadd.f32 %v6030_v58, %v5247_v62 }
0x1cdb   :  { %v5262_v0 = vmul.f32 0.5, %v5256_v61 }
0x1cdc   :  { %v5277_v4 = vadd.f32 %v5273_v10, %v5253_v16  ;;  %v5271_v11 = vmul.f32 %v5267_v6, %v5245_v55  ;;  %v5270_v12 = vmul.f32 %v5266_v9, %v5256_v61  ;;  %v5264_v50 = vmul.f32 0.044715, %v5248_v59 }
0x1cdd   :  { %v5260_v30 = vmul.f32 0.5, %v5248_v59 }
0x1cde   :  { %v5274_v14 = vmul.f32 %v5270_v12, %v5256_v61  ;;  %v5268_v15 = vmul.f32 %v5264_v50, %v5248_v59  ;;  %v5275_v17 = vadd.f32 %v5271_v11, %v5245_v55  ;;  %v5281_v19 = vmul.f32 0.7978846, %v5277_v4 }
0x1ce0   :  { %v5278_v5 = vadd.f32 %v5274_v14, %v5256_v61  ;;  %v5272_v20 = vmul.f32 %v5268_v15, %v5248_v59  ;;  %v5279_v21 = vmul.f32 0.7978846, %v5275_v17 }
0x1ce2   :  { %v5282_v8 = vmul.f32 0.7978846, %v5278_v5  ;;  %v5276_v40 = vadd.f32 %v5272_v20, %v5248_v59  ;;  %7340 = vtanh.f32 %v5279_v21 }
0x1ce3   :  { %7342 = vtanh.f32 %v5281_v19 }
0x1ce4   :  { %7344 = vtanh.f32 %v5282_v8  ;;  %v5280_v24 = vmul.f32 0.7978846, %v5276_v40 }
0x1ce6   :  { %7346 = vtanh.f32 %v5280_v24 }
0x1cef   :  { %v7341_v31 = vpop.eup %7340 }
0x1cf0   :  { %v7343_v63 = vpop.eup %7342  ;;  %v5287_v49 = vadd.f32 1.0, %v7341_v31 }
0x1cf1   :  { %v7345_v56 = vpop.eup %7344  ;;  %v5289_v26 = vadd.f32 1.0, %v7343_v63 }
0x1cf2   :  { %v5290_v13 = vadd.f32 1.0, %v7345_v56  ;;  %v5291_v42 = vmul.f32 %v5287_v49, %v5259_v27 }
0x1cf3   :  { %v7347_v25 = vpop.eup %7346  ;;  %v5293_v18 = vmul.f32 %v5289_v26, %v5261_v44 }
0x1cf4   :  { %v5288_v45 = vadd.f32 1.0, %v7347_v25  ;;  %v5294_v46 = vmul.f32 %v5290_v13, %v5262_v0 }
0x1cf6   :  { %v5292_v23 = vmul.f32 %v5288_v45, %v5260_v30  ;;  %v5313_v47 = vpack.c.bf16 %v5294_v46, %v5293_v18  ;;  %v7074_v18 = vld [vmem:[#allocation15 + $0x28] sm:$0xff]  }
0x1cf8   :  { %v5312_v32 = vpack.c.bf16 %v5292_v23, %v5291_v42  ;;  %v7072_v42 = vld [vmem:[#allocation15 + $0x38] sm:$0xff]   ;;  %v7073_v23 = vld [vmem:[#allocation15 + $0x30] sm:$0xff]  }
0x1cf9   :  { %6846 = vmatprep.subr.bf16.mxu0 %v7072_v42 }
0x1cfa   :  { %6822 = vmatprep.mubr.bf16.mxu0 %v5312_v32  ;;  %v7075_v32 = vld [vmem:[#allocation15 + $0x20] sm:$0xff]  }
0x1cfb   :  { %6823 = vmatmul.mubr.bf16.vlgmr.msra.gmra.mxu0 %v5313_v47  ;;  %v7076_v47 = vld [vmem:[#allocation15 + $0x18] sm:$0xff]  }
0x1cfc   :  { %6847 = vmatpush3.bf16.msra.mxu0 %v7072_v42 }
0x1cfd   :  { %6848 = vmatprep.subr.bf16.mxu0 %v7073_v23 }
0x1d00   :  { %6849 = vmatpush3.bf16.msra.mxu0 %v7073_v23 }
0x1d01   :  { %6850 = vmatprep.subr.bf16.mxu0 %v7074_v18 }
0x1d04   :  { %6851 = vmatpush3.bf16.msra.mxu0 %v7074_v18 }
0x1d05   :  { %6852 = vmatprep.subr.bf16.mxu0 %v7075_v32 }
0x1d08   :  { %6853 = vmatpush3.bf16.msra.mxu0 %v7075_v32 }
0x1d09   :  { %6854 = vmatprep.subr.bf16.mxu0 %v7076_v47 }
0x1d0c   :  { %6855 = vmatpush3.bf16.msra.mxu0 %v7076_v47 }
0x1d0d   :  { %6856 = vmatprep.subr.bf16.mxu0 %v7077_v37 }
0x1d10   :  { %6857 = vmatpush3.bf16.msra.mxu0 %v7077_v37 }
0x1d11   :  { %6858 = vmatprep.subr.bf16.mxu0 %v7078_v60 }
0x1d14   :  { %6859 = vmatpush3.bf16.msra.mxu0 %v7078_v60 }
0x1d15   :  { %6860 = vmatprep.subr.bf16.mxu0 %v7079_v28 }
0x1d18   :  { %6861 = vmatpush3.bf16.msra.mxu0 %v7079_v28 }
0x1dbb   :  { %v6824_v39 = vpop.f32.mrf.mxu0 }
0x1dbc   :  { %v5411_v52 = vadd.f32 %v6824_v39, %v6040_v34 }
0x1dbd   :  { %v5402_v1 = vpop.f32.mrf.mxu0 }
0x1dbe   :  { %v5419_v57 = vadd.f32 %v5411_v52, %v8785_v36  ;;  %v5403_v58 = vadd.f32 %v6040_v34, %v5402_v1 }
0x1dbf   :  { %v6825_v2 = vpop.f32.mrf.mxu0 }
0x1dc0   :  { %v5427_v16 = vmul.f32 0.044715, %v5419_v57  ;;  %v5417_v51 = vadd.f32 %v5403_v58, %v8777_v38  ;;  %v5414_v7 = vadd.f32 %v6825_v2, %v6040_v34  ;;  %v5423_v0 = vmul.f32 0.5, %v5419_v57 }
0x1dc1   :  { %v5405_v55 = vpop.f32.mrf.mxu0 }
0x1dc2   :  { %v5431_v53 = vmul.f32 %v5427_v16, %v5419_v57  ;;  %v5425_v22 = vmul.f32 0.044715, %v5417_v51  ;;  %v5420_v43 = vadd.f32 %v5414_v7, %v8783_v33  ;;  %v5406_v61 = vadd.f32 %v6040_v34, %v5405_v55 }
0x1dc3   :  { %v5421_v49 = vmul.f32 0.5, %v5417_v51 }
0x1dc4   :  { %v5435_v62 = vmul.f32 %v5431_v53, %v5419_v57  ;;  %v5429_v10 = vmul.f32 %v5425_v22, %v5417_v51  ;;  %v5428_v6 = vmul.f32 0.044715, %v5420_v43  ;;  %v5418_v9 = vadd.f32 %v5406_v61, %v8775_v48 }
0x1dc5   :  { %v5424_v63 = vmul.f32 0.5, %v5420_v43 }
0x1dc6   :  { %v5439_v59 = vadd.f32 %v5435_v62, %v5419_v57  ;;  %v5432_v4 = vmul.f32 %v5428_v6, %v5420_v43  ;;  %v5426_v36 = vmul.f32 0.044715, %v5418_v9  ;;  %v5433_v11 = vmul.f32 %v5429_v10, %v5417_v51 }
0x1dc7   :  { %v5422_v13 = vmul.f32 0.5, %v5418_v9 }
0x1dc8   :  { %v5436_v12 = vmul.f32 %v5432_v4, %v5420_v43  ;;  %v5430_v50 = vmul.f32 %v5426_v36, %v5418_v9  ;;  %v5443_v14 = vmul.f32 0.7978846, %v5439_v59  ;;  %v5437_v38 = vadd.f32 %v5433_v11, %v5417_v51 }
0x1dca   :  { %v5440_v15 = vadd.f32 %v5436_v12, %v5420_v43  ;;  %v5434_v17 = vmul.f32 %v5430_v50, %v5418_v9  ;;  %v5441_v19 = vmul.f32 0.7978846, %v5437_v38  ;;  %7348 = vtanh.f32 %v5443_v14 }
0x1dcc   :  { %v5438_v5 = vadd.f32 %v5434_v17, %v5418_v9  ;;  %v5444_v20 = vmul.f32 0.7978846, %v5440_v15  ;;  %7350 = vtanh.f32 %v5441_v19 }
0x1dce   :  { %v5442_v33 = vmul.f32 0.7978846, %v5438_v5  ;;  %7352 = vtanh.f32 %v5444_v20 }
0x1dd0   :  { %7354 = vtanh.f32 %v5442_v33 }
0x1dd7   :  { %v7349_v21 = vpop.eup %7348 }
0x1dd8   :  { %v5451_v56 = vadd.f32 1.0, %v7349_v21 }
0x1dd9   :  { %v7351_v48 = vpop.eup %7350 }
0x1dda   :  { %v5449_v40 = vadd.f32 1.0, %v7351_v48  ;;  %v5455_v45 = vmul.f32 %v5451_v56, %v5423_v0 }
0x1ddb   :  { %v7353_v8 = vpop.eup %7352 }
0x1ddc   :  { %v5452_v24 = vadd.f32 1.0, %v7353_v8  ;;  %v5453_v27 = vmul.f32 %v5449_v40, %v5421_v49 }
0x1ddd   :  { %v7355_v31 = vpop.eup %7354 }
0x1dde   :  { %v5450_v25 = vadd.f32 1.0, %v7355_v31  ;;  %v5456_v26 = vmul.f32 %v5452_v24, %v5424_v63 }
0x1de0   :  { %v5454_v30 = vmul.f32 %v5450_v25, %v5422_v13  ;;  %v5475_v46 = vpack.c.bf16 %v5456_v26, %v5455_v45  ;;  %v6058_v25 = vld [vmem:[%s8827_s16] ss:$0 sm:$0xff] }
0x1de2   :  { %v5474_v44 = vpack.c.bf16 %v5454_v30, %v5453_v27 }
0x1de4   :  { %6842 = vmatprep.mubr.bf16.mxu1 %v5474_v44 }
0x1de5   :  { %6843 = vmatmul.mubr.bf16.vlgmr.msra.gmra.mxu1 %v5475_v46 }
0x1ea5   :  { %v6844_v29 = vpop.f32.mrf.mxu1 }
0x1ea6   :  { %v5573_v54 = vadd.f32 %v6844_v29, %v6049_v41 }
0x1ea7   :  { %v5564_v3 = vpop.f32.mrf.mxu1 }
0x1ea8   :  { %v5585_v35 = vmul.f32 0.044715, %v5573_v54  ;;  %v5565_v34 = vadd.f32 %v6049_v41, %v5564_v3  ;;  %v5581_v8 = vmul.f32 0.5, %v5573_v54 }
0x1ea9   :  { %v6845_v39 = vpop.f32.mrf.mxu1 }
0x1eaa   :  { %v5589_v52 = vmul.f32 %v5585_v35, %v5573_v54  ;;  %v5583_v1 = vmul.f32 0.044715, %v5565_v34  ;;  %v5576_v57 = vadd.f32 %v6845_v39, %v6049_v41  ;;  %v5579_v33 = vmul.f32 0.5, %v5565_v34 }
0x1eab   :  { %v5567_v58 = vpop.f32.mrf.mxu1 }
0x1eac   :  { %v5593_v2 = vmul.f32 %v5589_v52, %v5573_v54  ;;  %v5587_v16 = vmul.f32 %v5583_v1, %v5565_v34  ;;  %v5586_v51 = vmul.f32 0.044715, %v5576_v57  ;;  %v5568_v7 = vadd.f32 %v6049_v41, %v5567_v58 }
0x1ead   :  { %v5582_v5 = vmul.f32 0.5, %v5576_v57 }
0x1eae   :  { %v5597_v55 = vadd.f32 %v5593_v2, %v5573_v54  ;;  %v5591_v53 = vmul.f32 %v5587_v16, %v5565_v34  ;;  %v5590_v22 = vmul.f32 %v5586_v51, %v5576_v57  ;;  %v5584_v43 = vmul.f32 0.044715, %v5568_v7 }
0x1eaf   :  { %v5580_v21 = vmul.f32 0.5, %v5568_v7 }
0x1eb0   :  { %v5594_v61 = vmul.f32 %v5590_v22, %v5576_v57  ;;  %v5588_v62 = vmul.f32 %v5584_v43, %v5568_v7  ;;  %v5595_v10 = vadd.f32 %v5591_v53, %v5565_v34  ;;  %v5601_v6 = vmul.f32 0.7978846, %v5597_v55 }
0x1eb2   :  { %v5598_v9 = vadd.f32 %v5594_v61, %v5576_v57  ;;  %v5592_v59 = vmul.f32 %v5588_v62, %v5568_v7  ;;  %v5599_v4 = vmul.f32 0.7978846, %v5595_v10 }
0x1eb4   :  { %v5602_v36 = vmul.f32 0.7978846, %v5598_v9  ;;  %v5596_v11 = vadd.f32 %v5592_v59, %v5568_v7  ;;  %7356 = vtanh.f32 %v5599_v4 }
0x1eb5   :  { %7358 = vtanh.f32 %v5601_v6 }
0x1eb6   :  { %7360 = vtanh.f32 %v5602_v36  ;;  %v5600_v12 = vmul.f32 0.7978846, %v5596_v11 }
0x1eb8   :  { %7362 = vtanh.f32 %v5600_v12 }
0x1ec1   :  { %v7357_v50 = vpop.eup %7356 }
0x1ec2   :  { %v7359_v14 = vpop.eup %7358  ;;  %v5607_v15 = vadd.f32 1.0, %v7357_v50 }
0x1ec3   :  { %v7361_v38 = vpop.eup %7360  ;;  %v5609_v20 = vadd.f32 1.0, %v7359_v14 }
0x1ec4   :  { %v5610_v17 = vadd.f32 1.0, %v7361_v38  ;;  %v5611_v24 = vmul.f32 %v5607_v15, %v5579_v33 }
0x1ec5   :  { %v7363_v19 = vpop.eup %7362  ;;  %v5613_v63 = vmul.f32 %v5609_v20, %v5581_v8 }
0x1ec6   :  { %v5608_v48 = vadd.f32 1.0, %v7363_v19  ;;  %v5614_v40 = vmul.f32 %v5610_v17, %v5582_v5 }
0x1ec8   :  { %v5612_v31 = vmul.f32 %v5608_v48, %v5580_v21  ;;  %v5633_v49 = vpack.c.bf16 %v5614_v40, %v5613_v63 }
0x1eca   :  { %v5632_v56 = vpack.c.bf16 %v5612_v31, %v5611_v24 }
0x1ecc   :  { %6862 = vmatprep.mubr.bf16.mxu0 %v5632_v56 }
0x1ecd   :  { %6863 = vmatmul.mubr.bf16.vlgmr.msra.gmra.mxu0 %v5633_v49 }
0x1f8d   :  { %v6864_v13 = vpop.f32.mrf.mxu0 }
0x1f8e   :  { %v5731_v27 = vadd.f32 %v6864_v13, %v6058_v25 }
0x1f8f   :  { %v5722_v0 = vpop.f32.mrf.mxu0 }
0x1f90   :  { %v5723_v44 = vadd.f32 %v6058_v25, %v5722_v0 }
0x1f91   :  { %v6865_v26 = vpop.f32.mrf.mxu0 }
0x1f92   :  { %v5734_v30 = vadd.f32 %v6865_v26, %v6058_v25 }
0x1f93   :  { %v5725_v45 = vpop.f32.mrf.mxu0 }
0x1f94   :  { %v6111_v46 = vpack.c.bf16 %v5734_v30, %v5731_v27  ;;  %v5726_v42 = vadd.f32 %v6058_v25, %v5725_v45 }
0x1f96   :  { %6115 = vst [vmem:[#allocation17 + $0x28] sm:$0xff] %v6111_v46   ;;  %v6106_v23 = vpack.c.bf16 %v5726_v42, %v5723_v44 }
0x1f98   :  { %6107 = vst [vmem:[#allocation17 + $0x20] sm:$0xff] %v6106_v23  }
0x1f99   :  { %7535 = shalt.err (!%p7532_p2)
}
0x1f9a   :  { %5777 = dma.vmem_to_hbm [thread:$0]  %s5772_s2, 768, %s8828_s17, [#allocation5], %s7557_s27, %s7557_s27, %s7558_s28  }
0x1f9b   :  { %7554 = dma.done.wait [#allocation5], 768  }
0x1f9c   :  { %7555 = vsyncadd [#allocation5], 4294966528 }
0x1f9d   :  { %5781 = vsyncpa [#allocation4], 1 }
0x1f9e   :  { %5782 = vsyncpa [#allocation7], 1 }
0x1f9f   :  { %5783 = vsyncpa [#allocation10], 1 }
0x1fa0   :  { %5784 = vsyncpa [#allocation13], 1 }
0x1fa1   :  { %5785 = vsyncpa [#allocation16], 1 }
0x1fa2   :  { %5786 = vsyncpa [#allocation5], 1 }

</bundles_post_ra>
